<compile_context>
chip_gen: v7x
topology: tpu7x:2x2x1
jax: 0.10.0
libtpu: 0.0.40
codegen_flags: <defaults>
</compile_context>

<pallas_src>
import functools

import jax
import jax.numpy as jnp
from jax import lax
from jax.experimental import pallas as pl
from jax.experimental.pallas import tpu as pltpu


def _round_up(x, m):
    return ((x + m - 1) // m) * m


# ----------------------------------------------------------------------------
# Fused Pallas kernel: all conv layers + folded-BN + ReLU + residual, 1 image.
# ----------------------------------------------------------------------------
def dncnn_fused_kernel(x_ref, w_ref, shift_ref, o_ref, xpad_ref,
                       *, H, W, Cp, Wp, XOFF, use_relu):
    """
    x_ref     : (1, H, W, Cp)        f32   input image (channels zero-padded)
    w_ref     : (L, 3, 3*Cp, Cp)     bf16  folded weights, dx stacked on K
    shift_ref : (L, 1, Cp)           f32   folded (bias*scale + BN shift)
    o_ref     : (1, H*W, Cp)         f32   residual output  x - dncnn(x)
    xpad_ref  : (H+2, Wp, Cp)        f32   VMEM scratch, zero halo + activation
                                            interior at [1:H+1, XOFF:XOFF+W, :]
    """
    L = len(use_relu)

    # Zero the padded scratch once; the halo stays zero for all layers.
    xpad_ref[...] = jnp.zeros((H + 2, Wp, Cp), jnp.float32)
    # Place the input image into the (sublane-aligned) interior.
    xpad_ref[1:H + 1, XOFF:XOFF + W, :] = x_ref[0]

    acc = None
    for l in range(L):                       # unrolled layer loop (static)
        acc = None
        for dy in range(3):
            # (H*W, 3*Cp) patch: the three dx taps stacked on the K axis,
            # cast to bf16 before the lane-concat (half the data to move).
            taps = [
                xpad_ref[dy:dy + H, XOFF - 1 + dx:XOFF - 1 + dx + W, :]
                .reshape(H * W, Cp).astype(jnp.bfloat16)
                for dx in range(3)
            ]
            patch = jnp.concatenate(taps, axis=-1)
            part = jnp.dot(patch, w_ref[l, dy],
                           preferred_element_type=jnp.float32)
            acc = part if acc is None else acc + part
        acc = acc + shift_ref[l]             # folded bias + BN affine
        if use_relu[l]:
            acc = jnp.maximum(acc, 0.0)
        if l < L - 1:
            # Feed the next layer: aligned write into the scratch interior.
            xpad_ref[1:H + 1, XOFF:XOFF + W, :] = acc.reshape(H, W, Cp)

    # Fused residual: out = x - dncnn(x), stored as a flat (H*W, Cp) slab.
    o_ref[0] = x_ref[0].reshape(H * W, Cp) - acc


# ----------------------------------------------------------------------------
# Host-side parameter packing
# ----------------------------------------------------------------------------
def pack_params(params, Cp):
    """Fold BN scale into the conv weights, bias into the shift, pad channels
    to a common width Cp and stack all layers.

    Weight layout: (L, 3, 3*Cp, Cp) with K index [dx*Cp + cin], matching the
    dx-stacked K axis used by the kernel.
        (conv(x, w) + b) * scale + shift == conv(x, w*scale) + (b*scale + shift)
    Padded channels get weight 0 / shift 0 so they stay exactly zero.
    """
    L = len(params)
    w_all = jnp.zeros((L, 3, 3 * Cp, Cp), jnp.float32)
    shift_all = jnp.zeros((L, 1, Cp), jnp.float32)
    for l, p in enumerate(params):
        w = p['w'] * p['scale'][None, None, None, :]     # fold BN scale into w
        cin, cout = w.shape[2], w.shape[3]
        wp = jnp.zeros((3, 3, Cp, Cp), jnp.float32).at[:, :, :cin, :cout].set(w)
        w_all = w_all.at[l].set(wp.reshape(3, 3 * Cp, Cp))
        shift_all = shift_all.at[l, 0, :cout].set(p['b'] * p['scale'] + p['shift'])
    return w_all.astype(jnp.bfloat16), shift_all


# ----------------------------------------------------------------------------
# Forward builder (one pallas_call for the full network)
# ----------------------------------------------------------------------------
def make_dncnn_forward(params, in_channels, out_channels, H, W):
    L = len(params)
    chan_max = max(max(p['w'].shape[2], p['w'].shape[3]) for p in params)
    Cp = max(8, _round_up(chan_max, 8))      # common padded channel width
    XOFF = 8                                 # aligned interior W offset
    Wp = _round_up(XOFF + W + 1, 8)          # padded scratch width

    w_all, shift_all = pack_params(params, Cp)
    use_relu = tuple(bool(p['act']) for p in params)

    kernel = functools.partial(dncnn_fused_kernel, H=H, W=W, Cp=Cp, Wp=Wp,
                               XOFF=XOFF, use_relu=use_relu)

    def call_pallas(x_nhwc_p):               # (N, H, W, Cp) f32
        N = x_nhwc_p.shape[0]
        cost = pl.CostEstimate(
            flops=2 * N * H * W * 3 * (3 * Cp) * Cp * L,
            transcendentals=0,
            bytes_accessed=(x_nhwc_p.size * 4 + w_all.size * 2
                            + shift_all.size * 4 + N * H * W * Cp * 4))
        return pl.pallas_call(
            kernel,
            out_shape=jax.ShapeDtypeStruct((N, H * W, Cp), jnp.float32),
            grid_spec=pltpu.PrefetchScalarGridSpec(
                num_scalar_prefetch=0,
                grid=(N,),
                in_specs=[
                    # one image per grid step
                    pl.BlockSpec((1, H, W, Cp), lambda n: (n, 0, 0, 0)),
                    # all layer weights resident across the grid (same block)
                    pl.BlockSpec((L, 3, 3 * Cp, Cp), lambda n: (0, 0, 0, 0)),
                    pl.BlockSpec((L, 1, Cp), lambda n: (0, 0, 0)),
                ],
                out_specs=pl.BlockSpec((1, H * W, Cp), lambda n: (n, 0, 0)),
                scratch_shapes=[pltpu.VMEM((H + 2, Wp, Cp), jnp.float32)],
            ),
            compiler_params=pltpu.CompilerParams(
                dimension_semantics=("parallel",)),
            cost_estimate=cost,
        )(x_nhwc_p, w_all, shift_all)

    @jax.jit
    def forward(x_nchw):
        N = x_nchw.shape[0]
        x = jnp.transpose(x_nchw, (0, 2, 3, 1)).astype(jnp.float32)   # NHWC
        x_p = jnp.pad(x, ((0, 0), (0, 0), (0, 0), (0, Cp - in_channels)))
        out = call_pallas(x_p)                                        # (N, H*W, Cp)
        out = out.reshape(N, H, W, Cp)[..., :out_channels]
        return jnp.transpose(out, (0, 3, 1, 2))                       # NCHW

    return forward


# ----------------------------------------------------------------------------
# Parameter construction (deterministic, synthetic)
# ----------------------------------------------------------------------------
def make_params(key, in_channels, start_channels, out_channels, m_block):
    """Per-layer dicts {'w','b','scale','shift','act','use_scale'}.

    BatchNorm (inference) is pre-folded into an affine scale/shift:
        scale = gamma / sqrt(running_var + eps)
        shift = beta - running_mean * scale
    """
    eps = 1e-5
    params = []
    chans = [in_channels] + [start_channels] * (m_block - 1) + [out_channels]
    for li in range(m_block):
        cin, cout = chans[li], chans[li + 1]
        key, kw, kb, kg, kbe = jax.random.split(key, 5)
        w = 0.05 * jax.random.normal(kw, (3, 3, cin, cout), jnp.float32)
        b = 0.01 * jax.random.normal(kb, (cout,), jnp.float32)
        is_first = li == 0
        is_last = li == m_block - 1
        if (not is_first) and (not is_last):
            gamma = 1.0 + 0.1 * jax.random.normal(kg, (cout,), jnp.float32)
            beta = 0.05 * jax.random.normal(kbe, (cout,), jnp.float32)
            run_mean = jnp.zeros((cout,), jnp.float32)
            run_var = jnp.ones((cout,), jnp.float32)
            scale = gamma / jnp.sqrt(run_var + eps)
            shift = beta - run_mean * scale
            use_scale = True
        else:
            scale = jnp.ones((cout,), jnp.float32)
            shift = jnp.zeros((cout,), jnp.float32)
            use_scale = False
        params.append(dict(w=w, b=b, scale=scale, shift=shift,
                           act=not is_last, use_scale=use_scale))
    return params


# ----------------------------------------------------------------------------
# Pure-JAX reference (f32 lax.conv) for correctness checking
# ----------------------------------------------------------------------------
def dncnn_forward_ref(x_nchw, params):
    x = jnp.transpose(x_nchw, (0, 2, 3, 1)).astype(jnp.float32)
    h = x
    for p in params:
        h = lax.conv_general_dilated(
            h, p['w'], (1, 1), 'SAME',
            dimension_numbers=('NHWC', 'HWIO', 'NHWC')) + p['b']
        h = h * p['scale'] + p['shift']
        if p['act']:
            h = jnp.maximum(h, 0.0)
    out = x - h
    return jnp.transpose(out, (0, 3, 1, 2))


# ----------------------------------------------------------------------------
if __name__ == "__main__":
    # Small, DnCNN-consistent "opt": in=3, out=3, start_channels=16, m_block=5
    N, Cin, H, W = 2, 3, 16, 16
    start_channels, Cout, m_block = 16, 3, 5

    key = jax.random.PRNGKey(0)
    key, kx = jax.random.split(key)
    x = jax.random.normal(kx, (N, Cin, H, W), jnp.float32)   # NCHW like PyTorch

    params = make_params(key, Cin, start_channels, Cout, m_block)

    forward = make_dncnn_forward(params, Cin, Cout, H, W)
    out = jax.block_until_ready(forward(x))

    ref = dncnn_forward_ref(x, params)
    assert out.shape == (N, Cout, H, W)
    # bf16 MXU operands with f32 accumulation -> loosened tolerance.
    assert jnp.allclose(out, ref, atol=2e-2, rtol=2e-2), (
        "mismatch vs reference: max abs err = %g"
        % float(jnp.max(jnp.abs(out - ref))))
    print("KERNEL_OK")
</pallas_src>

<mosaic_0001>
module attributes {stable_mosaic.version = 11 : i64} {
  func.func @dncnn_fused_kernel(%arg0: i32, %arg1: memref<1x16x16x16xf32, #tpu.memory_space<vmem>>, %arg2: memref<5x3x48x16xbf16, #tpu.memory_space<vmem>>, %arg3: memref<5x1x16xf32, #tpu.memory_space<vmem>>, %arg4: memref<1x256x16xf32, #tpu.memory_space<vmem>>, %arg5: memref<18x32x16xf32, #tpu.memory_space<vmem>>) attributes {dimension_semantics = [#tpu.dimension_semantics<parallel>], iteration_bounds = array<i64: 2>, scalar_prefetch = 0 : i64, scratch_operands = 1 : i64, tpu.core_type = #tpu.core_type<tc>, window_params = [{transform_indices = @transform_0, window_bounds = array<i64: 1, 16, 16, 16>}, {pipeline_mode = #tpu.pipeline_mode<synchronous>, transform_indices = @transform_1, window_bounds = array<i64: 5, 3, 48, 16>}, {pipeline_mode = #tpu.pipeline_mode<synchronous>, transform_indices = @transform_2, window_bounds = array<i64: 5, 1, 16>}, {transform_indices = @transform_3, window_bounds = array<i64: 1, 256, 16>}]} {
    %cst = arith.constant 0.000000e+00 : f32
    %0 = vector.broadcast %cst : f32 to vector<18x32x16xf32>
    %c0 = arith.constant 0 : index
    %c0_0 = arith.constant 0 : index
    %c0_1 = arith.constant 0 : index
    %1 = vector.load %arg5[%c0, %c0_0, %c0_1] : memref<18x32x16xf32, #tpu.memory_space<vmem>>, vector<18x32x16xf32>
    tpu.vector_store %arg5[%c0, %c0_0, %c0_1], %0 {strides = array<i32>} : memref<18x32x16xf32, #tpu.memory_space<vmem>>, vector<18x32x16xf32>,
    %c0_2 = arith.constant 0 : index
    %c0_3 = arith.constant 0 : index
    %c0_4 = arith.constant 0 : index
    %c0_5 = arith.constant 0 : index
    %2 = vector.load %arg1[%c0_2, %c0_3, %c0_4, %c0_5] : memref<1x16x16x16xf32, #tpu.memory_space<vmem>>, vector<1x16x16x16xf32>
    %3 = vector.shape_cast %2 : vector<1x16x16x16xf32> to vector<16x16x16xf32>
    %c1 = arith.constant 1 : index
    %c8 = arith.constant 8 : index
    %c0_6 = arith.constant 0 : index
    %4 = vector.load %arg5[%c1, %c8, %c0_6] : memref<18x32x16xf32, #tpu.memory_space<vmem>>, vector<16x16x16xf32>
    tpu.vector_store %arg5[%c1, %c8, %c0_6], %3 {strides = array<i32>} : memref<18x32x16xf32, #tpu.memory_space<vmem>>, vector<16x16x16xf32>,
    %c0_7 = arith.constant 0 : index
    %c7 = arith.constant 7 : index
    %c0_8 = arith.constant 0 : index
    %5 = vector.load %arg5[%c0_7, %c7, %c0_8] : memref<18x32x16xf32, #tpu.memory_space<vmem>>, vector<16x16x16xf32>
    %6 = vector.shape_cast %5 : vector<16x16x16xf32> to vector<256x16xf32>
    %7 = arith.truncf %6 : vector<256x16xf32> to vector<256x16xbf16>
    %c0_9 = arith.constant 0 : index
    %c8_10 = arith.constant 8 : index
    %c0_11 = arith.constant 0 : index
    %8 = vector.load %arg5[%c0_9, %c8_10, %c0_11] : memref<18x32x16xf32, #tpu.memory_space<vmem>>, vector<16x16x16xf32>
    %9 = vector.shape_cast %8 : vector<16x16x16xf32> to vector<256x16xf32>
    %10 = arith.truncf %9 : vector<256x16xf32> to vector<256x16xbf16>
    %c0_12 = arith.constant 0 : index
    %c9 = arith.constant 9 : index
    %c0_13 = arith.constant 0 : index
    %11 = vector.load %arg5[%c0_12, %c9, %c0_13] : memref<18x32x16xf32, #tpu.memory_space<vmem>>, vector<16x16x16xf32>
    %12 = vector.shape_cast %11 : vector<16x16x16xf32> to vector<256x16xf32>
    %13 = arith.truncf %12 : vector<256x16xf32> to vector<256x16xbf16>
    %14 = tpu.concatenate %7, %10, %13 in 1 : vector<256x16xbf16>, vector<256x16xbf16>, vector<256x16xbf16> -> vector<256x48xbf16>
    %c0_14 = arith.constant 0 : index
    %c0_15 = arith.constant 0 : index
    %c0_16 = arith.constant 0 : index
    %c0_17 = arith.constant 0 : index
    %15 = vector.load %arg2[%c0_14, %c0_15, %c0_16, %c0_17] : memref<5x3x48x16xbf16, #tpu.memory_space<vmem>>, vector<1x1x48x16xbf16>
    %16 = vector.shape_cast %15 : vector<1x1x48x16xbf16> to vector<48x16xbf16>
    %cst_18 = arith.constant dense<0.000000e+00> : vector<256x16xf32>
    %17 = tpu.matmul %14, %16, %cst_18 {dimension_numbers = #tpu.dot_dimension_numbers<[1], [0], [0], [1], [0, 0, 1, 1], [], []>} : vector<256x48xbf16>, vector<48x16xbf16>, vector<256x16xf32> -> vector<256x16xf32>
    %c1_19 = arith.constant 1 : index
    %c7_20 = arith.constant 7 : index
    %c0_21 = arith.constant 0 : index
    %18 = vector.load %arg5[%c1_19, %c7_20, %c0_21] : memref<18x32x16xf32, #tpu.memory_space<vmem>>, vector<16x16x16xf32>
    %19 = vector.shape_cast %18 : vector<16x16x16xf32> to vector<256x16xf32>
    %20 = arith.truncf %19 : vector<256x16xf32> to vector<256x16xbf16>
    %c1_22 = arith.constant 1 : index
    %c8_23 = arith.constant 8 : index
    %c0_24 = arith.constant 0 : index
    %21 = vector.load %arg5[%c1_22, %c8_23, %c0_24] : memref<18x32x16xf32, #tpu.memory_space<vmem>>, vector<16x16x16xf32>
    %22 = vector.shape_cast %21 : vector<16x16x16xf32> to vector<256x16xf32>
    %23 = arith.truncf %22 : vector<256x16xf32> to vector<256x16xbf16>
    %c1_25 = arith.constant 1 : index
    %c9_26 = arith.constant 9 : index
    %c0_27 = arith.constant 0 : index
    %24 = vector.load %arg5[%c1_25, %c9_26, %c0_27] : memref<18x32x16xf32, #tpu.memory_space<vmem>>, vector<16x16x16xf32>
    %25 = vector.shape_cast %24 : vector<16x16x16xf32> to vector<256x16xf32>
    %26 = arith.truncf %25 : vector<256x16xf32> to vector<256x16xbf16>
    %27 = tpu.concatenate %20, %23, %26 in 1 : vector<256x16xbf16>, vector<256x16xbf16>, vector<256x16xbf16> -> vector<256x48xbf16>
    %c0_28 = arith.constant 0 : index
    %c1_29 = arith.constant 1 : index
    %c0_30 = arith.constant 0 : index
    %c0_31 = arith.constant 0 : index
    %28 = vector.load %arg2[%c0_28, %c1_29, %c0_30, %c0_31] : memref<5x3x48x16xbf16, #tpu.memory_space<vmem>>, vector<1x1x48x16xbf16>
    %29 = vector.shape_cast %28 : vector<1x1x48x16xbf16> to vector<48x16xbf16>
    %cst_32 = arith.constant dense<0.000000e+00> : vector<256x16xf32>
    %30 = tpu.matmul %27, %29, %cst_32 {dimension_numbers = #tpu.dot_dimension_numbers<[1], [0], [0], [1], [0, 0, 1, 1], [], []>} : vector<256x48xbf16>, vector<48x16xbf16>, vector<256x16xf32> -> vector<256x16xf32>
    %31 = arith.addf %17, %30 : vector<256x16xf32>
    %c2 = arith.constant 2 : index
    %c7_33 = arith.constant 7 : index
    %c0_34 = arith.constant 0 : index
    %32 = vector.load %arg5[%c2, %c7_33, %c0_34] : memref<18x32x16xf32, #tpu.memory_space<vmem>>, vector<16x16x16xf32>
    %33 = vector.shape_cast %32 : vector<16x16x16xf32> to vector<256x16xf32>
    %34 = arith.truncf %33 : vector<256x16xf32> to vector<256x16xbf16>
    %c2_35 = arith.constant 2 : index
    %c8_36 = arith.constant 8 : index
    %c0_37 = arith.constant 0 : index
    %35 = vector.load %arg5[%c2_35, %c8_36, %c0_37] : memref<18x32x16xf32, #tpu.memory_space<vmem>>, vector<16x16x16xf32>
    %36 = vector.shape_cast %35 : vector<16x16x16xf32> to vector<256x16xf32>
    %37 = arith.truncf %36 : vector<256x16xf32> to vector<256x16xbf16>
    %c2_38 = arith.constant 2 : index
    %c9_39 = arith.constant 9 : index
    %c0_40 = arith.constant 0 : index
    %38 = vector.load %arg5[%c2_38, %c9_39, %c0_40] : memref<18x32x16xf32, #tpu.memory_space<vmem>>, vector<16x16x16xf32>
    %39 = vector.shape_cast %38 : vector<16x16x16xf32> to vector<256x16xf32>
    %40 = arith.truncf %39 : vector<256x16xf32> to vector<256x16xbf16>
    %41 = tpu.concatenate %34, %37, %40 in 1 : vector<256x16xbf16>, vector<256x16xbf16>, vector<256x16xbf16> -> vector<256x48xbf16>
    %c0_41 = arith.constant 0 : index
    %c2_42 = arith.constant 2 : index
    %c0_43 = arith.constant 0 : index
    %c0_44 = arith.constant 0 : index
    %42 = vector.load %arg2[%c0_41, %c2_42, %c0_43, %c0_44] : memref<5x3x48x16xbf16, #tpu.memory_space<vmem>>, vector<1x1x48x16xbf16>
    %43 = vector.shape_cast %42 : vector<1x1x48x16xbf16> to vector<48x16xbf16>
    %cst_45 = arith.constant dense<0.000000e+00> : vector<256x16xf32>
    %44 = tpu.matmul %41, %43, %cst_45 {dimension_numbers = #tpu.dot_dimension_numbers<[1], [0], [0], [1], [0, 0, 1, 1], [], []>} : vector<256x48xbf16>, vector<48x16xbf16>, vector<256x16xf32> -> vector<256x16xf32>
    %45 = arith.addf %31, %44 : vector<256x16xf32>
    %c0_46 = arith.constant 0 : index
    %c0_47 = arith.constant 0 : index
    %c0_48 = arith.constant 0 : index
    %46 = vector.load %arg3[%c0_46, %c0_47, %c0_48] : memref<5x1x16xf32, #tpu.memory_space<vmem>>, vector<1x1x16xf32>
    %47 = vector.shape_cast %46 : vector<1x1x16xf32> to vector<1x16xf32>
    %48 = vector.broadcast %47 : vector<1x16xf32> to vector<256x16xf32>
    %49 = arith.addf %45, %48 : vector<256x16xf32>
    %cst_49 = arith.constant 0.000000e+00 : f32
    %50 = vector.broadcast %cst_49 : f32 to vector<256x16xf32>
    %51 = arith.maximumf %49, %50 : vector<256x16xf32>
    %52 = vector.shape_cast %51 : vector<256x16xf32> to vector<16x16x16xf32>
    %c1_50 = arith.constant 1 : index
    %c8_51 = arith.constant 8 : index
    %c0_52 = arith.constant 0 : index
    %53 = vector.load %arg5[%c1_50, %c8_51, %c0_52] : memref<18x32x16xf32, #tpu.memory_space<vmem>>, vector<16x16x16xf32>
    tpu.vector_store %arg5[%c1_50, %c8_51, %c0_52], %52 {strides = array<i32>} : memref<18x32x16xf32, #tpu.memory_space<vmem>>, vector<16x16x16xf32>,
    %c0_53 = arith.constant 0 : index
    %c7_54 = arith.constant 7 : index
    %c0_55 = arith.constant 0 : index
    %54 = vector.load %arg5[%c0_53, %c7_54, %c0_55] : memref<18x32x16xf32, #tpu.memory_space<vmem>>, vector<16x16x16xf32>
    %55 = vector.shape_cast %54 : vector<16x16x16xf32> to vector<256x16xf32>
    %56 = arith.truncf %55 : vector<256x16xf32> to vector<256x16xbf16>
    %c0_56 = arith.constant 0 : index
    %c8_57 = arith.constant 8 : index
    %c0_58 = arith.constant 0 : index
    %57 = vector.load %arg5[%c0_56, %c8_57, %c0_58] : memref<18x32x16xf32, #tpu.memory_space<vmem>>, vector<16x16x16xf32>
    %58 = vector.shape_cast %57 : vector<16x16x16xf32> to vector<256x16xf32>
    %59 = arith.truncf %58 : vector<256x16xf32> to vector<256x16xbf16>
    %c0_59 = arith.constant 0 : index
    %c9_60 = arith.constant 9 : index
    %c0_61 = arith.constant 0 : index
    %60 = vector.load %arg5[%c0_59, %c9_60, %c0_61] : memref<18x32x16xf32, #tpu.memory_space<vmem>>, vector<16x16x16xf32>
    %61 = vector.shape_cast %60 : vector<16x16x16xf32> to vector<256x16xf32>
    %62 = arith.truncf %61 : vector<256x16xf32> to vector<256x16xbf16>
    %63 = tpu.concatenate %56, %59, %62 in 1 : vector<256x16xbf16>, vector<256x16xbf16>, vector<256x16xbf16> -> vector<256x48xbf16>
    %c1_62 = arith.constant 1 : index
    %c0_63 = arith.constant 0 : index
    %c0_64 = arith.constant 0 : index
    %c0_65 = arith.constant 0 : index
    %64 = vector.load %arg2[%c1_62, %c0_63, %c0_64, %c0_65] : memref<5x3x48x16xbf16, #tpu.memory_space<vmem>>, vector<1x1x48x16xbf16>
    %65 = vector.shape_cast %64 : vector<1x1x48x16xbf16> to vector<48x16xbf16>
    %cst_66 = arith.constant dense<0.000000e+00> : vector<256x16xf32>
    %66 = tpu.matmul %63, %65, %cst_66 {dimension_numbers = #tpu.dot_dimension_numbers<[1], [0], [0], [1], [0, 0, 1, 1], [], []>} : vector<256x48xbf16>, vector<48x16xbf16>, vector<256x16xf32> -> vector<256x16xf32>
    %c1_67 = arith.constant 1 : index
    %c7_68 = arith.constant 7 : index
    %c0_69 = arith.constant 0 : index
    %67 = vector.load %arg5[%c1_67, %c7_68, %c0_69] : memref<18x32x16xf32, #tpu.memory_space<vmem>>, vector<16x16x16xf32>
    %68 = vector.shape_cast %67 : vector<16x16x16xf32> to vector<256x16xf32>
    %69 = arith.truncf %68 : vector<256x16xf32> to vector<256x16xbf16>
    %c1_70 = arith.constant 1 : index
    %c8_71 = arith.constant 8 : index
    %c0_72 = arith.constant 0 : index
    %70 = vector.load %arg5[%c1_70, %c8_71, %c0_72] : memref<18x32x16xf32, #tpu.memory_space<vmem>>, vector<16x16x16xf32>
    %71 = vector.shape_cast %70 : vector<16x16x16xf32> to vector<256x16xf32>
    %72 = arith.truncf %71 : vector<256x16xf32> to vector<256x16xbf16>
    %c1_73 = arith.constant 1 : index
    %c9_74 = arith.constant 9 : index
    %c0_75 = arith.constant 0 : index
    %73 = vector.load %arg5[%c1_73, %c9_74, %c0_75] : memref<18x32x16xf32, #tpu.memory_space<vmem>>, vector<16x16x16xf32>
    %74 = vector.shape_cast %73 : vector<16x16x16xf32> to vector<256x16xf32>
    %75 = arith.truncf %74 : vector<256x16xf32> to vector<256x16xbf16>
    %76 = tpu.concatenate %69, %72, %75 in 1 : vector<256x16xbf16>, vector<256x16xbf16>, vector<256x16xbf16> -> vector<256x48xbf16>
    %c1_76 = arith.constant 1 : index
    %c1_77 = arith.constant 1 : index
    %c0_78 = arith.constant 0 : index
    %c0_79 = arith.constant 0 : index
    %77 = vector.load %arg2[%c1_76, %c1_77, %c0_78, %c0_79] : memref<5x3x48x16xbf16, #tpu.memory_space<vmem>>, vector<1x1x48x16xbf16>
    %78 = vector.shape_cast %77 : vector<1x1x48x16xbf16> to vector<48x16xbf16>
    %cst_80 = arith.constant dense<0.000000e+00> : vector<256x16xf32>
    %79 = tpu.matmul %76, %78, %cst_80 {dimension_numbers = #tpu.dot_dimension_numbers<[1], [0], [0], [1], [0, 0, 1, 1], [], []>} : vector<256x48xbf16>, vector<48x16xbf16>, vector<256x16xf32> -> vector<256x16xf32>
    %80 = arith.addf %66, %79 : vector<256x16xf32>
    %c2_81 = arith.constant 2 : index
    %c7_82 = arith.constant 7 : index
    %c0_83 = arith.constant 0 : index
    %81 = vector.load %arg5[%c2_81, %c7_82, %c0_83] : memref<18x32x16xf32, #tpu.memory_space<vmem>>, vector<16x16x16xf32>
    %82 = vector.shape_cast %81 : vector<16x16x16xf32> to vector<256x16xf32>
    %83 = arith.truncf %82 : vector<256x16xf32> to vector<256x16xbf16>
    %c2_84 = arith.constant 2 : index
    %c8_85 = arith.constant 8 : index
    %c0_86 = arith.constant 0 : index
    %84 = vector.load %arg5[%c2_84, %c8_85, %c0_86] : memref<18x32x16xf32, #tpu.memory_space<vmem>>, vector<16x16x16xf32>
    %85 = vector.shape_cast %84 : vector<16x16x16xf32> to vector<256x16xf32>
    %86 = arith.truncf %85 : vector<256x16xf32> to vector<256x16xbf16>
    %c2_87 = arith.constant 2 : index
    %c9_88 = arith.constant 9 : index
    %c0_89 = arith.constant 0 : index
    %87 = vector.load %arg5[%c2_87, %c9_88, %c0_89] : memref<18x32x16xf32, #tpu.memory_space<vmem>>, vector<16x16x16xf32>
    %88 = vector.shape_cast %87 : vector<16x16x16xf32> to vector<256x16xf32>
    %89 = arith.truncf %88 : vector<256x16xf32> to vector<256x16xbf16>
    %90 = tpu.concatenate %83, %86, %89 in 1 : vector<256x16xbf16>, vector<256x16xbf16>, vector<256x16xbf16> -> vector<256x48xbf16>
    %c1_90 = arith.constant 1 : index
    %c2_91 = arith.constant 2 : index
    %c0_92 = arith.constant 0 : index
    %c0_93 = arith.constant 0 : index
    %91 = vector.load %arg2[%c1_90, %c2_91, %c0_92, %c0_93] : memref<5x3x48x16xbf16, #tpu.memory_space<vmem>>, vector<1x1x48x16xbf16>
    %92 = vector.shape_cast %91 : vector<1x1x48x16xbf16> to vector<48x16xbf16>
    %cst_94 = arith.constant dense<0.000000e+00> : vector<256x16xf32>
    %93 = tpu.matmul %90, %92, %cst_94 {dimension_numbers = #tpu.dot_dimension_numbers<[1], [0], [0], [1], [0, 0, 1, 1], [], []>} : vector<256x48xbf16>, vector<48x16xbf16>, vector<256x16xf32> -> vector<256x16xf32>
    %94 = arith.addf %80, %93 : vector<256x16xf32>
    %c1_95 = arith.constant 1 : index
    %c0_96 = arith.constant 0 : index
    %c0_97 = arith.constant 0 : index
    %95 = vector.load %arg3[%c1_95, %c0_96, %c0_97] : memref<5x1x16xf32, #tpu.memory_space<vmem>>, vector<1x1x16xf32>
    %96 = vector.shape_cast %95 : vector<1x1x16xf32> to vector<1x16xf32>
    %97 = vector.broadcast %96 : vector<1x16xf32> to vector<256x16xf32>
    %98 = arith.addf %94, %97 : vector<256x16xf32>
    %cst_98 = arith.constant 0.000000e+00 : f32
    %99 = vector.broadcast %cst_98 : f32 to vector<256x16xf32>
    %100 = arith.maximumf %98, %99 : vector<256x16xf32>
    %101 = vector.shape_cast %100 : vector<256x16xf32> to vector<16x16x16xf32>
    %c1_99 = arith.constant 1 : index
    %c8_100 = arith.constant 8 : index
    %c0_101 = arith.constant 0 : index
    %102 = vector.load %arg5[%c1_99, %c8_100, %c0_101] : memref<18x32x16xf32, #tpu.memory_space<vmem>>, vector<16x16x16xf32>
    tpu.vector_store %arg5[%c1_99, %c8_100, %c0_101], %101 {strides = array<i32>} : memref<18x32x16xf32, #tpu.memory_space<vmem>>, vector<16x16x16xf32>,
    %c0_102 = arith.constant 0 : index
    %c7_103 = arith.constant 7 : index
    %c0_104 = arith.constant 0 : index
    %103 = vector.load %arg5[%c0_102, %c7_103, %c0_104] : memref<18x32x16xf32, #tpu.memory_space<vmem>>, vector<16x16x16xf32>
    %104 = vector.shape_cast %103 : vector<16x16x16xf32> to vector<256x16xf32>
    %105 = arith.truncf %104 : vector<256x16xf32> to vector<256x16xbf16>
    %c0_105 = arith.constant 0 : index
    %c8_106 = arith.constant 8 : index
    %c0_107 = arith.constant 0 : index
    %106 = vector.load %arg5[%c0_105, %c8_106, %c0_107] : memref<18x32x16xf32, #tpu.memory_space<vmem>>, vector<16x16x16xf32>
    %107 = vector.shape_cast %106 : vector<16x16x16xf32> to vector<256x16xf32>
    %108 = arith.truncf %107 : vector<256x16xf32> to vector<256x16xbf16>
    %c0_108 = arith.constant 0 : index
    %c9_109 = arith.constant 9 : index
    %c0_110 = arith.constant 0 : index
    %109 = vector.load %arg5[%c0_108, %c9_109, %c0_110] : memref<18x32x16xf32, #tpu.memory_space<vmem>>, vector<16x16x16xf32>
    %110 = vector.shape_cast %109 : vector<16x16x16xf32> to vector<256x16xf32>
    %111 = arith.truncf %110 : vector<256x16xf32> to vector<256x16xbf16>
    %112 = tpu.concatenate %105, %108, %111 in 1 : vector<256x16xbf16>, vector<256x16xbf16>, vector<256x16xbf16> -> vector<256x48xbf16>
    %c2_111 = arith.constant 2 : index
    %c0_112 = arith.constant 0 : index
    %c0_113 = arith.constant 0 : index
    %c0_114 = arith.constant 0 : index
    %113 = vector.load %arg2[%c2_111, %c0_112, %c0_113, %c0_114] : memref<5x3x48x16xbf16, #tpu.memory_space<vmem>>, vector<1x1x48x16xbf16>
    %114 = vector.shape_cast %113 : vector<1x1x48x16xbf16> to vector<48x16xbf16>
    %cst_115 = arith.constant dense<0.000000e+00> : vector<256x16xf32>
    %115 = tpu.matmul %112, %114, %cst_115 {dimension_numbers = #tpu.dot_dimension_numbers<[1], [0], [0], [1], [0, 0, 1, 1], [], []>} : vector<256x48xbf16>, vector<48x16xbf16>, vector<256x16xf32> -> vector<256x16xf32>
    %c1_116 = arith.constant 1 : index
    %c7_117 = arith.constant 7 : index
    %c0_118 = arith.constant 0 : index
    %116 = vector.load %arg5[%c1_116, %c7_117, %c0_118] : memref<18x32x16xf32, #tpu.memory_space<vmem>>, vector<16x16x16xf32>
    %117 = vector.shape_cast %116 : vector<16x16x16xf32> to vector<256x16xf32>
    %118 = arith.truncf %117 : vector<256x16xf32> to vector<256x16xbf16>
    %c1_119 = arith.constant 1 : index
    %c8_120 = arith.constant 8 : index
    %c0_121 = arith.constant 0 : index
    %119 = vector.load %arg5[%c1_119, %c8_120, %c0_121] : memref<18x32x16xf32, #tpu.memory_space<vmem>>, vector<16x16x16xf32>
    %120 = vector.shape_cast %119 : vector<16x16x16xf32> to vector<256x16xf32>
    %121 = arith.truncf %120 : vector<256x16xf32> to vector<256x16xbf16>
    %c1_122 = arith.constant 1 : index
    %c9_123 = arith.constant 9 : index
    %c0_124 = arith.constant 0 : index
    %122 = vector.load %arg5[%c1_122, %c9_123, %c0_124] : memref<18x32x16xf32, #tpu.memory_space<vmem>>, vector<16x16x16xf32>
    %123 = vector.shape_cast %122 : vector<16x16x16xf32> to vector<256x16xf32>
    %124 = arith.truncf %123 : vector<256x16xf32> to vector<256x16xbf16>
    %125 = tpu.concatenate %118, %121, %124 in 1 : vector<256x16xbf16>, vector<256x16xbf16>, vector<256x16xbf16> -> vector<256x48xbf16>
    %c2_125 = arith.constant 2 : index
    %c1_126 = arith.constant 1 : index
    %c0_127 = arith.constant 0 : index
    %c0_128 = arith.constant 0 : index
    %126 = vector.load %arg2[%c2_125, %c1_126, %c0_127, %c0_128] : memref<5x3x48x16xbf16, #tpu.memory_space<vmem>>, vector<1x1x48x16xbf16>
    %127 = vector.shape_cast %126 : vector<1x1x48x16xbf16> to vector<48x16xbf16>
    %cst_129 = arith.constant dense<0.000000e+00> : vector<256x16xf32>
    %128 = tpu.matmul %125, %127, %cst_129 {dimension_numbers = #tpu.dot_dimension_numbers<[1], [0], [0], [1], [0, 0, 1, 1], [], []>} : vector<256x48xbf16>, vector<48x16xbf16>, vector<256x16xf32> -> vector<256x16xf32>
    %129 = arith.addf %115, %128 : vector<256x16xf32>
    %c2_130 = arith.constant 2 : index
    %c7_131 = arith.constant 7 : index
    %c0_132 = arith.constant 0 : index
    %130 = vector.load %arg5[%c2_130, %c7_131, %c0_132] : memref<18x32x16xf32, #tpu.memory_space<vmem>>, vector<16x16x16xf32>
    %131 = vector.shape_cast %130 : vector<16x16x16xf32> to vector<256x16xf32>
    %132 = arith.truncf %131 : vector<256x16xf32> to vector<256x16xbf16>
    %c2_133 = arith.constant 2 : index
    %c8_134 = arith.constant 8 : index
    %c0_135 = arith.constant 0 : index
    %133 = vector.load %arg5[%c2_133, %c8_134, %c0_135] : memref<18x32x16xf32, #tpu.memory_space<vmem>>, vector<16x16x16xf32>
    %134 = vector.shape_cast %133 : vector<16x16x16xf32> to vector<256x16xf32>
    %135 = arith.truncf %134 : vector<256x16xf32> to vector<256x16xbf16>
    %c2_136 = arith.constant 2 : index
    %c9_137 = arith.constant 9 : index
    %c0_138 = arith.constant 0 : index
    %136 = vector.load %arg5[%c2_136, %c9_137, %c0_138] : memref<18x32x16xf32, #tpu.memory_space<vmem>>, vector<16x16x16xf32>
    %137 = vector.shape_cast %136 : vector<16x16x16xf32> to vector<256x16xf32>
    %138 = arith.truncf %137 : vector<256x16xf32> to vector<256x16xbf16>
    %139 = tpu.concatenate %132, %135, %138 in 1 : vector<256x16xbf16>, vector<256x16xbf16>, vector<256x16xbf16> -> vector<256x48xbf16>
    %c2_139 = arith.constant 2 : index
    %c2_140 = arith.constant 2 : index
    %c0_141 = arith.constant 0 : index
    %c0_142 = arith.constant 0 : index
    %140 = vector.load %arg2[%c2_139, %c2_140, %c0_141, %c0_142] : memref<5x3x48x16xbf16, #tpu.memory_space<vmem>>, vector<1x1x48x16xbf16>
    %141 = vector.shape_cast %140 : vector<1x1x48x16xbf16> to vector<48x16xbf16>
    %cst_143 = arith.constant dense<0.000000e+00> : vector<256x16xf32>
    %142 = tpu.matmul %139, %141, %cst_143 {dimension_numbers = #tpu.dot_dimension_numbers<[1], [0], [0], [1], [0, 0, 1, 1], [], []>} : vector<256x48xbf16>, vector<48x16xbf16>, vector<256x16xf32> -> vector<256x16xf32>
    %143 = arith.addf %129, %142 : vector<256x16xf32>
    %c2_144 = arith.constant 2 : index
    %c0_145 = arith.constant 0 : index
    %c0_146 = arith.constant 0 : index
    %144 = vector.load %arg3[%c2_144, %c0_145, %c0_146] : memref<5x1x16xf32, #tpu.memory_space<vmem>>, vector<1x1x16xf32>
    %145 = vector.shape_cast %144 : vector<1x1x16xf32> to vector<1x16xf32>
    %146 = vector.broadcast %145 : vector<1x16xf32> to vector<256x16xf32>
    %147 = arith.addf %143, %146 : vector<256x16xf32>
    %cst_147 = arith.constant 0.000000e+00 : f32
    %148 = vector.broadcast %cst_147 : f32 to vector<256x16xf32>
    %149 = arith.maximumf %147, %148 : vector<256x16xf32>
    %150 = vector.shape_cast %149 : vector<256x16xf32> to vector<16x16x16xf32>
    %c1_148 = arith.constant 1 : index
    %c8_149 = arith.constant 8 : index
    %c0_150 = arith.constant 0 : index
    %151 = vector.load %arg5[%c1_148, %c8_149, %c0_150] : memref<18x32x16xf32, #tpu.memory_space<vmem>>, vector<16x16x16xf32>
    tpu.vector_store %arg5[%c1_148, %c8_149, %c0_150], %150 {strides = array<i32>} : memref<18x32x16xf32, #tpu.memory_space<vmem>>, vector<16x16x16xf32>,
    %c0_151 = arith.constant 0 : index
    %c7_152 = arith.constant 7 : index
    %c0_153 = arith.constant 0 : index
    %152 = vector.load %arg5[%c0_151, %c7_152, %c0_153] : memref<18x32x16xf32, #tpu.memory_space<vmem>>, vector<16x16x16xf32>
    %153 = vector.shape_cast %152 : vector<16x16x16xf32> to vector<256x16xf32>
    %154 = arith.truncf %153 : vector<256x16xf32> to vector<256x16xbf16>
    %c0_154 = arith.constant 0 : index
    %c8_155 = arith.constant 8 : index
    %c0_156 = arith.constant 0 : index
    %155 = vector.load %arg5[%c0_154, %c8_155, %c0_156] : memref<18x32x16xf32, #tpu.memory_space<vmem>>, vector<16x16x16xf32>
    %156 = vector.shape_cast %155 : vector<16x16x16xf32> to vector<256x16xf32>
    %157 = arith.truncf %156 : vector<256x16xf32> to vector<256x16xbf16>
    %c0_157 = arith.constant 0 : index
    %c9_158 = arith.constant 9 : index
    %c0_159 = arith.constant 0 : index
    %158 = vector.load %arg5[%c0_157, %c9_158, %c0_159] : memref<18x32x16xf32, #tpu.memory_space<vmem>>, vector<16x16x16xf32>
    %159 = vector.shape_cast %158 : vector<16x16x16xf32> to vector<256x16xf32>
    %160 = arith.truncf %159 : vector<256x16xf32> to vector<256x16xbf16>
    %161 = tpu.concatenate %154, %157, %160 in 1 : vector<256x16xbf16>, vector<256x16xbf16>, vector<256x16xbf16> -> vector<256x48xbf16>
    %c3 = arith.constant 3 : index
    %c0_160 = arith.constant 0 : index
    %c0_161 = arith.constant 0 : index
    %c0_162 = arith.constant 0 : index
    %162 = vector.load %arg2[%c3, %c0_160, %c0_161, %c0_162] : memref<5x3x48x16xbf16, #tpu.memory_space<vmem>>, vector<1x1x48x16xbf16>
    %163 = vector.shape_cast %162 : vector<1x1x48x16xbf16> to vector<48x16xbf16>
    %cst_163 = arith.constant dense<0.000000e+00> : vector<256x16xf32>
    %164 = tpu.matmul %161, %163, %cst_163 {dimension_numbers = #tpu.dot_dimension_numbers<[1], [0], [0], [1], [0, 0, 1, 1], [], []>} : vector<256x48xbf16>, vector<48x16xbf16>, vector<256x16xf32> -> vector<256x16xf32>
    %c1_164 = arith.constant 1 : index
    %c7_165 = arith.constant 7 : index
    %c0_166 = arith.constant 0 : index
    %165 = vector.load %arg5[%c1_164, %c7_165, %c0_166] : memref<18x32x16xf32, #tpu.memory_space<vmem>>, vector<16x16x16xf32>
    %166 = vector.shape_cast %165 : vector<16x16x16xf32> to vector<256x16xf32>
    %167 = arith.truncf %166 : vector<256x16xf32> to vector<256x16xbf16>
    %c1_167 = arith.constant 1 : index
    %c8_168 = arith.constant 8 : index
    %c0_169 = arith.constant 0 : index
    %168 = vector.load %arg5[%c1_167, %c8_168, %c0_169] : memref<18x32x16xf32, #tpu.memory_space<vmem>>, vector<16x16x16xf32>
    %169 = vector.shape_cast %168 : vector<16x16x16xf32> to vector<256x16xf32>
    %170 = arith.truncf %169 : vector<256x16xf32> to vector<256x16xbf16>
    %c1_170 = arith.constant 1 : index
    %c9_171 = arith.constant 9 : index
    %c0_172 = arith.constant 0 : index
    %171 = vector.load %arg5[%c1_170, %c9_171, %c0_172] : memref<18x32x16xf32, #tpu.memory_space<vmem>>, vector<16x16x16xf32>
    %172 = vector.shape_cast %171 : vector<16x16x16xf32> to vector<256x16xf32>
    %173 = arith.truncf %172 : vector<256x16xf32> to vector<256x16xbf16>
    %174 = tpu.concatenate %167, %170, %173 in 1 : vector<256x16xbf16>, vector<256x16xbf16>, vector<256x16xbf16> -> vector<256x48xbf16>
    %c3_173 = arith.constant 3 : index
    %c1_174 = arith.constant 1 : index
    %c0_175 = arith.constant 0 : index
    %c0_176 = arith.constant 0 : index
    %175 = vector.load %arg2[%c3_173, %c1_174, %c0_175, %c0_176] : memref<5x3x48x16xbf16, #tpu.memory_space<vmem>>, vector<1x1x48x16xbf16>
    %176 = vector.shape_cast %175 : vector<1x1x48x16xbf16> to vector<48x16xbf16>
    %cst_177 = arith.constant dense<0.000000e+00> : vector<256x16xf32>
    %177 = tpu.matmul %174, %176, %cst_177 {dimension_numbers = #tpu.dot_dimension_numbers<[1], [0], [0], [1], [0, 0, 1, 1], [], []>} : vector<256x48xbf16>, vector<48x16xbf16>, vector<256x16xf32> -> vector<256x16xf32>
    %178 = arith.addf %164, %177 : vector<256x16xf32>
    %c2_178 = arith.constant 2 : index
    %c7_179 = arith.constant 7 : index
    %c0_180 = arith.constant 0 : index
    %179 = vector.load %arg5[%c2_178, %c7_179, %c0_180] : memref<18x32x16xf32, #tpu.memory_space<vmem>>, vector<16x16x16xf32>
    %180 = vector.shape_cast %179 : vector<16x16x16xf32> to vector<256x16xf32>
    %181 = arith.truncf %180 : vector<256x16xf32> to vector<256x16xbf16>
    %c2_181 = arith.constant 2 : index
    %c8_182 = arith.constant 8 : index
    %c0_183 = arith.constant 0 : index
    %182 = vector.load %arg5[%c2_181, %c8_182, %c0_183] : memref<18x32x16xf32, #tpu.memory_space<vmem>>, vector<16x16x16xf32>
    %183 = vector.shape_cast %182 : vector<16x16x16xf32> to vector<256x16xf32>
    %184 = arith.truncf %183 : vector<256x16xf32> to vector<256x16xbf16>
    %c2_184 = arith.constant 2 : index
    %c9_185 = arith.constant 9 : index
    %c0_186 = arith.constant 0 : index
    %185 = vector.load %arg5[%c2_184, %c9_185, %c0_186] : memref<18x32x16xf32, #tpu.memory_space<vmem>>, vector<16x16x16xf32>
    %186 = vector.shape_cast %185 : vector<16x16x16xf32> to vector<256x16xf32>
    %187 = arith.truncf %186 : vector<256x16xf32> to vector<256x16xbf16>
    %188 = tpu.concatenate %181, %184, %187 in 1 : vector<256x16xbf16>, vector<256x16xbf16>, vector<256x16xbf16> -> vector<256x48xbf16>
    %c3_187 = arith.constant 3 : index
    %c2_188 = arith.constant 2 : index
    %c0_189 = arith.constant 0 : index
    %c0_190 = arith.constant 0 : index
    %189 = vector.load %arg2[%c3_187, %c2_188, %c0_189, %c0_190] : memref<5x3x48x16xbf16, #tpu.memory_space<vmem>>, vector<1x1x48x16xbf16>
    %190 = vector.shape_cast %189 : vector<1x1x48x16xbf16> to vector<48x16xbf16>
    %cst_191 = arith.constant dense<0.000000e+00> : vector<256x16xf32>
    %191 = tpu.matmul %188, %190, %cst_191 {dimension_numbers = #tpu.dot_dimension_numbers<[1], [0], [0], [1], [0, 0, 1, 1], [], []>} : vector<256x48xbf16>, vector<48x16xbf16>, vector<256x16xf32> -> vector<256x16xf32>
    %192 = arith.addf %178, %191 : vector<256x16xf32>
    %c3_192 = arith.constant 3 : index
    %c0_193 = arith.constant 0 : index
    %c0_194 = arith.constant 0 : index
    %193 = vector.load %arg3[%c3_192, %c0_193, %c0_194] : memref<5x1x16xf32, #tpu.memory_space<vmem>>, vector<1x1x16xf32>
    %194 = vector.shape_cast %193 : vector<1x1x16xf32> to vector<1x16xf32>
    %195 = vector.broadcast %194 : vector<1x16xf32> to vector<256x16xf32>
    %196 = arith.addf %192, %195 : vector<256x16xf32>
    %cst_195 = arith.constant 0.000000e+00 : f32
    %197 = vector.broadcast %cst_195 : f32 to vector<256x16xf32>
    %198 = arith.maximumf %196, %197 : vector<256x16xf32>
    %199 = vector.shape_cast %198 : vector<256x16xf32> to vector<16x16x16xf32>
    %c1_196 = arith.constant 1 : index
    %c8_197 = arith.constant 8 : index
    %c0_198 = arith.constant 0 : index
    %200 = vector.load %arg5[%c1_196, %c8_197, %c0_198] : memref<18x32x16xf32, #tpu.memory_space<vmem>>, vector<16x16x16xf32>
    tpu.vector_store %arg5[%c1_196, %c8_197, %c0_198], %199 {strides = array<i32>} : memref<18x32x16xf32, #tpu.memory_space<vmem>>, vector<16x16x16xf32>,
    %c0_199 = arith.constant 0 : index
    %c7_200 = arith.constant 7 : index
    %c0_201 = arith.constant 0 : index
    %201 = vector.load %arg5[%c0_199, %c7_200, %c0_201] : memref<18x32x16xf32, #tpu.memory_space<vmem>>, vector<16x16x16xf32>
    %202 = vector.shape_cast %201 : vector<16x16x16xf32> to vector<256x16xf32>
    %203 = arith.truncf %202 : vector<256x16xf32> to vector<256x16xbf16>
    %c0_202 = arith.constant 0 : index
    %c8_203 = arith.constant 8 : index
    %c0_204 = arith.constant 0 : index
    %204 = vector.load %arg5[%c0_202, %c8_203, %c0_204] : memref<18x32x16xf32, #tpu.memory_space<vmem>>, vector<16x16x16xf32>
    %205 = vector.shape_cast %204 : vector<16x16x16xf32> to vector<256x16xf32>
    %206 = arith.truncf %205 : vector<256x16xf32> to vector<256x16xbf16>
    %c0_205 = arith.constant 0 : index
    %c9_206 = arith.constant 9 : index
    %c0_207 = arith.constant 0 : index
    %207 = vector.load %arg5[%c0_205, %c9_206, %c0_207] : memref<18x32x16xf32, #tpu.memory_space<vmem>>, vector<16x16x16xf32>
    %208 = vector.shape_cast %207 : vector<16x16x16xf32> to vector<256x16xf32>
    %209 = arith.truncf %208 : vector<256x16xf32> to vector<256x16xbf16>
    %210 = tpu.concatenate %203, %206, %209 in 1 : vector<256x16xbf16>, vector<256x16xbf16>, vector<256x16xbf16> -> vector<256x48xbf16>
    %c4 = arith.constant 4 : index
    %c0_208 = arith.constant 0 : index
    %c0_209 = arith.constant 0 : index
    %c0_210 = arith.constant 0 : index
    %211 = vector.load %arg2[%c4, %c0_208, %c0_209, %c0_210] : memref<5x3x48x16xbf16, #tpu.memory_space<vmem>>, vector<1x1x48x16xbf16>
    %212 = vector.shape_cast %211 : vector<1x1x48x16xbf16> to vector<48x16xbf16>
    %cst_211 = arith.constant dense<0.000000e+00> : vector<256x16xf32>
    %213 = tpu.matmul %210, %212, %cst_211 {dimension_numbers = #tpu.dot_dimension_numbers<[1], [0], [0], [1], [0, 0, 1, 1], [], []>} : vector<256x48xbf16>, vector<48x16xbf16>, vector<256x16xf32> -> vector<256x16xf32>
    %c1_212 = arith.constant 1 : index
    %c7_213 = arith.constant 7 : index
    %c0_214 = arith.constant 0 : index
    %214 = vector.load %arg5[%c1_212, %c7_213, %c0_214] : memref<18x32x16xf32, #tpu.memory_space<vmem>>, vector<16x16x16xf32>
    %215 = vector.shape_cast %214 : vector<16x16x16xf32> to vector<256x16xf32>
    %216 = arith.truncf %215 : vector<256x16xf32> to vector<256x16xbf16>
    %c1_215 = arith.constant 1 : index
    %c8_216 = arith.constant 8 : index
    %c0_217 = arith.constant 0 : index
    %217 = vector.load %arg5[%c1_215, %c8_216, %c0_217] : memref<18x32x16xf32, #tpu.memory_space<vmem>>, vector<16x16x16xf32>
    %218 = vector.shape_cast %217 : vector<16x16x16xf32> to vector<256x16xf32>
    %219 = arith.truncf %218 : vector<256x16xf32> to vector<256x16xbf16>
    %c1_218 = arith.constant 1 : index
    %c9_219 = arith.constant 9 : index
    %c0_220 = arith.constant 0 : index
    %220 = vector.load %arg5[%c1_218, %c9_219, %c0_220] : memref<18x32x16xf32, #tpu.memory_space<vmem>>, vector<16x16x16xf32>
    %221 = vector.shape_cast %220 : vector<16x16x16xf32> to vector<256x16xf32>
    %222 = arith.truncf %221 : vector<256x16xf32> to vector<256x16xbf16>
    %223 = tpu.concatenate %216, %219, %222 in 1 : vector<256x16xbf16>, vector<256x16xbf16>, vector<256x16xbf16> -> vector<256x48xbf16>
    %c4_221 = arith.constant 4 : index
    %c1_222 = arith.constant 1 : index
    %c0_223 = arith.constant 0 : index
    %c0_224 = arith.constant 0 : index
    %224 = vector.load %arg2[%c4_221, %c1_222, %c0_223, %c0_224] : memref<5x3x48x16xbf16, #tpu.memory_space<vmem>>, vector<1x1x48x16xbf16>
    %225 = vector.shape_cast %224 : vector<1x1x48x16xbf16> to vector<48x16xbf16>
    %cst_225 = arith.constant dense<0.000000e+00> : vector<256x16xf32>
    %226 = tpu.matmul %223, %225, %cst_225 {dimension_numbers = #tpu.dot_dimension_numbers<[1], [0], [0], [1], [0, 0, 1, 1], [], []>} : vector<256x48xbf16>, vector<48x16xbf16>, vector<256x16xf32> -> vector<256x16xf32>
    %227 = arith.addf %213, %226 : vector<256x16xf32>
    %c2_226 = arith.constant 2 : index
    %c7_227 = arith.constant 7 : index
    %c0_228 = arith.constant 0 : index
    %228 = vector.load %arg5[%c2_226, %c7_227, %c0_228] : memref<18x32x16xf32, #tpu.memory_space<vmem>>, vector<16x16x16xf32>
    %229 = vector.shape_cast %228 : vector<16x16x16xf32> to vector<256x16xf32>
    %230 = arith.truncf %229 : vector<256x16xf32> to vector<256x16xbf16>
    %c2_229 = arith.constant 2 : index
    %c8_230 = arith.constant 8 : index
    %c0_231 = arith.constant 0 : index
    %231 = vector.load %arg5[%c2_229, %c8_230, %c0_231] : memref<18x32x16xf32, #tpu.memory_space<vmem>>, vector<16x16x16xf32>
    %232 = vector.shape_cast %231 : vector<16x16x16xf32> to vector<256x16xf32>
    %233 = arith.truncf %232 : vector<256x16xf32> to vector<256x16xbf16>
    %c2_232 = arith.constant 2 : index
    %c9_233 = arith.constant 9 : index
    %c0_234 = arith.constant 0 : index
    %234 = vector.load %arg5[%c2_232, %c9_233, %c0_234] : memref<18x32x16xf32, #tpu.memory_space<vmem>>, vector<16x16x16xf32>
    %235 = vector.shape_cast %234 : vector<16x16x16xf32> to vector<256x16xf32>
    %236 = arith.truncf %235 : vector<256x16xf32> to vector<256x16xbf16>
    %237 = tpu.concatenate %230, %233, %236 in 1 : vector<256x16xbf16>, vector<256x16xbf16>, vector<256x16xbf16> -> vector<256x48xbf16>
    %c4_235 = arith.constant 4 : index
    %c2_236 = arith.constant 2 : index
    %c0_237 = arith.constant 0 : index
    %c0_238 = arith.constant 0 : index
    %238 = vector.load %arg2[%c4_235, %c2_236, %c0_237, %c0_238] : memref<5x3x48x16xbf16, #tpu.memory_space<vmem>>, vector<1x1x48x16xbf16>
    %239 = vector.shape_cast %238 : vector<1x1x48x16xbf16> to vector<48x16xbf16>
    %cst_239 = arith.constant dense<0.000000e+00> : vector<256x16xf32>
    %240 = tpu.matmul %237, %239, %cst_239 {dimension_numbers = #tpu.dot_dimension_numbers<[1], [0], [0], [1], [0, 0, 1, 1], [], []>} : vector<256x48xbf16>, vector<48x16xbf16>, vector<256x16xf32> -> vector<256x16xf32>
    %241 = arith.addf %227, %240 : vector<256x16xf32>
    %c4_240 = arith.constant 4 : index
    %c0_241 = arith.constant 0 : index
    %c0_242 = arith.constant 0 : index
    %242 = vector.load %arg3[%c4_240, %c0_241, %c0_242] : memref<5x1x16xf32, #tpu.memory_space<vmem>>, vector<1x1x16xf32>
    %243 = vector.shape_cast %242 : vector<1x1x16xf32> to vector<1x16xf32>
    %244 = vector.broadcast %243 : vector<1x16xf32> to vector<256x16xf32>
    %245 = arith.addf %241, %244 : vector<256x16xf32>
    %c0_243 = arith.constant 0 : index
    %c0_244 = arith.constant 0 : index
    %c0_245 = arith.constant 0 : index
    %c0_246 = arith.constant 0 : index
    %246 = vector.load %arg1[%c0_243, %c0_244, %c0_245, %c0_246] : memref<1x16x16x16xf32, #tpu.memory_space<vmem>>, vector<1x16x16x16xf32>
    %247 = vector.shape_cast %246 : vector<1x16x16x16xf32> to vector<16x16x16xf32>
    %248 = vector.shape_cast %247 : vector<16x16x16xf32> to vector<256x16xf32>
    %249 = arith.subf %248, %245 : vector<256x16xf32>
    %c0_247 = arith.constant 0 : index
    %c0_248 = arith.constant 0 : index
    %c0_249 = arith.constant 0 : index
    %250 = vector.load %arg4[%c0_247, %c0_248, %c0_249] : memref<1x256x16xf32, #tpu.memory_space<vmem>>, vector<1x256x16xf32>
    %251 = vector.shape_cast %250 : vector<1x256x16xf32> to vector<256x16xf32>
    %252 = vector.shape_cast %249 : vector<256x16xf32> to vector<1x256x16xf32>
    tpu.vector_store %arg4[%c0_247, %c0_248, %c0_249], %252 {strides = array<i32>} : memref<1x256x16xf32, #tpu.memory_space<vmem>>, vector<1x256x16xf32>,
    return
  }
  func.func @transform_0(%arg0: i32) -> (i32, i32, i32, i32) {
    %c0_i32 = arith.constant 0 : i32
    %c0_i32_0 = arith.constant 0 : i32
    %c0_i32_1 = arith.constant 0 : i32
    %c0_i32_2 = arith.constant 0 : i32
    return %arg0, %c0_i32, %c0_i32_0, %c0_i32_1 : i32, i32, i32, i32
  }
  func.func @transform_1(%arg0: i32) -> (i32, i32, i32, i32) {
    %c0_i32 = arith.constant 0 : i32
    %c0_i32_0 = arith.constant 0 : i32
    %c0_i32_1 = arith.constant 0 : i32
    %c0_i32_2 = arith.constant 0 : i32
    %c0_i32_3 = arith.constant 0 : i32
    return %c0_i32, %c0_i32_0, %c0_i32_1, %c0_i32_2 : i32, i32, i32, i32
  }
  func.func @transform_2(%arg0: i32) -> (i32, i32, i32) {
    %c0_i32 = arith.constant 0 : i32
    %c0_i32_0 = arith.constant 0 : i32
    %c0_i32_1 = arith.constant 0 : i32
    %c0_i32_2 = arith.constant 0 : i32
    return %c0_i32, %c0_i32_0, %c0_i32_1 : i32, i32, i32
  }
  func.func @transform_3(%arg0: i32) -> (i32, i32, i32) {
    %c0_i32 = arith.constant 0 : i32
    %c0_i32_0 = arith.constant 0 : i32
    %c0_i32_1 = arith.constant 0 : i32
    return %arg0, %c0_i32, %c0_i32_0 : i32, i32, i32
  }
}

</mosaic_0001>

<bundles_post_ra>
// kernel: forward.1
= control target key start
LH: loop header
LB: loop body
LE: loop exit
PB: predicated region body
PF: predicated region fallthrough
CT: control target
= control target key end

     0   :  { %s10807_s12 = smov 0   ;;  %s14025_s0 = inlined_call_operand.vmem [shape: f32[2,16,16,16], index: 0, kind: input, shape index: {}]   ;;  %s14026_s1 = inlined_call_operand.vmem [shape: bf16[5,3,48,16], index: 1, kind: input, shape index: {}]   ;;  %s14027_s2 = inlined_call_operand.vmem [shape: f32[5,1,16], index: 2, kind: input, shape index: {}]   ;;  %s14028_s3 = inlined_call_operand.vmem [shape: f32[2,256,16], index: 3, kind: output, shape index: {}]  }
   0x1 LB: > { %s9148_s13 = sadd.s32 4294967295, %s10782_s12   ;;  %p9152_p0 = scmp.ge.s32.totalorder %s10782_s12, 1  ;;  %s10782_s12 = sphi %s10807_s12, %s13_s12  }
   0x2   : > { %p137_p1 = scmp.lt.s32.totalorder %s10782_s12, 3 }
   0x4   : > { %p138_p2 = pnand %p9152_p0, %p137_p1 }
   0x5   : > { %vm172_vm0 = vcmask (!%p138_p2), 130048   ;;  %v10784_v0 = vmov (!%p138_p2), 0.0   ;;  %p161_p3 = scmp.lt.s32.totalorder (!%p138_p2), %s9148_s13, 1  ;;  %v10731_v1 = vld [vmem:[%s14026_s1 + $0x18] sm:$0xff] (!%p138_p2)   ;;  %v10967_v2 = vld [vmem:[%s14026_s1] sm:$0xff] (!%p138_p2)   ;;  %v10982_v4 = vld [vmem:[%s14026_s1 + $0x8] sm:$0xff] (!%p138_p2)  }
   0x6   : > { %141 = sbr.rel (%p138_p2) target bundleno = 2486 (0x9b6), region = 32  ;;  %174 = vst.msk [vmem:[#allocation2 + $0x8] sm:$0xff] (!%p138_p2), %vm172_vm0, %v10784_v0  ;;  %175 = vst.msk [vmem:[#allocation2 + $0x10] sm:$0xff] (!%p138_p2), %vm172_vm0, %v10784_v0  ;;  %9824 = vmatprep.subr.bf16.mxu1 (!%p138_p2), %v10731_v1  ;;  %9862 = vmatprep.subr.bf16.mxu0 (!%p138_p2), %v10967_v2  ;;  %v10733_v3 = vld [vmem:[%s14026_s1 + $0x20] sm:$0xff] (!%p138_p2)   ;;  %s10785_s26 = smov (!%p138_p2), 16   ;;  %vm598_vm1 = vcmask (!%p138_p2), 261120  }
   0x7   : > { %173 = vst.msk [vmem:[#allocation2] sm:$0xff] (!%p138_p2), %vm172_vm0, %v10784_v0  ;;  %176 = vst.msk [vmem:[#allocation2 + $0x18] sm:$0xff] (!%p138_p2), %vm172_vm0, %v10784_v0  ;;  %9825 = vmatpush3.bf16.msra.mxu1 (!%p138_p2), %v10731_v1  ;;  %9863 = vmatpush3.bf16.msra.mxu0 (!%p138_p2), %v10967_v2  ;;  %s10786_s27 = smov (!%p138_p2), 32   ;;  %vm982_vm2 = vcmask (!%p138_p2), 392192  }
   0x8   : > { %177 = vst.msk [vmem:[#allocation2 + $0x20] sm:$0xff] (!%p138_p2), %vm172_vm0, %v10784_v0  ;;  %178 = vst.msk [vmem:[#allocation2 + $0x28] sm:$0xff] (!%p138_p2), %vm172_vm0, %v10784_v0  ;;  %9826 = vmatprep.subr.bf16.mxu1 (!%p138_p2), %v10733_v3  ;;  %9864 = vmatprep.subr.bf16.mxu0 (!%p138_p2), %v10982_v4 }
   0x9   : > { %179 = vst.msk [vmem:[#allocation2 + $0x30] sm:$0xff] (!%p138_p2), %vm172_vm0, %v10784_v0  ;;  %180 = vst.msk [vmem:[#allocation2 + $0x38] sm:$0xff] (!%p138_p2), %vm172_vm0, %v10784_v0 }
   0xa   : > { %181 = vst.msk [vmem:[#allocation2 + $0x40] sm:$0xff] (!%p138_p2), %vm172_vm0, %v10784_v0  ;;  %182 = vst.msk [vmem:[#allocation2 + $0x48] sm:$0xff] (!%p138_p2), %vm172_vm0, %v10784_v0 }
   0xb   : > { %183 = vst.msk [vmem:[#allocation2 + $0x50] sm:$0xff] (!%p138_p2), %vm172_vm0, %v10784_v0  ;;  %184 = vst.msk [vmem:[#allocation2 + $0x58] sm:$0xff] (!%p138_p2), %vm172_vm0, %v10784_v0  ;;  %9827 = vmatpush3.bf16.msra.mxu1 (!%p138_p2), %v10733_v3  ;;  %9865 = vmatpush3.bf16.msra.mxu0 (!%p138_p2), %v10982_v4 }
   0xc   : > { %185 = vst.msk [vmem:[#allocation2 + $0x60] sm:$0xff] (!%p138_p2), %vm172_vm0, %v10784_v0  ;;  %186 = vst.msk [vmem:[#allocation2 + $0x68] sm:$0xff] (!%p138_p2), %vm172_vm0, %v10784_v0 }
   0xd   : > { %187 = vst.msk [vmem:[#allocation2 + $0x70] sm:$0xff] %vm172_vm0, %v10784_v0  ;;  %188 = vst.msk [vmem:[#allocation2 + $0x78] sm:$0xff] %vm172_vm0, %v10784_v0  ;;  %s14030_s13 = smov (!%p161_p3, %s9148_s13), 1  ;;  %v358_v8 = vld [vmem:[#allocation2 + $0x8] sm:$0xff]  ;;  %v359_v9 = vld [vmem:[#allocation2 + $0x10] sm:$0xff] }
   0xe   : > { %189 = vst.msk [vmem:[#allocation2 + $0x80] sm:$0xff] %vm172_vm0, %v10784_v0  ;;  %190 = vst.msk [vmem:[#allocation2 + $0x88] sm:$0xff] %vm172_vm0, %v10784_v0  ;;  %s9537_s20 = sshll.u32 %s14030_s13, 8  ;;  %v406_v10 = vld [vmem:[#allocation2 + $0x9] sm:$0xff]  ;;  %v390_v11 = vpack.c.bf16 %v359_v9, %v358_v8  ;;  %v407_v12 = vld [vmem:[#allocation2 + $0x11] sm:$0xff] }
   0xf   : > { %191 = vst.msk [vmem:[#allocation2 + $0x90] sm:$0xff] %vm172_vm0, %v10784_v0  ;;  %192 = vst.msk [vmem:[#allocation2 + $0x98] sm:$0xff] %vm172_vm0, %v10784_v0  ;;  %s10989_s25 = scalar_lea.vmem %s14025_s0, %s9537_s20  ;;  %v438_v15 = vpack.c.bf16 %v407_v12, %v406_v10  ;;  %s13895_s9 = scalar_lea.vmem %s14028_s3, %s9537_s20 }
  0x10   : > { %193 = vst.msk [vmem:[#allocation2 + $0xa0] sm:$0xff] %vm172_vm0, %v10784_v0  ;;  %194 = vst.msk [vmem:[#allocation2 + $0xa8] sm:$0xff] %vm172_vm0, %v10784_v0  ;;  %v245_v5 = vld [vmem:[%s10989_s25] sm:$0xff]  ;;  %v246_v6 = vld [vmem:[%s10989_s25 + $0x8] sm:$0xff]  ;;  %470 = vrot.lane.b32.xlu0 %v390_v11, %s10785_s26 }
  0x11   : > { %195 = vst.msk [vmem:[#allocation2 + $0xb0] sm:$0xff] %vm172_vm0, %v10784_v0  ;;  %196 = vst.msk [vmem:[#allocation2 + $0xb8] sm:$0xff] %vm172_vm0, %v10784_v0  ;;  %v247_v7 = vld [vmem:[%s10989_s25 + $0x10] sm:$0xff]  ;;  %v248_v13 = vld [vmem:[%s10989_s25 + $0x18] sm:$0xff]  ;;  %518 = vrot.lane.b32.xlu1 %v438_v15, %s10786_s27 }
  0x12   : > { %197 = vst.msk [vmem:[#allocation2 + $0xc0] sm:$0xff] %vm172_vm0, %v10784_v0  ;;  %198 = vst.msk [vmem:[#allocation2 + $0xc8] sm:$0xff] %vm172_vm0, %v10784_v0  ;;  %v249_v14 = vld [vmem:[%s10989_s25 + $0x20] sm:$0xff]  ;;  %v250_v16 = vld [vmem:[%s10989_s25 + $0x28] sm:$0xff] }
  0x13   : > { %199 = vst.msk [vmem:[#allocation2 + $0xd0] sm:$0xff] %vm172_vm0, %v10784_v0  ;;  %200 = vst.msk [vmem:[#allocation2 + $0xd8] sm:$0xff] %vm172_vm0, %v10784_v0  ;;  %v251_v17 = vld [vmem:[%s10989_s25 + $0x30] sm:$0xff]  ;;  %v252_v18 = vld [vmem:[%s10989_s25 + $0x38] sm:$0xff] }
  0x14   : > { %201 = vst.msk [vmem:[#allocation2 + $0xe0] sm:$0xff] %vm172_vm0, %v10784_v0  ;;  %202 = vst.msk [vmem:[#allocation2 + $0xe8] sm:$0xff] %vm172_vm0, %v10784_v0  ;;  %v253_v19 = vld [vmem:[%s10989_s25 + $0x40] sm:$0xff]  ;;  %v254_v20 = vld [vmem:[%s10989_s25 + $0x48] sm:$0xff] }
  0x15   : > { %203 = vst.msk [vmem:[#allocation2 + $0xf0] sm:$0xff] %vm172_vm0, %v10784_v0  ;;  %204 = vst.msk [vmem:[#allocation2 + $0xf8] sm:$0xff] %vm172_vm0, %v10784_v0  ;;  %v255_v21 = vld [vmem:[%s10989_s25 + $0x50] sm:$0xff]  ;;  %v256_v22 = vld [vmem:[%s10989_s25 + $0x58] sm:$0xff] }
  0x16   : > { %205 = vst.msk [vmem:[#allocation2 + $0x100] sm:$0xff] %vm172_vm0, %v10784_v0  ;;  %206 = vst.msk [vmem:[#allocation2 + $0x108] sm:$0xff] %vm172_vm0, %v10784_v0  ;;  %v257_v23 = vld [vmem:[%s10989_s25 + $0x60] sm:$0xff]  ;;  %v258_v24 = vld [vmem:[%s10989_s25 + $0x68] sm:$0xff] }
  0x17   : > { %207 = vst.msk [vmem:[#allocation2 + $0x110] sm:$0xff] %vm172_vm0, %v10784_v0  ;;  %208 = vst.msk [vmem:[#allocation2 + $0x118] sm:$0xff] %vm172_vm0, %v10784_v0  ;;  %v259_v25 = vld [vmem:[%s10989_s25 + $0x70] sm:$0xff]  ;;  %v260_v26 = vld [vmem:[%s10989_s25 + $0x78] sm:$0xff] }
  0x18   : > { %209 = vst.msk [vmem:[#allocation2 + $0x120] sm:$0xff] %vm172_vm0, %v10784_v0  ;;  %210 = vst.msk [vmem:[#allocation2 + $0x128] sm:$0xff] %vm172_vm0, %v10784_v0  ;;  %v261_v27 = vld [vmem:[%s10989_s25 + $0x80] sm:$0xff]  ;;  %v262_v28 = vld [vmem:[%s10989_s25 + $0x88] sm:$0xff] }
  0x19   : > { %211 = vst.msk [vmem:[#allocation2 + $0x130] sm:$0xff] %vm172_vm0, %v10784_v0  ;;  %212 = vst.msk [vmem:[#allocation2 + $0x138] sm:$0xff] %vm172_vm0, %v10784_v0  ;;  %v263_v29 = vld [vmem:[%s10989_s25 + $0x90] sm:$0xff]  ;;  %v264_v30 = vld [vmem:[%s10989_s25 + $0x98] sm:$0xff] }
  0x1a   : > { %213 = vst.msk [vmem:[#allocation2 + $0x140] sm:$0xff] %vm172_vm0, %v10784_v0  ;;  %214 = vst.msk [vmem:[#allocation2 + $0x148] sm:$0xff] %vm172_vm0, %v10784_v0  ;;  %v265_v37 = vld [vmem:[%s10989_s25 + $0xa0] sm:$0xff]  ;;  %v266_v47 = vld [vmem:[%s10989_s25 + $0xa8] sm:$0xff] }
  0x1b   : > { %215 = vst.msk [vmem:[#allocation2 + $0x150] sm:$0xff] %vm172_vm0, %v10784_v0  ;;  %216 = vst.msk [vmem:[#allocation2 + $0x158] sm:$0xff] %vm172_vm0, %v10784_v0  ;;  %v267_v51 = vld [vmem:[%s10989_s25 + $0xb0] sm:$0xff]  ;;  %v268_v52 = vld [vmem:[%s10989_s25 + $0xb8] sm:$0xff] }
  0x1c   : > { %217 = vst.msk [vmem:[#allocation2 + $0x160] sm:$0xff] %vm172_vm0, %v10784_v0  ;;  %218 = vst.msk [vmem:[#allocation2 + $0x168] sm:$0xff] %vm172_vm0, %v10784_v0  ;;  %v269_v54 = vld [vmem:[%s10989_s25 + $0xc0] sm:$0xff]  ;;  %v270_v55 = vld [vmem:[%s10989_s25 + $0xc8] sm:$0xff] }
  0x1d   : > { %219 = vst.msk [vmem:[#allocation2 + $0x170] sm:$0xff] %vm172_vm0, %v10784_v0  ;;  %220 = vst.msk [vmem:[#allocation2 + $0x178] sm:$0xff] %vm172_vm0, %v10784_v0  ;;  %v271_v56 = vld [vmem:[%s10989_s25 + $0xd0] sm:$0xff]  ;;  %v272_v57 = vld [vmem:[%s10989_s25 + $0xd8] sm:$0xff] }
  0x1e   : > { %221 = vst.msk [vmem:[#allocation2 + $0x180] sm:$0xff] %vm172_vm0, %v10784_v0  ;;  %222 = vst.msk [vmem:[#allocation2 + $0x188] sm:$0xff] %vm172_vm0, %v10784_v0  ;;  %v273_v58 = vld [vmem:[%s10989_s25 + $0xe0] sm:$0xff]  ;;  %v274_v59 = vld [vmem:[%s10989_s25 + $0xe8] sm:$0xff] }
  0x1f   : > { %223 = vst.msk [vmem:[#allocation2 + $0x190] sm:$0xff] %vm172_vm0, %v10784_v0  ;;  %224 = vst.msk [vmem:[#allocation2 + $0x198] sm:$0xff] %vm172_vm0, %v10784_v0  ;;  %v275_v60 = vld [vmem:[%s10989_s25 + $0xf0] sm:$0xff]  ;;  %v276_v61 = vld [vmem:[%s10989_s25 + $0xf8] sm:$0xff] }
  0x20   : > { %225 = vst.msk [vmem:[#allocation2 + $0x1a0] sm:$0xff] %vm172_vm0, %v10784_v0  ;;  %226 = vst.msk [vmem:[#allocation2 + $0x1a8] sm:$0xff] %vm172_vm0, %v10784_v0 }
  0x21   : > { %227 = vst.msk [vmem:[#allocation2 + $0x1b0] sm:$0xff] %vm172_vm0, %v10784_v0  ;;  %228 = vst.msk [vmem:[#allocation2 + $0x1b8] sm:$0xff] %vm172_vm0, %v10784_v0 }
  0x22   : > { %229 = vst.msk [vmem:[#allocation2 + $0x1c0] sm:$0xff] %vm172_vm0, %v10784_v0  ;;  %230 = vst.msk [vmem:[#allocation2 + $0x1c8] sm:$0xff] %vm172_vm0, %v10784_v0 }
  0x23   : > { %231 = vst.msk [vmem:[#allocation2 + $0x1d0] sm:$0xff] %vm172_vm0, %v10784_v0  ;;  %232 = vst.msk [vmem:[#allocation2 + $0x1d8] sm:$0xff] %vm172_vm0, %v10784_v0 }
  0x24   : > { %233 = vst.msk [vmem:[#allocation2 + $0x1e0] sm:$0xff] %vm172_vm0, %v10784_v0  ;;  %234 = vst.msk [vmem:[#allocation2 + $0x1e8] sm:$0xff] %vm172_vm0, %v10784_v0 }
  0x25   : > { %235 = vst.msk [vmem:[#allocation2 + $0x1f0] sm:$0xff] %vm172_vm0, %v10784_v0  ;;  %236 = vst.msk [vmem:[#allocation2 + $0x1f8] sm:$0xff] %vm172_vm0, %v10784_v0 }
  0x26   : > { %237 = vst.msk [vmem:[#allocation2 + $0x200] sm:$0xff] %vm172_vm0, %v10784_v0  ;;  %238 = vst.msk [vmem:[#allocation2 + $0x208] sm:$0xff] %vm172_vm0, %v10784_v0 }
  0x27   : > { %239 = vst.msk [vmem:[#allocation2 + $0x210] sm:$0xff] %vm172_vm0, %v10784_v0  ;;  %240 = vst.msk [vmem:[#allocation2 + $0x218] sm:$0xff] %vm172_vm0, %v10784_v0 }
  0x28   : > { %241 = vst.msk [vmem:[#allocation2 + $0x220] sm:$0xff] %vm172_vm0, %v10784_v0  ;;  %242 = vst.msk [vmem:[#allocation2 + $0x228] sm:$0xff] %vm172_vm0, %v10784_v0 }
  0x29   : > { %243 = vst.msk [vmem:[#allocation2 + $0x230] sm:$0xff] %vm172_vm0, %v10784_v0  ;;  %244 = vst.msk [vmem:[#allocation2 + $0x238] sm:$0xff] %vm172_vm0, %v10784_v0  ;;  %v10735_v0 = vld [vmem:[%s14026_s1 + $0x28] sm:$0xff]  }
  0x2a   : > { %278 = vst.msk [vmem:[#allocation2 + $0x28] sm:$0xff] %vm172_vm0, %v245_v5  ;;  %279 = vst.msk [vmem:[#allocation2 + $0x30] sm:$0xff] %vm172_vm0, %v246_v6  ;;  %v11091_v5 = vld [vmem:[%s14026_s1 + $0x10] sm:$0xff]   ;;  %9828 = vmatprep.subr.bf16.mxu1 %v10735_v0 }
  0x2b   : > { %280 = vst.msk [vmem:[#allocation2 + $0x48] sm:$0xff] %vm172_vm0, %v247_v7  ;;  %281 = vst.msk [vmem:[#allocation2 + $0x50] sm:$0xff] %vm172_vm0, %v248_v13  ;;  %9866 = vmatprep.subr.bf16.mxu0 %v11091_v5  ;;  %9829 = vmatpush3.bf16.msra.mxu1 %v10735_v0 }
  0x2c   : > { %282 = vst.msk [vmem:[#allocation2 + $0x68] sm:$0xff] %vm172_vm0, %v249_v14  ;;  %283 = vst.msk [vmem:[#allocation2 + $0x70] sm:$0xff] %vm172_vm0, %v250_v16  ;;  %9867 = vmatpush3.bf16.msra.mxu0 %v11091_v5  ;;  %10394 = vmatprep.subr.bf16.mxu1 %v10967_v2 }
  0x2d   : > { %284 = vst.msk [vmem:[#allocation2 + $0x88] sm:$0xff] %vm172_vm0, %v251_v17  ;;  %285 = vst.msk [vmem:[#allocation2 + $0x90] sm:$0xff] %vm172_vm0, %v252_v18 }
  0x2e   : > { %286 = vst.msk [vmem:[#allocation2 + $0xa8] sm:$0xff] %vm172_vm0, %v253_v19  ;;  %287 = vst.msk [vmem:[#allocation2 + $0xb0] sm:$0xff] %vm172_vm0, %v254_v20 }
  0x2f   : > { %288 = vst.msk [vmem:[#allocation2 + $0xc8] sm:$0xff] %vm172_vm0, %v255_v21  ;;  %289 = vst.msk [vmem:[#allocation2 + $0xd0] sm:$0xff] %vm172_vm0, %v256_v22 }
  0x30   : > { %290 = vst.msk [vmem:[#allocation2 + $0xe8] sm:$0xff] %vm172_vm0, %v257_v23  ;;  %291 = vst.msk [vmem:[#allocation2 + $0xf0] sm:$0xff] %vm172_vm0, %v258_v24 }
  0x31   : > { %292 = vst.msk [vmem:[#allocation2 + $0x108] sm:$0xff] %vm172_vm0, %v259_v25  ;;  %293 = vst.msk [vmem:[#allocation2 + $0x110] sm:$0xff] %vm172_vm0, %v260_v26  ;;  %v685_v31 = vld [vmem:[#allocation2 + $0x28] sm:$0xff]  ;;  %v686_v32 = vld [vmem:[#allocation2 + $0x30] sm:$0xff] }
  0x32   : > { %294 = vst.msk [vmem:[#allocation2 + $0x128] sm:$0xff] %vm172_vm0, %v261_v27  ;;  %v687_v33 = vld [vmem:[#allocation2 + $0x48] sm:$0xff]  ;;  %295 = vst.msk [vmem:[#allocation2 + $0x130] sm:$0xff] %vm172_vm0, %v262_v28  ;;  %v717_v34 = vpack.c.bf16 %v686_v32, %v685_v31  ;;  %v734_v36 = vld [vmem:[#allocation2 + $0x31] sm:$0xff] }
  0x33   : > { %296 = vst.msk [vmem:[#allocation2 + $0x148] sm:$0xff] %vm172_vm0, %v263_v29  ;;  %297 = vst.msk [vmem:[#allocation2 + $0x150] sm:$0xff] %vm172_vm0, %v264_v30  ;;  %v733_v35 = vld [vmem:[#allocation2 + $0x29] sm:$0xff]  ;;  %v736_v42 = vld [vmem:[#allocation2 + $0x51] sm:$0xff] }
  0x34   : > { %v688_v38 = vld [vmem:[#allocation2 + $0x50] sm:$0xff]  ;;  %298 = vst.msk [vmem:[#allocation2 + $0x168] sm:$0xff] %vm172_vm0, %v265_v37  ;;  %797 = vrot.lane.b32.xlu0 %v717_v34, %s10785_s26  ;;  %472 = vrot.lane.b32.xlu1 %v717_v34, %s10785_s26  ;;  %v765_v40 = vpack.c.bf16 %v734_v36, %v733_v35  ;;  %v689_v44 = vld [vmem:[#allocation2 + $0x68] sm:$0xff]  ;;  %299 = vst.msk [vmem:[#allocation2 + $0x170] sm:$0xff] %vm172_vm0, %v266_v47 }
  0x35   : > { %v11039_v39 = vpack.c.bf16 %v688_v38, %v687_v33  ;;  %v735_v41 = vld [vmem:[#allocation2 + $0x49] sm:$0xff]  ;;  %v738_v53 = vld [vmem:[#allocation2 + $0x71] sm:$0xff]  ;;  %300 = vst.msk [vmem:[#allocation2 + $0x188] sm:$0xff] %vm172_vm0, %v267_v51  ;;  %301 = vst.msk [vmem:[#allocation2 + $0x190] sm:$0xff] %vm172_vm0, %v268_v52 }
  0x36   : > { %v11044_v43 = vpack.c.bf16 %v736_v42, %v735_v41  ;;  %v690_v45 = vld [vmem:[#allocation2 + $0x70] sm:$0xff]  ;;  %v691_v48 = vld [vmem:[#allocation2 + $0x88] sm:$0xff]  ;;  %302 = vst.msk [vmem:[#allocation2 + $0x1a8] sm:$0xff] %vm172_vm0, %v269_v54  ;;  %303 = vst.msk [vmem:[#allocation2 + $0x1b0] sm:$0xff] %vm172_vm0, %v270_v55 }
  0x37   : > { %v11049_v46 = vpack.c.bf16 %v690_v45, %v689_v44  ;;  %v692_v49 = vld [vmem:[#allocation2 + $0x90] sm:$0xff]  ;;  %304 = vst.msk [vmem:[#allocation2 + $0x1c8] sm:$0xff] %vm172_vm0, %v271_v56  ;;  %305 = vst.msk [vmem:[#allocation2 + $0x1d0] sm:$0xff] %vm172_vm0, %v272_v57  ;;  %v693_v7 = vld [vmem:[#allocation2 + $0xa8] sm:$0xff] }
  0x38   : > { %799 = vrot.lane.b32.xlu0 %v11039_v39, %s10785_s26  ;;  %845 = vrot.lane.b32.xlu1 %v765_v40, %s10786_s27  ;;  %v737_v50 = vld [vmem:[#allocation2 + $0x69] sm:$0xff]  ;;  %306 = vst.msk [vmem:[#allocation2 + $0x1e8] sm:$0xff] %vm172_vm0, %v273_v58  ;;  %307 = vst.msk [vmem:[#allocation2 + $0x1f0] sm:$0xff] %vm172_vm0, %v274_v59  ;;  %v11080_v62 = vpack.c.bf16 %v692_v49, %v691_v48  ;;  %v740_v3 = vld [vmem:[#allocation2 + $0x91] sm:$0xff] }
  0x39   : > { %308 = vst.msk [vmem:[#allocation2 + $0x208] sm:$0xff] %vm172_vm0, %v275_v60  ;;  %v11082_v63 = vpack.c.bf16 %v738_v53, %v737_v50  ;;  %309 = vst.msk [vmem:[#allocation2 + $0x210] sm:$0xff] %vm172_vm0, %v276_v61  ;;  %v739_v1 = vld [vmem:[#allocation2 + $0x89] sm:$0xff]  ;;  %v742_v13 = vld [vmem:[#allocation2 + $0xb1] sm:$0xff] }
  0x3a   : > { %v11098_v6 = vpack.c.bf16 %v740_v3, %v739_v1  ;;  %v694_v8 = vld [vmem:[#allocation2 + $0xb0] sm:$0xff]  ;;  %v695_v10 = vld [vmem:[#allocation2 + $0xc8] sm:$0xff] }
  0x3b   : > { %v11106_v9 = vpack.c.bf16 %v694_v8, %v693_v7  ;;  %v696_v11 = vld [vmem:[#allocation2 + $0xd0] sm:$0xff]  ;;  %v697_v19 = vld [vmem:[#allocation2 + $0xe8] sm:$0xff] }
  0x3c   : > { %520 = vrot.lane.b32.xlu0 %v765_v40, %s10786_s27  ;;  %847 = vrot.lane.b32.xlu1 %v11044_v43, %s10786_s27  ;;  %v741_v12 = vld [vmem:[#allocation2 + $0xa9] sm:$0xff]  ;;  %v11116_v15 = vpack.c.bf16 %v696_v11, %v695_v10  ;;  %v744_v17 = vld [vmem:[#allocation2 + $0xd1] sm:$0xff] }
  0x3d   : > { %v743_v14 = vld [vmem:[#allocation2 + $0xc9] sm:$0xff]  ;;  %v11118_v16 = vpack.c.bf16 %v742_v13, %v741_v12  ;;  %v746_v25 = vld [vmem:[#allocation2 + $0xf1] sm:$0xff] }
  0x3e   : > { %v11124_v18 = vpack.c.bf16 %v744_v17, %v743_v14  ;;  %v698_v20 = vld [vmem:[#allocation2 + $0xf0] sm:$0xff]  ;;  %v699_v22 = vld [vmem:[#allocation2 + $0x108] sm:$0xff] }
  0x3f   : > { %v11130_v21 = vpack.c.bf16 %v698_v20, %v697_v19  ;;  %v700_v23 = vld [vmem:[#allocation2 + $0x110] sm:$0xff]  ;;  %v701_v31 = vld [vmem:[#allocation2 + $0x128] sm:$0xff] }
  0x40   : > { %474 = vrot.lane.b32.xlu0 %v11039_v39, %s10785_s26  ;;  %801 = vrot.lane.b32.xlu1 %v11049_v46, %s10785_s26  ;;  %v745_v24 = vld [vmem:[#allocation2 + $0xe9] sm:$0xff]  ;;  %v11145_v27 = vpack.c.bf16 %v700_v23, %v699_v22  ;;  %v748_v30 = vld [vmem:[#allocation2 + $0x111] sm:$0xff] }
  0x41   : > { %v11139_v26 = vld [vmem:[%s14026_s1 + $0x30] sm:$0xff]   ;;  %v11147_v28 = vpack.c.bf16 %v746_v25, %v745_v24  ;;  %v703_v34 = vld [vmem:[#allocation2 + $0x148] sm:$0xff] }
  0x42   : > { %v747_v29 = vld [vmem:[#allocation2 + $0x109] sm:$0xff]  ;;  %9900 = vmatprep.subr.bf16.mxu0 %v11139_v26  ;;  %v750_v38 = vld [vmem:[#allocation2 + $0x131] sm:$0xff] }
  0x43   : > { %v11154_v32 = vpack.c.bf16 %v748_v30, %v747_v29  ;;  %v702_v33 = vld [vmem:[#allocation2 + $0x130] sm:$0xff]  ;;  %v707_v50 = vld [vmem:[#allocation2 + $0x188] sm:$0xff] }
  0x44   : > { %476 = vrot.lane.b32.xlu0 %v11049_v46, %s10785_s26  ;;  %522 = vrot.lane.b32.xlu1 %v11044_v43, %s10786_s27  ;;  %v704_v35 = vld [vmem:[#allocation2 + $0x150] sm:$0xff]  ;;  %v11160_v37 = vpack.c.bf16 %v702_v33, %v701_v31  ;;  %v709_v56 = vld [vmem:[#allocation2 + $0x1a8] sm:$0xff] }
  0x45   : > { %v749_v36 = vld [vmem:[#allocation2 + $0x129] sm:$0xff]  ;;  %v11166_v40 = vpack.c.bf16 %v704_v35, %v703_v34  ;;  %v752_v44 = vld [vmem:[#allocation2 + $0x151] sm:$0xff] }
  0x46   : > { %v11168_v41 = vpack.c.bf16 %v750_v38, %v749_v36  ;;  %v751_v42 = vld [vmem:[#allocation2 + $0x149] sm:$0xff]  ;;  %v754_v52 = vld [vmem:[#allocation2 + $0x171] sm:$0xff] }
  0x47   : > { %v11178_v45 = vpack.c.bf16 %v752_v44, %v751_v42  ;;  %v706_v47 = vld [vmem:[#allocation2 + $0x170] sm:$0xff]  ;;  %v711_v59 = vld [vmem:[#allocation2 + $0x1c8] sm:$0xff] }
  0x48   : > { %803 = vrot.lane.b32.xlu0 %v11080_v62, %s10785_s26  ;;  %849 = vrot.lane.b32.xlu1 %v11082_v63, %s10786_s27  ;;  %v753_v49 = vld [vmem:[#allocation2 + $0x169] sm:$0xff]  ;;  %v756_v54 = vld [vmem:[#allocation2 + $0x191] sm:$0xff] }
  0x49   : > { %v708_v51 = vld [vmem:[#allocation2 + $0x190] sm:$0xff]  ;;  %v310_v7 = vld [vmem:[#allocation2 + $0x7] sm:$0xff] }
  0x4a   : > { %v755_v53 = vld [vmem:[#allocation2 + $0x189] sm:$0xff]  ;;  %v760_v3 = vld [vmem:[#allocation2 + $0x1d1] sm:$0xff] }
  0x4b   : > { %v11202_v55 = vpack.c.bf16 %v756_v54, %v755_v53  ;;  %v710_v57 = vld [vmem:[#allocation2 + $0x1b0] sm:$0xff]  ;;  %v713_v8 = vld [vmem:[#allocation2 + $0x1e8] sm:$0xff]  ;;  %v10738_v54 = vld [vmem:[%s14026_s1 + $0x38] sm:$0xff]  }
  0x4c   : > { %524 = vrot.lane.b32.xlu0 %v11082_v63, %s10786_s27  ;;  %851 = vrot.lane.b32.xlu1 %v11098_v6, %s10786_s27  ;;  %v11208_v58 = vpack.c.bf16 %v710_v57, %v709_v56  ;;  %v712_v60 = vld [vmem:[#allocation2 + $0x1d0] sm:$0xff]  ;;  %v715_v13 = vld [vmem:[#allocation2 + $0x208] sm:$0xff] }
  0x4d   : > { %v757_v61 = vld [vmem:[#allocation2 + $0x1a9] sm:$0xff] }
  0x4e   : > { %v759_v1 = vld [vmem:[#allocation2 + $0x1c9] sm:$0xff] }
  0x4f   : > { %v311_v10 = vld [vmem:[#allocation2 + $0xf] sm:$0xff]  ;;  %v637_v23 = vld [vmem:[#allocation2 + $0x27] sm:$0xff] }
  0x50   : > { %478 = vrot.lane.b32.xlu0 %v11080_v62, %s10785_s26  ;;  %805 = vrot.lane.b32.xlu1 %v11106_v9, %s10785_s26  ;;  %v342_v12 = vpack.c.bf16 %v311_v10, %v310_v7  ;;  %v716_v14 = vld [vmem:[#allocation2 + $0x210] sm:$0xff]  ;;  %v639_v33 = vld [vmem:[#allocation2 + $0x47] sm:$0xff] }
  0x51   : > { %v11239_v20 = vpack.c.bf16 %v716_v14, %v715_v13  ;;  %v638_v24 = vld [vmem:[#allocation2 + $0x2f] sm:$0xff] }
  0x52   : > { %v763_v25 = vld [vmem:[#allocation2 + $0x209] sm:$0xff]  ;;  %v669_v30 = vpack.c.bf16 %v638_v24, %v637_v23 }
  0x53   : > { %v640_v34 = vld [vmem:[#allocation2 + $0x4f] sm:$0xff] }
  0x54   : > { %480 = vrot.lane.b32.xlu0 %v11106_v9, %s10785_s26  ;;  %526 = vrot.lane.b32.xlu1 %v11098_v6, %s10786_s27  ;;  %v11256_v38 = vpack.c.bf16 %v640_v34, %v639_v33  ;;  %v644_v7 = vld [vmem:[#allocation2 + $0x8f] sm:$0xff] }
  0x58   : > { %807 = vrot.lane.b32.xlu0 %v11116_v15, %s10785_s26  ;;  %853 = vrot.lane.b32.xlu1 %v11118_v16, %s10786_s27 }
  0x5c   : > { %528 = vrot.lane.b32.xlu0 %v11118_v16, %s10786_s27  ;;  %855 = vrot.lane.b32.xlu1 %v11124_v18, %s10786_s27 }
  0x60   : > { %482 = vrot.lane.b32.xlu0 %v11116_v15, %s10785_s26  ;;  %809 = vrot.lane.b32.xlu1 %v11130_v21, %s10785_s26 }
  0x64   : > { %484 = vrot.lane.b32.xlu0 %v11130_v21, %s10785_s26  ;;  %530 = vrot.lane.b32.xlu1 %v11124_v18, %s10786_s27 }
  0x68   : > { %811 = vrot.lane.b32.xlu0 %v11145_v27, %s10785_s26  ;;  %857 = vrot.lane.b32.xlu1 %v11147_v28, %s10786_s27 }
  0x6c   : > { %532 = vrot.lane.b32.xlu0 %v11147_v28, %s10786_s27  ;;  %859 = vrot.lane.b32.xlu1 %v11154_v32, %s10786_s27 }
  0x70   : > { %813 = vrot.lane.b32.xlu0 %v11160_v37, %s10785_s26  ;;  %1548 = vrot.lane.b32.xlu1 %v11039_v39, %s10785_s26  ;;  %v705_v39 = vld [vmem:[#allocation2 + $0x168] sm:$0xff] }
  0x71   : > { %v11184_v48 = vpack.c.bf16 %v706_v47, %v705_v39 }
  0x74   : > { %815 = vrot.lane.b32.xlu0 %v11166_v40, %s10785_s26  ;;  %861 = vrot.lane.b32.xlu1 %v11168_v41, %s10786_s27 }
  0x78   : > { %1550 = vrot.lane.b32.xlu0 %v11049_v46, %s10785_s26  ;;  %1596 = vrot.lane.b32.xlu1 %v11044_v43, %s10786_s27  ;;  %v11190_v43 = vpack.c.bf16 %v708_v51, %v707_v50  ;;  %v11192_v46 = vpack.c.bf16 %v754_v52, %v753_v49 }
  0x7c   : > { %863 = vrot.lane.b32.xlu0 %v11178_v45, %s10786_s27  ;;  %1598 = vrot.lane.b32.xlu1 %v11082_v63, %s10786_s27  ;;  %v11214_v63 = vpack.c.bf16 %v712_v60, %v711_v59  ;;  %v641_v59 = vld [vmem:[#allocation2 + $0x67] sm:$0xff]  ;;  %v642_v60 = vld [vmem:[#allocation2 + $0x6f] sm:$0xff] }
  0x80   : > { %817 = vrot.lane.b32.xlu0 %v11184_v48, %s10785_s26  ;;  %1552 = vrot.lane.b32.xlu1 %v11080_v62, %s10785_s26  ;;  %v758_v62 = vld [vmem:[#allocation2 + $0x1b1] sm:$0xff] }
  0x81   : > { %v11216_v0 = vpack.c.bf16 %v758_v62, %v757_v61  ;;  %v11290_v61 = vpack.c.bf16 %v642_v60, %v641_v59 }
  0x82   : > { %v471_v17 = vpop.permute.xlu0 %470 }
  0x83   : > { %v519_v19 = vpop.permute.xlu1 %518 }
  0x84   : > { %819 = vrot.lane.b32.xlu0 %v11190_v43, %s10785_s26  ;;  %865 = vrot.lane.b32.xlu1 %v11192_v46, %s10786_s27 }
  0x88   : > { %1554 = vrot.lane.b32.xlu0 %v11106_v9, %s10785_s26  ;;  %1600 = vrot.lane.b32.xlu1 %v11098_v6, %s10786_s27  ;;  %v11226_v6 = vpack.c.bf16 %v760_v3, %v759_v1  ;;  %v714_v9 = vld [vmem:[#allocation2 + $0x1f0] sm:$0xff]  ;;  %v643_v3 = vld [vmem:[#allocation2 + $0x87] sm:$0xff] }
  0x89   : > { %v11232_v11 = vpack.c.bf16 %v714_v9, %v713_v8 }
  0x8c   : > { %867 = vrot.lane.b32.xlu0 %v11202_v55, %s10786_s27  ;;  %1602 = vrot.lane.b32.xlu1 %v11118_v16, %s10786_s27  ;;  %v762_v16 = vld [vmem:[#allocation2 + $0x1f1] sm:$0xff] }
  0x90   : > { %821 = vrot.lane.b32.xlu0 %v11208_v58, %s10785_s26  ;;  %1556 = vrot.lane.b32.xlu1 %v11116_v15, %s10785_s26  ;;  %v761_v15 = vld [vmem:[#allocation2 + $0x1e9] sm:$0xff] }
  0x94   : > { %823 = vrot.lane.b32.xlu0 %v11214_v63, %s10785_s26  ;;  %869 = vrot.lane.b32.xlu1 %v11216_v0, %s10786_s27 }
  0x98   : > { %1558 = vrot.lane.b32.xlu0 %v11130_v21, %s10785_s26  ;;  %1604 = vrot.lane.b32.xlu1 %v11124_v18, %s10786_s27  ;;  %v552_v18 = vsel %vm172_vm0, %v342_v12, %v471_v17  ;;  %v11241_v21 = vpack.c.bf16 %v762_v16, %v761_v15  ;;  %v645_v17 = vld [vmem:[#allocation2 + $0xa7] sm:$0xff] }
  0x99   : > { %v600_v22 = vsel %vm598_vm1, %v552_v18, %v519_v19  ;;  %v646_v18 = vld [vmem:[#allocation2 + $0xaf] sm:$0xff] }
  0x9a   : > { %9868 = vmatprep.mubr.msk.bf16.mxu0 %vm982_vm2, %v600_v22  ;;  %v11329_v19 = vpack.c.bf16 %v646_v18, %v645_v17 }
  0x9c   : > { %871 = vrot.lane.b32.xlu0 %v11226_v6, %s10786_s27  ;;  %1606 = vrot.lane.b32.xlu1 %v11147_v28, %s10786_s27  ;;  %v764_v28 = vld [vmem:[#allocation2 + $0x211] sm:$0xff] }
  0x9d   : > { %v11253_v35 = vpack.c.bf16 %v764_v28, %v763_v25  ;;  %v647_v25 = vld [vmem:[#allocation2 + $0xc7] sm:$0xff]  ;;  %v648_v28 = vld [vmem:[#allocation2 + $0xcf] sm:$0xff] }
  0xa0   : > { %825 = vrot.lane.b32.xlu0 %v11232_v11, %s10785_s26  ;;  %1560 = vrot.lane.b32.xlu1 %v11145_v27, %s10785_s26 }
  0xa4   : > { %827 = vrot.lane.b32.xlu0 %v11239_v20, %s10785_s26  ;;  %873 = vrot.lane.b32.xlu1 %v11241_v21, %s10786_s27 }
  0xa6   : > { %v798_v29 = vpop.permute.xlu0 %797  ;;  %v473_v31 = vpop.permute.xlu1 %472 }
  0xa7   : > { %v879_v36 = vsel %vm172_vm0, %v669_v30, %v798_v29  ;;  %v555_v47 = vsel %vm172_vm0, %v669_v30, %v473_v31 }
  0xa8   : > { %1562 = vrot.lane.b32.xlu0 %v11160_v37, %s10785_s26  ;;  %1608 = vrot.lane.b32.xlu1 %v11154_v32, %s10786_s27 }
  0xaa   : > { %v800_v42 = vpop.permute.xlu0 %799  ;;  %v846_v44 = vpop.permute.xlu1 %845 }
  0xab   : > { %v926_v39 = vsel %vm598_vm1, %v879_v36, %v846_v44  ;;  %v882_v49 = vsel %vm172_vm0, %v11256_v38, %v800_v42 }
  0xac   : > { %875 = vrot.lane.b32.xlu0 %v11253_v35, %s10786_s27  ;;  %1610 = vrot.lane.b32.xlu1 %v11168_v41, %s10786_s27 }
  0xad   : > { %9830 = vmatprep.mubr.msk.bf16.mxu1 %vm982_vm2, %v926_v39 }
  0xae   : > { %v521_v50 = vpop.permute.xlu0 %520  ;;  %v848_v51 = vpop.permute.xlu1 %847 }
  0xaf   : > { %v602_v52 = vsel %vm598_vm1, %v555_v47, %v521_v50  ;;  %v928_v53 = vsel %vm598_vm1, %v882_v49, %v848_v51  ;;  %v649_v49 = vld [vmem:[#allocation2 + $0xe7] sm:$0xff]  ;;  %v650_v50 = vld [vmem:[#allocation2 + $0xef] sm:$0xff] }
  0xb0   : > { %486 = vrot.lane.b32.xlu0 %v11145_v27, %s10785_s26  ;;  %1564 = vrot.lane.b32.xlu1 %v11166_v40, %s10785_s26  ;;  %v10739_v27 = vld [vmem:[%s14026_s1 + $0x40] sm:$0xff]   ;;  %v11365_v51 = vpack.c.bf16 %v650_v50, %v649_v49 }
  0xb1   : > { %9831 = vmatmul.mubr.msk.bf16.vlgmr.msra.gmra.mrb[0].mxu1 %vm982_vm2, %v928_v53  ;;  %9869 = vmatmul.mubr.msk.bf16.vlgmr.msra.gmra.mrb[0].mxu0 %vm982_vm2, %v602_v52 }
  0xb2   : > { %v475_v56 = vpop.permute.xlu0 %474  ;;  %v802_v57 = vpop.permute.xlu1 %801  ;;  %9901 = vmatpush3.bf16.msra.mxu0 %v11139_v26  ;;  %10397 = vmatpush3.bf16.msra.mxu1 %v10967_v2 }
  0xb3   : > { %9902 = vmatprep.subr.bf16.mxu0 %v10738_v54  ;;  %10395 = vmatprep.subr.bf16.mxu1 %v10982_v4  ;;  %v558_v26 = vsel %vm172_vm0, %v11256_v38, %v475_v56  ;;  %v651_v56 = vld [vmem:[#allocation2 + $0x107] sm:$0xff] }
  0xb4   : > { %488 = vrot.lane.b32.xlu0 %v11160_v37, %s10785_s26  ;;  %534 = vrot.lane.b32.xlu1 %v11154_v32, %s10786_s27  ;;  %v885_v32 = vsel %vm172_vm0, %v11290_v61, %v802_v57  ;;  %v11302_v37 = vpack.c.bf16 %v644_v7, %v643_v3  ;;  %v652_v57 = vld [vmem:[#allocation2 + $0x10f] sm:$0xff] }
  0xb6   : > { %v477_v2 = vpop.permute.xlu0 %476  ;;  %v523_v62 = vpop.permute.xlu1 %522  ;;  %9903 = vmatpush3.bf16.msra.mxu0 %v10738_v54  ;;  %10398 = vmatpush3.bf16.msra.mxu1 %v10982_v4 }
  0xb7   : > { %v604_v1 = vsel %vm598_vm1, %v558_v26, %v523_v62  ;;  %9904 = vmatprep.subr.bf16.mxu0 %v10739_v27  ;;  %10396 = vmatprep.subr.bf16.mxu1 %v11091_v5  ;;  %v561_v10 = vsel %vm172_vm0, %v11290_v61, %v477_v2 }
  0xb8   : > { %1566 = vrot.lane.b32.xlu0 %v11184_v48, %s10785_s26  ;;  %1612 = vrot.lane.b32.xlu1 %v11178_v45, %s10786_s27 }
  0xb9   : > { %9872 = vmatprep.mubr.msk.bf16.mxu0 %vm982_vm2, %v604_v1 }
  0xba   : > { %v804_v4 = vpop.permute.xlu0 %803  ;;  %v850_v8 = vpop.permute.xlu1 %849  ;;  %9905 = vmatpush3.bf16.msra.mxu0 %v10739_v27  ;;  %10399 = vmatpush3.bf16.msra.mxu1 %v11091_v5 }
  0xbb   : > { %v930_v9 = vsel %vm598_vm1, %v885_v32, %v850_v8  ;;  %v888_v12 = vsel %vm172_vm0, %v11302_v37, %v804_v4  ;;  %v653_v32 = vld [vmem:[#allocation2 + $0x127] sm:$0xff]  ;;  %v654_v4 = vld [vmem:[#allocation2 + $0x12f] sm:$0xff] }
  0xbc   : > { %536 = vrot.lane.b32.xlu0 %v11168_v41, %s10786_s27  ;;  %1614 = vrot.lane.b32.xlu1 %v11192_v46, %s10786_s27  ;;  %v1467_v8 = vld [vmem:[#allocation2 + $0x230] sm:$0xff] }
  0xbd   : > { %9834 = vmatprep.mubr.msk.bf16.mxu1 %vm982_vm2, %v930_v9  ;;  %v11395_v9 = vpack.c.bf16 %v654_v4, %v653_v32 }
  0xbe   : > { %v525_v13 = vpop.permute.xlu0 %524  ;;  %v852_v14 = vpop.permute.xlu1 %851 }
  0xbf   : > { %v606_v5 = vsel %vm598_vm1, %v561_v10, %v525_v13  ;;  %v932_v15 = vsel %vm598_vm1, %v888_v12, %v852_v14  ;;  %v1514_v13 = vld [vmem:[#allocation2 + $0x229] sm:$0xff]  ;;  %v1515_v14 = vld [vmem:[#allocation2 + $0x231] sm:$0xff] }
  0xc0   : > { %490 = vrot.lane.b32.xlu0 %v11166_v40, %s10785_s26  ;;  %1568 = vrot.lane.b32.xlu1 %v11190_v43, %s10785_s26 }
  0xc1   : > { %9835 = vmatmul.mubr.msk.bf16.gmra.mrb[4].mxu1 %vm982_vm2, %v932_v15  ;;  %9873 = vmatmul.mubr.msk.bf16.gmra.mrb[4].mxu0 %vm982_vm2, %v606_v5 }
  0xc2   : > { %v479_v41 = vpop.permute.xlu0 %478  ;;  %v806_v16 = vpop.permute.xlu1 %805 }
  0xc3   : > { %v564_v40 = vsel %vm172_vm0, %v11302_v37, %v479_v41  ;;  %v655_v41 = vld [vmem:[#allocation2 + $0x147] sm:$0xff] }
  0xc4   : > { %492 = vrot.lane.b32.xlu0 %v11184_v48, %s10785_s26  ;;  %538 = vrot.lane.b32.xlu1 %v11178_v45, %s10786_s27  ;;  %v891_v45 = vsel %vm172_vm0, %v11329_v19, %v806_v16  ;;  %v11339_v48 = vpack.c.bf16 %v648_v28, %v647_v25  ;;  %v656_v16 = vld [vmem:[#allocation2 + $0x14f] sm:$0xff] }
  0xc5   : > { %v11410_v18 = vpack.c.bf16 %v656_v16, %v655_v41 }
  0xc6   : > { %v481_v22 = vpop.permute.xlu0 %480  ;;  %v527_v23 = vpop.permute.xlu1 %526 }
  0xc7   : > { %v608_v24 = vsel %vm598_vm1, %v564_v40, %v527_v23  ;;  %v567_v33 = vsel %vm172_vm0, %v11329_v19, %v481_v22 }
  0xc8   : > { %1570 = vrot.lane.b32.xlu0 %v11208_v58, %s10785_s26  ;;  %1616 = vrot.lane.b32.xlu1 %v11202_v55, %s10786_s27 }
  0xc9   : > { %9876 = vmatprep.mubr.msk.bf16.mxu0 %vm982_vm2, %v608_v24 }
  0xca   : > { %v808_v29 = vpop.permute.xlu0 %807  ;;  %v854_v30 = vpop.permute.xlu1 %853 }
  0xcb   : > { %v934_v31 = vsel %vm598_vm1, %v891_v45, %v854_v30  ;;  %v894_v34 = vsel %vm172_vm0, %v11339_v48, %v808_v29  ;;  %v657_v29 = vld [vmem:[#allocation2 + $0x167] sm:$0xff]  ;;  %v658_v30 = vld [vmem:[#allocation2 + $0x16f] sm:$0xff] }
  0xcc   : > { %540 = vrot.lane.b32.xlu0 %v11192_v46, %s10786_s27  ;;  %1618 = vrot.lane.b32.xlu1 %v11216_v0, %s10786_s27 }
  0xcd   : > { %9838 = vmatprep.mubr.msk.bf16.mxu1 %vm982_vm2, %v934_v31 }
  0xce   : > { %v529_v36 = vpop.permute.xlu0 %528  ;;  %v856_v42 = vpop.permute.xlu1 %855 }
  0xcf   : > { %v610_v44 = vsel %vm598_vm1, %v567_v33, %v529_v36  ;;  %v936_v39 = vsel %vm598_vm1, %v894_v34, %v856_v42  ;;  %v659_v42 = vld [vmem:[#allocation2 + $0x187] sm:$0xff] }
  0xd0   : > { %494 = vrot.lane.b32.xlu0 %v11190_v43, %s10785_s26  ;;  %1572 = vrot.lane.b32.xlu1 %v11214_v63, %s10785_s26 }
  0xd1   : > { %9839 = vmatmul.mubr.msk.bf16.gmra.mrb[8].mxu1 %vm982_vm2, %v936_v39  ;;  %9877 = vmatmul.mubr.msk.bf16.gmra.mrb[8].mxu0 %vm982_vm2, %v610_v44  ;;  %v660_v44 = vld [vmem:[#allocation2 + $0x18f] sm:$0xff] }
  0xd2   : > { %v483_v46 = vpop.permute.xlu0 %482  ;;  %v810_v47 = vpop.permute.xlu1 %809 }
  0xd3   : > { %v570_v43 = vsel %vm172_vm0, %v11339_v48, %v483_v46 }
  0xd4   : > { %496 = vrot.lane.b32.xlu0 %v11208_v58, %s10785_s26  ;;  %542 = vrot.lane.b32.xlu1 %v11202_v55, %s10786_s27  ;;  %v897_v55 = vsel %vm172_vm0, %v11365_v51, %v810_v47  ;;  %v11375_v58 = vpack.c.bf16 %v652_v57, %v651_v56  ;;  %v11433_v47 = vpack.c.bf16 %v660_v44, %v659_v42 }
  0xd6   : > { %v485_v52 = vpop.permute.xlu0 %484  ;;  %v531_v53 = vpop.permute.xlu1 %530 }
  0xd7   : > { %v612_v54 = vsel %vm598_vm1, %v570_v43, %v531_v53  ;;  %v573_v26 = vsel %vm172_vm0, %v11365_v51, %v485_v52 }
  0xd8   : > { %1574 = vrot.lane.b32.xlu0 %v11232_v11, %s10785_s26  ;;  %1620 = vrot.lane.b32.xlu1 %v11226_v6, %s10786_s27 }
  0xd9   : > { %9880 = vmatprep.mubr.msk.bf16.mxu0 %vm982_vm2, %v612_v54 }
  0xda   : > { %v812_v59 = vpop.permute.xlu0 %811  ;;  %v858_v60 = vpop.permute.xlu1 %857 }
  0xdb   : > { %v938_v27 = vsel %vm598_vm1, %v897_v55, %v858_v60  ;;  %v900_v2 = vsel %vm172_vm0, %v11375_v58, %v812_v59  ;;  %v661_v55 = vld [vmem:[#allocation2 + $0x1a7] sm:$0xff]  ;;  %v662_v59 = vld [vmem:[#allocation2 + $0x1af] sm:$0xff] }
  0xdc   : > { %544 = vrot.lane.b32.xlu0 %v11216_v0, %s10786_s27  ;;  %1622 = vrot.lane.b32.xlu1 %v11241_v21, %s10786_s27  ;;  %v1466_v0 = vld [vmem:[#allocation2 + $0x228] sm:$0xff]  ;;  %v11445_v60 = vpack.c.bf16 %v662_v59, %v661_v55 }
  0xdd   : > { %9842 = vmatprep.mubr.msk.bf16.mxu1 %vm982_vm2, %v938_v27 }
  0xde   : > { %v533_v62 = vpop.permute.xlu0 %532  ;;  %v860_v1 = vpop.permute.xlu1 %859 }
  0xdf   : > { %v614_v3 = vsel %vm598_vm1, %v573_v26, %v533_v62  ;;  %v940_v7 = vsel %vm598_vm1, %v900_v2, %v860_v1  ;;  %v663_v1 = vld [vmem:[#allocation2 + $0x1c7] sm:$0xff] }
  0xe0   : > { %498 = vrot.lane.b32.xlu0 %v11214_v63, %s10785_s26  ;;  %1576 = vrot.lane.b32.xlu1 %v11239_v20, %s10785_s26  ;;  %v1483_v63 = vpack.c.bf16 %v1467_v8, %v1466_v0 }
  0xe1   : > { %9843 = vmatmul.mubr.msk.bf16.gmra.mrb[12].mxu1 %vm982_vm2, %v940_v7  ;;  %9881 = vmatmul.mubr.msk.bf16.gmra.mrb[12].mxu0 %vm982_vm2, %v614_v3  ;;  %v664_v3 = vld [vmem:[#allocation2 + $0x1cf] sm:$0xff] }
  0xe2   : > { %v814_v10 = vpop.permute.xlu0 %813  ;;  %v1549_v12 = vpop.permute.xlu1 %1548  ;;  %v11453_v4 = vpack.c.bf16 %v664_v3, %v663_v1 }
  0xe3   : > { %v903_v20 = vsel %vm172_vm0, %v11395_v9, %v814_v10 }
  0xe4   : > { %500 = vrot.lane.b32.xlu0 %v11232_v11, %s10785_s26  ;;  %546 = vrot.lane.b32.xlu1 %v11226_v6, %s10786_s27  ;;  %v1531_v11 = vpack.c.bf16 %v1515_v14, %v1514_v13  ;;  %v1630_v6 = vsel %vm172_vm0, %v11256_v38, %v1549_v12 }
  0xe6   : > { %v816_v5 = vpop.permute.xlu0 %815  ;;  %v862_v15 = vpop.permute.xlu1 %861 }
  0xe7   : > { %v942_v17 = vsel %vm598_vm1, %v903_v20, %v862_v15  ;;  %v666_v15 = vld [vmem:[#allocation2 + $0x1ef] sm:$0xff] }
  0xe8   : > { %1578 = vrot.lane.b32.xlu0 %v1483_v63, %s10785_s26  ;;  %1624 = vrot.lane.b32.xlu1 %v11253_v35, %s10786_s27  ;;  %v906_v35 = vsel %vm172_vm0, %v11410_v18, %v816_v5  ;;  %v665_v5 = vld [vmem:[#allocation2 + $0x1e7] sm:$0xff] }
  0xe9   : > { %9846 = vmatprep.mubr.msk.bf16.mxu1 %vm982_vm2, %v942_v17  ;;  %v11465_v41 = vpack.c.bf16 %v666_v15, %v665_v5 }
  0xea   : > { %v1551_v40 = vpop.permute.xlu0 %1550  ;;  %v1597_v22 = vpop.permute.xlu1 %1596 }
  0xeb   : > { %v1677_v23 = vsel %vm598_vm1, %v1630_v6, %v1597_v22  ;;  %v1633_v24 = vsel %vm172_vm0, %v11290_v61, %v1551_v40  ;;  %v667_v40 = vld [vmem:[#allocation2 + $0x207] sm:$0xff]  ;;  %v668_v22 = vld [vmem:[#allocation2 + $0x20f] sm:$0xff] }
  0xec   : > { %548 = vrot.lane.b32.xlu0 %v11241_v21, %s10786_s27  ;;  %1626 = vrot.lane.b32.xlu1 %v1531_v11, %s10786_s27  ;;  %v11425_v21 = vpack.c.bf16 %v658_v30, %v657_v29 }
  0xed   : > { %9906 = vmatprep.mubr.msk.bf16.mxu0 %vm982_vm2, %v1677_v23 }
  0xee   : > { %v864_v38 = vpop.permute.xlu0 %863  ;;  %v1599_v25 = vpop.permute.xlu1 %1598 }
  0xef   : > { %v944_v28 = vsel %vm598_vm1, %v906_v35, %v864_v38  ;;  %v1679_v45 = vsel %vm598_vm1, %v1633_v24, %v1599_v25  ;;  %v11473_v24 = vpack.c.bf16 %v668_v22, %v667_v40 }
  0xf0   : > { %9847 = vmatmul.mubr.msk.bf16.gmra.mrb[16].mxu1 %vm982_vm2, %v944_v28  ;;  %9907 = vmatmul.mubr.msk.bf16.vlgmr.msra.gmra.mrb[0].mxu0 %vm982_vm2, %v1679_v45 }
  0xf2   : > { %v818_v31 = vpop.permute.xlu0 %817  ;;  %v1553_v33 = vpop.permute.xlu1 %1552 }
  0xf3   : > { %v909_v34 = vsel %vm172_vm0, %v11425_v21, %v818_v31  ;;  %v1636_v46 = vsel %vm172_vm0, %v11302_v37, %v1553_v33 }
  0xf6   : > { %v820_v61 = vpop.permute.xlu0 %819  ;;  %v866_v36 = vpop.permute.xlu1 %865 }
  0xf7   : > { %v946_v39 = vsel %vm598_vm1, %v909_v34, %v866_v36  ;;  %v912_v52 = vsel %vm172_vm0, %v11433_v47, %v820_v61 }
  0xf8   : > { %9850 = vmatprep.mubr.msk.bf16.mxu1 %vm982_vm2, %v946_v39 }
  0xfa   : > { %v1555_v49 = vpop.permute.xlu0 %1554  ;;  %v1601_v50 = vpop.permute.xlu1 %1600 }
  0xfb   : > { %v1681_v43 = vsel %vm598_vm1, %v1636_v46, %v1601_v50  ;;  %v1639_v53 = vsel %vm172_vm0, %v11329_v19, %v1555_v49 }
  0xfc   : > { %9910 = vmatprep.mubr.msk.bf16.mxu0 %vm982_vm2, %v1681_v43 }
  0xfe   : > { %v868_v54 = vpop.permute.xlu0 %867  ;;  %v1603_v56 = vpop.permute.xlu1 %1602 }
  0xff   : > { %v948_v57 = vsel %vm598_vm1, %v912_v52, %v868_v54  ;;  %v1683_v37 = vsel %vm598_vm1, %v1639_v53, %v1603_v56 }
 0x100   : > { %9851 = vmatmul.mubr.msk.bf16.gmra.mrb[20].mxu1 %vm982_vm2, %v948_v57  ;;  %9911 = vmatmul.mubr.msk.bf16.gmra.mrb[4].mxu0 %vm982_vm2, %v1683_v37 }
 0x102   : > { %v822_v27 = vpop.permute.xlu0 %821  ;;  %v1557_v26 = vpop.permute.xlu1 %1556 }
 0x103   : > { %v915_v2 = vsel %vm172_vm0, %v11445_v60, %v822_v27  ;;  %v1642_v32 = vsel %vm172_vm0, %v11339_v48, %v1557_v26 }
 0x106   : > { %v824_v19 = vpop.permute.xlu0 %823  ;;  %v870_v62 = vpop.permute.xlu1 %869 }
 0x107   : > { %v950_v7 = vsel %vm598_vm1, %v915_v2, %v870_v62  ;;  %v918_v12 = vsel %vm172_vm0, %v11453_v4, %v824_v19 }
 0x108   : > { %9854 = vmatprep.mubr.msk.bf16.mxu1 %vm982_vm2, %v950_v7 }
 0x10a   : > { %v1559_v0 = vpop.permute.xlu0 %1558  ;;  %v1605_v8 = vpop.permute.xlu1 %1604 }
 0x10b   : > { %v1685_v10 = vsel %vm598_vm1, %v1642_v32, %v1605_v8  ;;  %v1645_v63 = vsel %vm172_vm0, %v11365_v51, %v1559_v0 }
 0x10c   : > { %9914 = vmatprep.mubr.msk.bf16.mxu0 %vm982_vm2, %v1685_v10 }
 0x10e   : > { %v872_v13 = vpop.permute.xlu0 %871  ;;  %v1607_v14 = vpop.permute.xlu1 %1606 }
 0x10f   : > { %v952_v20 = vsel %vm598_vm1, %v918_v12, %v872_v13  ;;  %v1687_v48 = vsel %vm598_vm1, %v1645_v63, %v1607_v14 }
 0x110   : > { %9855 = vmatmul.mubr.msk.bf16.gmra.mrb[24].mxu1 %vm982_vm2, %v952_v20  ;;  %9915 = vmatmul.mubr.msk.bf16.gmra.mrb[8].mxu0 %vm982_vm2, %v1687_v48 }
 0x112   : > { %v826_v16 = vpop.permute.xlu0 %825  ;;  %v1561_v17 = vpop.permute.xlu1 %1560 }
 0x113   : > { %v921_v11 = vsel %vm172_vm0, %v11465_v41, %v826_v16  ;;  %v1648_v35 = vsel %vm172_vm0, %v11375_v58, %v1561_v17 }
 0x116   : > { %v828_v51 = vpop.permute.xlu0 %827  ;;  %v874_v6 = vpop.permute.xlu1 %873 }
 0x117   : > { %v954_v23 = vsel %vm598_vm1, %v921_v11, %v874_v6  ;;  %v924_v45 = vsel %vm172_vm0, %v11473_v24, %v828_v51 }
 0x118   : > { %9858 = vmatprep.mubr.msk.bf16.mxu1 %vm982_vm2, %v954_v23 }
 0x11a   : > { %v1563_v38 = vpop.permute.xlu0 %1562  ;;  %v1609_v25 = vpop.permute.xlu1 %1608 }
 0x11b   : > { %v1689_v28 = vsel %vm598_vm1, %v1648_v35, %v1609_v25  ;;  %v1651_v29 = vsel %vm172_vm0, %v11395_v9, %v1563_v38 }
 0x11c   : > { %9918 = vmatprep.mubr.msk.bf16.mxu0 %vm982_vm2, %v1689_v28  ;;  %v1418_v28 = vld [vmem:[#allocation2 + $0x227] sm:$0xff] }
 0x11e   : > { %v876_v30 = vpop.permute.xlu0 %875  ;;  %v1611_v31 = vpop.permute.xlu1 %1610 }
 0x11f   : > { %v956_v33 = vsel %vm598_vm1, %v924_v45, %v876_v30  ;;  %v1691_v34 = vsel %vm598_vm1, %v1651_v29, %v1611_v31  ;;  %v1419_v45 = vld [vmem:[#allocation2 + $0x22f] sm:$0xff] }
 0x120   : > { %9859 = vmatmul.mubr.msk.bf16.gmra.mrb[28].mxu1 %vm982_vm2, %v956_v33  ;;  %9919 = vmatmul.mubr.msk.bf16.gmra.mrb[12].mxu0 %vm982_vm2, %v1691_v34  ;;  %v1435_v30 = vpack.c.bf16 %v1419_v45, %v1418_v28 }
 0x122   : > { %v487_v61 = vpop.permute.xlu0 %486  ;;  %v1565_v36 = vpop.permute.xlu1 %1564 }
 0x123   : > { %v576_v42 = vsel %vm172_vm0, %v11375_v58, %v487_v61  ;;  %v1654_v49 = vsel %vm172_vm0, %v11410_v18, %v1565_v36 }
 0x126   : > { %v489_v44 = vpop.permute.xlu0 %488  ;;  %v535_v39 = vpop.permute.xlu1 %534 }
 0x127   : > { %v616_v46 = vsel %vm598_vm1, %v576_v42, %v535_v39  ;;  %v579_v53 = vsel %vm172_vm0, %v11395_v9, %v489_v44 }
 0x128   : > { %9884 = vmatprep.mubr.msk.bf16.mxu1 %vm982_vm2, %v616_v46 }
 0x12a   : > { %v1567_v50 = vpop.permute.xlu0 %1566  ;;  %v1613_v43 = vpop.permute.xlu1 %1612 }
 0x12b   : > { %v1693_v52 = vsel %vm598_vm1, %v1654_v49, %v1613_v43  ;;  %v1657_v58 = vsel %vm172_vm0, %v11425_v21, %v1567_v50 }
 0x12c   : > { %9922 = vmatprep.mubr.msk.bf16.mxu0 %vm982_vm2, %v1693_v52 }
 0x12e   : > { %v537_v54 = vpop.permute.xlu0 %536  ;;  %v1615_v56 = vpop.permute.xlu1 %1614 }
 0x12f   : > { %v618_v57 = vsel %vm598_vm1, %v579_v53, %v537_v54  ;;  %v1695_v37 = vsel %vm598_vm1, %v1657_v58, %v1615_v56 }
 0x130   : > { %9885 = vmatmul.mubr.msk.bf16.vlgmr.msra.gmra.mrb[16].mxu1 %vm982_vm2, %v618_v57  ;;  %9923 = vmatmul.mubr.msk.bf16.gmra.mrb[16].mxu0 %vm982_vm2, %v1695_v37 }
 0x132   : > { %v491_v55 = vpop.permute.xlu0 %490  ;;  %v1569_v59 = vpop.permute.xlu1 %1568 }
 0x133   : > { %v582_v27 = vsel %vm172_vm0, %v11410_v18, %v491_v55  ;;  %v1660_v19 = vsel %vm172_vm0, %v11433_v47, %v1569_v59 }
 0x136   : > { %v493_v26 = vpop.permute.xlu0 %492  ;;  %v539_v9 = vpop.permute.xlu1 %538 }
 0x137   : > { %v620_v2 = vsel %vm598_vm1, %v582_v27, %v539_v9  ;;  %v585_v7 = vsel %vm172_vm0, %v11425_v21, %v493_v26  ;;  %v10740_v26 = vld [vmem:[%s14026_s1 + $0x60] sm:$0xff]  }
 0x138   : > { %9888 = vmatprep.mubr.msk.bf16.mxu1 %vm982_vm2, %v620_v2  ;;  %9938 = vmatprep.subr.bf16.mxu1 %v10740_v26  ;;  %v11570_v2 = vld [vmem:[%s14027_s2] ss:$0 sm:$0xff] }
 0x139   : > { %9939 = vmatpush3.bf16.msra.mxu1 %v10740_v26 }
 0x13a   : > { %v1571_v62 = vpop.permute.xlu0 %1570  ;;  %v1617_v1 = vpop.permute.xlu1 %1616 }
 0x13b   : > { %v1697_v3 = vsel %vm598_vm1, %v1660_v19, %v1617_v1  ;;  %v1663_v18 = vsel %vm172_vm0, %v11445_v60, %v1571_v62 }
 0x13c   : > { %9926 = vmatprep.mubr.msk.bf16.mxu0 %vm982_vm2, %v1697_v3 }
 0x13e   : > { %v541_v32 = vpop.permute.xlu0 %540  ;;  %v1619_v0 = vpop.permute.xlu1 %1618 }
 0x13f   : > { %v622_v8 = vsel %vm598_vm1, %v585_v7, %v541_v32  ;;  %v1699_v10 = vsel %vm598_vm1, %v1663_v18, %v1619_v0 }
 0x140   : > { %9889 = vmatmul.mubr.msk.bf16.gmra.mrb[20].mxu1 %vm982_vm2, %v622_v8  ;;  %9927 = vmatmul.mubr.msk.bf16.gmra.mrb[20].mxu0 %vm982_vm2, %v1699_v10  ;;  %v10741_v10 = vld [vmem:[%s14026_s1 + $0x68] sm:$0xff]  }
 0x141   : > { %9940 = vmatprep.subr.bf16.mxu1 %v10741_v10 }
 0x142   : > { %v495_v12 = vpop.permute.xlu0 %494  ;;  %v1573_v63 = vpop.permute.xlu1 %1572  ;;  %9941 = vmatpush3.bf16.msra.mxu1 %v10741_v10 }
 0x143   : > { %v588_v13 = vsel %vm172_vm0, %v11433_v47, %v495_v12  ;;  %v1666_v48 = vsel %vm172_vm0, %v11453_v4, %v1573_v63 }
 0x146   : > { %v497_v14 = vpop.permute.xlu0 %496  ;;  %v543_v21 = vpop.permute.xlu1 %542 }
 0x147   : > { %v624_v20 = vsel %vm598_vm1, %v588_v13, %v543_v21  ;;  %v591_v17 = vsel %vm172_vm0, %v11445_v60, %v497_v14 }
 0x148   : > { %9892 = vmatprep.mubr.msk.bf16.mxu1 %vm982_vm2, %v624_v20 }
 0x14a   : > { %v1575_v5 = vpop.permute.xlu0 %1574  ;;  %v1621_v15 = vpop.permute.xlu1 %1620 }
 0x14b   : > { %v1701_v16 = vsel %vm598_vm1, %v1666_v48, %v1621_v15  ;;  %v1669_v47 = vsel %vm172_vm0, %v11465_v41, %v1575_v5  ;;  %v10742_v48 = vld [vmem:[%s14026_s1 + $0x70] sm:$0xff]  }
 0x14c   : > { %9930 = vmatprep.mubr.msk.bf16.mxu0 %vm982_vm2, %v1701_v16  ;;  %9942 = vmatprep.subr.bf16.mxu1 %v10742_v48 }
 0x14d   : > { %9943 = vmatpush3.bf16.msra.mxu1 %v10742_v48 }
 0x14e   : > { %v545_v11 = vpop.permute.xlu0 %544  ;;  %v1623_v51 = vpop.permute.xlu1 %1622 }
 0x14f   : > { %v626_v6 = vsel %vm598_vm1, %v591_v17, %v545_v11  ;;  %v1703_v40 = vsel %vm598_vm1, %v1669_v47, %v1623_v51 }
 0x150   : > { %9893 = vmatmul.mubr.msk.bf16.gmra.mrb[24].mxu1 %vm982_vm2, %v626_v6  ;;  %9931 = vmatmul.mubr.msk.bf16.gmra.mrb[24].mxu0 %vm982_vm2, %v1703_v40 }
 0x152   : > { %v499_v22 = vpop.permute.xlu0 %498  ;;  %v1577_v23 = vpop.permute.xlu1 %1576 }
 0x153   : > { %v594_v35 = vsel %vm172_vm0, %v11453_v4, %v499_v22  ;;  %v1672_v29 = vsel %vm172_vm0, %v11473_v24, %v1577_v23 }
 0x156   : > { %v501_v38 = vpop.permute.xlu0 %500  ;;  %v547_v60 = vpop.permute.xlu1 %546 }
 0x157   : > { %v628_v25 = vsel %vm598_vm1, %v594_v35, %v547_v60  ;;  %v597_v4 = vsel %vm172_vm0, %v11465_v41, %v501_v38 }
 0x158   : > { %9896 = vmatprep.mubr.msk.bf16.mxu1 %vm982_vm2, %v628_v25 }
 0x15a   : > { %v1579_v31 = vpop.permute.xlu0 %1578  ;;  %v1625_v33 = vpop.permute.xlu1 %1624 }
 0x15b   : > { %v1705_v34 = vsel %vm598_vm1, %v1672_v29, %v1625_v33  ;;  %v1675_v61 = vsel %vm172_vm0, %v1435_v30, %v1579_v31 }
 0x15c   : > { %9934 = vmatprep.mubr.msk.bf16.mxu0 %vm982_vm2, %v1705_v34 }
 0x15e   : > { %v549_v36 = vpop.permute.xlu0 %548  ;;  %v1627_v42 = vpop.permute.xlu1 %1626 }
 0x15f   : > { %v630_v44 = vsel %vm598_vm1, %v597_v4, %v549_v36  ;;  %v1707_v39 = vsel %vm598_vm1, %v1675_v61, %v1627_v42 }
 0x160   : > { %9897 = vmatmul.mubr.msk.bf16.gmra.mrb[28].mxu1 %vm982_vm2, %v630_v44  ;;  %9935 = vmatmul.mubr.msk.bf16.gmra.mrb[28].mxu0 %vm982_vm2, %v1707_v39 }
 0x184   : > { %v9832_v24 = vpop.f32.mrb[0].mxu1 }
 0x185   : > { %v1049_v46 = vpop.f32.mrb[1].mxu1 }
 0x186   : > { %v9833_v49 = vpop.f32.mrb[2].mxu1 }
 0x187   : > { %v1052_v50 = vpop.f32.mrb[3].mxu1 }
 0x194   : > { %v9836_v43 = vpop.f32.mrb[4].mxu1 }
 0x195   : > { %v1065_v52 = vpop.f32.mrb[5].mxu1 }
 0x196   : > { %v9837_v53 = vpop.f32.mrb[6].mxu1 }
 0x197   : > { %v1068_v41 = vpop.f32.mrb[7].mxu1 }
 0x1a4   : > { %v11548_v58 = vpop.f32.mrb[8].mxu1 }
 0x1a5   : > { %v11550_v54 = vpop.f32.mrb[9].mxu1 }
 0x1a6   : > { %v11552_v56 = vpop.f32.mrb[10].mxu1 }
 0x1a7   : > { %v11554_v57 = vpop.f32.mrb[11].mxu1 }
 0x1b4   : > { %v11556_v37 = vpop.f32.mrb[12].mxu1 }
 0x1b5   : > { %v11558_v55 = vpop.f32.mrb[13].mxu1 }
 0x1b6   : > { %v11560_v59 = vpop.f32.mrb[14].mxu1 }
 0x1b7   : > { %v11562_v27 = vpop.f32.mrb[15].mxu1 }
 0x1c3   : > { %v9908_v9 = vpop.f32.mrb[0].mxu0 }
 0x1c4   : > { %v10400_v19 = vadd.f32 %v9908_v9, %v9832_v24  ;;  %v1799_v62 = vpop.f32.mrb[1].mxu0 }
 0x1c5   : > { %v10401_v1 = vadd.f32 %v1799_v62, %v1049_v46  ;;  %v9909_v3 = vpop.f32.mrb[2].mxu0 }
 0x1c6   : > { %v1967_v7 = vadd.f32 %v10400_v19, %v11570_v2  ;;  %v10402_v18 = vadd.f32 %v9909_v3, %v9833_v49  ;;  %v1802_v32 = vpop.f32.mrb[3].mxu0 }
 0x1c7   : > { %v1965_v0 = vadd.f32 %v10401_v1, %v11570_v2  ;;  %v10403_v8 = vadd.f32 %v1802_v32, %v1052_v50 }
 0x1c8   : > { %v1999_v12 = vmax.f32 %v1967_v7, 0.0  ;;  %v1968_v63 = vadd.f32 %v10402_v18, %v11570_v2 }
 0x1c9   : > { %v1997_v13 = vmax.f32 %v1965_v0, 0.0  ;;  %v1966_v14 = vadd.f32 %v10403_v8, %v11570_v2 }
 0x1ca   : > { %2031 = vst.msk [vmem:[#allocation2 + $0x48] sm:$0xff] %vm172_vm0, %v1999_v12  ;;  %v2000_v21 = vmax.f32 %v1968_v63, 0.0 }
 0x1cb   : > { %2029 = vst.msk [vmem:[#allocation2 + $0x28] sm:$0xff] %vm172_vm0, %v1997_v13  ;;  %v1998_v20 = vmax.f32 %v1966_v14, 0.0 }
 0x1cc   : > { %2032 = vst.msk [vmem:[#allocation2 + $0x50] sm:$0xff] %vm172_vm0, %v2000_v21 }
 0x1cd   : > { %2030 = vst.msk [vmem:[#allocation2 + $0x30] sm:$0xff] %vm172_vm0, %v1998_v20 }
 0x1d1   : > { %v2438_v15 = vld [vmem:[#allocation2 + $0x48] sm:$0xff] }
 0x1d2   : > { %v2436_v51 = vld [vmem:[#allocation2 + $0x28] sm:$0xff] }
 0x1d3   : > { %v9912_v5 = vpop.f32.mrb[4].mxu0  ;;  %v2439_v16 = vld [vmem:[#allocation2 + $0x50] sm:$0xff] }
 0x1d4   : > { %v10404_v17 = vadd.f32 %v9912_v5, %v9836_v43  ;;  %v1815_v47 = vpop.f32.mrb[5].mxu0  ;;  %v11586_v11 = vpack.c.bf16 %v2439_v16, %v2438_v15  ;;  %v2437_v6 = vld [vmem:[#allocation2 + $0x30] sm:$0xff] }
 0x1d5   : > { %v10405_v40 = vadd.f32 %v1815_v47, %v1065_v52  ;;  %v9913_v22 = vpop.f32.mrb[6].mxu0  ;;  %v11588_v23 = vpack.c.bf16 %v2437_v6, %v2436_v51  ;;  %v2486_v35 = vld [vmem:[#allocation2 + $0x49] sm:$0xff]  ;;  %v2487_v38 = vld [vmem:[#allocation2 + $0x51] sm:$0xff] }
 0x1d6   : > { %v1971_v60 = vadd.f32 %v10404_v17, %v11570_v2  ;;  %v10406_v25 = vadd.f32 %v9913_v22, %v9837_v53  ;;  %2550 = vrot.lane.b32.xlu1 %v11586_v11, %s10785_s26  ;;  %v1818_v28 = vpop.f32.mrb[7].mxu0  ;;  %v2484_v45 = vld [vmem:[#allocation2 + $0x29] sm:$0xff]  ;;  %v2485_v29 = vld [vmem:[#allocation2 + $0x31] sm:$0xff]  ;;  %v11597_v4 = vpack.c.bf16 %v2487_v38, %v2486_v35 }
 0x1d7   : > { %v1969_v30 = vadd.f32 %v10405_v40, %v11570_v2  ;;  %v10407_v31 = vadd.f32 %v1818_v28, %v1068_v41  ;;  %2548 = vrot.lane.b32.xlu0 %v11588_v23, %s10785_s26  ;;  %v11600_v42 = vpack.c.bf16 %v2485_v29, %v2484_v45 }
 0x1d8   : > { %v2003_v33 = vmax.f32 %v1971_v60, 0.0  ;;  %v1972_v34 = vadd.f32 %v10406_v25, %v11570_v2 }
 0x1d9   : > { %v2001_v61 = vmax.f32 %v1969_v30, 0.0  ;;  %v1970_v36 = vadd.f32 %v10407_v31, %v11570_v2 }
 0x1da   : > { %2035 = vst.msk [vmem:[#allocation2 + $0x88] sm:$0xff] %vm172_vm0, %v2003_v33  ;;  %v2004_v44 = vmax.f32 %v1972_v34, 0.0  ;;  %2598 = vrot.lane.b32.xlu1 %v11597_v4, %s10786_s27 }
 0x1db   : > { %2033 = vst.msk [vmem:[#allocation2 + $0x68] sm:$0xff] %vm172_vm0, %v2001_v61  ;;  %v2002_v39 = vmax.f32 %v1970_v36, 0.0  ;;  %2596 = vrot.lane.b32.xlu0 %v11600_v42, %s10786_s27 }
 0x1dc   : > { %2036 = vst.msk [vmem:[#allocation2 + $0x90] sm:$0xff] %vm172_vm0, %v2004_v44 }
 0x1dd   : > { %2034 = vst.msk [vmem:[#allocation2 + $0x70] sm:$0xff] %vm172_vm0, %v2002_v39 }
 0x1e1   : > { %v2442_v46 = vld [vmem:[#allocation2 + $0x88] sm:$0xff] }
 0x1e2   : > { %v2440_v53 = vld [vmem:[#allocation2 + $0x68] sm:$0xff] }
 0x1e3   : > { %v9916_v24 = vpop.f32.mrb[8].mxu0  ;;  %v2443_v49 = vld [vmem:[#allocation2 + $0x90] sm:$0xff] }
 0x1e4   : > { %v10408_v50 = vadd.f32 %v9916_v24, %v11548_v58  ;;  %v1831_v43 = vpop.f32.mrb[9].mxu0  ;;  %v11611_v52 = vpack.c.bf16 %v2443_v49, %v2442_v46  ;;  %v2441_v41 = vld [vmem:[#allocation2 + $0x70] sm:$0xff] }
 0x1e5   : > { %v10409_v26 = vadd.f32 %v1831_v43, %v11550_v54  ;;  %v9917_v9 = vpop.f32.mrb[10].mxu0  ;;  %v11614_v19 = vpack.c.bf16 %v2441_v41, %v2440_v53  ;;  %v2490_v62 = vld [vmem:[#allocation2 + $0x89] sm:$0xff]  ;;  %v2491_v1 = vld [vmem:[#allocation2 + $0x91] sm:$0xff] }
 0x1e6   : > { %v1975_v3 = vadd.f32 %v10408_v50, %v11570_v2  ;;  %v10410_v7 = vadd.f32 %v9917_v9, %v11552_v56  ;;  %2554 = vrot.lane.b32.xlu1 %v11611_v52, %s10785_s26  ;;  %v1834_v58 = vpop.f32.mrb[11].mxu0  ;;  %v2488_v18 = vld [vmem:[#allocation2 + $0x69] sm:$0xff]  ;;  %v2489_v32 = vld [vmem:[#allocation2 + $0x71] sm:$0xff]  ;;  %v11625_v12 = vpack.c.bf16 %v2491_v1, %v2490_v62 }
 0x1e7   : > { %v1973_v0 = vadd.f32 %v10409_v26, %v11570_v2  ;;  %v10411_v8 = vadd.f32 %v1834_v58, %v11554_v57  ;;  %2552 = vrot.lane.b32.xlu0 %v11614_v19, %s10785_s26  ;;  %v11628_v13 = vpack.c.bf16 %v2489_v32, %v2488_v18 }
 0x1e8   : > { %v2007_v54 = vmax.f32 %v1975_v3, 0.0  ;;  %v1976_v10 = vadd.f32 %v10410_v7, %v11570_v2 }
 0x1e9   : > { %v2005_v63 = vmax.f32 %v1973_v0, 0.0  ;;  %v1974_v56 = vadd.f32 %v10411_v8, %v11570_v2 }
 0x1ea   : > { %2039 = vst.msk [vmem:[#allocation2 + $0xc8] sm:$0xff] %vm172_vm0, %v2007_v54  ;;  %v2008_v14 = vmax.f32 %v1976_v10, 0.0  ;;  %2602 = vrot.lane.b32.xlu1 %v11625_v12, %s10786_s27  ;;  %v11676_v10 = vld [vmem:[%s14026_s1 + $0x48] sm:$0xff]  }
 0x1eb   : > { %2037 = vst.msk [vmem:[#allocation2 + $0xa8] sm:$0xff] %vm172_vm0, %v2005_v63  ;;  %v2006_v57 = vmax.f32 %v1974_v56, 0.0  ;;  %2600 = vrot.lane.b32.xlu0 %v11628_v13, %s10786_s27  ;;  %9976 = vmatprep.subr.bf16.mxu1 %v11676_v10 }
 0x1ec   : > { %2040 = vst.msk [vmem:[#allocation2 + $0xd0] sm:$0xff] %vm172_vm0, %v2008_v14 }
 0x1ed   : > { %2038 = vst.msk [vmem:[#allocation2 + $0xb0] sm:$0xff] %vm172_vm0, %v2006_v57 }
 0x1f1   : > { %v2446_v20 = vld [vmem:[#allocation2 + $0xc8] sm:$0xff] }
 0x1f2   : > { %v2444_v17 = vld [vmem:[#allocation2 + $0xa8] sm:$0xff] }
 0x1f3   : > { %v9920_v21 = vpop.f32.mrb[12].mxu0  ;;  %v2447_v48 = vld [vmem:[#allocation2 + $0xd0] sm:$0xff] }
 0x1f4   : > { %v10412_v5 = vadd.f32 %v9920_v21, %v11556_v37  ;;  %v1847_v15 = vpop.f32.mrb[13].mxu0  ;;  %v11639_v16 = vpack.c.bf16 %v2447_v48, %v2446_v20  ;;  %v2445_v47 = vld [vmem:[#allocation2 + $0xb0] sm:$0xff] }
 0x1f5   : > { %v10413_v51 = vadd.f32 %v1847_v15, %v11558_v55  ;;  %v9921_v6 = vpop.f32.mrb[14].mxu0  ;;  %v11642_v40 = vpack.c.bf16 %v2445_v47, %v2444_v17  ;;  %v2494_v22 = vld [vmem:[#allocation2 + $0xc9] sm:$0xff]  ;;  %v2495_v35 = vld [vmem:[#allocation2 + $0xd1] sm:$0xff] }
 0x1f6   : > { %v1979_v38 = vadd.f32 %v10412_v5, %v11570_v2  ;;  %v10414_v60 = vadd.f32 %v9921_v6, %v11560_v59  ;;  %2558 = vrot.lane.b32.xlu1 %v11639_v16, %s10785_s26  ;;  %v1850_v37 = vpop.f32.mrb[15].mxu0  ;;  %v2492_v25 = vld [vmem:[#allocation2 + $0xa9] sm:$0xff]  ;;  %v2493_v28 = vld [vmem:[#allocation2 + $0xb1] sm:$0xff]  ;;  %v11653_v31 = vpack.c.bf16 %v2495_v35, %v2494_v22 }
 0x1f7   : > { %v1977_v45 = vadd.f32 %v10413_v51, %v11570_v2  ;;  %v10415_v29 = vadd.f32 %v1850_v37, %v11562_v27  ;;  %2556 = vrot.lane.b32.xlu0 %v11642_v40, %s10785_s26  ;;  %v11656_v34 = vpack.c.bf16 %v2493_v28, %v2492_v25 }
 0x1f8   : > { %v2011_v55 = vmax.f32 %v1979_v38, 0.0  ;;  %v1980_v30 = vadd.f32 %v10414_v60, %v11570_v2 }
 0x1f9   : > { %v2009_v33 = vmax.f32 %v1977_v45, 0.0  ;;  %v1978_v59 = vadd.f32 %v10415_v29, %v11570_v2 }
 0x1fa   : > { %2043 = vst.msk [vmem:[#allocation2 + $0x108] sm:$0xff] %vm172_vm0, %v2011_v55  ;;  %v2012_v61 = vmax.f32 %v1980_v30, 0.0  ;;  %2606 = vrot.lane.b32.xlu1 %v11653_v31, %s10786_s27 }
 0x1fb   : > { %2041 = vst.msk [vmem:[#allocation2 + $0xe8] sm:$0xff] %vm172_vm0, %v2009_v33  ;;  %v2010_v27 = vmax.f32 %v1978_v59, 0.0  ;;  %2604 = vrot.lane.b32.xlu0 %v11656_v34, %s10786_s27 }
 0x1fc   : > { %2044 = vst.msk [vmem:[#allocation2 + $0x110] sm:$0xff] %vm172_vm0, %v2012_v61 }
 0x1fd   : > { %2042 = vst.msk [vmem:[#allocation2 + $0xf0] sm:$0xff] %vm172_vm0, %v2010_v27 }
 0x201   : > { %v2450_v39 = vld [vmem:[#allocation2 + $0x108] sm:$0xff] }
 0x202   : > { %v2448_v53 = vld [vmem:[#allocation2 + $0xe8] sm:$0xff] }
 0x203   : > { %v9886_v36 = vpop.f32.mrb[16].mxu1  ;;  %v9924_v44 = vpop.f32.mrb[16].mxu0  ;;  %v2451_v24 = vld [vmem:[#allocation2 + $0x110] sm:$0xff] }
 0x204   : > { %v10416_v46 = vadd.f32 %v9924_v44, %v9886_v36  ;;  %v1324_v49 = vpop.f32.mrb[17].mxu1  ;;  %v1863_v50 = vpop.f32.mrb[17].mxu0  ;;  %v11666_v43 = vpack.c.bf16 %v2451_v24, %v2450_v39  ;;  %v2449_v41 = vld [vmem:[#allocation2 + $0xf0] sm:$0xff] }
 0x205   : > { %v10417_v26 = vadd.f32 %v1863_v50, %v1324_v49  ;;  %v9887_v9 = vpop.f32.mrb[18].mxu1  ;;  %v9925_v62 = vpop.f32.mrb[18].mxu0  ;;  %v11668_v1 = vpack.c.bf16 %v2449_v41, %v2448_v53  ;;  %v2498_v3 = vld [vmem:[#allocation2 + $0x109] sm:$0xff]  ;;  %v2499_v7 = vld [vmem:[#allocation2 + $0x111] sm:$0xff] }
 0x206   : > { %v1983_v58 = vadd.f32 %v10416_v46, %v11570_v2  ;;  %v10418_v18 = vadd.f32 %v9925_v62, %v9887_v9  ;;  %v1327_v32 = vpop.f32.mrb[19].mxu1  ;;  %2562 = vrot.lane.b32.xlu1 %v11666_v43, %s10785_s26  ;;  %v1866_v0 = vpop.f32.mrb[19].mxu0  ;;  %v2496_v8 = vld [vmem:[#allocation2 + $0xe9] sm:$0xff]  ;;  %v2497_v54 = vld [vmem:[#allocation2 + $0xf1] sm:$0xff]  ;;  %v11682_v21 = vpack.c.bf16 %v2499_v7, %v2498_v3 }
 0x207   : > { %v1981_v63 = vadd.f32 %v10417_v26, %v11570_v2  ;;  %v10419_v56 = vadd.f32 %v1866_v0, %v1327_v32  ;;  %2560 = vrot.lane.b32.xlu0 %v11668_v1, %s10785_s26  ;;  %v11686_v5 = vpack.c.bf16 %v2497_v54, %v2496_v8 }
 0x208   : > { %v2015_v14 = vmax.f32 %v1983_v58, 0.0  ;;  %v1984_v57 = vadd.f32 %v10418_v18, %v11570_v2 }
 0x209   : > { %v2013_v20 = vmax.f32 %v1981_v63, 0.0  ;;  %v1982_v48 = vadd.f32 %v10419_v56, %v11570_v2 }
 0x20a   : > { %2047 = vst.msk [vmem:[#allocation2 + $0x148] sm:$0xff] %vm172_vm0, %v2015_v14  ;;  %v2016_v15 = vmax.f32 %v1984_v57, 0.0  ;;  %2610 = vrot.lane.b32.xlu1 %v11682_v21, %s10786_s27 }
 0x20b   : > { %2045 = vst.msk [vmem:[#allocation2 + $0x128] sm:$0xff] %vm172_vm0, %v2013_v20  ;;  %v2014_v17 = vmax.f32 %v1982_v48, 0.0  ;;  %2608 = vrot.lane.b32.xlu0 %v11686_v5, %s10786_s27 }
 0x20c   : > { %2048 = vst.msk [vmem:[#allocation2 + $0x150] sm:$0xff] %vm172_vm0, %v2016_v15 }
 0x20d   : > { %2046 = vst.msk [vmem:[#allocation2 + $0x130] sm:$0xff] %vm172_vm0, %v2014_v17 }
 0x211   : > { %v2454_v6 = vld [vmem:[#allocation2 + $0x148] sm:$0xff] }
 0x212   : > { %v2452_v25 = vld [vmem:[#allocation2 + $0x128] sm:$0xff] }
 0x213   : > { %v9890_v47 = vpop.f32.mrb[20].mxu1  ;;  %v9928_v51 = vpop.f32.mrb[20].mxu0  ;;  %v2455_v22 = vld [vmem:[#allocation2 + $0x150] sm:$0xff] }
 0x214   : > { %v10420_v35 = vadd.f32 %v9928_v51, %v9890_v47  ;;  %v1340_v38 = vpop.f32.mrb[21].mxu1  ;;  %v1879_v60 = vpop.f32.mrb[21].mxu0  ;;  %v11696_v37 = vpack.c.bf16 %v2455_v22, %v2454_v6  ;;  %v2453_v28 = vld [vmem:[#allocation2 + $0x130] sm:$0xff] }
 0x215   : > { %v10421_v45 = vadd.f32 %v1879_v60, %v1340_v38  ;;  %v9891_v29 = vpop.f32.mrb[22].mxu1  ;;  %v9929_v55 = vpop.f32.mrb[22].mxu0  ;;  %v11698_v30 = vpack.c.bf16 %v2453_v28, %v2452_v25  ;;  %v2502_v33 = vld [vmem:[#allocation2 + $0x149] sm:$0xff]  ;;  %v2503_v59 = vld [vmem:[#allocation2 + $0x151] sm:$0xff] }
 0x216   : > { %v1987_v61 = vadd.f32 %v10420_v35, %v11570_v2  ;;  %v10422_v27 = vadd.f32 %v9929_v55, %v9891_v29  ;;  %v1343_v36 = vpop.f32.mrb[23].mxu1  ;;  %2566 = vrot.lane.b32.xlu1 %v11696_v37, %s10785_s26  ;;  %v1882_v44 = vpop.f32.mrb[23].mxu0  ;;  %v2500_v39 = vld [vmem:[#allocation2 + $0x129] sm:$0xff]  ;;  %v2501_v24 = vld [vmem:[#allocation2 + $0x131] sm:$0xff]  ;;  %v11707_v41 = vpack.c.bf16 %v2503_v59, %v2502_v33 }
 0x217   : > { %v1985_v46 = vadd.f32 %v10421_v45, %v11570_v2  ;;  %v10423_v49 = vadd.f32 %v1882_v44, %v1343_v36  ;;  %2564 = vrot.lane.b32.xlu0 %v11698_v30, %s10785_s26  ;;  %v11710_v62 = vpack.c.bf16 %v2501_v24, %v2500_v39 }
 0x218   : > { %v2019_v50 = vmax.f32 %v1987_v61, 0.0  ;;  %v1988_v53 = vadd.f32 %v10422_v27, %v11570_v2 }
 0x219   : > { %v2017_v26 = vmax.f32 %v1985_v46, 0.0  ;;  %v1986_v9 = vadd.f32 %v10423_v49, %v11570_v2 }
 0x21a   : > { %2051 = vst.msk [vmem:[#allocation2 + $0x188] sm:$0xff] %vm172_vm0, %v2019_v50  ;;  %v2020_v3 = vmax.f32 %v1988_v53, 0.0  ;;  %2614 = vrot.lane.b32.xlu1 %v11707_v41, %s10786_s27 }
 0x21b   : > { %2049 = vst.msk [vmem:[#allocation2 + $0x168] sm:$0xff] %vm172_vm0, %v2017_v26  ;;  %v2018_v7 = vmax.f32 %v1986_v9, 0.0  ;;  %2612 = vrot.lane.b32.xlu0 %v11710_v62, %s10786_s27 }
 0x21c   : > { %2052 = vst.msk [vmem:[#allocation2 + $0x190] sm:$0xff] %vm172_vm0, %v2020_v3 }
 0x21d   : > { %2050 = vst.msk [vmem:[#allocation2 + $0x170] sm:$0xff] %vm172_vm0, %v2018_v7 }
 0x221   : > { %v2458_v32 = vld [vmem:[#allocation2 + $0x188] sm:$0xff] }
 0x222   : > { %v2456_v14 = vld [vmem:[#allocation2 + $0x168] sm:$0xff] }
 0x223   : > { %v9894_v58 = vpop.f32.mrb[24].mxu1  ;;  %v9932_v18 = vpop.f32.mrb[24].mxu0  ;;  %v2459_v0 = vld [vmem:[#allocation2 + $0x190] sm:$0xff] }
 0x224   : > { %v10424_v8 = vadd.f32 %v9932_v18, %v9894_v58  ;;  %v1356_v54 = vpop.f32.mrb[25].mxu1  ;;  %v1895_v63 = vpop.f32.mrb[25].mxu0  ;;  %v11720_v56 = vpack.c.bf16 %v2459_v0, %v2458_v32  ;;  %v2457_v57 = vld [vmem:[#allocation2 + $0x170] sm:$0xff] }
 0x225   : > { %v10425_v20 = vadd.f32 %v1895_v63, %v1356_v54  ;;  %v9895_v48 = vpop.f32.mrb[26].mxu1  ;;  %v9933_v15 = vpop.f32.mrb[26].mxu0  ;;  %v11722_v17 = vpack.c.bf16 %v2457_v57, %v2456_v14  ;;  %v2506_v47 = vld [vmem:[#allocation2 + $0x189] sm:$0xff]  ;;  %v2507_v51 = vld [vmem:[#allocation2 + $0x191] sm:$0xff] }
 0x226   : > { %v1991_v6 = vadd.f32 %v10424_v8, %v11570_v2  ;;  %v10426_v22 = vadd.f32 %v9933_v15, %v9895_v48  ;;  %v1359_v35 = vpop.f32.mrb[27].mxu1  ;;  %2570 = vrot.lane.b32.xlu1 %v11720_v56, %s10785_s26  ;;  %v1898_v38 = vpop.f32.mrb[27].mxu0  ;;  %v2504_v60 = vld [vmem:[#allocation2 + $0x169] sm:$0xff]  ;;  %v2505_v25 = vld [vmem:[#allocation2 + $0x171] sm:$0xff]  ;;  %v11731_v33 = vpack.c.bf16 %v2507_v51, %v2506_v47 }
 0x227   : > { %v1989_v28 = vadd.f32 %v10425_v20, %v11570_v2  ;;  %v10427_v45 = vadd.f32 %v1898_v38, %v1359_v35  ;;  %2568 = vrot.lane.b32.xlu0 %v11722_v17, %s10785_s26  ;;  %v11734_v27 = vpack.c.bf16 %v2505_v25, %v2504_v60 }
 0x228   : > { %v2023_v29 = vmax.f32 %v1991_v6, 0.0  ;;  %v1992_v55 = vadd.f32 %v10426_v22, %v11570_v2 }
 0x229   : > { %v2021_v59 = vmax.f32 %v1989_v28, 0.0  ;;  %v1990_v61 = vadd.f32 %v10427_v45, %v11570_v2 }
 0x22a   : > { %2055 = vst.msk [vmem:[#allocation2 + $0x1c8] sm:$0xff] %vm172_vm0, %v2023_v29  ;;  %v2024_v36 = vmax.f32 %v1992_v55, 0.0  ;;  %2618 = vrot.lane.b32.xlu1 %v11731_v33, %s10786_s27 }
 0x22b   : > { %2053 = vst.msk [vmem:[#allocation2 + $0x1a8] sm:$0xff] %vm172_vm0, %v2021_v59  ;;  %v2022_v44 = vmax.f32 %v1990_v61, 0.0  ;;  %2616 = vrot.lane.b32.xlu0 %v11734_v27, %s10786_s27 }
 0x22c   : > { %2056 = vst.msk [vmem:[#allocation2 + $0x1d0] sm:$0xff] %vm172_vm0, %v2024_v36 }
 0x22d   : > { %2054 = vst.msk [vmem:[#allocation2 + $0x1b0] sm:$0xff] %vm172_vm0, %v2022_v44 }
 0x231   : > { %v2462_v46 = vld [vmem:[#allocation2 + $0x1c8] sm:$0xff] }
 0x232   : > { %v2460_v3 = vld [vmem:[#allocation2 + $0x1a8] sm:$0xff] }
 0x233   : > { %v9898_v39 = vpop.f32.mrb[28].mxu1  ;;  %v9936_v24 = vpop.f32.mrb[28].mxu0  ;;  %v2463_v49 = vld [vmem:[#allocation2 + $0x1d0] sm:$0xff] }
 0x234   : > { %v10428_v50 = vadd.f32 %v9936_v24, %v9898_v39  ;;  %v1372_v53 = vpop.f32.mrb[29].mxu1  ;;  %v1911_v26 = vpop.f32.mrb[29].mxu0  ;;  %v11744_v9 = vpack.c.bf16 %v2463_v49, %v2462_v46  ;;  %v2461_v7 = vld [vmem:[#allocation2 + $0x1b0] sm:$0xff] }
 0x235   : > { %v10429_v58 = vadd.f32 %v1911_v26, %v1372_v53  ;;  %v9899_v18 = vpop.f32.mrb[30].mxu1  ;;  %v9937_v32 = vpop.f32.mrb[30].mxu0  ;;  %v11746_v0 = vpack.c.bf16 %v2461_v7, %v2460_v3  ;;  %v2510_v8 = vld [vmem:[#allocation2 + $0x1c9] sm:$0xff]  ;;  %v2511_v54 = vld [vmem:[#allocation2 + $0x1d1] sm:$0xff] }
 0x236   : > { %v1995_v63 = vadd.f32 %v10428_v50, %v11570_v2  ;;  %v10430_v14 = vadd.f32 %v9937_v32, %v9899_v18  ;;  %v1375_v57 = vpop.f32.mrb[31].mxu1  ;;  %2574 = vrot.lane.b32.xlu1 %v11744_v9, %s10785_s26  ;;  %v1914_v20 = vpop.f32.mrb[31].mxu0  ;;  %v2508_v48 = vld [vmem:[#allocation2 + $0x1a9] sm:$0xff]  ;;  %v2509_v15 = vld [vmem:[#allocation2 + $0x1b1] sm:$0xff]  ;;  %v11755_v35 = vpack.c.bf16 %v2511_v54, %v2510_v8 }
 0x237   : > { %v1993_v47 = vadd.f32 %v10429_v58, %v11570_v2  ;;  %v10431_v51 = vadd.f32 %v1914_v20, %v1375_v57  ;;  %2572 = vrot.lane.b32.xlu0 %v11746_v0, %s10785_s26  ;;  %v11758_v25 = vpack.c.bf16 %v2509_v15, %v2508_v48  ;;  %v2389_v50 = vld [vmem:[#allocation2 + $0x2f] sm:$0xff]  ;;  %v2388_v32 = vld [vmem:[#allocation2 + $0x27] sm:$0xff] }
 0x238   : > { %v2027_v6 = vmax.f32 %v1995_v63, 0.0  ;;  %v1996_v22 = vadd.f32 %v10430_v14, %v11570_v2  ;;  %v2109_v26 = vld [vmem:[#allocation2 + $0x8] sm:$0xff]  ;;  %v2110_v3 = vld [vmem:[#allocation2 + $0x10] sm:$0xff]  ;;  %v11782_v54 = vpack.c.bf16 %v2389_v50, %v2388_v32 }
 0x239   : > { %v2025_v38 = vmax.f32 %v1993_v47, 0.0  ;;  %v1994_v60 = vadd.f32 %v10431_v51, %v11570_v2  ;;  %v2391_v7 = vld [vmem:[#allocation2 + $0x4f] sm:$0xff]  ;;  %v2390_v8 = vld [vmem:[#allocation2 + $0x47] sm:$0xff]  ;;  %v2141_v63 = vpack.c.bf16 %v2110_v3, %v2109_v26 }
 0x23a   : > { %2059 = vst.msk [vmem:[#allocation2 + $0x208] sm:$0xff] %vm172_vm0, %v2027_v6  ;;  %v2028_v28 = vmax.f32 %v1996_v22, 0.0  ;;  %2622 = vrot.lane.b32.xlu1 %v11755_v35, %s10786_s27  ;;  %v11786_v14 = vpack.c.bf16 %v2391_v7, %v2390_v8  ;;  %v2157_v20 = vld [vmem:[#allocation2 + $0x9] sm:$0xff]  ;;  %v2158_v48 = vld [vmem:[#allocation2 + $0x11] sm:$0xff] }
 0x23b   : > { %2057 = vst.msk [vmem:[#allocation2 + $0x1e8] sm:$0xff] %vm172_vm0, %v2025_v38  ;;  %v2026_v45 = vmax.f32 %v1994_v60, 0.0  ;;  %2620 = vrot.lane.b32.xlu0 %v11758_v25, %s10786_s27  ;;  %v10744_v22 = vld [vmem:[%s14026_s1 + $0x50] sm:$0xff]   ;;  %v2189_v60 = vpack.c.bf16 %v2158_v48, %v2157_v20  ;;  %v2396_v8 = vld [vmem:[#allocation2 + $0xa7] sm:$0xff] }
 0x23c   : > { %2060 = vst.msk [vmem:[#allocation2 + $0x210] sm:$0xff] %vm172_vm0, %v2028_v28  ;;  %v11814_v28 = vld [vmem:[%s14026_s1 + $0x78] sm:$0xff]   ;;  %v2397_v7 = vld [vmem:[#allocation2 + $0xaf] sm:$0xff] }
 0x23d   : > { %2058 = vst.msk [vmem:[#allocation2 + $0x1f0] sm:$0xff] %vm172_vm0, %v2026_v45  ;;  %v2395_v45 = vld [vmem:[#allocation2 + $0x8f] sm:$0xff] }
 0x241   : > { %v2466_v29 = vld [vmem:[#allocation2 + $0x208] sm:$0xff] }
 0x242   : > { %v2464_v59 = vld [vmem:[#allocation2 + $0x1e8] sm:$0xff] }
 0x243   : > { %v2467_v2 = vld [vmem:[#allocation2 + $0x210] sm:$0xff] }
 0x244   : > { %v11768_v55 = vpack.c.bf16 %v2467_v2, %v2466_v29  ;;  %v2465_v61 = vld [vmem:[#allocation2 + $0x1f0] sm:$0xff]  ;;  %v2392_v2 = vld [vmem:[#allocation2 + $0x67] sm:$0xff] }
 0x245   : > { %v11770_v36 = vpack.c.bf16 %v2465_v61, %v2464_v59  ;;  %v2514_v44 = vld [vmem:[#allocation2 + $0x209] sm:$0xff]  ;;  %v2515_v39 = vld [vmem:[#allocation2 + $0x211] sm:$0xff] }
 0x246   : > { %2578 = vrot.lane.b32.xlu1 %v11768_v55, %s10785_s26  ;;  %v2512_v24 = vld [vmem:[#allocation2 + $0x1e9] sm:$0xff]  ;;  %v2513_v46 = vld [vmem:[#allocation2 + $0x1f1] sm:$0xff]  ;;  %v11776_v53 = vpack.c.bf16 %v2515_v39, %v2514_v44 }
 0x247   : > { %2576 = vrot.lane.b32.xlu0 %v11770_v36, %s10785_s26  ;;  %v11778_v18 = vpack.c.bf16 %v2513_v46, %v2512_v24  ;;  %v2394_v59 = vld [vmem:[#allocation2 + $0x87] sm:$0xff] }
 0x248   : > { %v2551_v49 = vpop.permute.xlu1 %2550  ;;  %v11825_v44 = vpack.c.bf16 %v2395_v45, %v2394_v59  ;;  %v2402_v45 = vld [vmem:[#allocation2 + $0x107] sm:$0xff] }
 0x249   : > { %v2549_v58 = vpop.permute.xlu0 %2548  ;;  %v2633_v51 = vsel %vm172_vm0, %v11786_v14, %v2551_v49 }
 0x24a   : > { %2626 = vrot.lane.b32.xlu1 %v11776_v53, %s10786_s27  ;;  %v2630_v15 = vsel %vm172_vm0, %v11782_v54, %v2549_v58  ;;  %v2399_v58 = vld [vmem:[#allocation2 + $0xcf] sm:$0xff] }
 0x24b   : > { %2624 = vrot.lane.b32.xlu0 %v11778_v18, %s10786_s27 }
 0x24c   : > { %v2599_v57 = vpop.permute.xlu1 %2598 }
 0x24d   : > { %v2597_v47 = vpop.permute.xlu0 %2596  ;;  %v2679_v38 = vsel %vm598_vm1, %v2633_v51, %v2599_v57  ;;  %v11849_v57 = vpack.c.bf16 %v2397_v7, %v2396_v8  ;;  %v2407_v7 = vld [vmem:[#allocation2 + $0x14f] sm:$0xff]  ;;  %v2406_v8 = vld [vmem:[#allocation2 + $0x147] sm:$0xff] }
 0x24e   : > { %v2677_v6 = vsel %vm598_vm1, %v2630_v15, %v2597_v47  ;;  %2223 = vrot.lane.b32.xlu1 %v11588_v23, %s10785_s26  ;;  %v10745_v23 = vld [vmem:[%s14026_s1 + $0x58] sm:$0xff]  }
 0x24f   : > { %9944 = vmatprep.mubr.msk.bf16.mxu1 %vm982_vm2, %v2677_v6  ;;  %2221 = vrot.lane.b32.xlu0 %v2141_v63, %s10785_s26  ;;  %v2398_v63 = vld [vmem:[#allocation2 + $0xc7] sm:$0xff] }
 0x250   : > { %9945 = vmatmul.mubr.msk.bf16.vlgmr.msra.gmra.mrb[32].mxu1 %vm982_vm2, %v2679_v38  ;;  %v11853_v20 = vpack.c.bf16 %v2399_v58, %v2398_v63 }
 0x251   : > { %9977 = vmatpush3.bf16.msra.mxu1 %v11676_v10  ;;  %v2393_v10 = vld [vmem:[#allocation2 + $0x6f] sm:$0xff] }
 0x252   : > { %2271 = vrot.lane.b32.xlu1 %v11600_v42, %s10786_s27  ;;  %9978 = vmatprep.subr.bf16.mxu1 %v10744_v22  ;;  %v11821_v61 = vpack.c.bf16 %v2393_v10, %v2392_v2  ;;  %v2400_v10 = vld [vmem:[#allocation2 + $0xe7] sm:$0xff] }
 0x253   : > { %2269 = vrot.lane.b32.xlu0 %v2189_v60, %s10786_s27  ;;  %v2401_v60 = vld [vmem:[#allocation2 + $0xef] sm:$0xff] }
 0x255   : > { %9979 = vmatpush3.bf16.msra.mxu1 %v10744_v22 }
 0x256   : > { %2227 = vrot.lane.b32.xlu1 %v11614_v19, %s10785_s26  ;;  %9980 = vmatprep.subr.bf16.mxu1 %v10745_v23 }
 0x257   : > { %2225 = vrot.lane.b32.xlu0 %v11586_v11, %s10785_s26 }
 0x258   : > { %v2555_v42 = vpop.permute.xlu1 %2554 }
 0x259   : > { %v2553_v29 = vpop.permute.xlu0 %2552  ;;  %9981 = vmatpush3.bf16.msra.mxu1 %v10745_v23  ;;  %v2639_v49 = vsel %vm172_vm0, %v11825_v44, %v2555_v42  ;;  %v2403_v23 = vld [vmem:[#allocation2 + $0x10f] sm:$0xff] }
 0x25a   : > { %2275 = vrot.lane.b32.xlu1 %v11628_v13, %s10786_s27  ;;  %10014 = vmatprep.subr.bf16.mxu1 %v11814_v28  ;;  %v2636_v24 = vsel %vm172_vm0, %v11821_v61, %v2553_v29  ;;  %v11877_v29 = vpack.c.bf16 %v2401_v60, %v2400_v10  ;;  %v11881_v2 = vpack.c.bf16 %v2403_v23, %v2402_v45  ;;  %v2409_v60 = vld [vmem:[#allocation2 + $0x16f] sm:$0xff]  ;;  %v2408_v10 = vld [vmem:[#allocation2 + $0x167] sm:$0xff] }
 0x25b   : > { %2273 = vrot.lane.b32.xlu0 %v11597_v4, %s10786_s27  ;;  %v2411_v23 = vld [vmem:[#allocation2 + $0x18f] sm:$0xff]  ;;  %v11933_v45 = vpack.c.bf16 %v2409_v60, %v2408_v10 }
 0x25c   : > { %v2603_v39 = vpop.permute.xlu1 %2602 }
 0x25d   : > { %v2601_v46 = vpop.permute.xlu0 %2600  ;;  %v2683_v26 = vsel %vm598_vm1, %v2639_v49, %v2603_v39 }
 0x25e   : > { %v2681_v50 = vsel %vm598_vm1, %v2636_v24, %v2601_v46  ;;  %2231 = vrot.lane.b32.xlu1 %v11642_v40, %s10785_s26 }
 0x25f   : > { %9948 = vmatprep.mubr.msk.bf16.mxu1 %vm982_vm2, %v2681_v50  ;;  %2229 = vrot.lane.b32.xlu0 %v11611_v52, %s10785_s26 }
 0x260   : > { %9949 = vmatmul.mubr.msk.bf16.gmra.mrb[36].mxu1 %vm982_vm2, %v2683_v26 }
 0x262   : > { %2279 = vrot.lane.b32.xlu1 %v11656_v34, %s10786_s27 }
 0x263   : > { %2277 = vrot.lane.b32.xlu0 %v11625_v12, %s10786_s27 }
 0x266   : > { %2235 = vrot.lane.b32.xlu1 %v11668_v1, %s10785_s26 }
 0x267   : > { %2233 = vrot.lane.b32.xlu0 %v11639_v16, %s10785_s26 }
 0x268   : > { %v2559_v3 = vpop.permute.xlu1 %2558 }
 0x269   : > { %v2557_v32 = vpop.permute.xlu0 %2556  ;;  %v2645_v51 = vsel %vm172_vm0, %v11853_v20, %v2559_v3  ;;  %v2405_v3 = vld [vmem:[#allocation2 + $0x12f] sm:$0xff] }
 0x26a   : > { %2283 = vrot.lane.b32.xlu1 %v11686_v5, %s10786_s27  ;;  %v2642_v15 = vsel %vm172_vm0, %v11849_v57, %v2557_v32  ;;  %v2404_v32 = vld [vmem:[#allocation2 + $0x127] sm:$0xff] }
 0x26b   : > { %2281 = vrot.lane.b32.xlu0 %v11653_v31, %s10786_s27  ;;  %v11905_v63 = vpack.c.bf16 %v2405_v3, %v2404_v32  ;;  %v2416_v32 = vld [vmem:[#allocation2 + $0x1e7] sm:$0xff] }
 0x26c   : > { %v2607_v48 = vpop.permute.xlu1 %2606 }
 0x26d   : > { %v2605_v47 = vpop.permute.xlu0 %2604  ;;  %v2687_v22 = vsel %vm598_vm1, %v2645_v51, %v2607_v48  ;;  %v11909_v48 = vpack.c.bf16 %v2407_v7, %v2406_v8  ;;  %v2419_v7 = vld [vmem:[#allocation2 + $0x20f] sm:$0xff] }
 0x26e   : > { %v2685_v6 = vsel %vm598_vm1, %v2642_v15, %v2605_v47  ;;  %2239 = vrot.lane.b32.xlu1 %v11698_v30, %s10785_s26 }
 0x26f   : > { %9952 = vmatprep.mubr.msk.bf16.mxu1 %vm982_vm2, %v2685_v6  ;;  %2237 = vrot.lane.b32.xlu0 %v11666_v43, %s10785_s26 }
 0x270   : > { %9953 = vmatmul.mubr.msk.bf16.gmra.mrb[40].mxu1 %vm982_vm2, %v2687_v22 }
 0x272   : > { %2287 = vrot.lane.b32.xlu1 %v11710_v62, %s10786_s27 }
 0x273   : > { %2285 = vrot.lane.b32.xlu0 %v11682_v21, %s10786_s27 }
 0x276   : > { %2243 = vrot.lane.b32.xlu1 %v11722_v17, %s10785_s26 }
 0x277   : > { %2241 = vrot.lane.b32.xlu0 %v11696_v37, %s10785_s26 }
 0x278   : > { %v2563_v38 = vpop.permute.xlu1 %2562 }
 0x279   : > { %v2561_v42 = vpop.permute.xlu0 %2560  ;;  %v2651_v46 = vsel %vm172_vm0, %v11881_v2, %v2563_v38 }
 0x27a   : > { %2291 = vrot.lane.b32.xlu1 %v11734_v27, %s10786_s27  ;;  %v2648_v39 = vsel %vm172_vm0, %v11877_v29, %v2561_v42 }
 0x27b   : > { %2289 = vrot.lane.b32.xlu0 %v11707_v41, %s10786_s27 }
 0x27c   : > { %v2611_v59 = vpop.permute.xlu1 %2610 }
 0x27d   : > { %v2609_v24 = vpop.permute.xlu0 %2608  ;;  %v2691_v50 = vsel %vm598_vm1, %v2651_v46, %v2611_v59 }
 0x27e   : > { %v2689_v49 = vsel %vm598_vm1, %v2648_v39, %v2609_v24  ;;  %2247 = vrot.lane.b32.xlu1 %v11746_v0, %s10785_s26  ;;  %v2415_v24 = vld [vmem:[#allocation2 + $0x1cf] sm:$0xff] }
 0x27f   : > { %9956 = vmatprep.mubr.msk.bf16.mxu1 %vm982_vm2, %v2689_v49  ;;  %2245 = vrot.lane.b32.xlu0 %v11720_v56, %s10785_s26  ;;  %v2412_v49 = vld [vmem:[#allocation2 + $0x1a7] sm:$0xff] }
 0x280   : > { %9957 = vmatmul.mubr.msk.bf16.gmra.mrb[44].mxu1 %vm982_vm2, %v2691_v50 }
 0x282   : > { %2295 = vrot.lane.b32.xlu1 %v11758_v25, %s10786_s27 }
 0x283   : > { %2293 = vrot.lane.b32.xlu0 %v11731_v33, %s10786_s27 }
 0x286   : > { %2251 = vrot.lane.b32.xlu1 %v11770_v36, %s10785_s26 }
 0x287   : > { %2249 = vrot.lane.b32.xlu0 %v11744_v9, %s10785_s26 }
 0x288   : > { %v2567_v26 = vpop.permute.xlu1 %2566 }
 0x289   : > { %v2565_v58 = vpop.permute.xlu0 %2564  ;;  %v2657_v6 = vsel %vm172_vm0, %v11909_v48, %v2567_v26 }
 0x28a   : > { %2299 = vrot.lane.b32.xlu1 %v11778_v18, %s10786_s27  ;;  %v2654_v47 = vsel %vm172_vm0, %v11905_v63, %v2565_v58 }
 0x28b   : > { %2297 = vrot.lane.b32.xlu0 %v11755_v35, %s10786_s27 }
 0x28c   : > { %v2615_v15 = vpop.permute.xlu1 %2614 }
 0x28d   : > { %v2613_v51 = vpop.permute.xlu0 %2612  ;;  %v2695_v38 = vsel %vm598_vm1, %v2657_v6, %v2615_v15 }
 0x28e   : > { %v2693_v22 = vsel %vm598_vm1, %v2654_v47, %v2613_v51  ;;  %3299 = vrot.lane.b32.xlu1 %v11614_v19, %s10785_s26  ;;  %v2062_v51 = vld [vmem:[#allocation2 + $0xf] sm:$0xff] }
 0x28f   : > { %9960 = vmatprep.mubr.msk.bf16.mxu1 %vm982_vm2, %v2693_v22  ;;  %3297 = vrot.lane.b32.xlu0 %v11586_v11, %s10785_s26  ;;  %v2410_v11 = vld [vmem:[#allocation2 + $0x187] sm:$0xff]  ;;  %v3216_v22 = vld [vmem:[#allocation2 + $0x230] sm:$0xff] }
 0x290   : > { %9961 = vmatmul.mubr.msk.bf16.gmra.mrb[48].mxu1 %vm982_vm2, %v2695_v38 }
 0x292   : > { %3347 = vrot.lane.b32.xlu1 %v11628_v13, %s10786_s27 }
 0x293   : > { %3345 = vrot.lane.b32.xlu0 %v11597_v4, %s10786_s27  ;;  %v11937_v4 = vpack.c.bf16 %v2411_v23, %v2410_v11  ;;  %v3263_v23 = vld [vmem:[#allocation2 + $0x229] sm:$0xff] }
 0x296   : > { %3303 = vrot.lane.b32.xlu1 %v11642_v40, %s10785_s26 }
 0x297   : > { %3301 = vrot.lane.b32.xlu0 %v11611_v52, %s10785_s26 }
 0x298   : > { %v2571_v19 = vpop.permute.xlu1 %2570 }
 0x299   : > { %v2569_v42 = vpop.permute.xlu0 %2568  ;;  %v2663_v59 = vsel %vm172_vm0, %v11937_v4, %v2571_v19 }
 0x29a   : > { %3351 = vrot.lane.b32.xlu1 %v11656_v34, %s10786_s27  ;;  %v2660_v52 = vsel %vm172_vm0, %v11933_v45, %v2569_v42  ;;  %v3264_v42 = vld [vmem:[#allocation2 + $0x231] sm:$0xff] }
 0x29b   : > { %3349 = vrot.lane.b32.xlu0 %v11625_v12, %s10786_s27 }
 0x29c   : > { %v2619_v13 = vpop.permute.xlu1 %2618 }
 0x29d   : > { %v2617_v40 = vpop.permute.xlu0 %2616  ;;  %v2699_v34 = vsel %vm598_vm1, %v2663_v59, %v2619_v13 }
 0x29e   : > { %v2697_v39 = vsel %vm598_vm1, %v2660_v52, %v2617_v40  ;;  %3307 = vrot.lane.b32.xlu1 %v11668_v1, %s10785_s26  ;;  %v2413_v1 = vld [vmem:[#allocation2 + $0x1af] sm:$0xff]  ;;  %v3280_v40 = vpack.c.bf16 %v3264_v42, %v3263_v23 }
 0x29f   : > { %9964 = vmatprep.mubr.msk.bf16.mxu1 %vm982_vm2, %v2697_v39  ;;  %3305 = vrot.lane.b32.xlu0 %v11639_v16, %s10785_s26  ;;  %v2414_v16 = vld [vmem:[#allocation2 + $0x1c7] sm:$0xff]  ;;  %v11961_v50 = vpack.c.bf16 %v2413_v1, %v2412_v49 }
 0x2a0   : > { %9965 = vmatmul.mubr.msk.bf16.gmra.mrb[52].mxu1 %vm982_vm2, %v2699_v34  ;;  %v10748_v39 = vld [vmem:[%s14026_s1 + $0x88] sm:$0xff]  }
 0x2a2   : > { %3355 = vrot.lane.b32.xlu1 %v11686_v5, %s10786_s27 }
 0x2a3   : > { %3353 = vrot.lane.b32.xlu0 %v11653_v31, %s10786_s27  ;;  %v11965_v31 = vpack.c.bf16 %v2415_v24, %v2414_v16 }
 0x2a6   : > { %3311 = vrot.lane.b32.xlu1 %v11698_v30, %s10785_s26 }
 0x2a7   : > { %3309 = vrot.lane.b32.xlu0 %v11666_v43, %s10785_s26 }
 0x2a8   : > { %v2575_v12 = vpop.permute.xlu1 %2574 }
 0x2a9   : > { %v2573_v46 = vpop.permute.xlu0 %2572  ;;  %v2669_v26 = vsel %vm172_vm0, %v11965_v31, %v2575_v12 }
 0x2aa   : > { %3359 = vrot.lane.b32.xlu1 %v11710_v62, %s10786_s27  ;;  %v2666_v43 = vsel %vm172_vm0, %v11961_v50, %v2573_v46 }
 0x2ab   : > { %3357 = vrot.lane.b32.xlu0 %v11682_v21, %s10786_s27 }
 0x2ac   : > { %v2623_v5 = vpop.permute.xlu1 %2622 }
 0x2ad   : > { %v2621_v30 = vpop.permute.xlu0 %2620  ;;  %v2703_v62 = vsel %vm598_vm1, %v2669_v26, %v2623_v5 }
 0x2ae   : > { %v2701_v3 = vsel %vm598_vm1, %v2666_v43, %v2621_v30  ;;  %3315 = vrot.lane.b32.xlu1 %v11722_v17, %s10785_s26  ;;  %v2417_v17 = vld [vmem:[#allocation2 + $0x1ef] sm:$0xff] }
 0x2af   : > { %9968 = vmatprep.mubr.msk.bf16.mxu1 %vm982_vm2, %v2701_v3  ;;  %3313 = vrot.lane.b32.xlu0 %v11696_v37, %s10785_s26  ;;  %v2418_v37 = vld [vmem:[#allocation2 + $0x207] sm:$0xff]  ;;  %v11989_v8 = vpack.c.bf16 %v2417_v17, %v2416_v32 }
 0x2b0   : > { %9969 = vmatmul.mubr.msk.bf16.gmra.mrb[56].mxu1 %vm982_vm2, %v2703_v62 }
 0x2b2   : > { %3363 = vrot.lane.b32.xlu1 %v11734_v27, %s10786_s27 }
 0x2b3   : > { %3361 = vrot.lane.b32.xlu0 %v11707_v41, %s10786_s27  ;;  %v11993_v41 = vpack.c.bf16 %v2419_v7, %v2418_v37 }
 0x2b6   : > { %3319 = vrot.lane.b32.xlu1 %v11746_v0, %s10785_s26 }
 0x2b7   : > { %3317 = vrot.lane.b32.xlu0 %v11720_v56, %s10785_s26 }
 0x2b8   : > { %v2579_v21 = vpop.permute.xlu1 %2578 }
 0x2b9   : > { %v2577_v58 = vpop.permute.xlu0 %2576  ;;  %v2675_v15 = vsel %vm172_vm0, %v11993_v41, %v2579_v21 }
 0x2ba   : > { %3367 = vrot.lane.b32.xlu1 %v11758_v25, %s10786_s27  ;;  %v2672_v56 = vsel %vm172_vm0, %v11989_v8, %v2577_v58  ;;  %v2061_v25 = vld [vmem:[#allocation2 + $0x7] sm:$0xff] }
 0x2bb   : > { %3365 = vrot.lane.b32.xlu0 %v11731_v33, %s10786_s27  ;;  %v3215_v33 = vld [vmem:[#allocation2 + $0x228] sm:$0xff]  ;;  %v2093_v19 = vpack.c.bf16 %v2062_v51, %v2061_v25 }
 0x2bc   : > { %v2627_v27 = vpop.permute.xlu1 %2626 }
 0x2bd   : > { %v2625_v0 = vpop.permute.xlu0 %2624  ;;  %v2707_v6 = vsel %vm598_vm1, %v2675_v15, %v2627_v27 }
 0x2be   : > { %v2705_v47 = vsel %vm598_vm1, %v2672_v56, %v2625_v0  ;;  %3323 = vrot.lane.b32.xlu1 %v11770_v36, %s10785_s26  ;;  %v3232_v36 = vpack.c.bf16 %v3216_v22, %v3215_v33 }
 0x2bf   : > { %3321 = vrot.lane.b32.xlu0 %v11744_v9, %s10785_s26  ;;  %9972 = vmatprep.mubr.msk.bf16.mxu1 %vm982_vm2, %v2705_v47 }
 0x2c0   : > { %v2224_v38 = vpop.permute.xlu1 %2223  ;;  %9973 = vmatmul.mubr.msk.bf16.gmra.mrb[60].mxu1 %vm982_vm2, %v2707_v6 }
 0x2c1   : > { %v2222_v60 = vpop.permute.xlu0 %2221  ;;  %v2306_v13 = vsel %vm172_vm0, %v11782_v54, %v2224_v38 }
 0x2c2   : > { %3371 = vrot.lane.b32.xlu1 %v11778_v18, %s10786_s27  ;;  %v2303_v9 = vsel %vm172_vm0, %v2093_v19, %v2222_v60  ;;  %v10747_v18 = vld [vmem:[%s14026_s1 + $0x80] sm:$0xff]  }
 0x2c3   : > { %3369 = vrot.lane.b32.xlu0 %v11755_v35, %s10786_s27 }
 0x2c4   : > { %v2272_v10 = vpop.permute.xlu1 %2271 }
 0x2c5   : > { %v2270_v11 = vpop.permute.xlu0 %2269  ;;  %v2352_v35 = vsel %vm598_vm1, %v2306_v13, %v2272_v10 }
 0x2c6   : > { %v2350_v52 = vsel %vm598_vm1, %v2303_v9, %v2270_v11  ;;  %3327 = vrot.lane.b32.xlu1 %v3232_v36, %s10785_s26 }
 0x2c7   : > { %3325 = vrot.lane.b32.xlu0 %v11768_v55, %s10785_s26  ;;  %9982 = vmatprep.mubr.msk.bf16.mxu1 %vm982_vm2, %v2350_v52 }
 0x2c8   : > { %v2228_v59 = vpop.permute.xlu1 %2227  ;;  %9983 = vmatmul.mubr.msk.bf16.vlgmr.msra.gmra.mrb[32].mxu1 %vm982_vm2, %v2352_v35 }
 0x2c9   : > { %10015 = vmatpush3.bf16.msra.mxu1 %v11814_v28  ;;  %v2226_v54 = vpop.permute.xlu0 %2225  ;;  %v2312_v28 = vsel %vm172_vm0, %v11821_v61, %v2228_v59 }
 0x2ca   : > { %3375 = vrot.lane.b32.xlu1 %v3280_v40, %s10786_s27  ;;  %10016 = vmatprep.subr.bf16.mxu1 %v10747_v18  ;;  %v2309_v55 = vsel %vm172_vm0, %v11786_v14, %v2226_v54 }
 0x2cb   : > { %3373 = vrot.lane.b32.xlu0 %v11776_v53, %s10786_s27 }
 0x2cc   : > { %v2276_v34 = vpop.permute.xlu1 %2275 }
 0x2cd   : > { %v2274_v12 = vpop.permute.xlu0 %2273  ;;  %10017 = vmatpush3.bf16.msra.mxu1 %v10747_v18  ;;  %v2356_v24 = vsel %vm598_vm1, %v2312_v28, %v2276_v34 }
 0x2ce   : > { %v2354_v1 = vsel %vm598_vm1, %v2309_v55, %v2274_v12  ;;  %10018 = vmatprep.subr.bf16.mxu1 %v10748_v39 }
 0x2cf   : > { %9986 = vmatprep.mubr.msk.bf16.mxu1 %vm982_vm2, %v2354_v1  ;;  %v3138_v1 = vld [vmem:[#allocation2 + $0x4f] sm:$0xff] }
 0x2d0   : > { %v2232_v46 = vpop.permute.xlu1 %2231  ;;  %9987 = vmatmul.mubr.msk.bf16.gmra.mrb[36].mxu1 %vm982_vm2, %v2356_v24 }
 0x2d1   : > { %v2230_v53 = vpop.permute.xlu0 %2229  ;;  %10019 = vmatpush3.bf16.msra.mxu1 %v10748_v39  ;;  %v2318_v5 = vsel %vm172_vm0, %v11849_v57, %v2232_v46  ;;  %v3137_v46 = vld [vmem:[#allocation2 + $0x47] sm:$0xff] }
 0x2d2   : > { %v2315_v14 = vsel %vm172_vm0, %v11825_v44, %v2230_v53  ;;  %v3169_v53 = vpack.c.bf16 %v3138_v1, %v3137_v46 }
 0x2d4   : > { %v2280_v49 = vpop.permute.xlu1 %2279 }
 0x2d5   : > { %v2278_v16 = vpop.permute.xlu0 %2277  ;;  %v2360_v30 = vsel %vm598_vm1, %v2318_v5, %v2280_v49 }
 0x2d6   : > { %v2358_v43 = vsel %vm598_vm1, %v2315_v14, %v2278_v16 }
 0x2d7   : > { %9990 = vmatprep.mubr.msk.bf16.mxu1 %vm982_vm2, %v2358_v43 }
 0x2d8   : > { %v2236_v26 = vpop.permute.xlu1 %2235  ;;  %9991 = vmatmul.mubr.msk.bf16.gmra.mrb[40].mxu1 %vm982_vm2, %v2360_v30 }
 0x2d9   : > { %v2234_v3 = vpop.permute.xlu0 %2233  ;;  %v2324_v44 = vsel %vm172_vm0, %v11877_v29, %v2236_v26 }
 0x2da   : > { %v2321_v21 = vsel %vm172_vm0, %v11853_v20, %v2234_v3  ;;  %v3142_v3 = vld [vmem:[#allocation2 + $0x8f] sm:$0xff] }
 0x2dc   : > { %v2284_v62 = vpop.permute.xlu1 %2283 }
 0x2dd   : > { %v2282_v17 = vpop.permute.xlu0 %2281  ;;  %v2364_v58 = vsel %vm598_vm1, %v2324_v44, %v2284_v62 }
 0x2de   : > { %v2362_v7 = vsel %vm598_vm1, %v2321_v21, %v2282_v17  ;;  %v3141_v21 = vld [vmem:[#allocation2 + $0x87] sm:$0xff] }
 0x2df   : > { %9994 = vmatprep.mubr.msk.bf16.mxu1 %vm982_vm2, %v2362_v7  ;;  %v3171_v17 = vpack.c.bf16 %v3142_v3, %v3141_v21  ;;  %v12160_v3 = vld [vmem:[%s14027_s2 + $0x1] ss:$0 sm:$0xff] }
 0x2e0   : > { %v2240_v32 = vpop.permute.xlu1 %2239  ;;  %9995 = vmatmul.mubr.msk.bf16.gmra.mrb[44].mxu1 %vm982_vm2, %v2364_v58 }
 0x2e1   : > { %v2238_v37 = vpop.permute.xlu0 %2237  ;;  %v2330_v15 = vsel %vm172_vm0, %v11905_v63, %v2240_v32 }
 0x2e2   : > { %v2327_v56 = vsel %vm172_vm0, %v11881_v2, %v2238_v37 }
 0x2e4   : > { %v2288_v27 = vpop.permute.xlu1 %2287 }
 0x2e5   : > { %v2286_v0 = vpop.permute.xlu0 %2285  ;;  %v2368_v25 = vsel %vm598_vm1, %v2330_v15, %v2288_v27 }
 0x2e6   : > { %v2366_v47 = vsel %vm598_vm1, %v2327_v56, %v2286_v0 }
 0x2e7   : > { %9998 = vmatprep.mubr.msk.bf16.mxu1 %vm982_vm2, %v2366_v47 }
 0x2e8   : > { %v2244_v51 = vpop.permute.xlu1 %2243  ;;  %9999 = vmatmul.mubr.msk.bf16.gmra.mrb[48].mxu1 %vm982_vm2, %v2368_v25 }
 0x2e9   : > { %v2242_v6 = vpop.permute.xlu0 %2241  ;;  %v2336_v19 = vsel %vm172_vm0, %v11933_v45, %v2244_v51 }
 0x2ea   : > { %v2333_v22 = vsel %vm172_vm0, %v11909_v48, %v2242_v6 }
 0x2ec   : > { %v2292_v33 = vpop.permute.xlu1 %2291 }
 0x2ed   : > { %v2290_v38 = vpop.permute.xlu0 %2289  ;;  %v2372_v36 = vsel %vm598_vm1, %v2336_v19, %v2292_v33 }
 0x2ee   : > { %v2370_v60 = vsel %vm598_vm1, %v2333_v22, %v2290_v38 }
 0x2ef   : > { %10002 = vmatprep.mubr.msk.bf16.mxu1 %vm982_vm2, %v2370_v60 }
 0x2f0   : > { %v2248_v23 = vpop.permute.xlu1 %2247  ;;  %10003 = vmatmul.mubr.msk.bf16.gmra.mrb[52].mxu1 %vm982_vm2, %v2372_v36 }
 0x2f1   : > { %v2246_v42 = vpop.permute.xlu0 %2245  ;;  %v2342_v13 = vsel %vm172_vm0, %v11961_v50, %v2248_v23 }
 0x2f2   : > { %v2339_v9 = vsel %vm172_vm0, %v11937_v4, %v2246_v42 }
 0x2f4   : > { %v2296_v10 = vpop.permute.xlu1 %2295 }
 0x2f5   : > { %v2294_v11 = vpop.permute.xlu0 %2293  ;;  %v2376_v40 = vsel %vm598_vm1, %v2342_v13, %v2296_v10 }
 0x2f6   : > { %v2374_v52 = vsel %vm598_vm1, %v2339_v9, %v2294_v11 }
 0x2f7   : > { %10006 = vmatprep.mubr.msk.bf16.mxu1 %vm982_vm2, %v2374_v52 }
 0x2f8   : > { %10007 = vmatmul.mubr.msk.bf16.gmra.mrb[56].mxu1 %vm982_vm2, %v2376_v40  ;;  %v2252_v18 = vpop.permute.xlu1 %2251 }
 0x2f9   : > { %v2250_v35 = vpop.permute.xlu0 %2249  ;;  %v2348_v34 = vsel %vm172_vm0, %v11989_v8, %v2252_v18 }
 0x2fa   : > { %v2345_v54 = vsel %vm172_vm0, %v11965_v31, %v2250_v35 }
 0x2fc   : > { %v2300_v59 = vpop.permute.xlu1 %2299 }
 0x2fd   : > { %v2298_v39 = vpop.permute.xlu0 %2297  ;;  %v2380_v12 = vsel %vm598_vm1, %v2348_v34, %v2300_v59 }
 0x2fe   : > { %v2378_v55 = vsel %vm598_vm1, %v2345_v54, %v2298_v39 }
 0x2ff   : > { %10010 = vmatprep.mubr.msk.bf16.mxu1 %vm982_vm2, %v2378_v55 }
 0x300   : > { %v3300_v28 = vpop.permute.xlu1 %3299  ;;  %10011 = vmatmul.mubr.msk.bf16.gmra.mrb[60].mxu1 %vm982_vm2, %v2380_v12 }
 0x301   : > { %v3298_v24 = vpop.permute.xlu0 %3297  ;;  %v3382_v5 = vsel %vm172_vm0, %v11821_v61, %v3300_v28  ;;  %v3168_v28 = vld [vmem:[#allocation2 + $0x22f] sm:$0xff] }
 0x302   : > { %v3379_v14 = vsel %vm172_vm0, %v3169_v53, %v3298_v24 }
 0x304   : > { %v3348_v49 = vpop.permute.xlu1 %3347 }
 0x305   : > { %v3346_v16 = vpop.permute.xlu0 %3345  ;;  %v3428_v30 = vsel %vm598_vm1, %v3382_v5, %v3348_v49 }
 0x306   : > { %v3426_v43 = vsel %vm598_vm1, %v3379_v14, %v3346_v16 }
 0x307   : > { %10020 = vmatprep.mubr.msk.bf16.mxu1 %vm982_vm2, %v3426_v43 }
 0x308   : > { %v3304_v26 = vpop.permute.xlu1 %3303  ;;  %10021 = vmatmul.mubr.msk.bf16.vlgmr.msra.gmra.mrb[32].mxu1 %vm982_vm2, %v3428_v30  ;;  %v10749_v30 = vld [vmem:[%s14026_s1 + $0xa8] sm:$0xff]  }
 0x309   : > { %v3302_v62 = vpop.permute.xlu0 %3301  ;;  %v3388_v61 = vsel %vm172_vm0, %v11849_v57, %v3304_v26  ;;  %10052 = vmatprep.subr.bf16.mxu0 %v10749_v30  ;;  %v10750_v26 = vld [vmem:[%s14026_s1 + $0xb0] sm:$0xff]  }
 0x30a   : > { %v3385_v7 = vsel %vm172_vm0, %v3171_v17, %v3302_v62  ;;  %10053 = vmatpush3.bf16.msra.mxu0 %v10749_v30 }
 0x30b   : > { %10054 = vmatprep.subr.bf16.mxu0 %v10750_v26 }
 0x30c   : > { %v3352_v44 = vpop.permute.xlu1 %3351 }
 0x30d   : > { %v3350_v58 = vpop.permute.xlu0 %3349  ;;  %v3432_v37 = vsel %vm598_vm1, %v3388_v61, %v3352_v44 }
 0x30e   : > { %v3430_v32 = vsel %vm598_vm1, %v3385_v7, %v3350_v58  ;;  %10055 = vmatpush3.bf16.msra.mxu0 %v10750_v26 }
 0x30f   : > { %10024 = vmatprep.mubr.msk.bf16.mxu1 %vm982_vm2, %v3430_v32 }
 0x310   : > { %v3308_v27 = vpop.permute.xlu1 %3307  ;;  %10025 = vmatmul.mubr.msk.bf16.gmra.mrb[36].mxu1 %vm982_vm2, %v3432_v37 }
 0x311   : > { %v3306_v56 = vpop.permute.xlu0 %3305  ;;  %v3394_v25 = vsel %vm172_vm0, %v11877_v29, %v3308_v27 }
 0x312   : > { %v3391_v15 = vsel %vm172_vm0, %v11853_v20, %v3306_v56 }
 0x314   : > { %v3356_v0 = vpop.permute.xlu1 %3355 }
 0x315   : > { %v3354_v47 = vpop.permute.xlu0 %3353  ;;  %v3436_v51 = vsel %vm598_vm1, %v3394_v25, %v3356_v0 }
 0x316   : > { %v3434_v57 = vsel %vm598_vm1, %v3391_v15, %v3354_v47 }
 0x317   : > { %10028 = vmatprep.mubr.msk.bf16.mxu1 %vm982_vm2, %v3434_v57 }
 0x318   : > { %v3312_v6 = vpop.permute.xlu1 %3311  ;;  %10029 = vmatmul.mubr.msk.bf16.gmra.mrb[40].mxu1 %vm982_vm2, %v3436_v51 }
 0x319   : > { %v3310_v33 = vpop.permute.xlu0 %3309  ;;  %v3400_v20 = vsel %vm172_vm0, %v11905_v63, %v3312_v6  ;;  %v12175_v6 = vld [vmem:[%s14026_s1 + $0x90] sm:$0xff]  }
 0x31a   : > { %v3397_v38 = vsel %vm172_vm0, %v11881_v2, %v3310_v33 }
 0x31c   : > { %v3360_v22 = vpop.permute.xlu1 %3359 }
 0x31d   : > { %v3358_v19 = vpop.permute.xlu0 %3357  ;;  %v3440_v60 = vsel %vm598_vm1, %v3400_v20, %v3360_v22 }
 0x31e   : > { %v3438_v29 = vsel %vm598_vm1, %v3397_v38, %v3358_v19 }
 0x31f   : > { %10032 = vmatprep.mubr.msk.bf16.mxu1 %vm982_vm2, %v3438_v29 }
 0x320   : > { %v3316_v36 = vpop.permute.xlu1 %3315  ;;  %10033 = vmatmul.mubr.msk.bf16.gmra.mrb[44].mxu1 %vm982_vm2, %v3440_v60 }
 0x321   : > { %v3314_v23 = vpop.permute.xlu0 %3313  ;;  %v3406_v2 = vsel %vm172_vm0, %v11933_v45, %v3316_v36 }
 0x322   : > { %v3403_v10 = vsel %vm172_vm0, %v11909_v48, %v3314_v23 }
 0x324   : > { %v3364_v42 = vpop.permute.xlu1 %3363 }
 0x325   : > { %v3362_v9 = vpop.permute.xlu0 %3361  ;;  %v3444_v11 = vsel %vm598_vm1, %v3406_v2, %v3364_v42 }
 0x326   : > { %v3442_v63 = vsel %vm598_vm1, %v3403_v10, %v3362_v9 }
 0x327   : > { %10036 = vmatprep.mubr.msk.bf16.mxu1 %vm982_vm2, %v3442_v63 }
 0x328   : > { %v3320_v13 = vpop.permute.xlu1 %3319  ;;  %10037 = vmatmul.mubr.msk.bf16.gmra.mrb[48].mxu1 %vm982_vm2, %v3444_v11 }
 0x329   : > { %v3318_v52 = vpop.permute.xlu0 %3317  ;;  %v3412_v48 = vsel %vm172_vm0, %v11961_v50, %v3320_v13 }
 0x32a   : > { %v3409_v18 = vsel %vm172_vm0, %v11937_v4, %v3318_v52  ;;  %v3167_v4 = vld [vmem:[#allocation2 + $0x227] sm:$0xff] }
 0x32b   : > { %v3184_v46 = vpack.c.bf16 %v3168_v28, %v3167_v4 }
 0x32c   : > { %v3368_v40 = vpop.permute.xlu1 %3367 }
 0x32d   : > { %v3366_v35 = vpop.permute.xlu0 %3365  ;;  %v3448_v59 = vsel %vm598_vm1, %v3412_v48, %v3368_v40 }
 0x32e   : > { %v3446_v45 = vsel %vm598_vm1, %v3409_v18, %v3366_v35 }
 0x32f   : > { %10040 = vmatprep.mubr.msk.bf16.mxu1 %vm982_vm2, %v3446_v45 }
 0x330   : > { %v3324_v54 = vpop.permute.xlu1 %3323  ;;  %10041 = vmatmul.mubr.msk.bf16.gmra.mrb[52].mxu1 %vm982_vm2, %v3448_v59 }
 0x331   : > { %v3322_v39 = vpop.permute.xlu0 %3321  ;;  %v3418_v50 = vsel %vm172_vm0, %v11989_v8, %v3324_v54 }
 0x332   : > { %v3415_v55 = vsel %vm172_vm0, %v11965_v31, %v3322_v39 }
 0x334   : > { %v3372_v34 = vpop.permute.xlu1 %3371 }
 0x335   : > { %v3370_v12 = vpop.permute.xlu0 %3369  ;;  %v3452_v24 = vsel %vm598_vm1, %v3418_v50, %v3372_v34 }
 0x336   : > { %v3450_v1 = vsel %vm598_vm1, %v3415_v55, %v3370_v12 }
 0x337   : > { %10044 = vmatprep.mubr.msk.bf16.mxu1 %vm982_vm2, %v3450_v1 }
 0x338   : > { %v3328_v53 = vpop.permute.xlu1 %3327  ;;  %10045 = vmatmul.mubr.msk.bf16.gmra.mrb[56].mxu1 %vm982_vm2, %v3452_v24 }
 0x339   : > { %v3326_v49 = vpop.permute.xlu0 %3325  ;;  %v3424_v14 = vsel %vm172_vm0, %v3184_v46, %v3328_v53 }
 0x33a   : > { %v3421_v16 = vsel %vm172_vm0, %v11993_v41, %v3326_v49  ;;  %v10751_v41 = vld [vmem:[%s14026_s1 + $0xb8] sm:$0xff]  }
 0x33b   : > { %10056 = vmatprep.subr.bf16.mxu0 %v10751_v41 }
 0x33c   : > { %v3376_v31 = vpop.permute.xlu1 %3375  ;;  %10057 = vmatpush3.bf16.msra.mxu0 %v10751_v41 }
 0x33d   : > { %v3374_v5 = vpop.permute.xlu0 %3373  ;;  %v3456_v43 = vsel %vm598_vm1, %v3424_v14, %v3376_v31  ;;  %10090 = vmatprep.subr.bf16.mxu0 %v12175_v6 }
 0x33e   : > { %v3454_v8 = vsel %vm598_vm1, %v3421_v16, %v3374_v5 }
 0x33f   : > { %10048 = vmatprep.mubr.msk.bf16.mxu1 %vm982_vm2, %v3454_v8 }
 0x340   : > { %10049 = vmatmul.mubr.msk.bf16.gmra.mrb[60].mxu1 %vm982_vm2, %v3456_v43 }
 0x3db   : > { %v10022_v62 = vpop.f32.mrb[32].mxu1 }
 0x3dc   : > { %v3717_v21 = vadd.f32 %v10022_v62, %v12160_v3  ;;  %v3548_v17 = vpop.f32.mrb[33].mxu1 }
 0x3dd   : > { %v3715_v44 = vadd.f32 %v12160_v3, %v3548_v17  ;;  %v10023_v7 = vpop.f32.mrb[34].mxu1 }
 0x3de   : > { %v3749_v58 = vmax.f32 %v3717_v21, 0.0  ;;  %v3718_v61 = vadd.f32 %v10023_v7, %v12160_v3  ;;  %v3551_v32 = vpop.f32.mrb[35].mxu1 }
 0x3df   : > { %v3747_v37 = vmax.f32 %v3715_v44, 0.0  ;;  %v3716_v27 = vadd.f32 %v12160_v3, %v3551_v32 }
 0x3e0   : > { %3781 = vst.msk [vmem:[#allocation2 + $0x48] sm:$0xff] %vm172_vm0, %v3749_v58  ;;  %v3750_v56 = vmax.f32 %v3718_v61, 0.0 }
 0x3e1   : > { %3779 = vst.msk [vmem:[#allocation2 + $0x28] sm:$0xff] %vm172_vm0, %v3747_v37  ;;  %v3748_v0 = vmax.f32 %v3716_v27, 0.0 }
 0x3e2   : > { %3782 = vst.msk [vmem:[#allocation2 + $0x50] sm:$0xff] %vm172_vm0, %v3750_v56 }
 0x3e3   : > { %3780 = vst.msk [vmem:[#allocation2 + $0x30] sm:$0xff] %vm172_vm0, %v3748_v0  ;;  %v10026_v15 = vpop.f32.mrb[36].mxu1 }
 0x3e4   : > { %v3721_v47 = vadd.f32 %v10026_v15, %v12160_v3  ;;  %v3564_v25 = vpop.f32.mrb[37].mxu1 }
 0x3e5   : > { %v3719_v57 = vadd.f32 %v12160_v3, %v3564_v25  ;;  %v10027_v51 = vpop.f32.mrb[38].mxu1 }
 0x3e6   : > { %v3753_v33 = vmax.f32 %v3721_v47, 0.0  ;;  %v3722_v22 = vadd.f32 %v10027_v51, %v12160_v3  ;;  %v3567_v38 = vpop.f32.mrb[39].mxu1 }
 0x3e7   : > { %v3751_v19 = vmax.f32 %v3719_v57, 0.0  ;;  %v3720_v20 = vadd.f32 %v12160_v3, %v3567_v38  ;;  %v4188_v36 = vld [vmem:[#allocation2 + $0x48] sm:$0xff] }
 0x3e8   : > { %3785 = vst.msk [vmem:[#allocation2 + $0x88] sm:$0xff] %vm172_vm0, %v3753_v33  ;;  %v3754_v29 = vmax.f32 %v3722_v22, 0.0  ;;  %v4186_v10 = vld [vmem:[#allocation2 + $0x28] sm:$0xff] }
 0x3e9   : > { %3783 = vst.msk [vmem:[#allocation2 + $0x68] sm:$0xff] %vm172_vm0, %v3751_v19  ;;  %v3752_v60 = vmax.f32 %v3720_v20, 0.0  ;;  %v4189_v23 = vld [vmem:[#allocation2 + $0x50] sm:$0xff] }
 0x3ea   : > { %3786 = vst.msk [vmem:[#allocation2 + $0x90] sm:$0xff] %vm172_vm0, %v3754_v29  ;;  %v12183_v42 = vpack.c.bf16 %v4189_v23, %v4188_v36  ;;  %v4187_v9 = vld [vmem:[#allocation2 + $0x30] sm:$0xff] }
 0x3eb   : > { %3784 = vst.msk [vmem:[#allocation2 + $0x70] sm:$0xff] %vm172_vm0, %v3752_v60  ;;  %v10030_v2 = vpop.f32.mrb[40].mxu1  ;;  %v12186_v63 = vpack.c.bf16 %v4187_v9, %v4186_v10  ;;  %v4236_v11 = vld [vmem:[#allocation2 + $0x49] sm:$0xff]  ;;  %v4237_v13 = vld [vmem:[#allocation2 + $0x51] sm:$0xff] }
 0x3ec   : > { %v3725_v52 = vadd.f32 %v10030_v2, %v12160_v3  ;;  %4300 = vrot.lane.b32.xlu1 %v12183_v42, %s10785_s26  ;;  %v3580_v40 = vpop.f32.mrb[41].mxu1  ;;  %v4234_v18 = vld [vmem:[#allocation2 + $0x29] sm:$0xff]  ;;  %v4235_v35 = vld [vmem:[#allocation2 + $0x31] sm:$0xff]  ;;  %v12195_v34 = vpack.c.bf16 %v4237_v13, %v4236_v11 }
 0x3ed   : > { %v3723_v48 = vadd.f32 %v12160_v3, %v3580_v40  ;;  %4298 = vrot.lane.b32.xlu0 %v12186_v63, %s10785_s26  ;;  %v10031_v45 = vpop.f32.mrb[42].mxu1  ;;  %v12198_v4 = vpack.c.bf16 %v4235_v35, %v4234_v18 }
 0x3ee   : > { %v3757_v59 = vmax.f32 %v3725_v52, 0.0  ;;  %v3726_v54 = vadd.f32 %v10031_v45, %v12160_v3  ;;  %v3583_v39 = vpop.f32.mrb[43].mxu1 }
 0x3ef   : > { %v3755_v55 = vmax.f32 %v3723_v48, 0.0  ;;  %v3724_v12 = vadd.f32 %v12160_v3, %v3583_v39  ;;  %v4192_v1 = vld [vmem:[#allocation2 + $0x88] sm:$0xff] }
 0x3f0   : > { %3789 = vst.msk [vmem:[#allocation2 + $0xc8] sm:$0xff] %vm172_vm0, %v3757_v59  ;;  %v3758_v28 = vmax.f32 %v3726_v54, 0.0  ;;  %4348 = vrot.lane.b32.xlu1 %v12195_v34, %s10786_s27  ;;  %v4190_v53 = vld [vmem:[#allocation2 + $0x68] sm:$0xff] }
 0x3f1   : > { %3787 = vst.msk [vmem:[#allocation2 + $0xa8] sm:$0xff] %vm172_vm0, %v3755_v55  ;;  %v3756_v50 = vmax.f32 %v3724_v12, 0.0  ;;  %4346 = vrot.lane.b32.xlu0 %v12198_v4, %s10786_s27  ;;  %v4193_v24 = vld [vmem:[#allocation2 + $0x90] sm:$0xff] }
 0x3f2   : > { %3790 = vst.msk [vmem:[#allocation2 + $0xd0] sm:$0xff] %vm172_vm0, %v3758_v28  ;;  %v12207_v46 = vpack.c.bf16 %v4193_v24, %v4192_v1  ;;  %v4191_v49 = vld [vmem:[#allocation2 + $0x70] sm:$0xff] }
 0x3f3   : > { %3788 = vst.msk [vmem:[#allocation2 + $0xb0] sm:$0xff] %vm172_vm0, %v3756_v50  ;;  %v10034_v14 = vpop.f32.mrb[44].mxu1  ;;  %v12210_v31 = vpack.c.bf16 %v4191_v49, %v4190_v53  ;;  %v4240_v16 = vld [vmem:[#allocation2 + $0x89] sm:$0xff]  ;;  %v4241_v5 = vld [vmem:[#allocation2 + $0x91] sm:$0xff] }
 0x3f4   : > { %v3729_v8 = vadd.f32 %v10034_v14, %v12160_v3  ;;  %4304 = vrot.lane.b32.xlu1 %v12207_v46, %s10785_s26  ;;  %v3596_v43 = vpop.f32.mrb[45].mxu1  ;;  %v4238_v30 = vld [vmem:[#allocation2 + $0x69] sm:$0xff]  ;;  %v4239_v26 = vld [vmem:[#allocation2 + $0x71] sm:$0xff]  ;;  %v12219_v7 = vpack.c.bf16 %v4241_v5, %v4240_v16 }
 0x3f5   : > { %v3727_v41 = vadd.f32 %v12160_v3, %v3596_v43  ;;  %4302 = vrot.lane.b32.xlu0 %v12210_v31, %s10785_s26  ;;  %v10035_v62 = vpop.f32.mrb[46].mxu1  ;;  %v12222_v32 = vpack.c.bf16 %v4239_v26, %v4238_v30 }
 0x3f6   : > { %v3761_v21 = vmax.f32 %v3729_v8, 0.0  ;;  %v3730_v17 = vadd.f32 %v10035_v62, %v12160_v3  ;;  %v3599_v44 = vpop.f32.mrb[47].mxu1 }
 0x3f7   : > { %v3759_v58 = vmax.f32 %v3727_v41, 0.0  ;;  %v3728_v61 = vadd.f32 %v12160_v3, %v3599_v44  ;;  %v4196_v56 = vld [vmem:[#allocation2 + $0xc8] sm:$0xff] }
 0x3f8   : > { %3793 = vst.msk [vmem:[#allocation2 + $0x108] sm:$0xff] %vm172_vm0, %v3761_v21  ;;  %v3762_v37 = vmax.f32 %v3730_v17, 0.0  ;;  %4352 = vrot.lane.b32.xlu1 %v12219_v7, %s10786_s27  ;;  %v4194_v47 = vld [vmem:[#allocation2 + $0xa8] sm:$0xff] }
 0x3f9   : > { %3791 = vst.msk [vmem:[#allocation2 + $0xe8] sm:$0xff] %vm172_vm0, %v3759_v58  ;;  %v3760_v27 = vmax.f32 %v3728_v61, 0.0  ;;  %4350 = vrot.lane.b32.xlu0 %v12222_v32, %s10786_s27  ;;  %v4197_v0 = vld [vmem:[#allocation2 + $0xd0] sm:$0xff] }
 0x3fa   : > { %3794 = vst.msk [vmem:[#allocation2 + $0x110] sm:$0xff] %vm172_vm0, %v3762_v37  ;;  %v12231_v15 = vpack.c.bf16 %v4197_v0, %v4196_v56  ;;  %v4195_v25 = vld [vmem:[#allocation2 + $0xb0] sm:$0xff] }
 0x3fb   : > { %3792 = vst.msk [vmem:[#allocation2 + $0xf0] sm:$0xff] %vm172_vm0, %v3760_v27  ;;  %v10038_v57 = vpop.f32.mrb[48].mxu1  ;;  %v12234_v51 = vpack.c.bf16 %v4195_v25, %v4194_v47  ;;  %v4244_v33 = vld [vmem:[#allocation2 + $0xc9] sm:$0xff]  ;;  %v4245_v22 = vld [vmem:[#allocation2 + $0xd1] sm:$0xff] }
 0x3fc   : > { %v3733_v38 = vadd.f32 %v10038_v57, %v12160_v3  ;;  %4308 = vrot.lane.b32.xlu1 %v12231_v15, %s10785_s26  ;;  %v3612_v19 = vpop.f32.mrb[49].mxu1  ;;  %v4242_v20 = vld [vmem:[#allocation2 + $0xa9] sm:$0xff]  ;;  %v4243_v29 = vld [vmem:[#allocation2 + $0xb1] sm:$0xff]  ;;  %v12243_v2 = vpack.c.bf16 %v4245_v22, %v4244_v33 }
 0x3fd   : > { %v3731_v60 = vadd.f32 %v12160_v3, %v3612_v19  ;;  %4306 = vrot.lane.b32.xlu0 %v12234_v51, %s10785_s26  ;;  %v10039_v36 = vpop.f32.mrb[50].mxu1  ;;  %v12246_v52 = vpack.c.bf16 %v4243_v29, %v4242_v20 }
 0x3fe   : > { %v3765_v23 = vmax.f32 %v3733_v38, 0.0  ;;  %v3734_v10 = vadd.f32 %v10039_v36, %v12160_v3  ;;  %v3615_v9 = vpop.f32.mrb[51].mxu1 }
 0x3ff   : > { %v3763_v11 = vmax.f32 %v3731_v60, 0.0  ;;  %v3732_v13 = vadd.f32 %v12160_v3, %v3615_v9  ;;  %v4200_v35 = vld [vmem:[#allocation2 + $0x108] sm:$0xff] }
 0x400   : > { %3797 = vst.msk [vmem:[#allocation2 + $0x148] sm:$0xff] %vm172_vm0, %v3765_v23  ;;  %v3766_v40 = vmax.f32 %v3734_v10, 0.0  ;;  %4356 = vrot.lane.b32.xlu1 %v12243_v2, %s10786_s27  ;;  %v4198_v59 = vld [vmem:[#allocation2 + $0xe8] sm:$0xff] }
 0x401   : > { %3795 = vst.msk [vmem:[#allocation2 + $0x128] sm:$0xff] %vm172_vm0, %v3763_v11  ;;  %v3764_v18 = vmax.f32 %v3732_v13, 0.0  ;;  %4354 = vrot.lane.b32.xlu0 %v12246_v52, %s10786_s27  ;;  %v4201_v48 = vld [vmem:[#allocation2 + $0x110] sm:$0xff] }
 0x402   : > { %3798 = vst.msk [vmem:[#allocation2 + $0x150] sm:$0xff] %vm172_vm0, %v3766_v40  ;;  %v12255_v45 = vpack.c.bf16 %v4201_v48, %v4200_v35  ;;  %v4199_v54 = vld [vmem:[#allocation2 + $0xf0] sm:$0xff] }
 0x403   : > { %3796 = vst.msk [vmem:[#allocation2 + $0x130] sm:$0xff] %vm172_vm0, %v3764_v18  ;;  %v10042_v39 = vpop.f32.mrb[52].mxu1  ;;  %v12258_v55 = vpack.c.bf16 %v4199_v54, %v4198_v59  ;;  %v4248_v12 = vld [vmem:[#allocation2 + $0x109] sm:$0xff]  ;;  %v4249_v28 = vld [vmem:[#allocation2 + $0x111] sm:$0xff] }
 0x404   : > { %v3737_v50 = vadd.f32 %v10042_v39, %v12160_v3  ;;  %4312 = vrot.lane.b32.xlu1 %v12255_v45, %s10785_s26  ;;  %v3628_v1 = vpop.f32.mrb[53].mxu1  ;;  %v4246_v24 = vld [vmem:[#allocation2 + $0xe9] sm:$0xff]  ;;  %v4247_v53 = vld [vmem:[#allocation2 + $0xf1] sm:$0xff]  ;;  %v12267_v43 = vpack.c.bf16 %v4249_v28, %v4248_v12 }
 0x405   : > { %v3735_v49 = vadd.f32 %v12160_v3, %v3628_v1  ;;  %4310 = vrot.lane.b32.xlu0 %v12258_v55, %s10785_s26  ;;  %v10043_v14 = vpop.f32.mrb[54].mxu1  ;;  %v12270_v41 = vpack.c.bf16 %v4247_v53, %v4246_v24 }
 0x406   : > { %v3769_v16 = vmax.f32 %v3737_v50, 0.0  ;;  %v3738_v5 = vadd.f32 %v10043_v14, %v12160_v3  ;;  %v3631_v8 = vpop.f32.mrb[55].mxu1 }
 0x407   : > { %v3767_v30 = vmax.f32 %v3735_v49, 0.0  ;;  %v3736_v26 = vadd.f32 %v12160_v3, %v3631_v8  ;;  %v4204_v17 = vld [vmem:[#allocation2 + $0x148] sm:$0xff] }
 0x408   : > { %3801 = vst.msk [vmem:[#allocation2 + $0x188] sm:$0xff] %vm172_vm0, %v3769_v16  ;;  %v3770_v62 = vmax.f32 %v3738_v5, 0.0  ;;  %4360 = vrot.lane.b32.xlu1 %v12267_v43, %s10786_s27  ;;  %v4202_v61 = vld [vmem:[#allocation2 + $0x128] sm:$0xff] }
 0x409   : > { %3799 = vst.msk [vmem:[#allocation2 + $0x168] sm:$0xff] %vm172_vm0, %v3767_v30  ;;  %v3768_v21 = vmax.f32 %v3736_v26, 0.0  ;;  %4358 = vrot.lane.b32.xlu0 %v12270_v41, %s10786_s27  ;;  %v4205_v44 = vld [vmem:[#allocation2 + $0x150] sm:$0xff] }
 0x40a   : > { %3802 = vst.msk [vmem:[#allocation2 + $0x190] sm:$0xff] %vm172_vm0, %v3770_v62  ;;  %v12279_v58 = vpack.c.bf16 %v4205_v44, %v4204_v17  ;;  %v4203_v37 = vld [vmem:[#allocation2 + $0x130] sm:$0xff] }
 0x40b   : > { %3800 = vst.msk [vmem:[#allocation2 + $0x170] sm:$0xff] %vm172_vm0, %v3768_v21  ;;  %v10046_v27 = vpop.f32.mrb[56].mxu1  ;;  %v12282_v56 = vpack.c.bf16 %v4203_v37, %v4202_v61  ;;  %v4252_v0 = vld [vmem:[#allocation2 + $0x149] sm:$0xff]  ;;  %v4253_v47 = vld [vmem:[#allocation2 + $0x151] sm:$0xff] }
 0x40c   : > { %v3741_v25 = vadd.f32 %v10046_v27, %v12160_v3  ;;  %4316 = vrot.lane.b32.xlu1 %v12279_v58, %s10785_s26  ;;  %v3644_v57 = vpop.f32.mrb[57].mxu1  ;;  %v4250_v33 = vld [vmem:[#allocation2 + $0x129] sm:$0xff]  ;;  %v4251_v22 = vld [vmem:[#allocation2 + $0x131] sm:$0xff]  ;;  %v12291_v36 = vpack.c.bf16 %v4253_v47, %v4252_v0 }
 0x40d   : > { %v3739_v38 = vadd.f32 %v12160_v3, %v3644_v57  ;;  %4314 = vrot.lane.b32.xlu0 %v12282_v56, %s10785_s26  ;;  %v10047_v19 = vpop.f32.mrb[58].mxu1  ;;  %v12294_v9 = vpack.c.bf16 %v4251_v22, %v4250_v33 }
 0x40e   : > { %v3773_v20 = vmax.f32 %v3741_v25, 0.0  ;;  %v3742_v29 = vadd.f32 %v10047_v19, %v12160_v3  ;;  %v3647_v60 = vpop.f32.mrb[59].mxu1 }
 0x40f   : > { %v3771_v23 = vmax.f32 %v3739_v38, 0.0  ;;  %v3740_v10 = vadd.f32 %v12160_v3, %v3647_v60  ;;  %v4208_v40 = vld [vmem:[#allocation2 + $0x188] sm:$0xff] }
 0x410   : > { %3805 = vst.msk [vmem:[#allocation2 + $0x1c8] sm:$0xff] %vm172_vm0, %v3773_v20  ;;  %v3774_v11 = vmax.f32 %v3742_v29, 0.0  ;;  %4364 = vrot.lane.b32.xlu1 %v12291_v36, %s10786_s27  ;;  %v4206_v48 = vld [vmem:[#allocation2 + $0x168] sm:$0xff] }
 0x411   : > { %3803 = vst.msk [vmem:[#allocation2 + $0x1a8] sm:$0xff] %vm172_vm0, %v3771_v23  ;;  %v3772_v13 = vmax.f32 %v3740_v10, 0.0  ;;  %4362 = vrot.lane.b32.xlu0 %v12294_v9, %s10786_s27  ;;  %v4209_v18 = vld [vmem:[#allocation2 + $0x190] sm:$0xff] }
 0x412   : > { %3806 = vst.msk [vmem:[#allocation2 + $0x1d0] sm:$0xff] %vm172_vm0, %v3774_v11  ;;  %v12303_v35 = vpack.c.bf16 %v4209_v18, %v4208_v40  ;;  %v4207_v59 = vld [vmem:[#allocation2 + $0x170] sm:$0xff] }
 0x413   : > { %3804 = vst.msk [vmem:[#allocation2 + $0x1b0] sm:$0xff] %vm172_vm0, %v3772_v13  ;;  %v10050_v54 = vpop.f32.mrb[60].mxu1  ;;  %v12306_v39 = vpack.c.bf16 %v4207_v59, %v4206_v48  ;;  %v4256_v12 = vld [vmem:[#allocation2 + $0x189] sm:$0xff]  ;;  %v4257_v28 = vld [vmem:[#allocation2 + $0x191] sm:$0xff] }
 0x414   : > { %v3745_v50 = vadd.f32 %v10050_v54, %v12160_v3  ;;  %4320 = vrot.lane.b32.xlu1 %v12303_v35, %s10785_s26  ;;  %v3660_v1 = vpop.f32.mrb[61].mxu1  ;;  %v4254_v24 = vld [vmem:[#allocation2 + $0x169] sm:$0xff]  ;;  %v4255_v53 = vld [vmem:[#allocation2 + $0x171] sm:$0xff]  ;;  %v12315_v30 = vpack.c.bf16 %v4257_v28, %v4256_v12 }
 0x415   : > { %v3743_v49 = vadd.f32 %v12160_v3, %v3660_v1  ;;  %4318 = vrot.lane.b32.xlu0 %v12306_v39, %s10785_s26  ;;  %v10051_v14 = vpop.f32.mrb[62].mxu1  ;;  %v12318_v21 = vpack.c.bf16 %v4255_v53, %v4254_v24  ;;  %v3859_v54 = vld [vmem:[#allocation2 + $0x8] sm:$0xff]  ;;  %v3860_v12 = vld [vmem:[#allocation2 + $0x10] sm:$0xff] }
 0x416   : > { %v3777_v16 = vmax.f32 %v3745_v50, 0.0  ;;  %v3746_v5 = vadd.f32 %v10051_v14, %v12160_v3  ;;  %v3663_v8 = vpop.f32.mrb[63].mxu1  ;;  %v3891_v50 = vpack.c.bf16 %v3860_v12, %v3859_v54  ;;  %v3907_v1 = vld [vmem:[#allocation2 + $0x9] sm:$0xff]  ;;  %v3908_v24 = vld [vmem:[#allocation2 + $0x11] sm:$0xff]  ;;  %v12455_v12 = vld [vmem:[%s14026_s1 + $0xc0] sm:$0xff]  }
 0x417   : > { %v3775_v26 = vmax.f32 %v3743_v49, 0.0  ;;  %v3744_v62 = vadd.f32 %v12160_v3, %v3663_v8  ;;  %v4212_v61 = vld [vmem:[#allocation2 + $0x1c8] sm:$0xff]  ;;  %v3939_v53 = vpack.c.bf16 %v3908_v24, %v3907_v1 }
 0x418   : > { %3809 = vst.msk [vmem:[#allocation2 + $0x208] sm:$0xff] %vm172_vm0, %v3777_v16  ;;  %v3778_v17 = vmax.f32 %v3746_v5, 0.0  ;;  %4368 = vrot.lane.b32.xlu1 %v12315_v30, %s10786_s27  ;;  %v4210_v3 = vld [vmem:[#allocation2 + $0x1a8] sm:$0xff] }
 0x419   : > { %3807 = vst.msk [vmem:[#allocation2 + $0x1e8] sm:$0xff] %vm172_vm0, %v3775_v26  ;;  %v3776_v44 = vmax.f32 %v3744_v62, 0.0  ;;  %4366 = vrot.lane.b32.xlu0 %v12318_v21, %s10786_s27  ;;  %v4213_v37 = vld [vmem:[#allocation2 + $0x1d0] sm:$0xff]  ;;  %v4138_v16 = vld [vmem:[#allocation2 + $0x27] sm:$0xff] }
 0x41a   : > { %3810 = vst.msk [vmem:[#allocation2 + $0x210] sm:$0xff] %vm172_vm0, %v3778_v17  ;;  %v12327_v27 = vpack.c.bf16 %v4213_v37, %v4212_v61  ;;  %v4211_v0 = vld [vmem:[#allocation2 + $0x1b0] sm:$0xff]  ;;  %v4140_v5 = vld [vmem:[#allocation2 + $0x47] sm:$0xff] }
 0x41b   : > { %3808 = vst.msk [vmem:[#allocation2 + $0x1f0] sm:$0xff] %vm172_vm0, %v3776_v44  ;;  %v12330_v47 = vpack.c.bf16 %v4211_v0, %v4210_v3  ;;  %v4260_v25 = vld [vmem:[#allocation2 + $0x1c9] sm:$0xff]  ;;  %v4261_v57 = vld [vmem:[#allocation2 + $0x1d1] sm:$0xff] }
 0x41c   : > { %4324 = vrot.lane.b32.xlu1 %v12327_v27, %s10785_s26  ;;  %v4258_v33 = vld [vmem:[#allocation2 + $0x1a9] sm:$0xff]  ;;  %v4259_v22 = vld [vmem:[#allocation2 + $0x1b1] sm:$0xff]  ;;  %v12336_v38 = vpack.c.bf16 %v4261_v57, %v4260_v25 }
 0x41d   : > { %4322 = vrot.lane.b32.xlu0 %v12330_v47, %s10785_s26  ;;  %v12338_v19 = vpack.c.bf16 %v4259_v22, %v4258_v33  ;;  %v4141_v49 = vld [vmem:[#allocation2 + $0x4f] sm:$0xff]  ;;  %v10753_v3 = vld [vmem:[%s14026_s1 + $0x98] sm:$0xff]  }
 0x41e   : > { %v12416_v26 = vpack.c.bf16 %v4141_v49, %v4140_v5  ;;  %v4143_v57 = vld [vmem:[#allocation2 + $0x6f] sm:$0xff] }
 0x41f   : > { %v4216_v20 = vld [vmem:[#allocation2 + $0x208] sm:$0xff] }
 0x420   : > { %4372 = vrot.lane.b32.xlu1 %v12336_v38, %s10786_s27  ;;  %v4214_v23 = vld [vmem:[#allocation2 + $0x1e8] sm:$0xff] }
 0x421   : > { %4370 = vrot.lane.b32.xlu0 %v12338_v19, %s10786_s27  ;;  %v4217_v29 = vld [vmem:[#allocation2 + $0x210] sm:$0xff] }
 0x422   : > { %v12344_v60 = vpack.c.bf16 %v4217_v29, %v4216_v20  ;;  %v4215_v10 = vld [vmem:[#allocation2 + $0x1f0] sm:$0xff]  ;;  %v4142_v20 = vld [vmem:[#allocation2 + $0x67] sm:$0xff] }
 0x423   : > { %v12346_v11 = vpack.c.bf16 %v4215_v10, %v4214_v23  ;;  %v4264_v13 = vld [vmem:[#allocation2 + $0x209] sm:$0xff]  ;;  %v4265_v40 = vld [vmem:[#allocation2 + $0x211] sm:$0xff]  ;;  %v10754_v29 = vld [vmem:[%s14026_s1 + $0xa0] sm:$0xff]   ;;  %v12439_v10 = vpack.c.bf16 %v4143_v57, %v4142_v20 }
 0x424   : > { %4328 = vrot.lane.b32.xlu1 %v12344_v60, %s10785_s26  ;;  %v4262_v18 = vld [vmem:[#allocation2 + $0x1e9] sm:$0xff]  ;;  %v4263_v48 = vld [vmem:[#allocation2 + $0x1f1] sm:$0xff]  ;;  %v12352_v59 = vpack.c.bf16 %v4265_v40, %v4264_v13 }
 0x425   : > { %4326 = vrot.lane.b32.xlu0 %v12346_v11, %s10785_s26  ;;  %v12354_v28 = vpack.c.bf16 %v4263_v48, %v4262_v18  ;;  %v4145_v33 = vld [vmem:[#allocation2 + $0x8f] sm:$0xff]  ;;  %v4144_v23 = vld [vmem:[#allocation2 + $0x87] sm:$0xff] }
 0x426   : > { %v12443_v13 = vpack.c.bf16 %v4145_v33, %v4144_v23  ;;  %v4147_v24 = vld [vmem:[#allocation2 + $0xaf] sm:$0xff] }
 0x427   : > { %v4157_v23 = vld [vmem:[#allocation2 + $0x14f] sm:$0xff] }
 0x428   : > { %4376 = vrot.lane.b32.xlu1 %v12352_v59, %s10786_s27 }
 0x429   : > { %4374 = vrot.lane.b32.xlu0 %v12354_v28, %s10786_s27 }
 0x42c   : > { %3973 = vrot.lane.b32.xlu1 %v12186_v63, %s10785_s26 }
 0x42d   : > { %3971 = vrot.lane.b32.xlu0 %v3891_v50, %s10785_s26 }
 0x430   : > { %4021 = vrot.lane.b32.xlu1 %v12198_v4, %s10786_s27  ;;  %v4139_v4 = vld [vmem:[#allocation2 + $0x2f] sm:$0xff] }
 0x431   : > { %4019 = vrot.lane.b32.xlu0 %v3939_v53, %s10786_s27  ;;  %v12412_v8 = vpack.c.bf16 %v4139_v4, %v4138_v16  ;;  %v4149_v53 = vld [vmem:[#allocation2 + $0xcf] sm:$0xff]  ;;  %v4148_v4 = vld [vmem:[#allocation2 + $0xc7] sm:$0xff] }
 0x434   : > { %3977 = vrot.lane.b32.xlu1 %v12210_v31, %s10785_s26 }
 0x435   : > { %3975 = vrot.lane.b32.xlu0 %v12183_v42, %s10785_s26 }
 0x438   : > { %4025 = vrot.lane.b32.xlu1 %v12222_v32, %s10786_s27 }
 0x439   : > { %4023 = vrot.lane.b32.xlu0 %v12195_v34, %s10786_s27 }
 0x43c   : > { %3981 = vrot.lane.b32.xlu1 %v12234_v51, %s10785_s26 }
 0x43d   : > { %3979 = vrot.lane.b32.xlu0 %v12207_v46, %s10785_s26 }
 0x440   : > { %4029 = vrot.lane.b32.xlu1 %v12246_v52, %s10786_s27 }
 0x441   : > { %4027 = vrot.lane.b32.xlu0 %v12219_v7, %s10786_s27 }
 0x444   : > { %3985 = vrot.lane.b32.xlu1 %v12258_v55, %s10785_s26 }
 0x445   : > { %3983 = vrot.lane.b32.xlu0 %v12231_v15, %s10785_s26 }
 0x448   : > { %4033 = vrot.lane.b32.xlu1 %v12270_v41, %s10786_s27 }
 0x449   : > { %4031 = vrot.lane.b32.xlu0 %v12243_v2, %s10786_s27 }
 0x44c   : > { %3989 = vrot.lane.b32.xlu1 %v12282_v56, %s10785_s26 }
 0x44d   : > { %3987 = vrot.lane.b32.xlu0 %v12255_v45, %s10785_s26 }
 0x450   : > { %4037 = vrot.lane.b32.xlu1 %v12294_v9, %s10786_s27 }
 0x451   : > { %4035 = vrot.lane.b32.xlu0 %v12267_v43, %s10786_s27 }
 0x454   : > { %3993 = vrot.lane.b32.xlu1 %v12306_v39, %s10785_s26 }
 0x455   : > { %3991 = vrot.lane.b32.xlu0 %v12279_v58, %s10785_s26 }
 0x458   : > { %4041 = vrot.lane.b32.xlu1 %v12318_v21, %s10786_s27 }
 0x459   : > { %4039 = vrot.lane.b32.xlu0 %v12291_v36, %s10786_s27 }
 0x45c   : > { %3997 = vrot.lane.b32.xlu1 %v12330_v47, %s10785_s26 }
 0x45d   : > { %3995 = vrot.lane.b32.xlu0 %v12303_v35, %s10785_s26 }
 0x45e   : > { %v4301_v63 = vpop.permute.xlu1 %4300 }
 0x45f   : > { %v4299_v14 = vpop.permute.xlu0 %4298  ;;  %v4383_v61 = vsel %vm172_vm0, %v12416_v26, %v4301_v63 }
 0x460   : > { %4045 = vrot.lane.b32.xlu1 %v12338_v19, %s10786_s27  ;;  %v4380_v17 = vsel %vm172_vm0, %v12412_v8, %v4299_v14 }
 0x461   : > { %4043 = vrot.lane.b32.xlu0 %v12315_v30, %s10786_s27 }
 0x462   : > { %v4349_v62 = vpop.permute.xlu1 %4348 }
 0x463   : > { %v4347_v44 = vpop.permute.xlu0 %4346  ;;  %v4429_v0 = vsel %vm598_vm1, %v4383_v61, %v4349_v62  ;;  %v4153_v61 = vld [vmem:[#allocation2 + $0x10f] sm:$0xff] }
 0x464   : > { %v4427_v37 = vsel %vm598_vm1, %v4380_v17, %v4347_v44  ;;  %4001 = vrot.lane.b32.xlu1 %v12346_v11, %s10785_s26  ;;  %v4151_v44 = vld [vmem:[#allocation2 + $0xef] sm:$0xff] }
 0x465   : > { %10058 = vmatprep.mubr.msk.bf16.mxu0 %vm982_vm2, %v4427_v37  ;;  %3999 = vrot.lane.b32.xlu0 %v12327_v27, %s10785_s26 }
 0x466   : > { %10059 = vmatmul.mubr.msk.bf16.vlgmr.msra.gmra.mrb[32].mxu0 %vm982_vm2, %v4429_v0  ;;  %v4305_v25 = vpop.permute.xlu1 %4304  ;;  %v4152_v0 = vld [vmem:[#allocation2 + $0x107] sm:$0xff] }
 0x467   : > { %10091 = vmatpush3.bf16.msra.mxu0 %v12175_v6  ;;  %v4303_v22 = vpop.permute.xlu0 %4302  ;;  %v4389_v48 = vsel %vm172_vm0, %v12443_v13, %v4305_v25 }
 0x468   : > { %4049 = vrot.lane.b32.xlu1 %v12354_v28, %s10786_s27  ;;  %10092 = vmatprep.subr.bf16.mxu0 %v10753_v3  ;;  %v4386_v40 = vsel %vm172_vm0, %v12439_v10, %v4303_v22 }
 0x469   : > { %4047 = vrot.lane.b32.xlu0 %v12336_v38, %s10786_s27 }
 0x46a   : > { %v4353_v6 = vpop.permute.xlu1 %4352 }
 0x46b   : > { %v4351_v18 = vpop.permute.xlu0 %4350  ;;  %10093 = vmatpush3.bf16.msra.mxu0 %v10753_v3  ;;  %v4433_v50 = vsel %vm598_vm1, %v4389_v48, %v4353_v6  ;;  %v4150_v3 = vld [vmem:[#allocation2 + $0xe7] sm:$0xff] }
 0x46c   : > { %v4431_v54 = vsel %vm598_vm1, %v4386_v40, %v4351_v18  ;;  %5049 = vrot.lane.b32.xlu1 %v12210_v31, %s10785_s26  ;;  %10094 = vmatprep.subr.bf16.mxu0 %v10754_v29  ;;  %v4146_v31 = vld [vmem:[#allocation2 + $0xa7] sm:$0xff]  ;;  %v12485_v25 = vpack.c.bf16 %v4151_v44, %v4150_v3  ;;  %v4165_v44 = vld [vmem:[#allocation2 + $0x1cf] sm:$0xff] }
 0x46d   : > { %10062 = vmatprep.mubr.msk.bf16.mxu0 %vm982_vm2, %v4431_v54  ;;  %5047 = vrot.lane.b32.xlu0 %v12183_v42, %s10785_s26  ;;  %v12465_v49 = vpack.c.bf16 %v4147_v24, %v4146_v31  ;;  %v12469_v42 = vpack.c.bf16 %v4149_v53, %v4148_v4  ;;  %v4154_v40 = vld [vmem:[#allocation2 + $0x127] sm:$0xff]  ;;  %v4159_v53 = vld [vmem:[#allocation2 + $0x16f] sm:$0xff] }
 0x46e   : > { %10063 = vmatmul.mubr.msk.bf16.gmra.mrb[36].mxu0 %vm982_vm2, %v4433_v50  ;;  %v4309_v1 = vpop.permute.xlu1 %4308  ;;  %v4156_v18 = vld [vmem:[#allocation2 + $0x147] sm:$0xff] }
 0x46f   : > { %v4307_v63 = vpop.permute.xlu0 %4306  ;;  %10095 = vmatpush3.bf16.msra.mxu0 %v10754_v29  ;;  %v4395_v62 = vsel %vm172_vm0, %v12469_v42, %v4309_v1  ;;  %v4155_v29 = vld [vmem:[#allocation2 + $0x12f] sm:$0xff]  ;;  %v4158_v4 = vld [vmem:[#allocation2 + $0x167] sm:$0xff] }
 0x470   : > { %5097 = vrot.lane.b32.xlu1 %v12222_v32, %s10786_s27  ;;  %10128 = vmatprep.subr.bf16.mxu0 %v12455_v12  ;;  %v4392_v16 = vsel %vm172_vm0, %v12465_v49, %v4307_v63  ;;  %v12505_v48 = vpack.c.bf16 %v4155_v29, %v4154_v40  ;;  %v4161_v63 = vld [vmem:[#allocation2 + $0x18f] sm:$0xff]  ;;  %v4164_v3 = vld [vmem:[#allocation2 + $0x1c7] sm:$0xff] }
 0x471   : > { %5095 = vrot.lane.b32.xlu0 %v12195_v34, %s10786_s27  ;;  %v4166_v29 = vld [vmem:[#allocation2 + $0x1e7] sm:$0xff] }
 0x472   : > { %v4357_v14 = vpop.permute.xlu1 %4356 }
 0x473   : > { %v4355_v5 = vpop.permute.xlu0 %4354  ;;  %v4437_v17 = vsel %vm598_vm1, %v4395_v62, %v4357_v14  ;;  %v4160_v14 = vld [vmem:[#allocation2 + $0x187] sm:$0xff] }
 0x474   : > { %v4435_v32 = vsel %vm598_vm1, %v4392_v16, %v4355_v5  ;;  %5053 = vrot.lane.b32.xlu1 %v12234_v51, %s10785_s26  ;;  %v12489_v51 = vpack.c.bf16 %v4153_v61, %v4152_v0  ;;  %v12525_v16 = vpack.c.bf16 %v4159_v53, %v4158_v4 }
 0x475   : > { %10066 = vmatprep.mubr.msk.bf16.mxu0 %vm982_vm2, %v4435_v32  ;;  %5051 = vrot.lane.b32.xlu0 %v12207_v46, %s10785_s26 }
 0x476   : > { %10067 = vmatmul.mubr.msk.bf16.gmra.mrb[40].mxu0 %vm982_vm2, %v4437_v17  ;;  %v4313_v34 = vpop.permute.xlu1 %4312 }
 0x477   : > { %v4311_v37 = vpop.permute.xlu0 %4310  ;;  %v4401_v22 = vsel %vm172_vm0, %v12489_v51, %v4313_v34  ;;  %v4163_v34 = vld [vmem:[#allocation2 + $0x1af] sm:$0xff] }
 0x478   : > { %5101 = vrot.lane.b32.xlu1 %v12246_v52, %s10786_s27  ;;  %v4398_v46 = vsel %vm172_vm0, %v12485_v25, %v4311_v37  ;;  %v4162_v37 = vld [vmem:[#allocation2 + $0x1a7] sm:$0xff] }
 0x479   : > { %5099 = vrot.lane.b32.xlu0 %v12219_v7, %s10786_s27  ;;  %v12545_v0 = vpack.c.bf16 %v4163_v34, %v4162_v37 }
 0x47a   : > { %v4361_v57 = vpop.permute.xlu1 %4360 }
 0x47b   : > { %v4359_v33 = vpop.permute.xlu0 %4358  ;;  %v4441_v52 = vsel %vm598_vm1, %v4401_v22, %v4361_v57 }
 0x47c   : > { %v4439_v20 = vsel %vm598_vm1, %v4398_v46, %v4359_v33  ;;  %5057 = vrot.lane.b32.xlu1 %v12258_v55, %s10785_s26  ;;  %v12509_v55 = vpack.c.bf16 %v4157_v23, %v4156_v18  ;;  %v4168_v23 = vld [vmem:[#allocation2 + $0x207] sm:$0xff] }
 0x47d   : > { %10070 = vmatprep.mubr.msk.bf16.mxu0 %vm982_vm2, %v4439_v20  ;;  %5055 = vrot.lane.b32.xlu0 %v12231_v15, %s10785_s26  ;;  %v4167_v20 = vld [vmem:[#allocation2 + $0x1ef] sm:$0xff] }
 0x47e   : > { %10071 = vmatmul.mubr.msk.bf16.gmra.mrb[44].mxu0 %vm982_vm2, %v4441_v52  ;;  %v4317_v7 = vpop.permute.xlu1 %4316  ;;  %v4169_v52 = vld [vmem:[#allocation2 + $0x20f] sm:$0xff] }
 0x47f   : > { %v4315_v6 = vpop.permute.xlu0 %4314  ;;  %v4407_v1 = vsel %vm172_vm0, %v12509_v55, %v4317_v7 }
 0x480   : > { %5105 = vrot.lane.b32.xlu1 %v12270_v41, %s10786_s27  ;;  %v4404_v15 = vsel %vm172_vm0, %v12505_v48, %v4315_v6  ;;  %v12565_v6 = vpack.c.bf16 %v4167_v20, %v4166_v29 }
 0x481   : > { %5103 = vrot.lane.b32.xlu0 %v12243_v2, %s10786_s27 }
 0x482   : > { %v4365_v54 = vpop.permute.xlu1 %4364 }
 0x483   : > { %v4363_v50 = vpop.permute.xlu0 %4362  ;;  %v4445_v41 = vsel %vm598_vm1, %v4407_v1, %v4365_v54 }
 0x484   : > { %v4443_v24 = vsel %vm598_vm1, %v4404_v15, %v4363_v50  ;;  %5061 = vrot.lane.b32.xlu1 %v12282_v56, %s10785_s26  ;;  %v12529_v56 = vpack.c.bf16 %v4161_v63, %v4160_v14  ;;  %v3812_v50 = vld [vmem:[#allocation2 + $0xf] sm:$0xff] }
 0x485   : > { %10074 = vmatprep.mubr.msk.bf16.mxu0 %vm982_vm2, %v4443_v24  ;;  %5059 = vrot.lane.b32.xlu0 %v12255_v45, %s10785_s26  ;;  %v4966_v24 = vld [vmem:[#allocation2 + $0x230] sm:$0xff] }
 0x486   : > { %10075 = vmatmul.mubr.msk.bf16.gmra.mrb[48].mxu0 %vm982_vm2, %v4445_v41  ;;  %v4321_v2 = vpop.permute.xlu1 %4320  ;;  %v5013_v63 = vld [vmem:[#allocation2 + $0x229] sm:$0xff] }
 0x487   : > { %v4319_v31 = vpop.permute.xlu0 %4318  ;;  %v4413_v32 = vsel %vm172_vm0, %v12529_v56, %v4321_v2 }
 0x488   : > { %5109 = vrot.lane.b32.xlu1 %v12294_v9, %s10786_s27  ;;  %v4410_v45 = vsel %vm172_vm0, %v12525_v16, %v4319_v31  ;;  %v5014_v31 = vld [vmem:[#allocation2 + $0x231] sm:$0xff] }
 0x489   : > { %5107 = vrot.lane.b32.xlu0 %v12267_v43, %s10786_s27 }
 0x48a   : > { %v4369_v5 = vpop.permute.xlu1 %4368 }
 0x48b   : > { %v4367_v62 = vpop.permute.xlu0 %4366  ;;  %v4449_v9 = vsel %vm598_vm1, %v4413_v32, %v4369_v5 }
 0x48c   : > { %v4447_v17 = vsel %vm598_vm1, %v4410_v45, %v4367_v62  ;;  %5065 = vrot.lane.b32.xlu1 %v12306_v39, %s10785_s26  ;;  %v12549_v39 = vpack.c.bf16 %v4165_v44, %v4164_v3  ;;  %v5030_v62 = vpack.c.bf16 %v5014_v31, %v5013_v63 }
 0x48d   : > { %10078 = vmatprep.mubr.msk.bf16.mxu0 %vm982_vm2, %v4447_v17  ;;  %5063 = vrot.lane.b32.xlu0 %v12279_v58, %s10785_s26  ;;  %v10757_v17 = vld [vmem:[%s14026_s1 + $0xd0] sm:$0xff]  }
 0x48e   : > { %10079 = vmatmul.mubr.msk.bf16.gmra.mrb[52].mxu0 %vm982_vm2, %v4449_v9  ;;  %v4325_v43 = vpop.permute.xlu1 %4324 }
 0x48f   : > { %v4323_v61 = vpop.permute.xlu0 %4322  ;;  %v4419_v33 = vsel %vm172_vm0, %v12549_v39, %v4325_v43 }
 0x490   : > { %5113 = vrot.lane.b32.xlu1 %v12318_v21, %s10786_s27  ;;  %v4416_v58 = vsel %vm172_vm0, %v12545_v0, %v4323_v61 }
 0x491   : > { %5111 = vrot.lane.b32.xlu0 %v12291_v36, %s10786_s27 }
 0x492   : > { %v4373_v57 = vpop.permute.xlu1 %4372 }
 0x493   : > { %v4371_v46 = vpop.permute.xlu0 %4370  ;;  %v4453_v21 = vsel %vm598_vm1, %v4419_v33, %v4373_v57 }
 0x494   : > { %v4451_v22 = vsel %vm598_vm1, %v4416_v58, %v4371_v46  ;;  %5069 = vrot.lane.b32.xlu1 %v12330_v47, %s10785_s26  ;;  %v12569_v47 = vpack.c.bf16 %v4169_v52, %v4168_v23 }
 0x495   : > { %10082 = vmatprep.mubr.msk.bf16.mxu0 %vm982_vm2, %v4451_v22  ;;  %5067 = vrot.lane.b32.xlu0 %v12303_v35, %s10785_s26 }
 0x496   : > { %10083 = vmatmul.mubr.msk.bf16.gmra.mrb[56].mxu0 %vm982_vm2, %v4453_v21  ;;  %v4329_v36 = vpop.permute.xlu1 %4328 }
 0x497   : > { %v4327_v7 = vpop.permute.xlu0 %4326  ;;  %v4425_v54 = vsel %vm172_vm0, %v12569_v47, %v4329_v36 }
 0x498   : > { %5117 = vrot.lane.b32.xlu1 %v12338_v19, %s10786_s27  ;;  %v4422_v35 = vsel %vm172_vm0, %v12565_v6, %v4327_v7  ;;  %v3811_v19 = vld [vmem:[#allocation2 + $0x7] sm:$0xff] }
 0x499   : > { %5115 = vrot.lane.b32.xlu0 %v12315_v30, %s10786_s27  ;;  %v4965_v30 = vld [vmem:[#allocation2 + $0x228] sm:$0xff]  ;;  %v3843_v2 = vpack.c.bf16 %v3812_v50, %v3811_v19 }
 0x49a   : > { %v4377_v40 = vpop.permute.xlu1 %4376 }
 0x49b   : > { %v4375_v18 = vpop.permute.xlu0 %4374  ;;  %v4457_v1 = vsel %vm598_vm1, %v4425_v54, %v4377_v40 }
 0x49c   : > { %v4455_v15 = vsel %vm598_vm1, %v4422_v35, %v4375_v18  ;;  %5073 = vrot.lane.b32.xlu1 %v12346_v11, %s10785_s26  ;;  %v4982_v11 = vpack.c.bf16 %v4966_v24, %v4965_v30 }
 0x49d   : > { %5071 = vrot.lane.b32.xlu0 %v12327_v27, %s10785_s26  ;;  %10086 = vmatprep.mubr.msk.bf16.mxu0 %vm982_vm2, %v4455_v15 }
 0x49e   : > { %v3974_v41 = vpop.permute.xlu1 %3973  ;;  %10087 = vmatmul.mubr.msk.bf16.gmra.mrb[60].mxu0 %vm982_vm2, %v4457_v1 }
 0x49f   : > { %v3972_v53 = vpop.permute.xlu0 %3971  ;;  %v4056_v5 = vsel %vm172_vm0, %v12412_v8, %v3974_v41 }
 0x4a0   : > { %5121 = vrot.lane.b32.xlu1 %v12354_v28, %s10786_s27  ;;  %v4053_v27 = vsel %vm172_vm0, %v3843_v2, %v3972_v53  ;;  %v10756_v28 = vld [vmem:[%s14026_s1 + $0xc8] sm:$0xff]  }
 0x4a1   : > { %5119 = vrot.lane.b32.xlu0 %v12336_v38, %s10786_s27 }
 0x4a2   : > { %v4022_v4 = vpop.permute.xlu1 %4021 }
 0x4a3   : > { %v4020_v14 = vpop.permute.xlu0 %4019  ;;  %v4102_v38 = vsel %vm598_vm1, %v4056_v5, %v4022_v4 }
 0x4a4   : > { %v4100_v45 = vsel %vm598_vm1, %v4053_v27, %v4020_v14  ;;  %5077 = vrot.lane.b32.xlu1 %v4982_v11, %s10785_s26 }
 0x4a5   : > { %5075 = vrot.lane.b32.xlu0 %v12344_v60, %s10785_s26  ;;  %10096 = vmatprep.mubr.msk.bf16.mxu0 %vm982_vm2, %v4100_v45 }
 0x4a6   : > { %v3978_v32 = vpop.permute.xlu1 %3977  ;;  %10097 = vmatmul.mubr.msk.bf16.vlgmr.msra.gmra.mrb[32].mxu0 %vm982_vm2, %v4102_v38 }
 0x4a7   : > { %10129 = vmatpush3.bf16.msra.mxu0 %v12455_v12  ;;  %v3976_v8 = vpop.permute.xlu0 %3975  ;;  %v4062_v12 = vsel %vm172_vm0, %v12439_v10, %v3978_v32 }
 0x4a8   : > { %5125 = vrot.lane.b32.xlu1 %v5030_v62, %s10786_s27  ;;  %10130 = vmatprep.subr.bf16.mxu0 %v10756_v28  ;;  %v4059_v60 = vsel %vm172_vm0, %v12416_v26, %v3976_v8 }
 0x4a9   : > { %5123 = vrot.lane.b32.xlu0 %v12352_v59, %s10786_s27 }
 0x4aa   : > { %v4026_v9 = vpop.permute.xlu1 %4025 }
 0x4ab   : > { %v4024_v43 = vpop.permute.xlu0 %4023  ;;  %10131 = vmatpush3.bf16.msra.mxu0 %v10756_v28  ;;  %v4106_v44 = vsel %vm598_vm1, %v4062_v12, %v4026_v9 }
 0x4ac   : > { %v4104_v34 = vsel %vm598_vm1, %v4059_v60, %v4024_v43  ;;  %10132 = vmatprep.subr.bf16.mxu0 %v10757_v17 }
 0x4ad   : > { %10100 = vmatprep.mubr.msk.bf16.mxu0 %vm982_vm2, %v4104_v34 }
 0x4ae   : > { %v3982_v61 = vpop.permute.xlu1 %3981  ;;  %10101 = vmatmul.mubr.msk.bf16.gmra.mrb[36].mxu0 %vm982_vm2, %v4106_v44 }
 0x4af   : > { %v3980_v59 = vpop.permute.xlu0 %3979  ;;  %10133 = vmatpush3.bf16.msra.mxu0 %v10757_v17  ;;  %v4068_v58 = vsel %vm172_vm0, %v12465_v49, %v3982_v61 }
 0x4b0   : > { %v4065_v3 = vsel %vm172_vm0, %v12443_v13, %v3980_v59 }
 0x4b2   : > { %v4030_v37 = vpop.permute.xlu1 %4029 }
 0x4b3   : > { %v4028_v57 = vpop.permute.xlu0 %4027  ;;  %v4110_v33 = vsel %vm598_vm1, %v4068_v58, %v4030_v37 }
 0x4b4   : > { %v4108_v46 = vsel %vm598_vm1, %v4065_v3, %v4028_v57 }
 0x4b5   : > { %10104 = vmatprep.mubr.msk.bf16.mxu0 %vm982_vm2, %v4108_v46 }
 0x4b6   : > { %v3986_v22 = vpop.permute.xlu1 %3985  ;;  %10105 = vmatmul.mubr.msk.bf16.gmra.mrb[40].mxu0 %vm982_vm2, %v4110_v33 }
 0x4b7   : > { %v3984_v21 = vpop.permute.xlu0 %3983  ;;  %v4074_v7 = vsel %vm172_vm0, %v12485_v25, %v3986_v22 }
 0x4b8   : > { %v4071_v20 = vsel %vm172_vm0, %v12469_v42, %v3984_v21 }
 0x4ba   : > { %v4034_v36 = vpop.permute.xlu1 %4033 }
 0x4bb   : > { %v4032_v52 = vpop.permute.xlu0 %4031  ;;  %v4114_v23 = vsel %vm598_vm1, %v4074_v7, %v4034_v36 }
 0x4bc   : > { %v4112_v29 = vsel %vm598_vm1, %v4071_v20, %v4032_v52 }
 0x4bd   : > { %10108 = vmatprep.mubr.msk.bf16.mxu0 %vm982_vm2, %v4112_v29 }
 0x4be   : > { %v3990_v40 = vpop.permute.xlu1 %3989  ;;  %10109 = vmatmul.mubr.msk.bf16.gmra.mrb[44].mxu0 %vm982_vm2, %v4114_v23 }
 0x4bf   : > { %v3988_v35 = vpop.permute.xlu0 %3987  ;;  %v4080_v19 = vsel %vm172_vm0, %v12505_v48, %v3990_v40 }
 0x4c0   : > { %v4077_v54 = vsel %vm172_vm0, %v12489_v51, %v3988_v35 }
 0x4c2   : > { %v4038_v18 = vpop.permute.xlu1 %4037 }
 0x4c3   : > { %v4036_v15 = vpop.permute.xlu0 %4035  ;;  %v4118_v1 = vsel %vm598_vm1, %v4080_v19, %v4038_v18 }
 0x4c4   : > { %v4116_v50 = vsel %vm598_vm1, %v4077_v54, %v4036_v15 }
 0x4c5   : > { %10112 = vmatprep.mubr.msk.bf16.mxu0 %vm982_vm2, %v4116_v50 }
 0x4c6   : > { %v3994_v30 = vpop.permute.xlu1 %3993  ;;  %10113 = vmatmul.mubr.msk.bf16.gmra.mrb[48].mxu0 %vm982_vm2, %v4118_v1 }
 0x4c7   : > { %v3992_v24 = vpop.permute.xlu0 %3991  ;;  %v4086_v11 = vsel %vm172_vm0, %v12525_v16, %v3994_v30 }
 0x4c8   : > { %v4083_v2 = vsel %vm172_vm0, %v12509_v55, %v3992_v24 }
 0x4ca   : > { %v4042_v41 = vpop.permute.xlu1 %4041 }
 0x4cb   : > { %v4040_v53 = vpop.permute.xlu0 %4039  ;;  %v4122_v31 = vsel %vm598_vm1, %v4086_v11, %v4042_v41 }
 0x4cc   : > { %v4120_v63 = vsel %vm598_vm1, %v4083_v2, %v4040_v53 }
 0x4cd   : > { %10116 = vmatprep.mubr.msk.bf16.mxu0 %vm982_vm2, %v4120_v63 }
 0x4ce   : > { %v3998_v4 = vpop.permute.xlu1 %3997  ;;  %10117 = vmatmul.mubr.msk.bf16.gmra.mrb[52].mxu0 %vm982_vm2, %v4122_v31 }
 0x4cf   : > { %v3996_v27 = vpop.permute.xlu0 %3995  ;;  %v4092_v62 = vsel %vm172_vm0, %v12545_v0, %v3998_v4 }
 0x4d0   : > { %v4089_v5 = vsel %vm172_vm0, %v12529_v56, %v3996_v27 }
 0x4d2   : > { %v4046_v14 = vpop.permute.xlu1 %4045 }
 0x4d3   : > { %v4044_v45 = vpop.permute.xlu0 %4043  ;;  %v4126_v38 = vsel %vm598_vm1, %v4092_v62, %v4046_v14 }
 0x4d4   : > { %v4124_v28 = vsel %vm598_vm1, %v4089_v5, %v4044_v45 }
 0x4d5   : > { %10120 = vmatprep.mubr.msk.bf16.mxu0 %vm982_vm2, %v4124_v28 }
 0x4d6   : > { %10121 = vmatmul.mubr.msk.bf16.gmra.mrb[56].mxu0 %vm982_vm2, %v4126_v38  ;;  %v4002_v32 = vpop.permute.xlu1 %4001 }
 0x4d7   : > { %v4000_v8 = vpop.permute.xlu0 %3999  ;;  %v4098_v43 = vsel %vm172_vm0, %v12565_v6, %v4002_v32 }
 0x4d8   : > { %v4095_v9 = vsel %vm172_vm0, %v12549_v39, %v4000_v8 }
 0x4da   : > { %v4050_v17 = vpop.permute.xlu1 %4049 }
 0x4db   : > { %v4048_v60 = vpop.permute.xlu0 %4047  ;;  %v4130_v34 = vsel %vm598_vm1, %v4098_v43, %v4050_v17  ;;  %v4918_v17 = vld [vmem:[#allocation2 + $0x22f] sm:$0xff] }
 0x4dc   : > { %v4128_v12 = vsel %vm598_vm1, %v4095_v9, %v4048_v60 }
 0x4dd   : > { %10124 = vmatprep.mubr.msk.bf16.mxu0 %vm982_vm2, %v4128_v12 }
 0x4de   : > { %v5050_v44 = vpop.permute.xlu1 %5049  ;;  %10125 = vmatmul.mubr.msk.bf16.gmra.mrb[60].mxu0 %vm982_vm2, %v4130_v34 }
 0x4df   : > { %v5048_v61 = vpop.permute.xlu0 %5047  ;;  %v5132_v57 = vsel %vm172_vm0, %v12439_v10, %v5050_v44 }
 0x4e0   : > { %v5129_v37 = vsel %vm172_vm0, %v12416_v26, %v5048_v61 }
 0x4e2   : > { %v5098_v59 = vpop.permute.xlu1 %5097 }
 0x4e3   : > { %v5096_v3 = vpop.permute.xlu0 %5095  ;;  %v5178_v46 = vsel %vm598_vm1, %v5132_v57, %v5098_v59  ;;  %v10759_v57 = vld [vmem:[%s14026_s1 + $0xf8] sm:$0xff]  }
 0x4e4   : > { %v5176_v58 = vsel %vm598_vm1, %v5129_v37, %v5096_v3  ;;  %v10758_v3 = vld [vmem:[%s14026_s1 + $0xf0] sm:$0xff]  }
 0x4e5   : > { %10134 = vmatprep.mubr.msk.bf16.mxu0 %vm982_vm2, %v5176_v58  ;;  %10166 = vmatprep.subr.bf16.mxu1 %v10758_v3  ;;  %v12738_v58 = vld [vmem:[%s14027_s2 + $0x2] ss:$0 sm:$0xff] }
 0x4e6   : > { %v5054_v33 = vpop.permute.xlu1 %5053  ;;  %10135 = vmatmul.mubr.msk.bf16.vlgmr.msra.gmra.mrb[32].mxu0 %vm982_vm2, %v5178_v46  ;;  %10167 = vmatpush3.bf16.msra.mxu1 %v10758_v3 }
 0x4e7   : > { %v5052_v22 = vpop.permute.xlu0 %5051  ;;  %v5138_v26 = vsel %vm172_vm0, %v12465_v49, %v5054_v33  ;;  %10168 = vmatprep.subr.bf16.mxu1 %v10759_v57 }
 0x4e8   : > { %v5135_v36 = vsel %vm172_vm0, %v12443_v13, %v5052_v22 }
 0x4ea   : > { %v5102_v21 = vpop.permute.xlu1 %5101  ;;  %10169 = vmatpush3.bf16.msra.mxu1 %v10759_v57 }
 0x4eb   : > { %v5100_v20 = vpop.permute.xlu0 %5099  ;;  %v5182_v52 = vsel %vm598_vm1, %v5138_v26, %v5102_v21 }
 0x4ec   : > { %v5180_v10 = vsel %vm598_vm1, %v5135_v36, %v5100_v20 }
 0x4ed   : > { %10138 = vmatprep.mubr.msk.bf16.mxu0 %vm982_vm2, %v5180_v10 }
 0x4ee   : > { %v5058_v7 = vpop.permute.xlu1 %5057  ;;  %10139 = vmatmul.mubr.msk.bf16.gmra.mrb[36].mxu0 %vm982_vm2, %v5182_v52 }
 0x4ef   : > { %v5056_v29 = vpop.permute.xlu0 %5055  ;;  %v5144_v13 = vsel %vm172_vm0, %v12485_v25, %v5058_v7 }
 0x4f0   : > { %v5141_v40 = vsel %vm172_vm0, %v12469_v42, %v5056_v29 }
 0x4f2   : > { %v5106_v23 = vpop.permute.xlu1 %5105 }
 0x4f3   : > { %v5104_v35 = vpop.permute.xlu0 %5103  ;;  %v5186_v18 = vsel %vm598_vm1, %v5144_v13, %v5106_v23 }
 0x4f4   : > { %v5184_v49 = vsel %vm598_vm1, %v5141_v40, %v5104_v35 }
 0x4f5   : > { %10142 = vmatprep.mubr.msk.bf16.mxu0 %vm982_vm2, %v5184_v49 }
 0x4f6   : > { %v5062_v54 = vpop.permute.xlu1 %5061  ;;  %10143 = vmatmul.mubr.msk.bf16.gmra.mrb[40].mxu0 %vm982_vm2, %v5186_v18 }
 0x4f7   : > { %v5060_v15 = vpop.permute.xlu0 %5059  ;;  %v5150_v42 = vsel %vm172_vm0, %v12505_v48, %v5062_v54  ;;  %v12753_v54 = vld [vmem:[%s14026_s1 + $0xd8] sm:$0xff]  }
 0x4f8   : > { %v5147_v50 = vsel %vm172_vm0, %v12489_v51, %v5060_v15 }
 0x4fa   : > { %v5110_v19 = vpop.permute.xlu1 %5109 }
 0x4fb   : > { %v5108_v1 = vpop.permute.xlu0 %5107  ;;  %v5190_v30 = vsel %vm598_vm1, %v5150_v42, %v5110_v19 }
 0x4fc   : > { %v5188_v25 = vsel %vm598_vm1, %v5147_v50, %v5108_v1 }
 0x4fd   : > { %10146 = vmatprep.mubr.msk.bf16.mxu0 %vm982_vm2, %v5188_v25 }
 0x4fe   : > { %v5066_v24 = vpop.permute.xlu1 %5065  ;;  %10147 = vmatmul.mubr.msk.bf16.gmra.mrb[44].mxu0 %vm982_vm2, %v5190_v30 }
 0x4ff   : > { %v5064_v41 = vpop.permute.xlu0 %5063  ;;  %v5156_v51 = vsel %vm172_vm0, %v12525_v16, %v5066_v24 }
 0x500   : > { %v5153_v53 = vsel %vm172_vm0, %v12509_v55, %v5064_v41 }
 0x502   : > { %v5114_v2 = vpop.permute.xlu1 %5113 }
 0x503   : > { %v5112_v11 = vpop.permute.xlu0 %5111  ;;  %v5194_v63 = vsel %vm598_vm1, %v5156_v51, %v5114_v2 }
 0x504   : > { %v5192_v48 = vsel %vm598_vm1, %v5153_v53, %v5112_v11 }
 0x505   : > { %10150 = vmatprep.mubr.msk.bf16.mxu0 %vm982_vm2, %v5192_v48 }
 0x506   : > { %v5070_v31 = vpop.permute.xlu1 %5069  ;;  %10151 = vmatmul.mubr.msk.bf16.gmra.mrb[48].mxu0 %vm982_vm2, %v5194_v63 }
 0x507   : > { %v5068_v4 = vpop.permute.xlu0 %5067  ;;  %v5162_v55 = vsel %vm172_vm0, %v12545_v0, %v5070_v31 }
 0x508   : > { %v5159_v14 = vsel %vm172_vm0, %v12529_v56, %v5068_v4  ;;  %v4917_v56 = vld [vmem:[#allocation2 + $0x227] sm:$0xff] }
 0x509   : > { %v4934_v43 = vpack.c.bf16 %v4918_v17, %v4917_v56 }
 0x50a   : > { %v5118_v27 = vpop.permute.xlu1 %5117 }
 0x50b   : > { %v5116_v5 = vpop.permute.xlu0 %5115  ;;  %v5198_v45 = vsel %vm598_vm1, %v5162_v55, %v5118_v27 }
 0x50c   : > { %v5196_v16 = vsel %vm598_vm1, %v5159_v14, %v5116_v5 }
 0x50d   : > { %10154 = vmatprep.mubr.msk.bf16.mxu0 %vm982_vm2, %v5196_v16 }
 0x50e   : > { %v5074_v62 = vpop.permute.xlu1 %5073  ;;  %10155 = vmatmul.mubr.msk.bf16.gmra.mrb[52].mxu0 %vm982_vm2, %v5198_v45 }
 0x50f   : > { %v5072_v28 = vpop.permute.xlu0 %5071  ;;  %v5168_v0 = vsel %vm172_vm0, %v12565_v6, %v5074_v62 }
 0x510   : > { %v5165_v32 = vsel %vm172_vm0, %v12549_v39, %v5072_v28 }
 0x512   : > { %v5122_v38 = vpop.permute.xlu1 %5121 }
 0x513   : > { %v5120_v8 = vpop.permute.xlu0 %5119  ;;  %v5202_v60 = vsel %vm598_vm1, %v5168_v0, %v5122_v38 }
 0x514   : > { %v5200_v9 = vsel %vm598_vm1, %v5165_v32, %v5120_v8 }
 0x515   : > { %10158 = vmatprep.mubr.msk.bf16.mxu0 %vm982_vm2, %v5200_v9 }
 0x516   : > { %v5078_v12 = vpop.permute.xlu1 %5077  ;;  %10159 = vmatmul.mubr.msk.bf16.gmra.mrb[56].mxu0 %vm982_vm2, %v5202_v60 }
 0x517   : > { %v5076_v34 = vpop.permute.xlu0 %5075  ;;  %v5174_v44 = vsel %vm172_vm0, %v4934_v43, %v5078_v12 }
 0x518   : > { %v5171_v61 = vsel %vm172_vm0, %v12569_v47, %v5076_v34  ;;  %v10760_v47 = vld [vmem:[%s14026_s1 + $0x100] sm:$0xff]  }
 0x519   : > { %10170 = vmatprep.subr.bf16.mxu1 %v10760_v47 }
 0x51a   : > { %v5126_v39 = vpop.permute.xlu1 %5125  ;;  %10171 = vmatpush3.bf16.msra.mxu1 %v10760_v47 }
 0x51b   : > { %v5124_v59 = vpop.permute.xlu0 %5123  ;;  %v5206_v37 = vsel %vm598_vm1, %v5174_v44, %v5126_v39  ;;  %10204 = vmatprep.subr.bf16.mxu1 %v12753_v54 }
 0x51c   : > { %v5204_v6 = vsel %vm598_vm1, %v5171_v61, %v5124_v59 }
 0x51d   : > { %10162 = vmatprep.mubr.msk.bf16.mxu0 %vm982_vm2, %v5204_v6 }
 0x51e   : > { %10163 = vmatmul.mubr.msk.bf16.gmra.mrb[60].mxu0 %vm982_vm2, %v5206_v37 }
 0x5b9   : > { %v10136_v46 = vpop.f32.mrb[32].mxu0 }
 0x5ba   : > { %v5467_v33 = vadd.f32 %v10136_v46, %v12738_v58  ;;  %v5298_v22 = vpop.f32.mrb[33].mxu0 }
 0x5bb   : > { %v5465_v21 = vadd.f32 %v12738_v58, %v5298_v22  ;;  %v10137_v36 = vpop.f32.mrb[34].mxu0 }
 0x5bc   : > { %v5499_v20 = vmax.f32 %v5467_v33, 0.0  ;;  %v5468_v26 = vadd.f32 %v10137_v36, %v12738_v58  ;;  %v5301_v10 = vpop.f32.mrb[35].mxu0 }
 0x5bd   : > { %v5497_v52 = vmax.f32 %v5465_v21, 0.0  ;;  %v5466_v7 = vadd.f32 %v12738_v58, %v5301_v10 }
 0x5be   : > { %5531 = vst.msk [vmem:[#allocation2 + $0x48] sm:$0xff] %vm172_vm0, %v5499_v20  ;;  %v5500_v29 = vmax.f32 %v5468_v26, 0.0 }
 0x5bf   : > { %5529 = vst.msk [vmem:[#allocation2 + $0x28] sm:$0xff] %vm172_vm0, %v5497_v52  ;;  %v5498_v23 = vmax.f32 %v5466_v7, 0.0 }
 0x5c0   : > { %5532 = vst.msk [vmem:[#allocation2 + $0x50] sm:$0xff] %vm172_vm0, %v5500_v29 }
 0x5c1   : > { %5530 = vst.msk [vmem:[#allocation2 + $0x30] sm:$0xff] %vm172_vm0, %v5498_v23  ;;  %v10140_v40 = vpop.f32.mrb[36].mxu0 }
 0x5c2   : > { %v5471_v35 = vadd.f32 %v10140_v40, %v12738_v58  ;;  %v5314_v13 = vpop.f32.mrb[37].mxu0 }
 0x5c3   : > { %v5469_v49 = vadd.f32 %v12738_v58, %v5314_v13  ;;  %v10141_v18 = vpop.f32.mrb[38].mxu0 }
 0x5c4   : > { %v5503_v15 = vmax.f32 %v5471_v35, 0.0  ;;  %v5472_v19 = vadd.f32 %v10141_v18, %v12738_v58  ;;  %v5317_v50 = vpop.f32.mrb[39].mxu0 }
 0x5c5   : > { %v5501_v1 = vmax.f32 %v5469_v49, 0.0  ;;  %v5470_v42 = vadd.f32 %v12738_v58, %v5317_v50  ;;  %v5938_v24 = vld [vmem:[#allocation2 + $0x48] sm:$0xff] }
 0x5c6   : > { %5535 = vst.msk [vmem:[#allocation2 + $0x88] sm:$0xff] %vm172_vm0, %v5503_v15  ;;  %v5504_v25 = vmax.f32 %v5472_v19, 0.0  ;;  %v5936_v53 = vld [vmem:[#allocation2 + $0x28] sm:$0xff] }
 0x5c7   : > { %5533 = vst.msk [vmem:[#allocation2 + $0x68] sm:$0xff] %vm172_vm0, %v5501_v1  ;;  %v5502_v30 = vmax.f32 %v5470_v42, 0.0  ;;  %v5939_v41 = vld [vmem:[#allocation2 + $0x50] sm:$0xff] }
 0x5c8   : > { %5536 = vst.msk [vmem:[#allocation2 + $0x90] sm:$0xff] %vm172_vm0, %v5504_v25  ;;  %v12761_v2 = vpack.c.bf16 %v5939_v41, %v5938_v24  ;;  %v5937_v11 = vld [vmem:[#allocation2 + $0x30] sm:$0xff] }
 0x5c9   : > { %5534 = vst.msk [vmem:[#allocation2 + $0x70] sm:$0xff] %vm172_vm0, %v5502_v30  ;;  %v10144_v51 = vpop.f32.mrb[40].mxu0  ;;  %v12764_v48 = vpack.c.bf16 %v5937_v11, %v5936_v53  ;;  %v5986_v63 = vld [vmem:[#allocation2 + $0x49] sm:$0xff]  ;;  %v5987_v31 = vld [vmem:[#allocation2 + $0x51] sm:$0xff] }
 0x5ca   : > { %v5475_v4 = vadd.f32 %v10144_v51, %v12738_v58  ;;  %6050 = vrot.lane.b32.xlu1 %v12761_v2, %s10785_s26  ;;  %v5330_v27 = vpop.f32.mrb[41].mxu0  ;;  %v5984_v14 = vld [vmem:[#allocation2 + $0x29] sm:$0xff]  ;;  %v5985_v5 = vld [vmem:[#allocation2 + $0x31] sm:$0xff]  ;;  %v12773_v38 = vpack.c.bf16 %v5987_v31, %v5986_v63 }
 0x5cb   : > { %v5473_v55 = vadd.f32 %v12738_v58, %v5330_v27  ;;  %6048 = vrot.lane.b32.xlu0 %v12764_v48, %s10785_s26  ;;  %v10145_v16 = vpop.f32.mrb[42].mxu0  ;;  %v12776_v56 = vpack.c.bf16 %v5985_v5, %v5984_v14 }
 0x5cc   : > { %v5507_v45 = vmax.f32 %v5475_v4, 0.0  ;;  %v5476_v62 = vadd.f32 %v10145_v16, %v12738_v58  ;;  %v5333_v28 = vpop.f32.mrb[43].mxu0 }
 0x5cd   : > { %v5505_v32 = vmax.f32 %v5473_v55, 0.0  ;;  %v5474_v8 = vadd.f32 %v12738_v58, %v5333_v28  ;;  %v5942_v9 = vld [vmem:[#allocation2 + $0x88] sm:$0xff] }
 0x5ce   : > { %5539 = vst.msk [vmem:[#allocation2 + $0xc8] sm:$0xff] %vm172_vm0, %v5507_v45  ;;  %v5508_v17 = vmax.f32 %v5476_v62, 0.0  ;;  %6098 = vrot.lane.b32.xlu1 %v12773_v38, %s10786_s27  ;;  %v5940_v12 = vld [vmem:[#allocation2 + $0x68] sm:$0xff] }
 0x5cf   : > { %5537 = vst.msk [vmem:[#allocation2 + $0xa8] sm:$0xff] %vm172_vm0, %v5505_v32  ;;  %v5506_v0 = vmax.f32 %v5474_v8, 0.0  ;;  %6096 = vrot.lane.b32.xlu0 %v12776_v56, %s10786_s27  ;;  %v5943_v60 = vld [vmem:[#allocation2 + $0x90] sm:$0xff] }
 0x5d0   : > { %5540 = vst.msk [vmem:[#allocation2 + $0xd0] sm:$0xff] %vm172_vm0, %v5508_v17  ;;  %v12785_v43 = vpack.c.bf16 %v5943_v60, %v5942_v9  ;;  %v5941_v34 = vld [vmem:[#allocation2 + $0x70] sm:$0xff] }
 0x5d1   : > { %5538 = vst.msk [vmem:[#allocation2 + $0xb0] sm:$0xff] %vm172_vm0, %v5506_v0  ;;  %v10148_v44 = vpop.f32.mrb[44].mxu0  ;;  %v12788_v39 = vpack.c.bf16 %v5941_v34, %v5940_v12  ;;  %v5990_v61 = vld [vmem:[#allocation2 + $0x89] sm:$0xff]  ;;  %v5991_v59 = vld [vmem:[#allocation2 + $0x91] sm:$0xff] }
 0x5d2   : > { %v5479_v6 = vadd.f32 %v10148_v44, %v12738_v58  ;;  %6054 = vrot.lane.b32.xlu1 %v12785_v43, %s10785_s26  ;;  %v5346_v37 = vpop.f32.mrb[45].mxu0  ;;  %v5988_v3 = vld [vmem:[#allocation2 + $0x69] sm:$0xff]  ;;  %v5989_v57 = vld [vmem:[#allocation2 + $0x71] sm:$0xff]  ;;  %v12797_v36 = vpack.c.bf16 %v5991_v59, %v5990_v61 }
 0x5d3   : > { %v5477_v47 = vadd.f32 %v12738_v58, %v5346_v37  ;;  %6052 = vrot.lane.b32.xlu0 %v12788_v39, %s10785_s26  ;;  %v10149_v46 = vpop.f32.mrb[46].mxu0  ;;  %v12800_v10 = vpack.c.bf16 %v5989_v57, %v5988_v3 }
 0x5d4   : > { %v5511_v33 = vmax.f32 %v5479_v6, 0.0  ;;  %v5480_v22 = vadd.f32 %v10149_v46, %v12738_v58  ;;  %v5349_v21 = vpop.f32.mrb[47].mxu0 }
 0x5d5   : > { %v5509_v20 = vmax.f32 %v5477_v47, 0.0  ;;  %v5478_v26 = vadd.f32 %v12738_v58, %v5349_v21  ;;  %v5946_v29 = vld [vmem:[#allocation2 + $0xc8] sm:$0xff] }
 0x5d6   : > { %5543 = vst.msk [vmem:[#allocation2 + $0x108] sm:$0xff] %vm172_vm0, %v5511_v33  ;;  %v5512_v52 = vmax.f32 %v5480_v22, 0.0  ;;  %6102 = vrot.lane.b32.xlu1 %v12797_v36, %s10786_s27  ;;  %v5944_v35 = vld [vmem:[#allocation2 + $0xa8] sm:$0xff] }
 0x5d7   : > { %5541 = vst.msk [vmem:[#allocation2 + $0xe8] sm:$0xff] %vm172_vm0, %v5509_v20  ;;  %v5510_v7 = vmax.f32 %v5478_v26, 0.0  ;;  %6100 = vrot.lane.b32.xlu0 %v12800_v10, %s10786_s27  ;;  %v5947_v23 = vld [vmem:[#allocation2 + $0xd0] sm:$0xff] }
 0x5d8   : > { %5544 = vst.msk [vmem:[#allocation2 + $0x110] sm:$0xff] %vm172_vm0, %v5512_v52  ;;  %v12809_v40 = vpack.c.bf16 %v5947_v23, %v5946_v29  ;;  %v5945_v13 = vld [vmem:[#allocation2 + $0xb0] sm:$0xff] }
 0x5d9   : > { %5542 = vst.msk [vmem:[#allocation2 + $0xf0] sm:$0xff] %vm172_vm0, %v5510_v7  ;;  %v10152_v49 = vpop.f32.mrb[48].mxu0  ;;  %v12812_v18 = vpack.c.bf16 %v5945_v13, %v5944_v35  ;;  %v5994_v15 = vld [vmem:[#allocation2 + $0xc9] sm:$0xff]  ;;  %v5995_v19 = vld [vmem:[#allocation2 + $0xd1] sm:$0xff] }
 0x5da   : > { %v5483_v50 = vadd.f32 %v10152_v49, %v12738_v58  ;;  %6058 = vrot.lane.b32.xlu1 %v12809_v40, %s10785_s26  ;;  %v5362_v1 = vpop.f32.mrb[49].mxu0  ;;  %v5992_v42 = vld [vmem:[#allocation2 + $0xa9] sm:$0xff]  ;;  %v5993_v25 = vld [vmem:[#allocation2 + $0xb1] sm:$0xff]  ;;  %v12821_v51 = vpack.c.bf16 %v5995_v19, %v5994_v15 }
 0x5db   : > { %v5481_v30 = vadd.f32 %v12738_v58, %v5362_v1  ;;  %6056 = vrot.lane.b32.xlu0 %v12812_v18, %s10785_s26  ;;  %v10153_v24 = vpop.f32.mrb[50].mxu0  ;;  %v12824_v4 = vpack.c.bf16 %v5993_v25, %v5992_v42 }
 0x5dc   : > { %v5515_v41 = vmax.f32 %v5483_v50, 0.0  ;;  %v5484_v53 = vadd.f32 %v10153_v24, %v12738_v58  ;;  %v5365_v11 = vpop.f32.mrb[51].mxu0 }
 0x5dd   : > { %v5513_v63 = vmax.f32 %v5481_v30, 0.0  ;;  %v5482_v31 = vadd.f32 %v12738_v58, %v5365_v11  ;;  %v5950_v5 = vld [vmem:[#allocation2 + $0x108] sm:$0xff] }
 0x5de   : > { %5547 = vst.msk [vmem:[#allocation2 + $0x148] sm:$0xff] %vm172_vm0, %v5515_v41  ;;  %v5516_v27 = vmax.f32 %v5484_v53, 0.0  ;;  %6106 = vrot.lane.b32.xlu1 %v12821_v51, %s10786_s27  ;;  %v5948_v45 = vld [vmem:[#allocation2 + $0xe8] sm:$0xff] }
 0x5df   : > { %5545 = vst.msk [vmem:[#allocation2 + $0x128] sm:$0xff] %vm172_vm0, %v5513_v63  ;;  %v5514_v14 = vmax.f32 %v5482_v31, 0.0  ;;  %6104 = vrot.lane.b32.xlu0 %v12824_v4, %s10786_s27  ;;  %v5951_v55 = vld [vmem:[#allocation2 + $0x110] sm:$0xff] }
 0x5e0   : > { %5548 = vst.msk [vmem:[#allocation2 + $0x150] sm:$0xff] %vm172_vm0, %v5516_v27  ;;  %v12833_v16 = vpack.c.bf16 %v5951_v55, %v5950_v5  ;;  %v5949_v62 = vld [vmem:[#allocation2 + $0xf0] sm:$0xff] }
 0x5e1   : > { %5546 = vst.msk [vmem:[#allocation2 + $0x130] sm:$0xff] %vm172_vm0, %v5514_v14  ;;  %v10156_v28 = vpop.f32.mrb[52].mxu0  ;;  %v12836_v32 = vpack.c.bf16 %v5949_v62, %v5948_v45  ;;  %v5998_v8 = vld [vmem:[#allocation2 + $0x109] sm:$0xff]  ;;  %v5999_v17 = vld [vmem:[#allocation2 + $0x111] sm:$0xff] }
 0x5e2   : > { %v5487_v0 = vadd.f32 %v10156_v28, %v12738_v58  ;;  %6062 = vrot.lane.b32.xlu1 %v12833_v16, %s10785_s26  ;;  %v5378_v9 = vpop.f32.mrb[53].mxu0  ;;  %v5996_v60 = vld [vmem:[#allocation2 + $0xe9] sm:$0xff]  ;;  %v5997_v12 = vld [vmem:[#allocation2 + $0xf1] sm:$0xff]  ;;  %v12845_v37 = vpack.c.bf16 %v5999_v17, %v5998_v8 }
 0x5e3   : > { %v5485_v34 = vadd.f32 %v12738_v58, %v5378_v9  ;;  %6060 = vrot.lane.b32.xlu0 %v12836_v32, %s10785_s26  ;;  %v10157_v44 = vpop.f32.mrb[54].mxu0  ;;  %v12848_v47 = vpack.c.bf16 %v5997_v12, %v5996_v60 }
 0x5e4   : > { %v5519_v61 = vmax.f32 %v5487_v0, 0.0  ;;  %v5488_v59 = vadd.f32 %v10157_v44, %v12738_v58  ;;  %v5381_v6 = vpop.f32.mrb[55].mxu0 }
 0x5e5   : > { %v5517_v3 = vmax.f32 %v5485_v34, 0.0  ;;  %v5486_v57 = vadd.f32 %v12738_v58, %v5381_v6  ;;  %v5954_v22 = vld [vmem:[#allocation2 + $0x148] sm:$0xff] }
 0x5e6   : > { %5551 = vst.msk [vmem:[#allocation2 + $0x188] sm:$0xff] %vm172_vm0, %v5519_v61  ;;  %v5520_v46 = vmax.f32 %v5488_v59, 0.0  ;;  %6110 = vrot.lane.b32.xlu1 %v12845_v37, %s10786_s27  ;;  %v5952_v26 = vld [vmem:[#allocation2 + $0x128] sm:$0xff] }
 0x5e7   : > { %5549 = vst.msk [vmem:[#allocation2 + $0x168] sm:$0xff] %vm172_vm0, %v5517_v3  ;;  %v5518_v33 = vmax.f32 %v5486_v57, 0.0  ;;  %6108 = vrot.lane.b32.xlu0 %v12848_v47, %s10786_s27  ;;  %v5955_v21 = vld [vmem:[#allocation2 + $0x150] sm:$0xff] }
 0x5e8   : > { %5552 = vst.msk [vmem:[#allocation2 + $0x190] sm:$0xff] %vm172_vm0, %v5520_v46  ;;  %v12857_v20 = vpack.c.bf16 %v5955_v21, %v5954_v22  ;;  %v5953_v52 = vld [vmem:[#allocation2 + $0x130] sm:$0xff] }
 0x5e9   : > { %5550 = vst.msk [vmem:[#allocation2 + $0x170] sm:$0xff] %vm172_vm0, %v5518_v33  ;;  %v10160_v7 = vpop.f32.mrb[56].mxu0  ;;  %v12860_v29 = vpack.c.bf16 %v5953_v52, %v5952_v26  ;;  %v6002_v23 = vld [vmem:[#allocation2 + $0x149] sm:$0xff]  ;;  %v6003_v35 = vld [vmem:[#allocation2 + $0x151] sm:$0xff] }
 0x5ea   : > { %v5491_v13 = vadd.f32 %v10160_v7, %v12738_v58  ;;  %6066 = vrot.lane.b32.xlu1 %v12857_v20, %s10785_s26  ;;  %v5394_v49 = vpop.f32.mrb[57].mxu0  ;;  %v6000_v15 = vld [vmem:[#allocation2 + $0x129] sm:$0xff]  ;;  %v6001_v19 = vld [vmem:[#allocation2 + $0x131] sm:$0xff]  ;;  %v12869_v24 = vpack.c.bf16 %v6003_v35, %v6002_v23 }
 0x5eb   : > { %v5489_v50 = vadd.f32 %v12738_v58, %v5394_v49  ;;  %6064 = vrot.lane.b32.xlu0 %v12860_v29, %s10785_s26  ;;  %v10161_v1 = vpop.f32.mrb[58].mxu0  ;;  %v12872_v11 = vpack.c.bf16 %v6001_v19, %v6000_v15 }
 0x5ec   : > { %v5523_v42 = vmax.f32 %v5491_v13, 0.0  ;;  %v5492_v25 = vadd.f32 %v10161_v1, %v12738_v58  ;;  %v5397_v30 = vpop.f32.mrb[59].mxu0 }
 0x5ed   : > { %v5521_v41 = vmax.f32 %v5489_v50, 0.0  ;;  %v5490_v53 = vadd.f32 %v12738_v58, %v5397_v30  ;;  %v5958_v27 = vld [vmem:[#allocation2 + $0x188] sm:$0xff] }
 0x5ee   : > { %5555 = vst.msk [vmem:[#allocation2 + $0x1c8] sm:$0xff] %vm172_vm0, %v5523_v42  ;;  %v5524_v63 = vmax.f32 %v5492_v25, 0.0  ;;  %6114 = vrot.lane.b32.xlu1 %v12869_v24, %s10786_s27  ;;  %v5956_v55 = vld [vmem:[#allocation2 + $0x168] sm:$0xff] }
 0x5ef   : > { %5553 = vst.msk [vmem:[#allocation2 + $0x1a8] sm:$0xff] %vm172_vm0, %v5521_v41  ;;  %v5522_v31 = vmax.f32 %v5490_v53, 0.0  ;;  %6112 = vrot.lane.b32.xlu0 %v12872_v11, %s10786_s27  ;;  %v5959_v14 = vld [vmem:[#allocation2 + $0x190] sm:$0xff] }
 0x5f0   : > { %5556 = vst.msk [vmem:[#allocation2 + $0x1d0] sm:$0xff] %vm172_vm0, %v5524_v63  ;;  %v12881_v5 = vpack.c.bf16 %v5959_v14, %v5958_v27  ;;  %v5957_v45 = vld [vmem:[#allocation2 + $0x170] sm:$0xff] }
 0x5f1   : > { %5554 = vst.msk [vmem:[#allocation2 + $0x1b0] sm:$0xff] %vm172_vm0, %v5522_v31  ;;  %v10164_v62 = vpop.f32.mrb[60].mxu0  ;;  %v12884_v28 = vpack.c.bf16 %v5957_v45, %v5956_v55  ;;  %v6006_v8 = vld [vmem:[#allocation2 + $0x189] sm:$0xff]  ;;  %v6007_v17 = vld [vmem:[#allocation2 + $0x191] sm:$0xff] }
 0x5f2   : > { %v5495_v0 = vadd.f32 %v10164_v62, %v12738_v58  ;;  %6070 = vrot.lane.b32.xlu1 %v12881_v5, %s10785_s26  ;;  %v5410_v9 = vpop.f32.mrb[61].mxu0  ;;  %v6004_v60 = vld [vmem:[#allocation2 + $0x169] sm:$0xff]  ;;  %v6005_v12 = vld [vmem:[#allocation2 + $0x171] sm:$0xff]  ;;  %v12893_v3 = vpack.c.bf16 %v6007_v17, %v6006_v8 }
 0x5f3   : > { %v5493_v34 = vadd.f32 %v12738_v58, %v5410_v9  ;;  %6068 = vrot.lane.b32.xlu0 %v12884_v28, %s10785_s26  ;;  %v10165_v44 = vpop.f32.mrb[62].mxu0  ;;  %v12896_v33 = vpack.c.bf16 %v6005_v12, %v6004_v60  ;;  %v5609_v62 = vld [vmem:[#allocation2 + $0x8] sm:$0xff]  ;;  %v5610_v8 = vld [vmem:[#allocation2 + $0x10] sm:$0xff] }
 0x5f4   : > { %v5527_v61 = vmax.f32 %v5495_v0, 0.0  ;;  %v5496_v59 = vadd.f32 %v10165_v44, %v12738_v58  ;;  %v5413_v6 = vpop.f32.mrb[63].mxu0  ;;  %v5641_v0 = vpack.c.bf16 %v5610_v8, %v5609_v62  ;;  %v5657_v9 = vld [vmem:[#allocation2 + $0x9] sm:$0xff]  ;;  %v5658_v60 = vld [vmem:[#allocation2 + $0x11] sm:$0xff] }
 0x5f5   : > { %v5525_v57 = vmax.f32 %v5493_v34, 0.0  ;;  %v5494_v46 = vadd.f32 %v12738_v58, %v5413_v6  ;;  %v5962_v26 = vld [vmem:[#allocation2 + $0x1c8] sm:$0xff]  ;;  %v5689_v12 = vpack.c.bf16 %v5658_v60, %v5657_v9 }
 0x5f6   : > { %5559 = vst.msk [vmem:[#allocation2 + $0x208] sm:$0xff] %vm172_vm0, %v5527_v61  ;;  %v5528_v22 = vmax.f32 %v5496_v59, 0.0  ;;  %6118 = vrot.lane.b32.xlu1 %v12893_v3, %s10786_s27  ;;  %v5960_v58 = vld [vmem:[#allocation2 + $0x1a8] sm:$0xff] }
 0x5f7   : > { %5557 = vst.msk [vmem:[#allocation2 + $0x1e8] sm:$0xff] %vm172_vm0, %v5525_v57  ;;  %v5526_v21 = vmax.f32 %v5494_v46, 0.0  ;;  %6116 = vrot.lane.b32.xlu0 %v12896_v33, %s10786_s27  ;;  %v5963_v52 = vld [vmem:[#allocation2 + $0x1d0] sm:$0xff]  ;;  %v5888_v61 = vld [vmem:[#allocation2 + $0x27] sm:$0xff] }
 0x5f8   : > { %5560 = vst.msk [vmem:[#allocation2 + $0x210] sm:$0xff] %vm172_vm0, %v5528_v22  ;;  %v12905_v7 = vpack.c.bf16 %v5963_v52, %v5962_v26  ;;  %v5961_v23 = vld [vmem:[#allocation2 + $0x1b0] sm:$0xff]  ;;  %v5890_v59 = vld [vmem:[#allocation2 + $0x47] sm:$0xff] }
 0x5f9   : > { %5558 = vst.msk [vmem:[#allocation2 + $0x1f0] sm:$0xff] %vm172_vm0, %v5526_v21  ;;  %v12908_v35 = vpack.c.bf16 %v5961_v23, %v5960_v58  ;;  %v6010_v13 = vld [vmem:[#allocation2 + $0x1c9] sm:$0xff]  ;;  %v6011_v49 = vld [vmem:[#allocation2 + $0x1d1] sm:$0xff]  ;;  %v10762_v58 = vld [vmem:[%s14026_s1 + $0xe0] sm:$0xff]  }
 0x5fa   : > { %6074 = vrot.lane.b32.xlu1 %v12905_v7, %s10785_s26  ;;  %v6008_v15 = vld [vmem:[#allocation2 + $0x1a9] sm:$0xff]  ;;  %v6009_v19 = vld [vmem:[#allocation2 + $0x1b1] sm:$0xff]  ;;  %v12914_v50 = vpack.c.bf16 %v6011_v49, %v6010_v13 }
 0x5fb   : > { %6072 = vrot.lane.b32.xlu0 %v12908_v35, %s10785_s26  ;;  %v12916_v1 = vpack.c.bf16 %v6009_v19, %v6008_v15  ;;  %v5891_v34 = vld [vmem:[#allocation2 + $0x4f] sm:$0xff] }
 0x5fc   : > { %v12994_v57 = vpack.c.bf16 %v5891_v34, %v5890_v59  ;;  %v5893_v49 = vld [vmem:[#allocation2 + $0x6f] sm:$0xff] }
 0x5fd   : > { %v5966_v42 = vld [vmem:[#allocation2 + $0x208] sm:$0xff] }
 0x5fe   : > { %6122 = vrot.lane.b32.xlu1 %v12914_v50, %s10786_s27  ;;  %v5964_v41 = vld [vmem:[#allocation2 + $0x1e8] sm:$0xff] }
 0x5ff   : > { %6120 = vrot.lane.b32.xlu0 %v12916_v1, %s10786_s27  ;;  %v5967_v25 = vld [vmem:[#allocation2 + $0x210] sm:$0xff]  ;;  %v13033_v8 = vld [vmem:[%s14026_s1 + $0x108] sm:$0xff]  }
 0x600   : > { %v12922_v30 = vpack.c.bf16 %v5967_v25, %v5966_v42  ;;  %v5965_v53 = vld [vmem:[#allocation2 + $0x1f0] sm:$0xff]  ;;  %v5892_v42 = vld [vmem:[#allocation2 + $0x67] sm:$0xff] }
 0x601   : > { %v12924_v63 = vpack.c.bf16 %v5965_v53, %v5964_v41  ;;  %v6014_v31 = vld [vmem:[#allocation2 + $0x209] sm:$0xff]  ;;  %v6015_v27 = vld [vmem:[#allocation2 + $0x211] sm:$0xff]  ;;  %v13017_v53 = vpack.c.bf16 %v5893_v49, %v5892_v42 }
 0x602   : > { %6078 = vrot.lane.b32.xlu1 %v12922_v30, %s10785_s26  ;;  %v6012_v14 = vld [vmem:[#allocation2 + $0x1e9] sm:$0xff]  ;;  %v6013_v55 = vld [vmem:[#allocation2 + $0x1f1] sm:$0xff]  ;;  %v12930_v45 = vpack.c.bf16 %v6015_v27, %v6014_v31 }
 0x603   : > { %6076 = vrot.lane.b32.xlu0 %v12924_v63, %s10785_s26  ;;  %v12932_v17 = vpack.c.bf16 %v6013_v55, %v6012_v14  ;;  %v5895_v15 = vld [vmem:[#allocation2 + $0x8f] sm:$0xff]  ;;  %v5894_v41 = vld [vmem:[#allocation2 + $0x87] sm:$0xff] }
 0x604   : > { %v10763_v25 = vld [vmem:[%s14026_s1 + $0xe8] sm:$0xff]   ;;  %v13021_v31 = vpack.c.bf16 %v5895_v15, %v5894_v41 }
 0x605   : > { %v5897_v60 = vld [vmem:[#allocation2 + $0xaf] sm:$0xff] }
 0x606   : > { %6126 = vrot.lane.b32.xlu1 %v12930_v45, %s10786_s27  ;;  %v5907_v41 = vld [vmem:[#allocation2 + $0x14f] sm:$0xff] }
 0x607   : > { %6124 = vrot.lane.b32.xlu0 %v12932_v17, %s10786_s27 }
 0x60a   : > { %5723 = vrot.lane.b32.xlu1 %v12764_v48, %s10785_s26 }
 0x60b   : > { %5721 = vrot.lane.b32.xlu0 %v5641_v0, %s10785_s26 }
 0x60e   : > { %5771 = vrot.lane.b32.xlu1 %v12776_v56, %s10786_s27  ;;  %v5889_v56 = vld [vmem:[#allocation2 + $0x2f] sm:$0xff] }
 0x60f   : > { %5769 = vrot.lane.b32.xlu0 %v5689_v12, %s10786_s27  ;;  %v12990_v6 = vpack.c.bf16 %v5889_v56, %v5888_v61  ;;  %v5899_v12 = vld [vmem:[#allocation2 + $0xcf] sm:$0xff]  ;;  %v5898_v56 = vld [vmem:[#allocation2 + $0xc7] sm:$0xff] }
 0x612   : > { %5727 = vrot.lane.b32.xlu1 %v12788_v39, %s10785_s26 }
 0x613   : > { %5725 = vrot.lane.b32.xlu0 %v12761_v2, %s10785_s26 }
 0x616   : > { %5775 = vrot.lane.b32.xlu1 %v12800_v10, %s10786_s27 }
 0x617   : > { %5773 = vrot.lane.b32.xlu0 %v12773_v38, %s10786_s27 }
 0x61a   : > { %5731 = vrot.lane.b32.xlu1 %v12812_v18, %s10785_s26 }
 0x61b   : > { %5729 = vrot.lane.b32.xlu0 %v12785_v43, %s10785_s26 }
 0x61e   : > { %5779 = vrot.lane.b32.xlu1 %v12824_v4, %s10786_s27 }
 0x61f   : > { %5777 = vrot.lane.b32.xlu0 %v12797_v36, %s10786_s27 }
 0x622   : > { %5735 = vrot.lane.b32.xlu1 %v12836_v32, %s10785_s26 }
 0x623   : > { %5733 = vrot.lane.b32.xlu0 %v12809_v40, %s10785_s26 }
 0x626   : > { %5783 = vrot.lane.b32.xlu1 %v12848_v47, %s10786_s27 }
 0x627   : > { %5781 = vrot.lane.b32.xlu0 %v12821_v51, %s10786_s27 }
 0x62a   : > { %5739 = vrot.lane.b32.xlu1 %v12860_v29, %s10785_s26 }
 0x62b   : > { %5737 = vrot.lane.b32.xlu0 %v12833_v16, %s10785_s26 }
 0x62e   : > { %5787 = vrot.lane.b32.xlu1 %v12872_v11, %s10786_s27 }
 0x62f   : > { %5785 = vrot.lane.b32.xlu0 %v12845_v37, %s10786_s27 }
 0x632   : > { %5743 = vrot.lane.b32.xlu1 %v12884_v28, %s10785_s26 }
 0x633   : > { %5741 = vrot.lane.b32.xlu0 %v12857_v20, %s10785_s26 }
 0x636   : > { %5791 = vrot.lane.b32.xlu1 %v12896_v33, %s10786_s27 }
 0x637   : > { %5789 = vrot.lane.b32.xlu0 %v12869_v24, %s10786_s27 }
 0x63a   : > { %5747 = vrot.lane.b32.xlu1 %v12908_v35, %s10785_s26 }
 0x63b   : > { %5745 = vrot.lane.b32.xlu0 %v12881_v5, %s10785_s26 }
 0x63c   : > { %v6051_v48 = vpop.permute.xlu1 %6050 }
 0x63d   : > { %v6049_v44 = vpop.permute.xlu0 %6048  ;;  %v6133_v26 = vsel %vm172_vm0, %v12994_v57, %v6051_v48 }
 0x63e   : > { %5795 = vrot.lane.b32.xlu1 %v12916_v1, %s10786_s27  ;;  %v6130_v22 = vsel %vm172_vm0, %v12990_v6, %v6049_v44 }
 0x63f   : > { %5793 = vrot.lane.b32.xlu0 %v12893_v3, %s10786_s27 }
 0x640   : > { %v6099_v46 = vpop.permute.xlu1 %6098 }
 0x641   : > { %v6097_v21 = vpop.permute.xlu0 %6096  ;;  %v6179_v23 = vsel %vm598_vm1, %v6133_v26, %v6099_v46  ;;  %v5903_v26 = vld [vmem:[#allocation2 + $0x10f] sm:$0xff] }
 0x642   : > { %v6177_v52 = vsel %vm598_vm1, %v6130_v22, %v6097_v21  ;;  %5751 = vrot.lane.b32.xlu1 %v12924_v63, %s10785_s26  ;;  %v5901_v21 = vld [vmem:[#allocation2 + $0xef] sm:$0xff] }
 0x643   : > { %10172 = vmatprep.mubr.msk.bf16.mxu1 %vm982_vm2, %v6177_v52  ;;  %5749 = vrot.lane.b32.xlu0 %v12905_v7, %s10785_s26 }
 0x644   : > { %10173 = vmatmul.mubr.msk.bf16.vlgmr.msra.gmra.mrb[64].mxu1 %vm982_vm2, %v6179_v23  ;;  %v6055_v13 = vpop.permute.xlu1 %6054  ;;  %v5902_v23 = vld [vmem:[#allocation2 + $0x107] sm:$0xff] }
 0x645   : > { %10205 = vmatpush3.bf16.msra.mxu1 %v12753_v54  ;;  %v6053_v19 = vpop.permute.xlu0 %6052  ;;  %v6139_v55 = vsel %vm172_vm0, %v13021_v31, %v6055_v13 }
 0x646   : > { %5799 = vrot.lane.b32.xlu1 %v12932_v17, %s10786_s27  ;;  %10206 = vmatprep.subr.bf16.mxu1 %v10762_v58  ;;  %v6136_v27 = vsel %vm172_vm0, %v13017_v53, %v6053_v19 }
 0x647   : > { %5797 = vrot.lane.b32.xlu0 %v12914_v50, %s10786_s27 }
 0x648   : > { %v6103_v54 = vpop.permute.xlu1 %6102 }
 0x649   : > { %v6101_v14 = vpop.permute.xlu0 %6100  ;;  %10207 = vmatpush3.bf16.msra.mxu1 %v10762_v58  ;;  %v6183_v0 = vsel %vm598_vm1, %v6139_v55, %v6103_v54  ;;  %v5900_v58 = vld [vmem:[#allocation2 + $0xe7] sm:$0xff] }
 0x64a   : > { %v6181_v62 = vsel %vm598_vm1, %v6136_v27, %v6101_v14  ;;  %6799 = vrot.lane.b32.xlu1 %v12788_v39, %s10785_s26  ;;  %10208 = vmatprep.subr.bf16.mxu1 %v10763_v25  ;;  %v5896_v39 = vld [vmem:[#allocation2 + $0xa7] sm:$0xff]  ;;  %v13063_v13 = vpack.c.bf16 %v5901_v21, %v5900_v58  ;;  %v5915_v21 = vld [vmem:[#allocation2 + $0x1cf] sm:$0xff] }
 0x64b   : > { %10176 = vmatprep.mubr.msk.bf16.mxu1 %vm982_vm2, %v6181_v62  ;;  %6797 = vrot.lane.b32.xlu0 %v12761_v2, %s10785_s26  ;;  %v13043_v34 = vpack.c.bf16 %v5897_v60, %v5896_v39  ;;  %v13047_v2 = vpack.c.bf16 %v5899_v12, %v5898_v56  ;;  %v5904_v27 = vld [vmem:[#allocation2 + $0x127] sm:$0xff]  ;;  %v5909_v12 = vld [vmem:[#allocation2 + $0x16f] sm:$0xff] }
 0x64c   : > { %10177 = vmatmul.mubr.msk.bf16.gmra.mrb[68].mxu1 %vm982_vm2, %v6183_v0  ;;  %v6059_v9 = vpop.permute.xlu1 %6058  ;;  %v5906_v14 = vld [vmem:[#allocation2 + $0x147] sm:$0xff] }
 0x64d   : > { %v6057_v48 = vpop.permute.xlu0 %6056  ;;  %10209 = vmatpush3.bf16.msra.mxu1 %v10763_v25  ;;  %v6145_v46 = vsel %vm172_vm0, %v13047_v2, %v6059_v9  ;;  %v5905_v25 = vld [vmem:[#allocation2 + $0x12f] sm:$0xff]  ;;  %v5908_v56 = vld [vmem:[#allocation2 + $0x167] sm:$0xff] }
 0x64e   : > { %6847 = vrot.lane.b32.xlu1 %v12800_v10, %s10786_s27  ;;  %10242 = vmatprep.subr.bf16.mxu1 %v13033_v8  ;;  %v6142_v61 = vsel %vm172_vm0, %v13043_v34, %v6057_v48  ;;  %v13083_v55 = vpack.c.bf16 %v5905_v25, %v5904_v27  ;;  %v5911_v48 = vld [vmem:[#allocation2 + $0x18f] sm:$0xff]  ;;  %v5914_v58 = vld [vmem:[#allocation2 + $0x1c7] sm:$0xff] }
 0x64f   : > { %6845 = vrot.lane.b32.xlu0 %v12773_v38, %s10786_s27  ;;  %v5916_v25 = vld [vmem:[#allocation2 + $0x1e7] sm:$0xff] }
 0x650   : > { %v6107_v44 = vpop.permute.xlu1 %6106 }
 0x651   : > { %v6105_v59 = vpop.permute.xlu0 %6104  ;;  %v6187_v22 = vsel %vm598_vm1, %v6145_v46, %v6107_v44  ;;  %v5910_v44 = vld [vmem:[#allocation2 + $0x187] sm:$0xff] }
 0x652   : > { %v6185_v10 = vsel %vm598_vm1, %v6142_v61, %v6105_v59  ;;  %6803 = vrot.lane.b32.xlu1 %v12812_v18, %s10785_s26  ;;  %v13067_v18 = vpack.c.bf16 %v5903_v26, %v5902_v23  ;;  %v13103_v61 = vpack.c.bf16 %v5909_v12, %v5908_v56 }
 0x653   : > { %10180 = vmatprep.mubr.msk.bf16.mxu1 %vm982_vm2, %v6185_v10  ;;  %6801 = vrot.lane.b32.xlu0 %v12785_v43, %s10785_s26 }
 0x654   : > { %10181 = vmatmul.mubr.msk.bf16.gmra.mrb[72].mxu1 %vm982_vm2, %v6187_v22  ;;  %v6063_v38 = vpop.permute.xlu1 %6062 }
 0x655   : > { %v6061_v52 = vpop.permute.xlu0 %6060  ;;  %v6151_v19 = vsel %vm172_vm0, %v13067_v18, %v6063_v38  ;;  %v5913_v38 = vld [vmem:[#allocation2 + $0x1af] sm:$0xff] }
 0x656   : > { %6851 = vrot.lane.b32.xlu1 %v12824_v4, %s10786_s27  ;;  %v6148_v43 = vsel %vm172_vm0, %v13063_v13, %v6061_v52  ;;  %v5912_v52 = vld [vmem:[#allocation2 + $0x1a7] sm:$0xff] }
 0x657   : > { %6849 = vrot.lane.b32.xlu0 %v12797_v36, %s10786_s27  ;;  %v13123_v23 = vpack.c.bf16 %v5913_v38, %v5912_v52 }
 0x658   : > { %v6111_v49 = vpop.permute.xlu1 %6110 }
 0x659   : > { %v6109_v15 = vpop.permute.xlu0 %6108  ;;  %v6191_v4 = vsel %vm598_vm1, %v6151_v19, %v6111_v49 }
 0x65a   : > { %v6189_v42 = vsel %vm598_vm1, %v6148_v43, %v6109_v15  ;;  %6807 = vrot.lane.b32.xlu1 %v12836_v32, %s10785_s26  ;;  %v13087_v32 = vpack.c.bf16 %v5907_v41, %v5906_v14  ;;  %v5918_v41 = vld [vmem:[#allocation2 + $0x207] sm:$0xff] }
 0x65b   : > { %10184 = vmatprep.mubr.msk.bf16.mxu1 %vm982_vm2, %v6189_v42  ;;  %6805 = vrot.lane.b32.xlu0 %v12809_v40, %s10785_s26  ;;  %v5917_v42 = vld [vmem:[#allocation2 + $0x1ef] sm:$0xff] }
 0x65c   : > { %10185 = vmatmul.mubr.msk.bf16.gmra.mrb[76].mxu1 %vm982_vm2, %v6191_v4  ;;  %v6067_v36 = vpop.permute.xlu1 %6066  ;;  %v5919_v4 = vld [vmem:[#allocation2 + $0x20f] sm:$0xff] }
 0x65d   : > { %v6065_v54 = vpop.permute.xlu0 %6064  ;;  %v6157_v9 = vsel %vm172_vm0, %v13087_v32, %v6067_v36 }
 0x65e   : > { %6855 = vrot.lane.b32.xlu1 %v12848_v47, %s10786_s27  ;;  %v6154_v40 = vsel %vm172_vm0, %v13083_v55, %v6065_v54  ;;  %v13143_v54 = vpack.c.bf16 %v5917_v42, %v5916_v25 }
 0x65f   : > { %6853 = vrot.lane.b32.xlu0 %v12821_v51, %s10786_s27 }
 0x660   : > { %v6115_v62 = vpop.permute.xlu1 %6114 }
 0x661   : > { %v6113_v0 = vpop.permute.xlu0 %6112  ;;  %v6195_v47 = vsel %vm598_vm1, %v6157_v9, %v6115_v62 }
 0x662   : > { %v6193_v60 = vsel %vm598_vm1, %v6154_v40, %v6113_v0  ;;  %6811 = vrot.lane.b32.xlu1 %v12860_v29, %s10785_s26  ;;  %v13107_v29 = vpack.c.bf16 %v5911_v48, %v5910_v44  ;;  %v5562_v0 = vld [vmem:[#allocation2 + $0xf] sm:$0xff] }
 0x663   : > { %10188 = vmatprep.mubr.msk.bf16.mxu1 %vm982_vm2, %v6193_v60  ;;  %6809 = vrot.lane.b32.xlu0 %v12833_v16, %s10785_s26  ;;  %v6716_v60 = vld [vmem:[#allocation2 + $0x230] sm:$0xff] }
 0x664   : > { %10189 = vmatmul.mubr.msk.bf16.gmra.mrb[80].mxu1 %vm982_vm2, %v6195_v47  ;;  %v6071_v51 = vpop.permute.xlu1 %6070  ;;  %v6763_v48 = vld [vmem:[#allocation2 + $0x229] sm:$0xff] }
 0x665   : > { %v6069_v39 = vpop.permute.xlu0 %6068  ;;  %v6163_v10 = vsel %vm172_vm0, %v13107_v29, %v6071_v51 }
 0x666   : > { %6859 = vrot.lane.b32.xlu1 %v12872_v11, %s10786_s27  ;;  %v6160_v16 = vsel %vm172_vm0, %v13103_v61, %v6069_v39  ;;  %v6764_v39 = vld [vmem:[#allocation2 + $0x231] sm:$0xff] }
 0x667   : > { %6857 = vrot.lane.b32.xlu0 %v12845_v37, %s10786_s27 }
 0x668   : > { %v6119_v59 = vpop.permute.xlu1 %6118 }
 0x669   : > { %v6117_v46 = vpop.permute.xlu0 %6116  ;;  %v6199_v11 = vsel %vm598_vm1, %v6163_v10, %v6119_v59 }
 0x66a   : > { %v6197_v22 = vsel %vm598_vm1, %v6160_v16, %v6117_v46  ;;  %6815 = vrot.lane.b32.xlu1 %v12884_v28, %s10785_s26  ;;  %v13127_v28 = vpack.c.bf16 %v5915_v21, %v5914_v58  ;;  %v6780_v46 = vpack.c.bf16 %v6764_v39, %v6763_v48 }
 0x66b   : > { %10192 = vmatprep.mubr.msk.bf16.mxu1 %vm982_vm2, %v6197_v22  ;;  %6813 = vrot.lane.b32.xlu0 %v12857_v20, %s10785_s26  ;;  %v10766_v22 = vld [vmem:[%s14026_s1 + $0x118] sm:$0xff]  }
 0x66c   : > { %10193 = vmatmul.mubr.msk.bf16.gmra.mrb[84].mxu1 %vm982_vm2, %v6199_v11  ;;  %v6075_v37 = vpop.permute.xlu1 %6074 }
 0x66d   : > { %v6073_v26 = vpop.permute.xlu0 %6072  ;;  %v6169_v15 = vsel %vm172_vm0, %v13127_v28, %v6075_v37 }
 0x66e   : > { %6863 = vrot.lane.b32.xlu1 %v12896_v33, %s10786_s27  ;;  %v6166_v20 = vsel %vm172_vm0, %v13123_v23, %v6073_v26 }
 0x66f   : > { %6861 = vrot.lane.b32.xlu0 %v12869_v24, %s10786_s27 }
 0x670   : > { %v6123_v49 = vpop.permute.xlu1 %6122 }
 0x671   : > { %v6121_v43 = vpop.permute.xlu0 %6120  ;;  %v6203_v33 = vsel %vm598_vm1, %v6169_v15, %v6123_v49 }
 0x672   : > { %v6201_v19 = vsel %vm598_vm1, %v6166_v20, %v6121_v43  ;;  %6819 = vrot.lane.b32.xlu1 %v12908_v35, %s10785_s26  ;;  %v13147_v35 = vpack.c.bf16 %v5919_v4, %v5918_v41 }
 0x673   : > { %10196 = vmatprep.mubr.msk.bf16.mxu1 %vm982_vm2, %v6201_v19  ;;  %6817 = vrot.lane.b32.xlu0 %v12881_v5, %s10785_s26 }
 0x674   : > { %10197 = vmatmul.mubr.msk.bf16.gmra.mrb[88].mxu1 %vm982_vm2, %v6203_v33  ;;  %v6079_v24 = vpop.permute.xlu1 %6078 }
 0x675   : > { %v6077_v36 = vpop.permute.xlu0 %6076  ;;  %v6175_v62 = vsel %vm172_vm0, %v13147_v35, %v6079_v24 }
 0x676   : > { %6867 = vrot.lane.b32.xlu1 %v12916_v1, %s10786_s27  ;;  %v6172_v5 = vsel %vm172_vm0, %v13143_v54, %v6077_v36  ;;  %v5561_v1 = vld [vmem:[#allocation2 + $0x7] sm:$0xff] }
 0x677   : > { %6865 = vrot.lane.b32.xlu0 %v12893_v3, %s10786_s27  ;;  %v6715_v3 = vld [vmem:[#allocation2 + $0x228] sm:$0xff]  ;;  %v5593_v51 = vpack.c.bf16 %v5562_v0, %v5561_v1 }
 0x678   : > { %v6127_v27 = vpop.permute.xlu1 %6126 }
 0x679   : > { %v6125_v14 = vpop.permute.xlu0 %6124  ;;  %v6207_v9 = vsel %vm598_vm1, %v6175_v62, %v6127_v27 }
 0x67a   : > { %v6205_v40 = vsel %vm598_vm1, %v6172_v5, %v6125_v14  ;;  %6823 = vrot.lane.b32.xlu1 %v12924_v63, %s10785_s26  ;;  %v6732_v63 = vpack.c.bf16 %v6716_v60, %v6715_v3 }
 0x67b   : > { %6821 = vrot.lane.b32.xlu0 %v12905_v7, %s10785_s26  ;;  %10200 = vmatprep.mubr.msk.bf16.mxu1 %vm982_vm2, %v6205_v40 }
 0x67c   : > { %v5724_v47 = vpop.permute.xlu1 %5723  ;;  %10201 = vmatmul.mubr.msk.bf16.gmra.mrb[92].mxu1 %vm982_vm2, %v6207_v9 }
 0x67d   : > { %v5722_v12 = vpop.permute.xlu0 %5721  ;;  %v5806_v59 = vsel %vm172_vm0, %v12990_v6, %v5724_v47 }
 0x67e   : > { %6871 = vrot.lane.b32.xlu1 %v12932_v17, %s10786_s27  ;;  %v5803_v7 = vsel %vm172_vm0, %v5593_v51, %v5722_v12  ;;  %v10765_v17 = vld [vmem:[%s14026_s1 + $0x110] sm:$0xff]  }
 0x67f   : > { %6869 = vrot.lane.b32.xlu0 %v12914_v50, %s10786_s27 }
 0x680   : > { %v5772_v56 = vpop.permute.xlu1 %5771 }
 0x681   : > { %v5770_v44 = vpop.permute.xlu0 %5769  ;;  %v5852_v50 = vsel %vm598_vm1, %v5806_v59, %v5772_v56 }
 0x682   : > { %v5850_v16 = vsel %vm598_vm1, %v5803_v7, %v5770_v44  ;;  %6827 = vrot.lane.b32.xlu1 %v6732_v63, %s10785_s26 }
 0x683   : > { %6825 = vrot.lane.b32.xlu0 %v12922_v30, %s10785_s26  ;;  %10210 = vmatprep.mubr.msk.bf16.mxu1 %vm982_vm2, %v5850_v16 }
 0x684   : > { %v5728_v10 = vpop.permute.xlu1 %5727  ;;  %10211 = vmatmul.mubr.msk.bf16.vlgmr.msra.gmra.mrb[64].mxu1 %vm982_vm2, %v5852_v50 }
 0x685   : > { %10243 = vmatpush3.bf16.msra.mxu1 %v13033_v8  ;;  %v5726_v6 = vpop.permute.xlu0 %5725  ;;  %v5812_v8 = vsel %vm172_vm0, %v13017_v53, %v5728_v10 }
 0x686   : > { %6875 = vrot.lane.b32.xlu1 %v6780_v46, %s10786_s27  ;;  %10244 = vmatprep.subr.bf16.mxu1 %v10765_v17  ;;  %v5809_v30 = vsel %vm172_vm0, %v12994_v57, %v5726_v6 }
 0x687   : > { %6873 = vrot.lane.b32.xlu0 %v12930_v45, %s10786_s27 }
 0x688   : > { %v5776_v11 = vpop.permute.xlu1 %5775 }
 0x689   : > { %v5774_v37 = vpop.permute.xlu0 %5773  ;;  %10245 = vmatpush3.bf16.msra.mxu1 %v10765_v17  ;;  %v5856_v21 = vsel %vm598_vm1, %v5812_v8, %v5776_v11 }
 0x68a   : > { %v5854_v38 = vsel %vm598_vm1, %v5809_v30, %v5774_v37  ;;  %10246 = vmatprep.subr.bf16.mxu1 %v10766_v22 }
 0x68b   : > { %10214 = vmatprep.mubr.msk.bf16.mxu1 %vm982_vm2, %v5854_v38 }
 0x68c   : > { %v5732_v26 = vpop.permute.xlu1 %5731  ;;  %10215 = vmatmul.mubr.msk.bf16.gmra.mrb[68].mxu1 %vm982_vm2, %v5856_v21 }
 0x68d   : > { %v5730_v45 = vpop.permute.xlu0 %5729  ;;  %10247 = vmatpush3.bf16.msra.mxu1 %v10766_v22  ;;  %v5818_v20 = vsel %vm172_vm0, %v13043_v34, %v5732_v26 }
 0x68e   : > { %v5815_v58 = vsel %vm172_vm0, %v13021_v31, %v5730_v45 }
 0x690   : > { %v5780_v52 = vpop.permute.xlu1 %5779 }
 0x691   : > { %v5778_v49 = vpop.permute.xlu0 %5777  ;;  %v5860_v15 = vsel %vm598_vm1, %v5818_v20, %v5780_v52 }
 0x692   : > { %v5858_v43 = vsel %vm598_vm1, %v5815_v58, %v5778_v49 }
 0x693   : > { %10218 = vmatprep.mubr.msk.bf16.mxu1 %vm982_vm2, %v5858_v43 }
 0x694   : > { %v5736_v19 = vpop.permute.xlu1 %5735  ;;  %10219 = vmatmul.mubr.msk.bf16.gmra.mrb[72].mxu1 %vm982_vm2, %v5860_v15 }
 0x695   : > { %v5734_v33 = vpop.permute.xlu0 %5733  ;;  %v5824_v36 = vsel %vm172_vm0, %v13063_v13, %v5736_v19 }
 0x696   : > { %v5821_v42 = vsel %vm172_vm0, %v13047_v2, %v5734_v33 }
 0x698   : > { %v5784_v24 = vpop.permute.xlu1 %5783 }
 0x699   : > { %v5782_v4 = vpop.permute.xlu0 %5781  ;;  %v5864_v41 = vsel %vm598_vm1, %v5824_v36, %v5784_v24 }
 0x69a   : > { %v5862_v25 = vsel %vm598_vm1, %v5821_v42, %v5782_v4 }
 0x69b   : > { %10222 = vmatprep.mubr.msk.bf16.mxu1 %vm982_vm2, %v5862_v25 }
 0x69c   : > { %v5740_v27 = vpop.permute.xlu1 %5739  ;;  %10223 = vmatmul.mubr.msk.bf16.gmra.mrb[76].mxu1 %vm982_vm2, %v5864_v41 }
 0x69d   : > { %v5738_v5 = vpop.permute.xlu0 %5737  ;;  %v5830_v1 = vsel %vm172_vm0, %v13083_v55, %v5740_v27 }
 0x69e   : > { %v5827_v62 = vsel %vm172_vm0, %v13067_v18, %v5738_v5 }
 0x6a0   : > { %v5788_v14 = vpop.permute.xlu1 %5787 }
 0x6a1   : > { %v5786_v40 = vpop.permute.xlu0 %5785  ;;  %v5868_v9 = vsel %vm598_vm1, %v5830_v1, %v5788_v14 }
 0x6a2   : > { %v5866_v0 = vsel %vm598_vm1, %v5827_v62, %v5786_v40 }
 0x6a3   : > { %10226 = vmatprep.mubr.msk.bf16.mxu1 %vm982_vm2, %v5866_v0 }
 0x6a4   : > { %v5744_v3 = vpop.permute.xlu1 %5743  ;;  %10227 = vmatmul.mubr.msk.bf16.gmra.mrb[80].mxu1 %vm982_vm2, %v5868_v9 }
 0x6a5   : > { %v5742_v60 = vpop.permute.xlu0 %5741  ;;  %v5836_v63 = vsel %vm172_vm0, %v13103_v61, %v5744_v3 }
 0x6a6   : > { %v5833_v51 = vsel %vm172_vm0, %v13087_v32, %v5742_v60 }
 0x6a8   : > { %v5792_v47 = vpop.permute.xlu1 %5791 }
 0x6a9   : > { %v5790_v12 = vpop.permute.xlu0 %5789  ;;  %v5872_v39 = vsel %vm598_vm1, %v5836_v63, %v5792_v47 }
 0x6aa   : > { %v5870_v48 = vsel %vm598_vm1, %v5833_v51, %v5790_v12 }
 0x6ab   : > { %10230 = vmatprep.mubr.msk.bf16.mxu1 %vm982_vm2, %v5870_v48 }
 0x6ac   : > { %v5748_v56 = vpop.permute.xlu1 %5747  ;;  %10231 = vmatmul.mubr.msk.bf16.gmra.mrb[84].mxu1 %vm982_vm2, %v5872_v39 }
 0x6ad   : > { %v5746_v7 = vpop.permute.xlu0 %5745  ;;  %v5842_v46 = vsel %vm172_vm0, %v13123_v23, %v5748_v56 }
 0x6ae   : > { %v5839_v59 = vsel %vm172_vm0, %v13107_v29, %v5746_v7 }
 0x6b0   : > { %v5796_v44 = vpop.permute.xlu1 %5795 }
 0x6b1   : > { %v5794_v16 = vpop.permute.xlu0 %5793  ;;  %v5876_v50 = vsel %vm598_vm1, %v5842_v46, %v5796_v44 }
 0x6b2   : > { %v5874_v17 = vsel %vm598_vm1, %v5839_v59, %v5794_v16 }
 0x6b3   : > { %10234 = vmatprep.mubr.msk.bf16.mxu1 %vm982_vm2, %v5874_v17 }
 0x6b4   : > { %10235 = vmatmul.mubr.msk.bf16.gmra.mrb[88].mxu1 %vm982_vm2, %v5876_v50  ;;  %v5752_v10 = vpop.permute.xlu1 %5751 }
 0x6b5   : > { %v5750_v6 = vpop.permute.xlu0 %5749  ;;  %v5848_v37 = vsel %vm172_vm0, %v13143_v54, %v5752_v10 }
 0x6b6   : > { %v5845_v11 = vsel %vm172_vm0, %v13127_v28, %v5750_v6 }
 0x6b8   : > { %v5800_v22 = vpop.permute.xlu1 %5799 }
 0x6b9   : > { %v5798_v30 = vpop.permute.xlu0 %5797  ;;  %v5880_v38 = vsel %vm598_vm1, %v5848_v37, %v5800_v22  ;;  %v6668_v22 = vld [vmem:[#allocation2 + $0x22f] sm:$0xff] }
 0x6ba   : > { %v5878_v8 = vsel %vm598_vm1, %v5845_v11, %v5798_v30 }
 0x6bb   : > { %10238 = vmatprep.mubr.msk.bf16.mxu1 %vm982_vm2, %v5878_v8 }
 0x6bc   : > { %v6800_v21 = vpop.permute.xlu1 %6799  ;;  %10239 = vmatmul.mubr.msk.bf16.gmra.mrb[92].mxu1 %vm982_vm2, %v5880_v38 }
 0x6bd   : > { %v6798_v26 = vpop.permute.xlu0 %6797  ;;  %v6882_v49 = vsel %vm172_vm0, %v13017_v53, %v6800_v21 }
 0x6be   : > { %v6879_v52 = vsel %vm172_vm0, %v12994_v57, %v6798_v26 }
 0x6c0   : > { %v6848_v45 = vpop.permute.xlu1 %6847 }
 0x6c1   : > { %v6846_v58 = vpop.permute.xlu0 %6845  ;;  %v6928_v43 = vsel %vm598_vm1, %v6882_v49, %v6848_v45  ;;  %v10768_v49 = vld [vmem:[%s14026_s1 + $0x140] sm:$0xff]  }
 0x6c2   : > { %v6926_v20 = vsel %vm598_vm1, %v6879_v52, %v6846_v58  ;;  %v10767_v58 = vld [vmem:[%s14026_s1 + $0x138] sm:$0xff]  }
 0x6c3   : > { %10248 = vmatprep.mubr.msk.bf16.mxu1 %vm982_vm2, %v6926_v20  ;;  %10280 = vmatprep.subr.bf16.mxu0 %v10767_v58  ;;  %v13316_v20 = vld [vmem:[%s14027_s2 + $0x3] ss:$0 sm:$0xff] }
 0x6c4   : > { %v6804_v15 = vpop.permute.xlu1 %6803  ;;  %10249 = vmatmul.mubr.msk.bf16.vlgmr.msra.gmra.mrb[64].mxu1 %vm982_vm2, %v6928_v43  ;;  %10281 = vmatpush3.bf16.msra.mxu0 %v10767_v58 }
 0x6c5   : > { %v6802_v19 = vpop.permute.xlu0 %6801  ;;  %v6888_v57 = vsel %vm172_vm0, %v13043_v34, %v6804_v15  ;;  %10282 = vmatprep.subr.bf16.mxu0 %v10768_v49 }
 0x6c6   : > { %v6885_v24 = vsel %vm172_vm0, %v13021_v31, %v6802_v19 }
 0x6c8   : > { %v6852_v33 = vpop.permute.xlu1 %6851  ;;  %10283 = vmatpush3.bf16.msra.mxu0 %v10768_v49 }
 0x6c9   : > { %v6850_v42 = vpop.permute.xlu0 %6849  ;;  %v6932_v4 = vsel %vm598_vm1, %v6888_v57, %v6852_v33 }
 0x6ca   : > { %v6930_v53 = vsel %vm598_vm1, %v6885_v24, %v6850_v42 }
 0x6cb   : > { %10252 = vmatprep.mubr.msk.bf16.mxu1 %vm982_vm2, %v6930_v53 }
 0x6cc   : > { %v6808_v36 = vpop.permute.xlu1 %6807  ;;  %10253 = vmatmul.mubr.msk.bf16.gmra.mrb[68].mxu1 %vm982_vm2, %v6932_v4 }
 0x6cd   : > { %v6806_v25 = vpop.permute.xlu0 %6805  ;;  %v6894_v31 = vsel %vm172_vm0, %v13063_v13, %v6808_v36 }
 0x6ce   : > { %v6891_v27 = vsel %vm172_vm0, %v13047_v2, %v6806_v25 }
 0x6d0   : > { %v6856_v41 = vpop.permute.xlu1 %6855 }
 0x6d1   : > { %v6854_v5 = vpop.permute.xlu0 %6853  ;;  %v6936_v14 = vsel %vm598_vm1, %v6894_v31, %v6856_v41 }
 0x6d2   : > { %v6934_v34 = vsel %vm598_vm1, %v6891_v27, %v6854_v5 }
 0x6d3   : > { %10256 = vmatprep.mubr.msk.bf16.mxu1 %vm982_vm2, %v6934_v34 }
 0x6d4   : > { %v6812_v62 = vpop.permute.xlu1 %6811  ;;  %10257 = vmatmul.mubr.msk.bf16.gmra.mrb[72].mxu1 %vm982_vm2, %v6936_v14 }
 0x6d5   : > { %v6810_v40 = vpop.permute.xlu0 %6809  ;;  %v6900_v2 = vsel %vm172_vm0, %v13083_v55, %v6812_v62  ;;  %v13331_v62 = vld [vmem:[%s14026_s1 + $0x120] sm:$0xff]  }
 0x6d6   : > { %v6897_v0 = vsel %vm172_vm0, %v13067_v18, %v6810_v40 }
 0x6d8   : > { %v6860_v1 = vpop.permute.xlu1 %6859 }
 0x6d9   : > { %v6858_v9 = vpop.permute.xlu0 %6857  ;;  %v6940_v3 = vsel %vm598_vm1, %v6900_v2, %v6860_v1 }
 0x6da   : > { %v6938_v13 = vsel %vm598_vm1, %v6897_v0, %v6858_v9 }
 0x6db   : > { %10260 = vmatprep.mubr.msk.bf16.mxu1 %vm982_vm2, %v6938_v13 }
 0x6dc   : > { %v6816_v60 = vpop.permute.xlu1 %6815  ;;  %10261 = vmatmul.mubr.msk.bf16.gmra.mrb[76].mxu1 %vm982_vm2, %v6940_v3 }
 0x6dd   : > { %v6814_v47 = vpop.permute.xlu0 %6813  ;;  %v6906_v18 = vsel %vm172_vm0, %v13103_v61, %v6816_v60 }
 0x6de   : > { %v6903_v12 = vsel %vm172_vm0, %v13087_v32, %v6814_v47 }
 0x6e0   : > { %v6864_v51 = vpop.permute.xlu1 %6863 }
 0x6e1   : > { %v6862_v63 = vpop.permute.xlu0 %6861  ;;  %v6944_v48 = vsel %vm598_vm1, %v6906_v18, %v6864_v51 }
 0x6e2   : > { %v6942_v55 = vsel %vm598_vm1, %v6903_v12, %v6862_v63 }
 0x6e3   : > { %10264 = vmatprep.mubr.msk.bf16.mxu1 %vm982_vm2, %v6942_v55 }
 0x6e4   : > { %v6820_v39 = vpop.permute.xlu1 %6819  ;;  %10265 = vmatmul.mubr.msk.bf16.gmra.mrb[80].mxu1 %vm982_vm2, %v6944_v48 }
 0x6e5   : > { %v6818_v56 = vpop.permute.xlu0 %6817  ;;  %v6912_v32 = vsel %vm172_vm0, %v13123_v23, %v6820_v39 }
 0x6e6   : > { %v6909_v44 = vsel %vm172_vm0, %v13107_v29, %v6818_v56  ;;  %v6667_v29 = vld [vmem:[#allocation2 + $0x227] sm:$0xff] }
 0x6e7   : > { %v6684_v37 = vpack.c.bf16 %v6668_v22, %v6667_v29 }
 0x6e8   : > { %v6868_v7 = vpop.permute.xlu1 %6867 }
 0x6e9   : > { %v6866_v59 = vpop.permute.xlu0 %6865  ;;  %v6948_v16 = vsel %vm598_vm1, %v6912_v32, %v6868_v7 }
 0x6ea   : > { %v6946_v61 = vsel %vm598_vm1, %v6909_v44, %v6866_v59 }
 0x6eb   : > { %10268 = vmatprep.mubr.msk.bf16.mxu1 %vm982_vm2, %v6946_v61 }
 0x6ec   : > { %v6824_v46 = vpop.permute.xlu1 %6823  ;;  %10269 = vmatmul.mubr.msk.bf16.gmra.mrb[84].mxu1 %vm982_vm2, %v6948_v16 }
 0x6ed   : > { %v6822_v17 = vpop.permute.xlu0 %6821  ;;  %v6918_v23 = vsel %vm172_vm0, %v13143_v54, %v6824_v46 }
 0x6ee   : > { %v6915_v10 = vsel %vm172_vm0, %v13127_v28, %v6822_v17 }
 0x6f0   : > { %v6872_v50 = vpop.permute.xlu1 %6871 }
 0x6f1   : > { %v6870_v6 = vpop.permute.xlu0 %6869  ;;  %v6952_v30 = vsel %vm598_vm1, %v6918_v23, %v6872_v50 }
 0x6f2   : > { %v6950_v11 = vsel %vm598_vm1, %v6915_v10, %v6870_v6 }
 0x6f3   : > { %10272 = vmatprep.mubr.msk.bf16.mxu1 %vm982_vm2, %v6950_v11 }
 0x6f4   : > { %v6828_v8 = vpop.permute.xlu1 %6827  ;;  %10273 = vmatmul.mubr.msk.bf16.gmra.mrb[88].mxu1 %vm982_vm2, %v6952_v30 }
 0x6f5   : > { %v6826_v38 = vpop.permute.xlu0 %6825  ;;  %v6924_v21 = vsel %vm172_vm0, %v6684_v37, %v6828_v8 }
 0x6f6   : > { %v6921_v26 = vsel %vm172_vm0, %v13147_v35, %v6826_v38  ;;  %v10769_v35 = vld [vmem:[%s14026_s1 + $0x148] sm:$0xff]  }
 0x6f7   : > { %10284 = vmatprep.subr.bf16.mxu0 %v10769_v35 }
 0x6f8   : > { %v6876_v28 = vpop.permute.xlu1 %6875  ;;  %10285 = vmatpush3.bf16.msra.mxu0 %v10769_v35 }
 0x6f9   : > { %v6874_v45 = vpop.permute.xlu0 %6873  ;;  %v6956_v52 = vsel %vm598_vm1, %v6924_v21, %v6876_v28  ;;  %10318 = vmatprep.subr.bf16.mxu0 %v13331_v62 }
 0x6fa   : > { %v6954_v54 = vsel %vm598_vm1, %v6921_v26, %v6874_v45 }
 0x6fb   : > { %10276 = vmatprep.mubr.msk.bf16.mxu1 %vm982_vm2, %v6954_v54 }
 0x6fc   : > { %10277 = vmatmul.mubr.msk.bf16.gmra.mrb[92].mxu1 %vm982_vm2, %v6956_v52 }
 0x797   : > { %v10250_v43 = vpop.f32.mrb[64].mxu1 }
 0x798   : > { %v7217_v15 = vadd.f32 %v10250_v43, %v13316_v20  ;;  %v7048_v19 = vpop.f32.mrb[65].mxu1 }
 0x799   : > { %v7215_v33 = vadd.f32 %v13316_v20, %v7048_v19  ;;  %v10251_v24 = vpop.f32.mrb[66].mxu1 }
 0x79a   : > { %v7249_v42 = vmax.f32 %v7217_v15, 0.0  ;;  %v7218_v57 = vadd.f32 %v10251_v24, %v13316_v20  ;;  %v7051_v53 = vpop.f32.mrb[67].mxu1 }
 0x79b   : > { %v7247_v4 = vmax.f32 %v7215_v33, 0.0  ;;  %v7216_v36 = vadd.f32 %v13316_v20, %v7051_v53 }
 0x79c   : > { %7281 = vst.msk [vmem:[#allocation2 + $0x48] sm:$0xff] %vm172_vm0, %v7249_v42  ;;  %v7250_v25 = vmax.f32 %v7218_v57, 0.0 }
 0x79d   : > { %7279 = vst.msk [vmem:[#allocation2 + $0x28] sm:$0xff] %vm172_vm0, %v7247_v4  ;;  %v7248_v41 = vmax.f32 %v7216_v36, 0.0 }
 0x79e   : > { %7282 = vst.msk [vmem:[#allocation2 + $0x50] sm:$0xff] %vm172_vm0, %v7250_v25 }
 0x79f   : > { %7280 = vst.msk [vmem:[#allocation2 + $0x30] sm:$0xff] %vm172_vm0, %v7248_v41  ;;  %v10254_v27 = vpop.f32.mrb[68].mxu1 }
 0x7a0   : > { %v7221_v5 = vadd.f32 %v10254_v27, %v13316_v20  ;;  %v7064_v31 = vpop.f32.mrb[69].mxu1 }
 0x7a1   : > { %v7219_v34 = vadd.f32 %v13316_v20, %v7064_v31  ;;  %v10255_v14 = vpop.f32.mrb[70].mxu1 }
 0x7a2   : > { %v7253_v40 = vmax.f32 %v7221_v5, 0.0  ;;  %v7222_v1 = vadd.f32 %v10255_v14, %v13316_v20  ;;  %v7067_v0 = vpop.f32.mrb[71].mxu1 }
 0x7a3   : > { %v7251_v9 = vmax.f32 %v7219_v34, 0.0  ;;  %v7220_v2 = vadd.f32 %v13316_v20, %v7067_v0  ;;  %v7688_v60 = vld [vmem:[#allocation2 + $0x48] sm:$0xff] }
 0x7a4   : > { %7285 = vst.msk [vmem:[#allocation2 + $0x88] sm:$0xff] %vm172_vm0, %v7253_v40  ;;  %v7254_v13 = vmax.f32 %v7222_v1, 0.0  ;;  %v7686_v12 = vld [vmem:[#allocation2 + $0x28] sm:$0xff] }
 0x7a5   : > { %7283 = vst.msk [vmem:[#allocation2 + $0x68] sm:$0xff] %vm172_vm0, %v7251_v9  ;;  %v7252_v3 = vmax.f32 %v7220_v2, 0.0  ;;  %v7689_v47 = vld [vmem:[#allocation2 + $0x50] sm:$0xff] }
 0x7a6   : > { %7286 = vst.msk [vmem:[#allocation2 + $0x90] sm:$0xff] %vm172_vm0, %v7254_v13  ;;  %v13339_v51 = vpack.c.bf16 %v7689_v47, %v7688_v60  ;;  %v7687_v63 = vld [vmem:[#allocation2 + $0x30] sm:$0xff] }
 0x7a7   : > { %7284 = vst.msk [vmem:[#allocation2 + $0x70] sm:$0xff] %vm172_vm0, %v7252_v3  ;;  %v10258_v18 = vpop.f32.mrb[72].mxu1  ;;  %v13342_v55 = vpack.c.bf16 %v7687_v63, %v7686_v12  ;;  %v7736_v48 = vld [vmem:[#allocation2 + $0x49] sm:$0xff]  ;;  %v7737_v39 = vld [vmem:[#allocation2 + $0x51] sm:$0xff] }
 0x7a8   : > { %v7225_v56 = vadd.f32 %v10258_v18, %v13316_v20  ;;  %7800 = vrot.lane.b32.xlu1 %v13339_v51, %s10785_s26  ;;  %v7080_v7 = vpop.f32.mrb[73].mxu1  ;;  %v7734_v44 = vld [vmem:[#allocation2 + $0x29] sm:$0xff]  ;;  %v7735_v59 = vld [vmem:[#allocation2 + $0x31] sm:$0xff]  ;;  %v13351_v50 = vpack.c.bf16 %v7737_v39, %v7736_v48 }
 0x7a9   : > { %v7223_v32 = vadd.f32 %v13316_v20, %v7080_v7  ;;  %7798 = vrot.lane.b32.xlu0 %v13342_v55, %s10785_s26  ;;  %v10259_v61 = vpop.f32.mrb[74].mxu1  ;;  %v13354_v29 = vpack.c.bf16 %v7735_v59, %v7734_v44 }
 0x7aa   : > { %v7257_v16 = vmax.f32 %v7225_v56, 0.0  ;;  %v7226_v46 = vadd.f32 %v10259_v61, %v13316_v20  ;;  %v7083_v17 = vpop.f32.mrb[75].mxu1 }
 0x7ab   : > { %v7255_v10 = vmax.f32 %v7223_v32, 0.0  ;;  %v7224_v6 = vadd.f32 %v13316_v20, %v7083_v17  ;;  %v7692_v11 = vld [vmem:[#allocation2 + $0x88] sm:$0xff] }
 0x7ac   : > { %7289 = vst.msk [vmem:[#allocation2 + $0xc8] sm:$0xff] %vm172_vm0, %v7257_v16  ;;  %v7258_v22 = vmax.f32 %v7226_v46, 0.0  ;;  %7848 = vrot.lane.b32.xlu1 %v13351_v50, %s10786_s27  ;;  %v7690_v8 = vld [vmem:[#allocation2 + $0x68] sm:$0xff] }
 0x7ad   : > { %7287 = vst.msk [vmem:[#allocation2 + $0xa8] sm:$0xff] %vm172_vm0, %v7255_v10  ;;  %v7256_v23 = vmax.f32 %v7224_v6, 0.0  ;;  %7846 = vrot.lane.b32.xlu0 %v13354_v29, %s10786_s27  ;;  %v7693_v30 = vld [vmem:[#allocation2 + $0x90] sm:$0xff] }
 0x7ae   : > { %7290 = vst.msk [vmem:[#allocation2 + $0xd0] sm:$0xff] %vm172_vm0, %v7258_v22  ;;  %v13363_v37 = vpack.c.bf16 %v7693_v30, %v7692_v11  ;;  %v7691_v38 = vld [vmem:[#allocation2 + $0x70] sm:$0xff] }
 0x7af   : > { %7288 = vst.msk [vmem:[#allocation2 + $0xb0] sm:$0xff] %vm172_vm0, %v7256_v23  ;;  %v10262_v21 = vpop.f32.mrb[76].mxu1  ;;  %v13366_v28 = vpack.c.bf16 %v7691_v38, %v7690_v8  ;;  %v7740_v26 = vld [vmem:[#allocation2 + $0x89] sm:$0xff]  ;;  %v7741_v45 = vld [vmem:[#allocation2 + $0x91] sm:$0xff] }
 0x7b0   : > { %v7229_v54 = vadd.f32 %v10262_v21, %v13316_v20  ;;  %7804 = vrot.lane.b32.xlu1 %v13363_v37, %s10785_s26  ;;  %v7096_v52 = vpop.f32.mrb[77].mxu1  ;;  %v7738_v58 = vld [vmem:[#allocation2 + $0x69] sm:$0xff]  ;;  %v7739_v49 = vld [vmem:[#allocation2 + $0x71] sm:$0xff]  ;;  %v13375_v24 = vpack.c.bf16 %v7741_v45, %v7740_v26 }
 0x7b1   : > { %v7227_v35 = vadd.f32 %v13316_v20, %v7096_v52  ;;  %7802 = vrot.lane.b32.xlu0 %v13366_v28, %s10785_s26  ;;  %v10263_v43 = vpop.f32.mrb[78].mxu1  ;;  %v13378_v53 = vpack.c.bf16 %v7739_v49, %v7738_v58 }
 0x7b2   : > { %v7261_v15 = vmax.f32 %v7229_v54, 0.0  ;;  %v7230_v19 = vadd.f32 %v10263_v43, %v13316_v20  ;;  %v7099_v33 = vpop.f32.mrb[79].mxu1 }
 0x7b3   : > { %v7259_v42 = vmax.f32 %v7227_v35, 0.0  ;;  %v7228_v57 = vadd.f32 %v13316_v20, %v7099_v33  ;;  %v7696_v25 = vld [vmem:[#allocation2 + $0xc8] sm:$0xff] }
 0x7b4   : > { %7293 = vst.msk [vmem:[#allocation2 + $0x108] sm:$0xff] %vm172_vm0, %v7261_v15  ;;  %v7262_v4 = vmax.f32 %v7230_v19, 0.0  ;;  %7852 = vrot.lane.b32.xlu1 %v13375_v24, %s10786_s27  ;;  %v7694_v5 = vld [vmem:[#allocation2 + $0xa8] sm:$0xff] }
 0x7b5   : > { %7291 = vst.msk [vmem:[#allocation2 + $0xe8] sm:$0xff] %vm172_vm0, %v7259_v42  ;;  %v7260_v36 = vmax.f32 %v7228_v57, 0.0  ;;  %7850 = vrot.lane.b32.xlu0 %v13378_v53, %s10786_s27  ;;  %v7697_v41 = vld [vmem:[#allocation2 + $0xd0] sm:$0xff] }
 0x7b6   : > { %7294 = vst.msk [vmem:[#allocation2 + $0x110] sm:$0xff] %vm172_vm0, %v7262_v4  ;;  %v13387_v27 = vpack.c.bf16 %v7697_v41, %v7696_v25  ;;  %v7695_v31 = vld [vmem:[#allocation2 + $0xb0] sm:$0xff] }
 0x7b7   : > { %7292 = vst.msk [vmem:[#allocation2 + $0xf0] sm:$0xff] %vm172_vm0, %v7260_v36  ;;  %v10266_v34 = vpop.f32.mrb[80].mxu1  ;;  %v13390_v14 = vpack.c.bf16 %v7695_v31, %v7694_v5  ;;  %v7744_v40 = vld [vmem:[#allocation2 + $0xc9] sm:$0xff]  ;;  %v7745_v1 = vld [vmem:[#allocation2 + $0xd1] sm:$0xff] }
 0x7b8   : > { %v7233_v0 = vadd.f32 %v10266_v34, %v13316_v20  ;;  %7808 = vrot.lane.b32.xlu1 %v13387_v27, %s10785_s26  ;;  %v7112_v9 = vpop.f32.mrb[81].mxu1  ;;  %v7742_v2 = vld [vmem:[#allocation2 + $0xa9] sm:$0xff]  ;;  %v7743_v13 = vld [vmem:[#allocation2 + $0xb1] sm:$0xff]  ;;  %v13399_v18 = vpack.c.bf16 %v7745_v1, %v7744_v40 }
 0x7b9   : > { %v7231_v3 = vadd.f32 %v13316_v20, %v7112_v9  ;;  %7806 = vrot.lane.b32.xlu0 %v13390_v14, %s10785_s26  ;;  %v10267_v60 = vpop.f32.mrb[82].mxu1  ;;  %v13402_v56 = vpack.c.bf16 %v7743_v13, %v7742_v2 }
 0x7ba   : > { %v7265_v47 = vmax.f32 %v7233_v0, 0.0  ;;  %v7234_v12 = vadd.f32 %v10267_v60, %v13316_v20  ;;  %v7115_v63 = vpop.f32.mrb[83].mxu1 }
 0x7bb   : > { %v7263_v48 = vmax.f32 %v7231_v3, 0.0  ;;  %v7232_v39 = vadd.f32 %v13316_v20, %v7115_v63  ;;  %v7700_v59 = vld [vmem:[#allocation2 + $0x108] sm:$0xff] }
 0x7bc   : > { %7297 = vst.msk [vmem:[#allocation2 + $0x148] sm:$0xff] %vm172_vm0, %v7265_v47  ;;  %v7266_v7 = vmax.f32 %v7234_v12, 0.0  ;;  %7856 = vrot.lane.b32.xlu1 %v13399_v18, %s10786_s27  ;;  %v7698_v16 = vld [vmem:[#allocation2 + $0xe8] sm:$0xff] }
 0x7bd   : > { %7295 = vst.msk [vmem:[#allocation2 + $0x128] sm:$0xff] %vm172_vm0, %v7263_v48  ;;  %v7264_v44 = vmax.f32 %v7232_v39, 0.0  ;;  %7854 = vrot.lane.b32.xlu0 %v13402_v56, %s10786_s27  ;;  %v7701_v32 = vld [vmem:[#allocation2 + $0x110] sm:$0xff] }
 0x7be   : > { %7298 = vst.msk [vmem:[#allocation2 + $0x150] sm:$0xff] %vm172_vm0, %v7266_v7  ;;  %v13411_v61 = vpack.c.bf16 %v7701_v32, %v7700_v59  ;;  %v7699_v46 = vld [vmem:[#allocation2 + $0xf0] sm:$0xff] }
 0x7bf   : > { %7296 = vst.msk [vmem:[#allocation2 + $0x130] sm:$0xff] %vm172_vm0, %v7264_v44  ;;  %v10270_v17 = vpop.f32.mrb[84].mxu1  ;;  %v13414_v10 = vpack.c.bf16 %v7699_v46, %v7698_v16  ;;  %v7748_v6 = vld [vmem:[#allocation2 + $0x109] sm:$0xff]  ;;  %v7749_v22 = vld [vmem:[#allocation2 + $0x111] sm:$0xff] }
 0x7c0   : > { %v7237_v23 = vadd.f32 %v10270_v17, %v13316_v20  ;;  %7812 = vrot.lane.b32.xlu1 %v13411_v61, %s10785_s26  ;;  %v7128_v11 = vpop.f32.mrb[85].mxu1  ;;  %v7746_v30 = vld [vmem:[#allocation2 + $0xe9] sm:$0xff]  ;;  %v7747_v8 = vld [vmem:[#allocation2 + $0xf1] sm:$0xff]  ;;  %v13423_v52 = vpack.c.bf16 %v7749_v22, %v7748_v6 }
 0x7c1   : > { %v7235_v38 = vadd.f32 %v13316_v20, %v7128_v11  ;;  %7810 = vrot.lane.b32.xlu0 %v13414_v10, %s10785_s26  ;;  %v10271_v21 = vpop.f32.mrb[86].mxu1  ;;  %v13426_v35 = vpack.c.bf16 %v7747_v8, %v7746_v30 }
 0x7c2   : > { %v7269_v26 = vmax.f32 %v7237_v23, 0.0  ;;  %v7238_v45 = vadd.f32 %v10271_v21, %v13316_v20  ;;  %v7131_v54 = vpop.f32.mrb[87].mxu1 }
 0x7c3   : > { %v7267_v58 = vmax.f32 %v7235_v38, 0.0  ;;  %v7236_v49 = vadd.f32 %v13316_v20, %v7131_v54  ;;  %v7704_v19 = vld [vmem:[#allocation2 + $0x148] sm:$0xff] }
 0x7c4   : > { %7301 = vst.msk [vmem:[#allocation2 + $0x188] sm:$0xff] %vm172_vm0, %v7269_v26  ;;  %v7270_v43 = vmax.f32 %v7238_v45, 0.0  ;;  %7860 = vrot.lane.b32.xlu1 %v13423_v52, %s10786_s27  ;;  %v7702_v57 = vld [vmem:[#allocation2 + $0x128] sm:$0xff] }
 0x7c5   : > { %7299 = vst.msk [vmem:[#allocation2 + $0x168] sm:$0xff] %vm172_vm0, %v7267_v58  ;;  %v7268_v15 = vmax.f32 %v7236_v49, 0.0  ;;  %7858 = vrot.lane.b32.xlu0 %v13426_v35, %s10786_s27  ;;  %v7705_v33 = vld [vmem:[#allocation2 + $0x150] sm:$0xff] }
 0x7c6   : > { %7302 = vst.msk [vmem:[#allocation2 + $0x190] sm:$0xff] %vm172_vm0, %v7270_v43  ;;  %v13435_v42 = vpack.c.bf16 %v7705_v33, %v7704_v19  ;;  %v7703_v4 = vld [vmem:[#allocation2 + $0x130] sm:$0xff] }
 0x7c7   : > { %7300 = vst.msk [vmem:[#allocation2 + $0x170] sm:$0xff] %vm172_vm0, %v7268_v15  ;;  %v10274_v36 = vpop.f32.mrb[88].mxu1  ;;  %v13438_v25 = vpack.c.bf16 %v7703_v4, %v7702_v57  ;;  %v7752_v41 = vld [vmem:[#allocation2 + $0x149] sm:$0xff]  ;;  %v7753_v5 = vld [vmem:[#allocation2 + $0x151] sm:$0xff] }
 0x7c8   : > { %v7241_v31 = vadd.f32 %v10274_v36, %v13316_v20  ;;  %7816 = vrot.lane.b32.xlu1 %v13435_v42, %s10785_s26  ;;  %v7144_v34 = vpop.f32.mrb[89].mxu1  ;;  %v7750_v40 = vld [vmem:[#allocation2 + $0x129] sm:$0xff]  ;;  %v7751_v1 = vld [vmem:[#allocation2 + $0x131] sm:$0xff]  ;;  %v13447_v60 = vpack.c.bf16 %v7753_v5, %v7752_v41 }
 0x7c9   : > { %v7239_v0 = vadd.f32 %v13316_v20, %v7144_v34  ;;  %7814 = vrot.lane.b32.xlu0 %v13438_v25, %s10785_s26  ;;  %v10275_v9 = vpop.f32.mrb[90].mxu1  ;;  %v13450_v63 = vpack.c.bf16 %v7751_v1, %v7750_v40 }
 0x7ca   : > { %v7273_v2 = vmax.f32 %v7241_v31, 0.0  ;;  %v7242_v13 = vadd.f32 %v10275_v9, %v13316_v20  ;;  %v7147_v3 = vpop.f32.mrb[91].mxu1 }
 0x7cb   : > { %v7271_v47 = vmax.f32 %v7239_v0, 0.0  ;;  %v7240_v12 = vadd.f32 %v13316_v20, %v7147_v3  ;;  %v7708_v7 = vld [vmem:[#allocation2 + $0x188] sm:$0xff] }
 0x7cc   : > { %7305 = vst.msk [vmem:[#allocation2 + $0x1c8] sm:$0xff] %vm172_vm0, %v7273_v2  ;;  %v7274_v48 = vmax.f32 %v7242_v13, 0.0  ;;  %7864 = vrot.lane.b32.xlu1 %v13447_v60, %s10786_s27  ;;  %v7706_v32 = vld [vmem:[#allocation2 + $0x168] sm:$0xff] }
 0x7cd   : > { %7303 = vst.msk [vmem:[#allocation2 + $0x1a8] sm:$0xff] %vm172_vm0, %v7271_v47  ;;  %v7272_v39 = vmax.f32 %v7240_v12, 0.0  ;;  %7862 = vrot.lane.b32.xlu0 %v13450_v63, %s10786_s27  ;;  %v7709_v44 = vld [vmem:[#allocation2 + $0x190] sm:$0xff] }
 0x7ce   : > { %7306 = vst.msk [vmem:[#allocation2 + $0x1d0] sm:$0xff] %vm172_vm0, %v7274_v48  ;;  %v13459_v59 = vpack.c.bf16 %v7709_v44, %v7708_v7  ;;  %v7707_v16 = vld [vmem:[#allocation2 + $0x170] sm:$0xff] }
 0x7cf   : > { %7304 = vst.msk [vmem:[#allocation2 + $0x1b0] sm:$0xff] %vm172_vm0, %v7272_v39  ;;  %v10278_v46 = vpop.f32.mrb[92].mxu1  ;;  %v13462_v17 = vpack.c.bf16 %v7707_v16, %v7706_v32  ;;  %v7756_v6 = vld [vmem:[#allocation2 + $0x189] sm:$0xff]  ;;  %v7757_v22 = vld [vmem:[#allocation2 + $0x191] sm:$0xff] }
 0x7d0   : > { %v7245_v23 = vadd.f32 %v10278_v46, %v13316_v20  ;;  %7820 = vrot.lane.b32.xlu1 %v13459_v59, %s10785_s26  ;;  %v7160_v11 = vpop.f32.mrb[93].mxu1  ;;  %v7754_v30 = vld [vmem:[#allocation2 + $0x169] sm:$0xff]  ;;  %v7755_v8 = vld [vmem:[#allocation2 + $0x171] sm:$0xff]  ;;  %v13471_v58 = vpack.c.bf16 %v7757_v22, %v7756_v6 }
 0x7d1   : > { %v7243_v38 = vadd.f32 %v13316_v20, %v7160_v11  ;;  %7818 = vrot.lane.b32.xlu0 %v13462_v17, %s10785_s26  ;;  %v10279_v21 = vpop.f32.mrb[94].mxu1  ;;  %v13474_v15 = vpack.c.bf16 %v7755_v8, %v7754_v30  ;;  %v7359_v46 = vld [vmem:[#allocation2 + $0x8] sm:$0xff]  ;;  %v7360_v6 = vld [vmem:[#allocation2 + $0x10] sm:$0xff] }
 0x7d2   : > { %v7277_v26 = vmax.f32 %v7245_v23, 0.0  ;;  %v7246_v45 = vadd.f32 %v10279_v21, %v13316_v20  ;;  %v7163_v54 = vpop.f32.mrb[95].mxu1  ;;  %v7391_v23 = vpack.c.bf16 %v7360_v6, %v7359_v46  ;;  %v7407_v11 = vld [vmem:[#allocation2 + $0x9] sm:$0xff]  ;;  %v7408_v30 = vld [vmem:[#allocation2 + $0x11] sm:$0xff] }
 0x7d3   : > { %v7275_v49 = vmax.f32 %v7243_v38, 0.0  ;;  %v7244_v43 = vadd.f32 %v13316_v20, %v7163_v54  ;;  %v7712_v57 = vld [vmem:[#allocation2 + $0x1c8] sm:$0xff]  ;;  %v7439_v8 = vpack.c.bf16 %v7408_v30, %v7407_v11  ;;  %v13611_v6 = vld [vmem:[%s14026_s1 + $0x150] sm:$0xff]  }
 0x7d4   : > { %7309 = vst.msk [vmem:[#allocation2 + $0x208] sm:$0xff] %vm172_vm0, %v7277_v26  ;;  %v7278_v19 = vmax.f32 %v7246_v45, 0.0  ;;  %7868 = vrot.lane.b32.xlu1 %v13471_v58, %s10786_s27  ;;  %v7710_v20 = vld [vmem:[#allocation2 + $0x1a8] sm:$0xff] }
 0x7d5   : > { %7307 = vst.msk [vmem:[#allocation2 + $0x1e8] sm:$0xff] %vm172_vm0, %v7275_v49  ;;  %v7276_v33 = vmax.f32 %v7244_v43, 0.0  ;;  %7866 = vrot.lane.b32.xlu0 %v13474_v15, %s10786_s27  ;;  %v7713_v4 = vld [vmem:[#allocation2 + $0x1d0] sm:$0xff]  ;;  %v7638_v26 = vld [vmem:[#allocation2 + $0x27] sm:$0xff] }
 0x7d6   : > { %7310 = vst.msk [vmem:[#allocation2 + $0x210] sm:$0xff] %vm172_vm0, %v7278_v19  ;;  %v13483_v36 = vpack.c.bf16 %v7713_v4, %v7712_v57  ;;  %v7711_v41 = vld [vmem:[#allocation2 + $0x1b0] sm:$0xff]  ;;  %v7640_v45 = vld [vmem:[#allocation2 + $0x47] sm:$0xff] }
 0x7d7   : > { %7308 = vst.msk [vmem:[#allocation2 + $0x1f0] sm:$0xff] %vm172_vm0, %v7276_v33  ;;  %v13486_v5 = vpack.c.bf16 %v7711_v41, %v7710_v20  ;;  %v7760_v31 = vld [vmem:[#allocation2 + $0x1c9] sm:$0xff]  ;;  %v7761_v34 = vld [vmem:[#allocation2 + $0x1d1] sm:$0xff] }
 0x7d8   : > { %7824 = vrot.lane.b32.xlu1 %v13483_v36, %s10785_s26  ;;  %v7758_v40 = vld [vmem:[#allocation2 + $0x1a9] sm:$0xff]  ;;  %v7759_v1 = vld [vmem:[#allocation2 + $0x1b1] sm:$0xff]  ;;  %v13492_v0 = vpack.c.bf16 %v7761_v34, %v7760_v31 }
 0x7d9   : > { %7822 = vrot.lane.b32.xlu0 %v13486_v5, %s10785_s26  ;;  %v13494_v9 = vpack.c.bf16 %v7759_v1, %v7758_v40  ;;  %v7641_v38 = vld [vmem:[#allocation2 + $0x4f] sm:$0xff] }
 0x7da   : > { %v13572_v49 = vpack.c.bf16 %v7641_v38, %v7640_v45  ;;  %v10771_v20 = vld [vmem:[%s14026_s1 + $0x128] sm:$0xff]  }
 0x7db   : > { %v7716_v2 = vld [vmem:[#allocation2 + $0x208] sm:$0xff] }
 0x7dc   : > { %7872 = vrot.lane.b32.xlu1 %v13492_v0, %s10786_s27  ;;  %v7714_v47 = vld [vmem:[#allocation2 + $0x1e8] sm:$0xff] }
 0x7dd   : > { %7870 = vrot.lane.b32.xlu0 %v13494_v9, %s10786_s27  ;;  %v7717_v13 = vld [vmem:[#allocation2 + $0x210] sm:$0xff] }
 0x7de   : > { %v13500_v3 = vpack.c.bf16 %v7717_v13, %v7716_v2  ;;  %v7715_v12 = vld [vmem:[#allocation2 + $0x1f0] sm:$0xff]  ;;  %v7642_v2 = vld [vmem:[#allocation2 + $0x67] sm:$0xff] }
 0x7df   : > { %v13502_v48 = vpack.c.bf16 %v7715_v12, %v7714_v47  ;;  %v7764_v39 = vld [vmem:[#allocation2 + $0x209] sm:$0xff]  ;;  %v7765_v7 = vld [vmem:[#allocation2 + $0x211] sm:$0xff] }
 0x7e0   : > { %7828 = vrot.lane.b32.xlu1 %v13500_v3, %s10785_s26  ;;  %v7762_v44 = vld [vmem:[#allocation2 + $0x1e9] sm:$0xff]  ;;  %v7763_v32 = vld [vmem:[#allocation2 + $0x1f1] sm:$0xff]  ;;  %v13508_v16 = vpack.c.bf16 %v7765_v7, %v7764_v39 }
 0x7e1   : > { %7826 = vrot.lane.b32.xlu0 %v13502_v48, %s10785_s26  ;;  %v13510_v22 = vpack.c.bf16 %v7763_v32, %v7762_v44  ;;  %v7643_v34 = vld [vmem:[#allocation2 + $0x6f] sm:$0xff]  ;;  %v7644_v47 = vld [vmem:[#allocation2 + $0x87] sm:$0xff] }
 0x7e2   : > { %v7645_v40 = vld [vmem:[#allocation2 + $0x8f] sm:$0xff]  ;;  %v13595_v12 = vpack.c.bf16 %v7643_v34, %v7642_v2 }
 0x7e3   : > { %v10772_v13 = vld [vmem:[%s14026_s1 + $0x130] sm:$0xff]   ;;  %v13599_v39 = vpack.c.bf16 %v7645_v40, %v7644_v47 }
 0x7e4   : > { %7876 = vrot.lane.b32.xlu1 %v13508_v16, %s10786_s27  ;;  %v7647_v30 = vld [vmem:[#allocation2 + $0xaf] sm:$0xff] }
 0x7e5   : > { %7874 = vrot.lane.b32.xlu0 %v13510_v22, %s10786_s27  ;;  %v7657_v47 = vld [vmem:[#allocation2 + $0x14f] sm:$0xff] }
 0x7e8   : > { %7473 = vrot.lane.b32.xlu1 %v13342_v55, %s10785_s26 }
 0x7e9   : > { %7471 = vrot.lane.b32.xlu0 %v7391_v23, %s10785_s26 }
 0x7ec   : > { %7521 = vrot.lane.b32.xlu1 %v13354_v29, %s10786_s27  ;;  %v7639_v29 = vld [vmem:[#allocation2 + $0x2f] sm:$0xff] }
 0x7ed   : > { %7519 = vrot.lane.b32.xlu0 %v7439_v8, %s10786_s27  ;;  %v13568_v54 = vpack.c.bf16 %v7639_v29, %v7638_v26  ;;  %v7649_v8 = vld [vmem:[#allocation2 + $0xcf] sm:$0xff]  ;;  %v7648_v29 = vld [vmem:[#allocation2 + $0xc7] sm:$0xff] }
 0x7f0   : > { %7477 = vrot.lane.b32.xlu1 %v13366_v28, %s10785_s26 }
 0x7f1   : > { %7475 = vrot.lane.b32.xlu0 %v13339_v51, %s10785_s26 }
 0x7f4   : > { %7525 = vrot.lane.b32.xlu1 %v13378_v53, %s10786_s27 }
 0x7f5   : > { %7523 = vrot.lane.b32.xlu0 %v13351_v50, %s10786_s27 }
 0x7f8   : > { %7481 = vrot.lane.b32.xlu1 %v13390_v14, %s10785_s26 }
 0x7f9   : > { %7479 = vrot.lane.b32.xlu0 %v13363_v37, %s10785_s26 }
 0x7fc   : > { %7529 = vrot.lane.b32.xlu1 %v13402_v56, %s10786_s27 }
 0x7fd   : > { %7527 = vrot.lane.b32.xlu0 %v13375_v24, %s10786_s27 }
 0x800   : > { %7485 = vrot.lane.b32.xlu1 %v13414_v10, %s10785_s26 }
 0x801   : > { %7483 = vrot.lane.b32.xlu0 %v13387_v27, %s10785_s26 }
 0x804   : > { %7533 = vrot.lane.b32.xlu1 %v13426_v35, %s10786_s27 }
 0x805   : > { %7531 = vrot.lane.b32.xlu0 %v13399_v18, %s10786_s27 }
 0x808   : > { %7489 = vrot.lane.b32.xlu1 %v13438_v25, %s10785_s26 }
 0x809   : > { %7487 = vrot.lane.b32.xlu0 %v13411_v61, %s10785_s26 }
 0x80c   : > { %7537 = vrot.lane.b32.xlu1 %v13450_v63, %s10786_s27 }
 0x80d   : > { %7535 = vrot.lane.b32.xlu0 %v13423_v52, %s10786_s27 }
 0x810   : > { %7493 = vrot.lane.b32.xlu1 %v13462_v17, %s10785_s26 }
 0x811   : > { %7491 = vrot.lane.b32.xlu0 %v13435_v42, %s10785_s26 }
 0x814   : > { %7541 = vrot.lane.b32.xlu1 %v13474_v15, %s10786_s27 }
 0x815   : > { %7539 = vrot.lane.b32.xlu0 %v13447_v60, %s10786_s27 }
 0x818   : > { %7497 = vrot.lane.b32.xlu1 %v13486_v5, %s10785_s26 }
 0x819   : > { %7495 = vrot.lane.b32.xlu0 %v13459_v59, %s10785_s26 }
 0x81a   : > { %v7801_v55 = vpop.permute.xlu1 %7800 }
 0x81b   : > { %v7799_v21 = vpop.permute.xlu0 %7798  ;;  %v7883_v57 = vsel %vm172_vm0, %v13572_v49, %v7801_v55 }
 0x81c   : > { %7545 = vrot.lane.b32.xlu1 %v13494_v9, %s10786_s27  ;;  %v7880_v19 = vsel %vm172_vm0, %v13568_v54, %v7799_v21 }
 0x81d   : > { %7543 = vrot.lane.b32.xlu0 %v13471_v58, %s10786_s27 }
 0x81e   : > { %v7849_v43 = vpop.permute.xlu1 %7848 }
 0x81f   : > { %v7847_v33 = vpop.permute.xlu0 %7846  ;;  %v7929_v41 = vsel %vm598_vm1, %v7883_v57, %v7849_v43  ;;  %v7653_v57 = vld [vmem:[#allocation2 + $0x10f] sm:$0xff] }
 0x820   : > { %v7927_v4 = vsel %vm598_vm1, %v7880_v19, %v7847_v33  ;;  %7501 = vrot.lane.b32.xlu1 %v13502_v48, %s10785_s26  ;;  %v7651_v33 = vld [vmem:[#allocation2 + $0xef] sm:$0xff] }
 0x821   : > { %10286 = vmatprep.mubr.msk.bf16.mxu0 %vm982_vm2, %v7927_v4  ;;  %7499 = vrot.lane.b32.xlu0 %v13483_v36, %s10785_s26 }
 0x822   : > { %10287 = vmatmul.mubr.msk.bf16.vlgmr.msra.gmra.mrb[64].mxu0 %vm982_vm2, %v7929_v41  ;;  %v7805_v31 = vpop.permute.xlu1 %7804  ;;  %v7652_v41 = vld [vmem:[#allocation2 + $0x107] sm:$0xff] }
 0x823   : > { %10319 = vmatpush3.bf16.msra.mxu0 %v13331_v62  ;;  %v7803_v1 = vpop.permute.xlu0 %7802  ;;  %v7889_v32 = vsel %vm172_vm0, %v13599_v39, %v7805_v31 }
 0x824   : > { %7549 = vrot.lane.b32.xlu1 %v13510_v22, %s10786_s27  ;;  %10320 = vmatprep.subr.bf16.mxu0 %v10771_v20  ;;  %v7886_v7 = vsel %vm172_vm0, %v13595_v12, %v7803_v1 }
 0x825   : > { %7547 = vrot.lane.b32.xlu0 %v13492_v0, %s10786_s27 }
 0x826   : > { %v7853_v62 = vpop.permute.xlu1 %7852 }
 0x827   : > { %v7851_v44 = vpop.permute.xlu0 %7850  ;;  %10321 = vmatpush3.bf16.msra.mxu0 %v10771_v20  ;;  %v7933_v23 = vsel %vm598_vm1, %v7889_v32, %v7853_v62  ;;  %v7650_v20 = vld [vmem:[#allocation2 + $0xe7] sm:$0xff] }
 0x828   : > { %v7931_v46 = vsel %vm598_vm1, %v7886_v7, %v7851_v44  ;;  %8549 = vrot.lane.b32.xlu1 %v13366_v28, %s10785_s26  ;;  %10322 = vmatprep.subr.bf16.mxu0 %v10772_v13  ;;  %v7646_v28 = vld [vmem:[#allocation2 + $0xa7] sm:$0xff]  ;;  %v13641_v31 = vpack.c.bf16 %v7651_v33, %v7650_v20  ;;  %v7665_v33 = vld [vmem:[#allocation2 + $0x1cf] sm:$0xff] }
 0x829   : > { %10290 = vmatprep.mubr.msk.bf16.mxu0 %vm982_vm2, %v7931_v46  ;;  %8547 = vrot.lane.b32.xlu0 %v13339_v51, %s10785_s26  ;;  %v13621_v38 = vpack.c.bf16 %v7647_v30, %v7646_v28  ;;  %v13625_v51 = vpack.c.bf16 %v7649_v8, %v7648_v29  ;;  %v7654_v7 = vld [vmem:[#allocation2 + $0x127] sm:$0xff]  ;;  %v7659_v8 = vld [vmem:[#allocation2 + $0x16f] sm:$0xff] }
 0x82a   : > { %10291 = vmatmul.mubr.msk.bf16.gmra.mrb[68].mxu0 %vm982_vm2, %v7933_v23  ;;  %v7809_v11 = vpop.permute.xlu1 %7808  ;;  %v7656_v44 = vld [vmem:[#allocation2 + $0x147] sm:$0xff] }
 0x82b   : > { %v7807_v55 = vpop.permute.xlu0 %7806  ;;  %10323 = vmatpush3.bf16.msra.mxu0 %v10772_v13  ;;  %v7895_v43 = vsel %vm172_vm0, %v13625_v51, %v7809_v11  ;;  %v7655_v13 = vld [vmem:[#allocation2 + $0x12f] sm:$0xff]  ;;  %v7658_v29 = vld [vmem:[#allocation2 + $0x167] sm:$0xff] }
 0x82c   : > { %8597 = vrot.lane.b32.xlu1 %v13378_v53, %s10786_s27  ;;  %10356 = vmatprep.subr.bf16.mxu0 %v13611_v6  ;;  %v7892_v26 = vsel %vm172_vm0, %v13621_v38, %v7807_v55  ;;  %v13661_v32 = vpack.c.bf16 %v7655_v13, %v7654_v7  ;;  %v7661_v55 = vld [vmem:[#allocation2 + $0x18f] sm:$0xff]  ;;  %v7664_v20 = vld [vmem:[#allocation2 + $0x1c7] sm:$0xff] }
 0x82d   : > { %8595 = vrot.lane.b32.xlu0 %v13351_v50, %s10786_s27  ;;  %v7666_v13 = vld [vmem:[#allocation2 + $0x1e7] sm:$0xff] }
 0x82e   : > { %v7857_v21 = vpop.permute.xlu1 %7856 }
 0x82f   : > { %v7855_v45 = vpop.permute.xlu0 %7854  ;;  %v7937_v19 = vsel %vm598_vm1, %v7895_v43, %v7857_v21  ;;  %v7660_v21 = vld [vmem:[#allocation2 + $0x187] sm:$0xff] }
 0x830   : > { %v7935_v53 = vsel %vm598_vm1, %v7892_v26, %v7855_v45  ;;  %8553 = vrot.lane.b32.xlu1 %v13390_v14, %s10785_s26  ;;  %v13645_v14 = vpack.c.bf16 %v7653_v57, %v7652_v41  ;;  %v13681_v26 = vpack.c.bf16 %v7659_v8, %v7658_v29 }
 0x831   : > { %10294 = vmatprep.mubr.msk.bf16.mxu0 %vm982_vm2, %v7935_v53  ;;  %8551 = vrot.lane.b32.xlu0 %v13363_v37, %s10785_s26 }
 0x832   : > { %10295 = vmatmul.mubr.msk.bf16.gmra.mrb[72].mxu0 %vm982_vm2, %v7937_v19  ;;  %v7813_v50 = vpop.permute.xlu1 %7812 }
 0x833   : > { %v7811_v4 = vpop.permute.xlu0 %7810  ;;  %v7901_v1 = vsel %vm172_vm0, %v13645_v14, %v7813_v50  ;;  %v7663_v50 = vld [vmem:[#allocation2 + $0x1af] sm:$0xff] }
 0x834   : > { %8601 = vrot.lane.b32.xlu1 %v13402_v56, %s10786_s27  ;;  %v7898_v37 = vsel %vm172_vm0, %v13641_v31, %v7811_v4  ;;  %v7662_v4 = vld [vmem:[#allocation2 + $0x1a7] sm:$0xff] }
 0x835   : > { %8599 = vrot.lane.b32.xlu0 %v13375_v24, %s10786_s27  ;;  %v13701_v41 = vpack.c.bf16 %v7663_v50, %v7662_v4 }
 0x836   : > { %v7861_v34 = vpop.permute.xlu1 %7860 }
 0x837   : > { %v7859_v40 = vpop.permute.xlu0 %7858  ;;  %v7941_v56 = vsel %vm598_vm1, %v7901_v1, %v7861_v34 }
 0x838   : > { %v7939_v2 = vsel %vm598_vm1, %v7898_v37, %v7859_v40  ;;  %8557 = vrot.lane.b32.xlu1 %v13414_v10, %s10785_s26  ;;  %v13665_v10 = vpack.c.bf16 %v7657_v47, %v7656_v44  ;;  %v7668_v47 = vld [vmem:[#allocation2 + $0x207] sm:$0xff] }
 0x839   : > { %10298 = vmatprep.mubr.msk.bf16.mxu0 %vm982_vm2, %v7939_v2  ;;  %8555 = vrot.lane.b32.xlu0 %v13387_v27, %s10785_s26  ;;  %v7667_v2 = vld [vmem:[#allocation2 + $0x1ef] sm:$0xff] }
 0x83a   : > { %10299 = vmatmul.mubr.msk.bf16.gmra.mrb[76].mxu0 %vm982_vm2, %v7941_v56  ;;  %v7817_v24 = vpop.permute.xlu1 %7816  ;;  %v7669_v56 = vld [vmem:[#allocation2 + $0x20f] sm:$0xff] }
 0x83b   : > { %v7815_v62 = vpop.permute.xlu0 %7814  ;;  %v7907_v11 = vsel %vm172_vm0, %v13665_v10, %v7817_v24 }
 0x83c   : > { %8605 = vrot.lane.b32.xlu1 %v13426_v35, %s10786_s27  ;;  %v7904_v27 = vsel %vm172_vm0, %v13661_v32, %v7815_v62  ;;  %v13721_v62 = vpack.c.bf16 %v7667_v2, %v7666_v13 }
 0x83d   : > { %8603 = vrot.lane.b32.xlu0 %v13399_v18, %s10786_s27 }
 0x83e   : > { %v7865_v46 = vpop.permute.xlu1 %7864 }
 0x83f   : > { %v7863_v23 = vpop.permute.xlu0 %7862  ;;  %v7945_v35 = vsel %vm598_vm1, %v7907_v11, %v7865_v46 }
 0x840   : > { %v7943_v30 = vsel %vm598_vm1, %v7904_v27, %v7863_v23  ;;  %8561 = vrot.lane.b32.xlu1 %v13438_v25, %s10785_s26  ;;  %v13685_v25 = vpack.c.bf16 %v7661_v55, %v7660_v21  ;;  %v7312_v23 = vld [vmem:[#allocation2 + $0xf] sm:$0xff] }
 0x841   : > { %10302 = vmatprep.mubr.msk.bf16.mxu0 %vm982_vm2, %v7943_v30  ;;  %8559 = vrot.lane.b32.xlu0 %v13411_v61, %s10785_s26  ;;  %v8466_v30 = vld [vmem:[#allocation2 + $0x230] sm:$0xff] }
 0x842   : > { %10303 = vmatmul.mubr.msk.bf16.gmra.mrb[80].mxu0 %vm982_vm2, %v7945_v35  ;;  %v7821_v18 = vpop.permute.xlu1 %7820  ;;  %v8513_v55 = vld [vmem:[#allocation2 + $0x229] sm:$0xff] }
 0x843   : > { %v7819_v28 = vpop.permute.xlu0 %7818  ;;  %v7913_v53 = vsel %vm172_vm0, %v13685_v25, %v7821_v18 }
 0x844   : > { %8609 = vrot.lane.b32.xlu1 %v13450_v63, %s10786_s27  ;;  %v7910_v61 = vsel %vm172_vm0, %v13681_v26, %v7819_v28  ;;  %v8514_v28 = vld [vmem:[#allocation2 + $0x231] sm:$0xff] }
 0x845   : > { %8607 = vrot.lane.b32.xlu0 %v13423_v52, %s10786_s27 }
 0x846   : > { %v7869_v45 = vpop.permute.xlu1 %7868 }
 0x847   : > { %v7867_v43 = vpop.permute.xlu0 %7866  ;;  %v7949_v63 = vsel %vm598_vm1, %v7913_v53, %v7869_v45 }
 0x848   : > { %v7947_v19 = vsel %vm598_vm1, %v7910_v61, %v7867_v43  ;;  %8565 = vrot.lane.b32.xlu1 %v13462_v17, %s10785_s26  ;;  %v13705_v17 = vpack.c.bf16 %v7665_v33, %v7664_v20  ;;  %v8530_v43 = vpack.c.bf16 %v8514_v28, %v8513_v55 }
 0x849   : > { %10306 = vmatprep.mubr.msk.bf16.mxu0 %vm982_vm2, %v7947_v19  ;;  %8563 = vrot.lane.b32.xlu0 %v13435_v42, %s10785_s26  ;;  %v10775_v19 = vld [vmem:[%s14026_s1 + $0x160] sm:$0xff]  }
 0x84a   : > { %10307 = vmatmul.mubr.msk.bf16.gmra.mrb[84].mxu0 %vm982_vm2, %v7949_v63  ;;  %v7825_v52 = vpop.permute.xlu1 %7824 }
 0x84b   : > { %v7823_v57 = vpop.permute.xlu0 %7822  ;;  %v7919_v40 = vsel %vm172_vm0, %v13705_v17, %v7825_v52 }
 0x84c   : > { %8613 = vrot.lane.b32.xlu1 %v13474_v15, %s10786_s27  ;;  %v7916_v42 = vsel %vm172_vm0, %v13701_v41, %v7823_v57 }
 0x84d   : > { %8611 = vrot.lane.b32.xlu0 %v13447_v60, %s10786_s27 }
 0x84e   : > { %v7873_v34 = vpop.permute.xlu1 %7872 }
 0x84f   : > { %v7871_v37 = vpop.permute.xlu0 %7870  ;;  %v7953_v15 = vsel %vm598_vm1, %v7919_v40, %v7873_v34 }
 0x850   : > { %v7951_v1 = vsel %vm598_vm1, %v7916_v42, %v7871_v37  ;;  %8569 = vrot.lane.b32.xlu1 %v13486_v5, %s10785_s26  ;;  %v13725_v5 = vpack.c.bf16 %v7669_v56, %v7668_v47 }
 0x851   : > { %10310 = vmatprep.mubr.msk.bf16.mxu0 %vm982_vm2, %v7951_v1  ;;  %8567 = vrot.lane.b32.xlu0 %v13459_v59, %s10785_s26 }
 0x852   : > { %10311 = vmatmul.mubr.msk.bf16.gmra.mrb[88].mxu0 %vm982_vm2, %v7953_v15  ;;  %v7829_v60 = vpop.permute.xlu1 %7828 }
 0x853   : > { %v7827_v24 = vpop.permute.xlu0 %7826  ;;  %v7925_v46 = vsel %vm172_vm0, %v13725_v5, %v7829_v60 }
 0x854   : > { %8617 = vrot.lane.b32.xlu1 %v13494_v9, %s10786_s27  ;;  %v7922_v59 = vsel %vm172_vm0, %v13721_v62, %v7827_v24  ;;  %v7311_v9 = vld [vmem:[#allocation2 + $0x7] sm:$0xff] }
 0x855   : > { %8615 = vrot.lane.b32.xlu0 %v13471_v58, %s10786_s27  ;;  %v8465_v58 = vld [vmem:[#allocation2 + $0x228] sm:$0xff]  ;;  %v7343_v18 = vpack.c.bf16 %v7312_v23, %v7311_v9 }
 0x856   : > { %v7877_v7 = vpop.permute.xlu1 %7876 }
 0x857   : > { %v7875_v44 = vpop.permute.xlu0 %7874  ;;  %v7957_v11 = vsel %vm598_vm1, %v7925_v46, %v7877_v7 }
 0x858   : > { %v7955_v27 = vsel %vm598_vm1, %v7922_v59, %v7875_v44  ;;  %8573 = vrot.lane.b32.xlu1 %v13502_v48, %s10785_s26  ;;  %v8482_v48 = vpack.c.bf16 %v8466_v30, %v8465_v58 }
 0x859   : > { %8571 = vrot.lane.b32.xlu0 %v13483_v36, %s10785_s26  ;;  %10314 = vmatprep.mubr.msk.bf16.mxu0 %vm982_vm2, %v7955_v27 }
 0x85a   : > { %v7474_v35 = vpop.permute.xlu1 %7473  ;;  %10315 = vmatmul.mubr.msk.bf16.gmra.mrb[92].mxu0 %vm982_vm2, %v7957_v11 }
 0x85b   : > { %v7472_v8 = vpop.permute.xlu0 %7471  ;;  %v7556_v45 = vsel %vm172_vm0, %v13568_v54, %v7474_v35 }
 0x85c   : > { %8621 = vrot.lane.b32.xlu1 %v13510_v22, %s10786_s27  ;;  %v7553_v36 = vsel %vm172_vm0, %v7343_v18, %v7472_v8  ;;  %v10774_v22 = vld [vmem:[%s14026_s1 + $0x158] sm:$0xff]  }
 0x85d   : > { %8619 = vrot.lane.b32.xlu0 %v13492_v0, %s10786_s27 }
 0x85e   : > { %v7522_v29 = vpop.permute.xlu1 %7521 }
 0x85f   : > { %v7520_v21 = vpop.permute.xlu0 %7519  ;;  %v7602_v0 = vsel %vm598_vm1, %v7556_v45, %v7522_v29 }
 0x860   : > { %v7600_v61 = vsel %vm598_vm1, %v7553_v36, %v7520_v21  ;;  %8577 = vrot.lane.b32.xlu1 %v8482_v48, %s10785_s26 }
 0x861   : > { %8575 = vrot.lane.b32.xlu0 %v13500_v3, %s10785_s26  ;;  %10324 = vmatprep.mubr.msk.bf16.mxu0 %vm982_vm2, %v7600_v61 }
 0x862   : > { %v7478_v53 = vpop.permute.xlu1 %7477  ;;  %10325 = vmatmul.mubr.msk.bf16.vlgmr.msra.gmra.mrb[64].mxu0 %vm982_vm2, %v7602_v0 }
 0x863   : > { %10357 = vmatpush3.bf16.msra.mxu0 %v13611_v6  ;;  %v7476_v54 = vpop.permute.xlu0 %7475  ;;  %v7562_v6 = vsel %vm172_vm0, %v13595_v12, %v7478_v53 }
 0x864   : > { %8625 = vrot.lane.b32.xlu1 %v8530_v43, %s10786_s27  ;;  %10358 = vmatprep.subr.bf16.mxu0 %v10774_v22  ;;  %v7559_v3 = vsel %vm172_vm0, %v13572_v49, %v7476_v54 }
 0x865   : > { %8623 = vrot.lane.b32.xlu0 %v13508_v16, %s10786_s27 }
 0x866   : > { %v7526_v63 = vpop.permute.xlu1 %7525 }
 0x867   : > { %v7524_v52 = vpop.permute.xlu0 %7523  ;;  %10359 = vmatpush3.bf16.msra.mxu0 %v10774_v22  ;;  %v7606_v33 = vsel %vm598_vm1, %v7562_v6, %v7526_v63 }
 0x868   : > { %v7604_v50 = vsel %vm598_vm1, %v7559_v3, %v7524_v52  ;;  %10360 = vmatprep.subr.bf16.mxu0 %v10775_v19 }
 0x869   : > { %10328 = vmatprep.mubr.msk.bf16.mxu0 %vm982_vm2, %v7604_v50 }
 0x86a   : > { %v7482_v57 = vpop.permute.xlu1 %7481  ;;  %10329 = vmatmul.mubr.msk.bf16.gmra.mrb[68].mxu0 %vm982_vm2, %v7606_v33 }
 0x86b   : > { %v7480_v16 = vpop.permute.xlu0 %7479  ;;  %10361 = vmatpush3.bf16.msra.mxu0 %v10775_v19  ;;  %v7568_v42 = vsel %vm172_vm0, %v13621_v38, %v7482_v57 }
 0x86c   : > { %v7565_v20 = vsel %vm172_vm0, %v13599_v39, %v7480_v16 }
 0x86e   : > { %v7530_v4 = vpop.permute.xlu1 %7529 }
 0x86f   : > { %v7528_v34 = vpop.permute.xlu0 %7527  ;;  %v7610_v40 = vsel %vm598_vm1, %v7568_v42, %v7530_v4 }
 0x870   : > { %v7608_v37 = vsel %vm598_vm1, %v7565_v20, %v7528_v34 }
 0x871   : > { %10332 = vmatprep.mubr.msk.bf16.mxu0 %vm982_vm2, %v7608_v37 }
 0x872   : > { %v7486_v1 = vpop.permute.xlu1 %7485  ;;  %10333 = vmatmul.mubr.msk.bf16.gmra.mrb[72].mxu0 %vm982_vm2, %v7610_v40 }
 0x873   : > { %v7484_v15 = vpop.permute.xlu0 %7483  ;;  %v7574_v24 = vsel %vm172_vm0, %v13641_v31, %v7486_v1 }
 0x874   : > { %v7571_v2 = vsel %vm172_vm0, %v13625_v51, %v7484_v15 }
 0x876   : > { %v7534_v60 = vpop.permute.xlu1 %7533 }
 0x877   : > { %v7532_v56 = vpop.permute.xlu0 %7531  ;;  %v7614_v47 = vsel %vm598_vm1, %v7574_v24, %v7534_v60 }
 0x878   : > { %v7612_v13 = vsel %vm598_vm1, %v7571_v2, %v7532_v56 }
 0x879   : > { %10336 = vmatprep.mubr.msk.bf16.mxu0 %vm982_vm2, %v7612_v13 }
 0x87a   : > { %v7490_v7 = vpop.permute.xlu1 %7489  ;;  %10337 = vmatmul.mubr.msk.bf16.gmra.mrb[76].mxu0 %vm982_vm2, %v7614_v47 }
 0x87b   : > { %v7488_v59 = vpop.permute.xlu0 %7487  ;;  %v7580_v9 = vsel %vm172_vm0, %v13661_v32, %v7490_v7 }
 0x87c   : > { %v7577_v46 = vsel %vm172_vm0, %v13645_v14, %v7488_v59 }
 0x87e   : > { %v7538_v44 = vpop.permute.xlu1 %7537 }
 0x87f   : > { %v7536_v27 = vpop.permute.xlu0 %7535  ;;  %v7618_v11 = vsel %vm598_vm1, %v7580_v9, %v7538_v44 }
 0x880   : > { %v7616_v23 = vsel %vm598_vm1, %v7577_v46, %v7536_v27 }
 0x881   : > { %10340 = vmatprep.mubr.msk.bf16.mxu0 %vm982_vm2, %v7616_v23 }
 0x882   : > { %v7494_v58 = vpop.permute.xlu1 %7493  ;;  %10341 = vmatmul.mubr.msk.bf16.gmra.mrb[80].mxu0 %vm982_vm2, %v7618_v11 }
 0x883   : > { %v7492_v30 = vpop.permute.xlu0 %7491  ;;  %v7586_v48 = vsel %vm172_vm0, %v13681_v26, %v7494_v58 }
 0x884   : > { %v7583_v18 = vsel %vm172_vm0, %v13665_v10, %v7492_v30 }
 0x886   : > { %v7542_v35 = vpop.permute.xlu1 %7541 }
 0x887   : > { %v7540_v8 = vpop.permute.xlu0 %7539  ;;  %v7622_v28 = vsel %vm598_vm1, %v7586_v48, %v7542_v35 }
 0x888   : > { %v7620_v55 = vsel %vm598_vm1, %v7583_v18, %v7540_v8 }
 0x889   : > { %10344 = vmatprep.mubr.msk.bf16.mxu0 %vm982_vm2, %v7620_v55 }
 0x88a   : > { %v7498_v29 = vpop.permute.xlu1 %7497  ;;  %10345 = vmatmul.mubr.msk.bf16.gmra.mrb[84].mxu0 %vm982_vm2, %v7622_v28 }
 0x88b   : > { %v7496_v36 = vpop.permute.xlu0 %7495  ;;  %v7592_v43 = vsel %vm172_vm0, %v13701_v41, %v7498_v29 }
 0x88c   : > { %v7589_v45 = vsel %vm172_vm0, %v13685_v25, %v7496_v36 }
 0x88e   : > { %v7546_v21 = vpop.permute.xlu1 %7545 }
 0x88f   : > { %v7544_v61 = vpop.permute.xlu0 %7543  ;;  %v7626_v0 = vsel %vm598_vm1, %v7592_v43, %v7546_v21 }
 0x890   : > { %v7624_v22 = vsel %vm598_vm1, %v7589_v45, %v7544_v61 }
 0x891   : > { %10348 = vmatprep.mubr.msk.bf16.mxu0 %vm982_vm2, %v7624_v22 }
 0x892   : > { %10349 = vmatmul.mubr.msk.bf16.gmra.mrb[88].mxu0 %vm982_vm2, %v7626_v0  ;;  %v7502_v53 = vpop.permute.xlu1 %7501 }
 0x893   : > { %v7500_v54 = vpop.permute.xlu0 %7499  ;;  %v7598_v52 = vsel %vm172_vm0, %v13721_v62, %v7502_v53 }
 0x894   : > { %v7595_v63 = vsel %vm172_vm0, %v13705_v17, %v7500_v54 }
 0x896   : > { %v7550_v19 = vpop.permute.xlu1 %7549 }
 0x897   : > { %v7548_v3 = vpop.permute.xlu0 %7547  ;;  %v7630_v50 = vsel %vm598_vm1, %v7598_v52, %v7550_v19  ;;  %v8418_v19 = vld [vmem:[#allocation2 + $0x22f] sm:$0xff] }
 0x898   : > { %v7628_v6 = vsel %vm598_vm1, %v7595_v63, %v7548_v3 }
 0x899   : > { %10352 = vmatprep.mubr.msk.bf16.mxu0 %vm982_vm2, %v7628_v6 }
 0x89a   : > { %v8550_v33 = vpop.permute.xlu1 %8549  ;;  %10353 = vmatmul.mubr.msk.bf16.gmra.mrb[92].mxu0 %vm982_vm2, %v7630_v50 }
 0x89b   : > { %v8548_v57 = vpop.permute.xlu0 %8547  ;;  %v8632_v34 = vsel %vm172_vm0, %v13595_v12, %v8550_v33 }
 0x89c   : > { %v8629_v4 = vsel %vm172_vm0, %v13572_v49, %v8548_v57 }
 0x89e   : > { %v8598_v16 = vpop.permute.xlu1 %8597 }
 0x89f   : > { %v8596_v20 = vpop.permute.xlu0 %8595  ;;  %v8678_v37 = vsel %vm598_vm1, %v8632_v34, %v8598_v16 }
 0x8a0   : > { %v8676_v42 = vsel %vm598_vm1, %v8629_v4, %v8596_v20  ;;  %v13885_v20 = vld [vmem:[%s14027_s2 + $0x4] ss:$0 sm:$0xff] }
 0x8a1   : > { %10362 = vmatprep.mubr.msk.bf16.mxu0 %vm982_vm2, %v8676_v42  ;;  %v8999_v42 = vld [vmem:[%s10989_s25 + $0x10] sm:$0xff] }
 0x8a2   : > { %v8554_v40 = vpop.permute.xlu1 %8553  ;;  %10363 = vmatmul.mubr.msk.bf16.vlgmr.msra.gmra.mrb[64].mxu0 %vm982_vm2, %v8678_v37 }
 0x8a3   : > { %v8552_v1 = vpop.permute.xlu0 %8551  ;;  %v8638_v49 = vsel %vm172_vm0, %v13621_v38, %v8554_v40  ;;  %v8997_v40 = vld [vmem:[%s10989_s25] sm:$0xff] }
 0x8a4   : > { %v8635_v60 = vsel %vm172_vm0, %v13599_v39, %v8552_v1 }
 0x8a6   : > { %v8602_v15 = vpop.permute.xlu1 %8601 }
 0x8a7   : > { %v8600_v2 = vpop.permute.xlu0 %8599  ;;  %v8682_v56 = vsel %vm598_vm1, %v8638_v49, %v8602_v15 }
 0x8a8   : > { %v8680_v12 = vsel %vm598_vm1, %v8635_v60, %v8600_v2  ;;  %v9000_v60 = vld [vmem:[%s10989_s25 + $0x18] sm:$0xff] }
 0x8a9   : > { %10366 = vmatprep.mubr.msk.bf16.mxu0 %vm982_vm2, %v8680_v12 }
 0x8aa   : > { %v8558_v24 = vpop.permute.xlu1 %8557  ;;  %10367 = vmatmul.mubr.msk.bf16.gmra.mrb[68].mxu0 %vm982_vm2, %v8682_v56  ;;  %v8998_v56 = vld [vmem:[%s10989_s25 + $0x8] sm:$0xff] }
 0x8ab   : > { %v8556_v13 = vpop.permute.xlu0 %8555  ;;  %v8644_v39 = vsel %vm172_vm0, %v13641_v31, %v8558_v24 }
 0x8ac   : > { %v8641_v7 = vsel %vm172_vm0, %v13625_v51, %v8556_v13 }
 0x8ae   : > { %v8606_v47 = vpop.permute.xlu1 %8605 }
 0x8af   : > { %v8604_v59 = vpop.permute.xlu0 %8603  ;;  %v8686_v44 = vsel %vm598_vm1, %v8644_v39, %v8606_v47  ;;  %v9003_v39 = vld [vmem:[%s10989_s25 + $0x30] sm:$0xff] }
 0x8b0   : > { %v8684_v38 = vsel %vm598_vm1, %v8641_v7, %v8604_v59 }
 0x8b1   : > { %10370 = vmatprep.mubr.msk.bf16.mxu0 %vm982_vm2, %v8684_v38 }
 0x8b2   : > { %v8562_v46 = vpop.permute.xlu1 %8561  ;;  %10371 = vmatmul.mubr.msk.bf16.gmra.mrb[72].mxu0 %vm982_vm2, %v8686_v44 }
 0x8b3   : > { %v8560_v27 = vpop.permute.xlu0 %8559  ;;  %v8650_v51 = vsel %vm172_vm0, %v13661_v32, %v8562_v46  ;;  %v9001_v46 = vld [vmem:[%s10989_s25 + $0x20] sm:$0xff] }
 0x8b4   : > { %v8647_v23 = vsel %vm172_vm0, %v13645_v14, %v8560_v27 }
 0x8b6   : > { %v8610_v9 = vpop.permute.xlu1 %8609 }
 0x8b7   : > { %v8608_v11 = vpop.permute.xlu0 %8607  ;;  %v8690_v58 = vsel %vm598_vm1, %v8650_v51, %v8610_v9 }
 0x8b8   : > { %v8688_v31 = vsel %vm598_vm1, %v8647_v23, %v8608_v11  ;;  %v9004_v23 = vld [vmem:[%s10989_s25 + $0x38] sm:$0xff] }
 0x8b9   : > { %10374 = vmatprep.mubr.msk.bf16.mxu0 %vm982_vm2, %v8688_v31 }
 0x8ba   : > { %v8566_v30 = vpop.permute.xlu1 %8565  ;;  %10375 = vmatmul.mubr.msk.bf16.gmra.mrb[76].mxu0 %vm982_vm2, %v8690_v58  ;;  %v9002_v58 = vld [vmem:[%s10989_s25 + $0x28] sm:$0xff] }
 0x8bb   : > { %v8564_v35 = vpop.permute.xlu0 %8563  ;;  %v8656_v14 = vsel %vm172_vm0, %v13681_v26, %v8566_v30 }
 0x8bc   : > { %v8653_v8 = vsel %vm172_vm0, %v13665_v10, %v8564_v35 }
 0x8be   : > { %v8614_v18 = vpop.permute.xlu1 %8613 }
 0x8bf   : > { %v8612_v48 = vpop.permute.xlu0 %8611  ;;  %v8694_v55 = vsel %vm598_vm1, %v8656_v14, %v8614_v18  ;;  %v9007_v14 = vld [vmem:[%s10989_s25 + $0x50] sm:$0xff] }
 0x8c0   : > { %v8692_v32 = vsel %vm598_vm1, %v8653_v8, %v8612_v48 }
 0x8c1   : > { %10378 = vmatprep.mubr.msk.bf16.mxu0 %vm982_vm2, %v8692_v32 }
 0x8c2   : > { %v8570_v28 = vpop.permute.xlu1 %8569  ;;  %10379 = vmatmul.mubr.msk.bf16.gmra.mrb[80].mxu0 %vm982_vm2, %v8694_v55 }
 0x8c3   : > { %v8568_v29 = vpop.permute.xlu0 %8567  ;;  %v8662_v10 = vsel %vm172_vm0, %v13701_v41, %v8570_v28  ;;  %v9005_v28 = vld [vmem:[%s10989_s25 + $0x40] sm:$0xff] }
 0x8c4   : > { %v8659_v21 = vsel %vm172_vm0, %v13685_v25, %v8568_v29  ;;  %v8417_v25 = vld [vmem:[#allocation2 + $0x227] sm:$0xff] }
 0x8c5   : > { %v8434_v52 = vpack.c.bf16 %v8418_v19, %v8417_v25  ;;  %v9011_v25 = vld [vmem:[%s10989_s25 + $0x70] sm:$0xff] }
 0x8c6   : > { %v8618_v36 = vpop.permute.xlu1 %8617 }
 0x8c7   : > { %v8616_v45 = vpop.permute.xlu0 %8615  ;;  %v8698_v61 = vsel %vm598_vm1, %v8662_v10, %v8618_v36 }
 0x8c8   : > { %v8696_v26 = vsel %vm598_vm1, %v8659_v21, %v8616_v45  ;;  %v9008_v21 = vld [vmem:[%s10989_s25 + $0x58] sm:$0xff] }
 0x8c9   : > { %10382 = vmatprep.mubr.msk.bf16.mxu0 %vm982_vm2, %v8696_v26 }
 0x8ca   : > { %v8574_v43 = vpop.permute.xlu1 %8573  ;;  %10383 = vmatmul.mubr.msk.bf16.gmra.mrb[84].mxu0 %vm982_vm2, %v8698_v61  ;;  %v9006_v61 = vld [vmem:[%s10989_s25 + $0x48] sm:$0xff] }
 0x8cb   : > { %v8572_v22 = vpop.permute.xlu0 %8571  ;;  %v8668_v41 = vsel %vm172_vm0, %v13721_v62, %v8574_v43 }
 0x8cc   : > { %v8665_v53 = vsel %vm172_vm0, %v13705_v17, %v8572_v22 }
 0x8ce   : > { %v8622_v0 = vpop.permute.xlu1 %8621 }
 0x8cf   : > { %v8620_v54 = vpop.permute.xlu0 %8619  ;;  %v8702_v3 = vsel %vm598_vm1, %v8668_v41, %v8622_v0 }
 0x8d0   : > { %v8700_v63 = vsel %vm598_vm1, %v8665_v53, %v8620_v54 }
 0x8d1   : > { %10386 = vmatprep.mubr.msk.bf16.mxu0 %vm982_vm2, %v8700_v63  ;;  %v9009_v63 = vld [vmem:[%s10989_s25 + $0x60] sm:$0xff] }
 0x8d2   : > { %v8578_v6 = vpop.permute.xlu1 %8577  ;;  %10387 = vmatmul.mubr.msk.bf16.gmra.mrb[88].mxu0 %vm982_vm2, %v8702_v3 }
 0x8d3   : > { %v8576_v17 = vpop.permute.xlu0 %8575  ;;  %v8674_v50 = vsel %vm172_vm0, %v8434_v52, %v8578_v6  ;;  %v9012_v6 = vld [vmem:[%s10989_s25 + $0x78] sm:$0xff] }
 0x8d4   : > { %v8671_v62 = vsel %vm172_vm0, %v13725_v5, %v8576_v17 }
 0x8d6   : > { %v8626_v33 = vpop.permute.xlu1 %8625 }
 0x8d7   : > { %v8624_v57 = vpop.permute.xlu0 %8623  ;;  %v8706_v4 = vsel %vm598_vm1, %v8674_v50, %v8626_v33 }
 0x8d8   : > { %v8704_v16 = vsel %vm598_vm1, %v8671_v62, %v8624_v57  ;;  %v9010_v62 = vld [vmem:[%s10989_s25 + $0x68] sm:$0xff] }
 0x8d9   : > { %10390 = vmatprep.mubr.msk.bf16.mxu0 %vm982_vm2, %v8704_v16 }
 0x8da   : > { %10391 = vmatmul.mubr.msk.bf16.gmra.mrb[92].mxu0 %vm982_vm2, %v8706_v4 }
 0x975   : > { %v10364_v34 = vpop.f32.mrb[64].mxu0 }
 0x976   : > { %v8967_v37 = vadd.f32 %v10364_v34, %v13885_v20  ;;  %v8798_v5 = vpop.f32.mrb[65].mxu0 }
 0x977   : > { %v8965_v1 = vadd.f32 %v13885_v20, %v8798_v5  ;;  %v10365_v15 = vpop.f32.mrb[66].mxu0 }
 0x978   : > { %v9031_v2 = vsub.f32 %v8999_v42, %v8967_v37  ;;  %v8968_v49 = vadd.f32 %v10365_v15, %v13885_v20  ;;  %v8801_v12 = vpop.f32.mrb[67].mxu0  ;;  %v9015_v37 = vld [vmem:[%s10989_s25 + $0x90] sm:$0xff] }
 0x979   : > { %v9029_v24 = vsub.f32 %v8997_v40, %v8965_v1  ;;  %v8966_v13 = vadd.f32 %v13885_v20, %v8801_v12  ;;  %v9013_v1 = vld [vmem:[%s10989_s25 + $0x80] sm:$0xff] }
 0x97a   : > { %9063 = vst.msk [vmem:[%s13895_s9 + $0x10] sm:$0xff] %vm172_vm0, %v9031_v2  ;;  %v9032_v47 = vsub.f32 %v9000_v60, %v8968_v49  ;;  %v9016_v2 = vld [vmem:[%s10989_s25 + $0x98] sm:$0xff] }
 0x97b   : > { %9061 = vst.msk [vmem:[%s13895_s9] sm:$0xff] %vm172_vm0, %v9029_v24  ;;  %v9030_v7 = vsub.f32 %v8998_v56, %v8966_v13  ;;  %v9014_v24 = vld [vmem:[%s10989_s25 + $0x88] sm:$0xff] }
 0x97c   : > { %9064 = vst.msk [vmem:[%s13895_s9 + $0x18] sm:$0xff] %vm172_vm0, %v9032_v47 }
 0x97d   : > { %9062 = vst.msk [vmem:[%s13895_s9 + $0x8] sm:$0xff] %vm172_vm0, %v9030_v7  ;;  %v10368_v59 = vpop.f32.mrb[68].mxu0 }
 0x97e   : > { %v8971_v38 = vadd.f32 %v10368_v59, %v13885_v20  ;;  %v8814_v44 = vpop.f32.mrb[69].mxu0 }
 0x97f   : > { %v8969_v27 = vadd.f32 %v13885_v20, %v8814_v44  ;;  %v10369_v9 = vpop.f32.mrb[70].mxu0 }
 0x980   : > { %v9035_v11 = vsub.f32 %v9003_v39, %v8971_v38  ;;  %v8972_v51 = vadd.f32 %v10369_v9, %v13885_v20  ;;  %v8817_v31 = vpop.f32.mrb[71].mxu0  ;;  %v9019_v38 = vld [vmem:[%s10989_s25 + $0xb0] sm:$0xff] }
 0x981   : > { %v9033_v30 = vsub.f32 %v9001_v46, %v8969_v27  ;;  %v8970_v35 = vadd.f32 %v13885_v20, %v8817_v31  ;;  %v9017_v27 = vld [vmem:[%s10989_s25 + $0xa0] sm:$0xff] }
 0x982   : > { %9067 = vst.msk [vmem:[%s13895_s9 + $0x30] sm:$0xff] %vm172_vm0, %v9035_v11  ;;  %v9036_v18 = vsub.f32 %v9004_v23, %v8972_v51  ;;  %v9020_v11 = vld [vmem:[%s10989_s25 + $0xb8] sm:$0xff] }
 0x983   : > { %9065 = vst.msk [vmem:[%s13895_s9 + $0x20] sm:$0xff] %vm172_vm0, %v9033_v30  ;;  %v9034_v8 = vsub.f32 %v9002_v58, %v8970_v35  ;;  %v9018_v30 = vld [vmem:[%s10989_s25 + $0xa8] sm:$0xff] }
 0x984   : > { %9068 = vst.msk [vmem:[%s13895_s9 + $0x38] sm:$0xff] %vm172_vm0, %v9036_v18 }
 0x985   : > { %9066 = vst.msk [vmem:[%s13895_s9 + $0x28] sm:$0xff] %vm172_vm0, %v9034_v8  ;;  %v10372_v48 = vpop.f32.mrb[72].mxu0 }
 0x986   : > { %v8975_v32 = vadd.f32 %v10372_v48, %v13885_v20  ;;  %v8830_v55 = vpop.f32.mrb[73].mxu0 }
 0x987   : > { %v8973_v29 = vadd.f32 %v13885_v20, %v8830_v55  ;;  %v10373_v36 = vpop.f32.mrb[74].mxu0 }
 0x988   : > { %v9039_v45 = vsub.f32 %v9007_v14, %v8975_v32  ;;  %v8976_v10 = vadd.f32 %v10373_v36, %v13885_v20  ;;  %v8833_v26 = vpop.f32.mrb[75].mxu0  ;;  %v9023_v32 = vld [vmem:[%s10989_s25 + $0xd0] sm:$0xff] }
 0x989   : > { %v9037_v43 = vsub.f32 %v9005_v28, %v8973_v29  ;;  %v8974_v22 = vadd.f32 %v13885_v20, %v8833_v26  ;;  %v9021_v29 = vld [vmem:[%s10989_s25 + $0xc0] sm:$0xff] }
 0x98a   : > { %9071 = vst.msk [vmem:[%s13895_s9 + $0x50] sm:$0xff] %vm172_vm0, %v9039_v45  ;;  %v9040_v0 = vsub.f32 %v9008_v21, %v8976_v10  ;;  %v9024_v45 = vld [vmem:[%s10989_s25 + $0xd8] sm:$0xff] }
 0x98b   : > { %9069 = vst.msk [vmem:[%s13895_s9 + $0x40] sm:$0xff] %vm172_vm0, %v9037_v43  ;;  %v9038_v53 = vsub.f32 %v9006_v61, %v8974_v22  ;;  %v9022_v43 = vld [vmem:[%s10989_s25 + $0xc8] sm:$0xff] }
 0x98c   : > { %9072 = vst.msk [vmem:[%s13895_s9 + $0x58] sm:$0xff] %vm172_vm0, %v9040_v0 }
 0x98d   : > { %9070 = vst.msk [vmem:[%s13895_s9 + $0x48] sm:$0xff] %vm172_vm0, %v9038_v53  ;;  %v10376_v54 = vpop.f32.mrb[76].mxu0 }
 0x98e   : > { %v8979_v19 = vadd.f32 %v10376_v54, %v13885_v20  ;;  %v8846_v41 = vpop.f32.mrb[77].mxu0 }
 0x98f   : > { %v8977_v3 = vadd.f32 %v13885_v20, %v8846_v41  ;;  %v10377_v52 = vpop.f32.mrb[78].mxu0 }
 0x990   : > { %v9043_v17 = vsub.f32 %v9011_v25, %v8979_v19  ;;  %v8980_v50 = vadd.f32 %v10377_v52, %v13885_v20  ;;  %v8849_v33 = vpop.f32.mrb[79].mxu0  ;;  %v9027_v19 = vld [vmem:[%s10989_s25 + $0xf0] sm:$0xff] }
 0x991   : > { %v9041_v57 = vsub.f32 %v9009_v63, %v8977_v3  ;;  %v8978_v16 = vadd.f32 %v13885_v20, %v8849_v33  ;;  %v9025_v3 = vld [vmem:[%s10989_s25 + $0xe0] sm:$0xff] }
 0x992   : > { %9075 = vst.msk [vmem:[%s13895_s9 + $0x70] sm:$0xff] %vm172_vm0, %v9043_v17  ;;  %v9044_v4 = vsub.f32 %v9012_v6, %v8980_v50  ;;  %v9028_v17 = vld [vmem:[%s10989_s25 + $0xf8] sm:$0xff] }
 0x993   : > { %9073 = vst.msk [vmem:[%s13895_s9 + $0x60] sm:$0xff] %vm172_vm0, %v9041_v57  ;;  %v9042_v34 = vsub.f32 %v9010_v62, %v8978_v16  ;;  %v9026_v57 = vld [vmem:[%s10989_s25 + $0xe8] sm:$0xff] }
 0x994   : > { %9076 = vst.msk [vmem:[%s13895_s9 + $0x78] sm:$0xff] %vm172_vm0, %v9044_v4 }
 0x995   : > { %9074 = vst.msk [vmem:[%s13895_s9 + $0x68] sm:$0xff] %vm172_vm0, %v9042_v34  ;;  %v10380_v42 = vpop.f32.mrb[80].mxu0 }
 0x996   : > { %v8983_v5 = vadd.f32 %v10380_v42, %v13885_v20  ;;  %v8862_v40 = vpop.f32.mrb[81].mxu0 }
 0x997   : > { %v8981_v15 = vadd.f32 %v13885_v20, %v8862_v40  ;;  %v10381_v60 = vpop.f32.mrb[82].mxu0 }
 0x998   : > { %v9047_v49 = vsub.f32 %v9015_v37, %v8983_v5  ;;  %v8984_v12 = vadd.f32 %v10381_v60, %v13885_v20  ;;  %v8865_v56 = vpop.f32.mrb[83].mxu0 }
 0x999   : > { %v9045_v13 = vsub.f32 %v9013_v1, %v8981_v15  ;;  %v8982_v47 = vadd.f32 %v13885_v20, %v8865_v56 }
 0x99a   : > { %9079 = vst.msk [vmem:[%s13895_s9 + $0x90] sm:$0xff] %vm172_vm0, %v9047_v49  ;;  %v9048_v7 = vsub.f32 %v9016_v2, %v8984_v12 }
 0x99b   : > { %9077 = vst.msk [vmem:[%s13895_s9 + $0x80] sm:$0xff] %vm172_vm0, %v9045_v13  ;;  %v9046_v59 = vsub.f32 %v9014_v24, %v8982_v47 }
 0x99c   : > { %9080 = vst.msk [vmem:[%s13895_s9 + $0x98] sm:$0xff] %vm172_vm0, %v9048_v7 }
 0x99d   : > { %9078 = vst.msk [vmem:[%s13895_s9 + $0x88] sm:$0xff] %vm172_vm0, %v9046_v59  ;;  %v10384_v39 = vpop.f32.mrb[84].mxu0 }
 0x99e   : > { %v8987_v44 = vadd.f32 %v10384_v39, %v13885_v20  ;;  %v8878_v46 = vpop.f32.mrb[85].mxu0 }
 0x99f   : > { %v8985_v9 = vadd.f32 %v13885_v20, %v8878_v46  ;;  %v10385_v23 = vpop.f32.mrb[86].mxu0 }
 0x9a0   : > { %v9051_v51 = vsub.f32 %v9019_v38, %v8987_v44  ;;  %v8988_v31 = vadd.f32 %v10385_v23, %v13885_v20  ;;  %v8881_v58 = vpop.f32.mrb[87].mxu0 }
 0x9a1   : > { %v9049_v35 = vsub.f32 %v9017_v27, %v8985_v9  ;;  %v8986_v18 = vadd.f32 %v13885_v20, %v8881_v58 }
 0x9a2   : > { %9083 = vst.msk [vmem:[%s13895_s9 + $0xb0] sm:$0xff] %vm172_vm0, %v9051_v51  ;;  %v9052_v8 = vsub.f32 %v9020_v11, %v8988_v31 }
 0x9a3   : > { %9081 = vst.msk [vmem:[%s13895_s9 + $0xa0] sm:$0xff] %vm172_vm0, %v9049_v35  ;;  %v9050_v48 = vsub.f32 %v9018_v30, %v8986_v18 }
 0x9a4   : > { %9084 = vst.msk [vmem:[%s13895_s9 + $0xb8] sm:$0xff] %vm172_vm0, %v9052_v8 }
 0x9a5   : > { %9082 = vst.msk [vmem:[%s13895_s9 + $0xa8] sm:$0xff] %vm172_vm0, %v9050_v48  ;;  %v10388_v14 = vpop.f32.mrb[88].mxu0 }
 0x9a6   : > { %v8991_v55 = vadd.f32 %v10388_v14, %v13885_v20  ;;  %v8894_v28 = vpop.f32.mrb[89].mxu0 }
 0x9a7   : > { %v8989_v36 = vadd.f32 %v13885_v20, %v8894_v28  ;;  %v10389_v21 = vpop.f32.mrb[90].mxu0 }
 0x9a8   : > { %v9055_v10 = vsub.f32 %v9023_v32, %v8991_v55  ;;  %v8992_v26 = vadd.f32 %v10389_v21, %v13885_v20  ;;  %v8897_v61 = vpop.f32.mrb[91].mxu0 }
 0x9a9   : > { %v9053_v22 = vsub.f32 %v9021_v29, %v8989_v36  ;;  %v8990_v0 = vadd.f32 %v13885_v20, %v8897_v61 }
 0x9aa   : > { %9087 = vst.msk [vmem:[%s13895_s9 + $0xd0] sm:$0xff] %vm172_vm0, %v9055_v10  ;;  %v9056_v53 = vsub.f32 %v9024_v45, %v8992_v26 }
 0x9ab   : > { %9085 = vst.msk [vmem:[%s13895_s9 + $0xc0] sm:$0xff] %vm172_vm0, %v9053_v22  ;;  %v9054_v54 = vsub.f32 %v9022_v43, %v8990_v0 }
 0x9ac   : > { %9088 = vst.msk [vmem:[%s13895_s9 + $0xd8] sm:$0xff] %vm172_vm0, %v9056_v53 }
 0x9ad   : > { %9086 = vst.msk [vmem:[%s13895_s9 + $0xc8] sm:$0xff] %vm172_vm0, %v9054_v54  ;;  %v10392_v25 = vpop.f32.mrb[92].mxu0 }
 0x9ae   : > { %v8995_v41 = vadd.f32 %v10392_v25, %v13885_v20  ;;  %v8910_v63 = vpop.f32.mrb[93].mxu0 }
 0x9af   : > { %v8993_v52 = vadd.f32 %v13885_v20, %v8910_v63  ;;  %v10393_v6 = vpop.f32.mrb[94].mxu0 }
 0x9b0   : > { %v9059_v50 = vsub.f32 %v9027_v19, %v8995_v41  ;;  %v8996_v33 = vadd.f32 %v10393_v6, %v13885_v20  ;;  %v8913_v62 = vpop.f32.mrb[95].mxu0 }
 0x9b1   : > { %v9057_v16 = vsub.f32 %v9025_v3, %v8993_v52  ;;  %v8994_v4 = vadd.f32 %v13885_v20, %v8913_v62 }
 0x9b2   : > { %9091 = vst.msk [vmem:[%s13895_s9 + $0xf0] sm:$0xff] %vm172_vm0, %v9059_v50  ;;  %v9060_v34 = vsub.f32 %v9028_v17, %v8996_v33 }
 0x9b3   : > { %9089 = vst.msk [vmem:[%s13895_s9 + $0xe0] sm:$0xff] %vm172_vm0, %v9057_v16  ;;  %v9058_v42 = vsub.f32 %v9026_v57, %v8994_v4 }
 0x9b4   : > { %9092 = vst.msk [vmem:[%s13895_s9 + $0xf8] sm:$0xff] %vm172_vm0, %v9060_v34 }
 0x9b5   : > { %9090 = vst.msk [vmem:[%s13895_s9 + $0xe8] sm:$0xff] %vm172_vm0, %v9058_v42 }
 0x9b6 PF: > { %s13_s12 = sadd.s32 1, %s10782_s12  }
 0x9b7   : > { %p10_p4 = scmp.ge.s32.totalorder %s13_s12, 4  }
 0x9b9   :  { %12 = sbr.rel (!%p10_p4) target bundleno = 1 (0x1), region = 82 }

</bundles_post_ra>
